<compile_context>
chip_gen: v7x
topology: tpu7x:2x2x1
jax: 0.10.0
libtpu: 0.0.40
codegen_flags: <defaults>
</compile_context>

<pallas_src>
import functools

import jax
import jax.numpy as jnp
from jax.experimental import pallas as pl
from jax.experimental.pallas import tpu as pltpu

BN_EPS = 1e-5
_VMEM = pl.BlockSpec(memory_space=pltpu.MemorySpace.VMEM)


# ----------------------------------------------------------------------------
# Fused kernel (whole InceptionBlock in one pallas_call)
# ----------------------------------------------------------------------------
def _make_inception_block_kernel(batch, length, depth, residual, sc0_has_conv):
    NL = batch * length

    def inception_block_kernel(*refs):
        refs = list(refs)
        o_ref = refs.pop()            # output ref is last
        x_ref = refs.pop(0)           # (Cin0, N*L)
        lpos_ref = refs.pop(0)        # (1, N*L) int32: position-within-sample

        # per-module refs: (wb, wf, gamma, beta)
        mod_refs = [refs[4 * d:4 * d + 4] for d in range(depth)]
        pos = 4 * depth
        sc_refs = []
        if residual:
            n_sc = sum(1 for d in range(depth) if d % 3 == 2)
            for s in range(n_sc):
                if s == 0 and sc0_has_conv:
                    sc_refs.append((refs[pos], refs[pos + 1], refs[pos + 2]))
                    pos += 3
                else:                                  # BN-only shortcut
                    sc_refs.append((None, refs[pos], refs[pos + 1]))
                    pos += 2

        lpos = lpos_ref[...]                           # (1, NL)

        def bn(y, g_ref, b_ref):
            # Training-mode BatchNorm1d: per-channel stats over (N, L) which
            # is exactly the lane axis in this layout (biased variance).
            mu = jnp.mean(y, axis=1, keepdims=True)
            var = jnp.mean(jnp.square(y - mu), axis=1, keepdims=True)
            return (y - mu) * jax.lax.rsqrt(var + BN_EPS) * g_ref[...] + b_ref[...]

        def inception_module(x, wb_ref, wf_ref, g_ref, b_ref):
            cin = x.shape[0]
            nf = wb_ref.shape[0]
            k_max = (wf_ref.shape[1] - cin) // nf
            p_max = k_max // 2

            # bottleneck 1x1 conv (bias=False) over all samples at once
            xb = jnp.dot(wb_ref[...], x, preferred_element_type=jnp.float32)

            # single flat zero-pad; per-sample boundaries handled by masks
            zp = jnp.zeros((nf, p_max), jnp.float32)
            xbp = jnp.concatenate([zp, xb, zp], axis=1)     # (nf, NL + 2*p_max)

            # shared im2col over the max kernel width (39 taps); conv19/conv9
            # reuse the middle tap blocks via the block-structured fused weight
            cols = []
            for t in range(k_max):
                delta = t - p_max
                if delta <= -length or delta >= length:
                    # receptive field entirely outside every sample -> zeros
                    cols.append(jnp.zeros((nf, NL), jnp.float32))
                    continue
                sl = xbp[:, t:t + NL]
                if delta == 0:
                    cols.append(sl)
                else:
                    valid = jnp.logical_and(lpos >= -delta, lpos < length - delta)
                    cols.append(jnp.where(valid, sl, 0.0))

            # MaxPool1d(3, stride=1, padding=1) on the module *input*
            ninf = jnp.full((cin, 1), -jnp.inf, jnp.float32)
            xp = jnp.concatenate([ninf, x, ninf], axis=1)   # (cin, NL + 2)
            left = jnp.where(lpos >= 1, xp[:, 0:NL], -jnp.inf)
            mid = xp[:, 1:NL + 1]
            right = jnp.where(lpos <= length - 2, xp[:, 2:NL + 2], -jnp.inf)
            cols.append(jnp.maximum(jnp.maximum(left, mid), right))

            xcol = jnp.concatenate(cols, axis=0)            # (k_max*nf+cin, NL)
            # ONE MXU matmul -> output already channel-concatenated
            y = jnp.dot(wf_ref[...], xcol, preferred_element_type=jnp.float32)
            return jnp.maximum(bn(y, g_ref, b_ref), 0.0)

        x = x_ref[...].astype(jnp.float32)
        res = x
        for d in range(depth):
            wb_ref, wf_ref, g_ref, b_ref = mod_refs[d]
            x = inception_module(x, wb_ref, wf_ref, g_ref, b_ref)
            if residual and d % 3 == 2:
                wsc_ref, gs_ref, bs_ref = sc_refs[d // 3]
                if wsc_ref is None:      # BN-only shortcut (n_in == n_out)
                    sc = res
                else:                    # 1x1 conv + BN shortcut
                    sc = jnp.dot(wsc_ref[...], res,
                                 preferred_element_type=jnp.float32)
                x = jnp.maximum(x + bn(sc, gs_ref, bs_ref), 0.0)
                res = x

        o_ref[...] = x.astype(o_ref.dtype)

    return inception_block_kernel


# ----------------------------------------------------------------------------
# Wrapper around the single pallas_call
# ----------------------------------------------------------------------------
def inception_block_forward(x, params, *, depth=6, residual=True):
    N, ni, L = x.shape
    nf4 = params["modules"][0]["gamma"].shape[0]

    # lane-dense (C, N*L) layout; layout plumbing done host-side
    x_flat = jnp.transpose(x, (1, 0, 2)).reshape(ni, N * L).astype(jnp.float32)
    lpos = jnp.tile(jnp.arange(L, dtype=jnp.int32), N).reshape(1, N * L)

    args = [x_flat, lpos]
    for m in params["modules"]:
        args += [m["wb"], m["wf"], m["gamma"], m["beta"]]
    sc0_has_conv = False
    if residual:
        for s, sc in enumerate(params["shortcuts"]):
            if s == 0 and "wsc" in sc:
                sc0_has_conv = True
                args.append(sc["wsc"])
            args += [sc["gamma"], sc["beta"]]

    kernel = _make_inception_block_kernel(N, L, depth, residual, sc0_has_conv)

    out_flat = pl.pallas_call(
        kernel,
        out_shape=jax.ShapeDtypeStruct((nf4, N * L), jnp.float32),
        in_specs=[_VMEM] * len(args),
        out_specs=_VMEM,
    )(*args)

    # back to the PyTorch (N, C, L) layout
    return jnp.transpose(out_flat.reshape(nf4, N, L), (1, 0, 2))


# ----------------------------------------------------------------------------
# Deterministic parameter construction (shapes follow the PyTorch __init__),
# including the block-structured fused branch weight.
# ----------------------------------------------------------------------------
def _conv_w(key, out_c, in_c, k):
    w = jax.random.normal(key, (out_c, in_c, k), jnp.float32)
    return w / jnp.sqrt(jnp.float32(in_c * k))


def init_inception_block_params(key, ni, nf=8, depth=6, ks=40, residual=True):
    kss = [ks // (2 ** i) for i in range(3)]
    kss = [k if k % 2 != 0 else k - 1 for k in kss]          # -> [39, 19, 9]
    k_max = max(kss)
    p_max = k_max // 2

    keys = iter(jax.random.split(key, depth * 6 + 4))
    nk = lambda: next(keys)

    modules = []
    for d in range(depth):
        c_in = ni if d == 0 else nf * 4
        wb = _conv_w(nk(), nf, c_in, 1)[:, :, 0]             # (nf, c_in)
        wmp = _conv_w(nk(), nf, c_in, 1)[:, :, 0]            # (nf, c_in)
        wks = [_conv_w(nk(), nf, nf, k) for k in kss]        # (nf, nf, k)

        # fused branch weight: rows = [conv39 | conv19 | conv9 | maxpool-1x1],
        # columns = [39 im2col tap blocks of nf | Cin maxpool rows].
        wf = jnp.zeros((4 * nf, k_max * nf + c_in), jnp.float32)
        for bi, (w, k) in enumerate(zip(wks, kss)):
            t0 = p_max - k // 2                              # tap offset in im2col
            blk = jnp.transpose(w, (0, 2, 1)).reshape(nf, k * nf)
            wf = wf.at[bi * nf:(bi + 1) * nf, t0 * nf:(t0 + k) * nf].set(blk)
        wf = wf.at[3 * nf:4 * nf, k_max * nf:].set(wmp)

        modules.append(dict(
            wb=wb, wf=wf,
            gamma=jnp.ones((4 * nf, 1), jnp.float32),        # PyTorch BN defaults
            beta=jnp.zeros((4 * nf, 1), jnp.float32),
            raw=dict(wb=wb, wks=wks, wmp=wmp),               # for the reference
        ))

    shortcuts = []
    if residual:
        n_out = nf * 4
        for d in [d for d in range(depth) if d % 3 == 2]:
            n_in = ni if d == 2 else n_out
            sc = dict(gamma=jnp.ones((n_out, 1), jnp.float32),
                      beta=jnp.zeros((n_out, 1), jnp.float32))
            if n_in != n_out:                                # ConvBlock(1x1)+BN
                sc["wsc"] = _conv_w(nk(), n_out, n_in, 1)[:, :, 0]
            shortcuts.append(sc)                             # else: BN only

    return dict(modules=modules, shortcuts=shortcuts)


# ----------------------------------------------------------------------------
# Pure-JAX reference (mirrors PyTorch semantics) for a correctness check
# ----------------------------------------------------------------------------
def _conv1d(x, w, pad):
    return jax.lax.conv_general_dilated(
        x, w, window_strides=(1,), padding=[(pad, pad)],
        dimension_numbers=("NCH", "OIH", "NCH"))


def _maxpool3(x):
    return jax.lax.reduce_window(
        x, -jnp.inf, jax.lax.max,
        window_dimensions=(1, 1, 3), window_strides=(1, 1, 1),
        padding=[(0, 0), (0, 0), (1, 1)])


def reference_forward(x, params, *, depth=6, residual=True):
    def bn(y, g, b):
        mu = jnp.mean(y, axis=(0, 2), keepdims=True)
        var = jnp.mean(jnp.square(y - mu), axis=(0, 2), keepdims=True)
        return ((y - mu) * jax.lax.rsqrt(var + BN_EPS)
                * g.reshape(1, -1, 1) + b.reshape(1, -1, 1))

    res = x
    for d in range(depth):
        m = params["modules"][d]
        raw = m["raw"]
        xb = _conv1d(x, raw["wb"][:, :, None], 0)
        branches = [_conv1d(xb, w, w.shape[2] // 2) for w in raw["wks"]]
        branches.append(_conv1d(_maxpool3(x), raw["wmp"][:, :, None], 0))
        y = jnp.concatenate(branches, axis=1)
        x = jax.nn.relu(bn(y, m["gamma"], m["beta"]))
        if residual and d % 3 == 2:
            sc = params["shortcuts"][d // 3]
            r = res if "wsc" not in sc else _conv1d(res, sc["wsc"][:, :, None], 0)
            x = jax.nn.relu(x + bn(r, sc["gamma"], sc["beta"]))
            res = x
    return x


# ----------------------------------------------------------------------------
if __name__ == "__main__":
    N, NI, NF, L, DEPTH = 2, 4, 8, 16, 6        # batch=2, in-ch=4, nf=8, len=16
    key = jax.random.PRNGKey(0)
    kx, kp = jax.random.split(key)

    x = jax.random.normal(kx, (N, NI, L), jnp.float32)       # NCL
    params = init_inception_block_params(kp, ni=NI, nf=NF, depth=DEPTH)

    fwd = jax.jit(functools.partial(inception_block_forward,
                                    depth=DEPTH, residual=True))
    out = jax.block_until_ready(fwd(x, params))

    assert out.shape == (N, 4 * NF, L), out.shape
    assert out.dtype == jnp.float32
    assert bool(jnp.all(jnp.isfinite(out)))
    assert bool(jnp.all(out >= 0.0))            # final op is ReLU

    ref = reference_forward(x, params, depth=DEPTH, residual=True)
    assert bool(jnp.allclose(out, ref, atol=1e-2, rtol=1e-2)), \
        float(jnp.max(jnp.abs(out - ref)))

    print("KERNEL_OK")
</pallas_src>

<mosaic_0001>
module attributes {stable_mosaic.version = 11 : i64} {
  func.func @inception_block_kernel(%arg0: memref<4x32xf32, #tpu.memory_space<vmem>>, %arg1: memref<1x32xi32, #tpu.memory_space<vmem>>, %arg2: memref<8x4xf32, #tpu.memory_space<vmem>>, %arg3: memref<32x316xf32, #tpu.memory_space<vmem>>, %arg4: memref<32x1xf32, #tpu.memory_space<vmem>>, %arg5: memref<32x1xf32, #tpu.memory_space<vmem>>, %arg6: memref<8x32xf32, #tpu.memory_space<vmem>>, %arg7: memref<32x344xf32, #tpu.memory_space<vmem>>, %arg8: memref<32x1xf32, #tpu.memory_space<vmem>>, %arg9: memref<32x1xf32, #tpu.memory_space<vmem>>, %arg10: memref<8x32xf32, #tpu.memory_space<vmem>>, %arg11: memref<32x344xf32, #tpu.memory_space<vmem>>, %arg12: memref<32x1xf32, #tpu.memory_space<vmem>>, %arg13: memref<32x1xf32, #tpu.memory_space<vmem>>, %arg14: memref<8x32xf32, #tpu.memory_space<vmem>>, %arg15: memref<32x344xf32, #tpu.memory_space<vmem>>, %arg16: memref<32x1xf32, #tpu.memory_space<vmem>>, %arg17: memref<32x1xf32, #tpu.memory_space<vmem>>, %arg18: memref<8x32xf32, #tpu.memory_space<vmem>>, %arg19: memref<32x344xf32, #tpu.memory_space<vmem>>, %arg20: memref<32x1xf32, #tpu.memory_space<vmem>>, %arg21: memref<32x1xf32, #tpu.memory_space<vmem>>, %arg22: memref<8x32xf32, #tpu.memory_space<vmem>>, %arg23: memref<32x344xf32, #tpu.memory_space<vmem>>, %arg24: memref<32x1xf32, #tpu.memory_space<vmem>>, %arg25: memref<32x1xf32, #tpu.memory_space<vmem>>, %arg26: memref<32x4xf32, #tpu.memory_space<vmem>>, %arg27: memref<32x1xf32, #tpu.memory_space<vmem>>, %arg28: memref<32x1xf32, #tpu.memory_space<vmem>>, %arg29: memref<32x1xf32, #tpu.memory_space<vmem>>, %arg30: memref<32x1xf32, #tpu.memory_space<vmem>>, %arg31: memref<32x32xf32, #tpu.memory_space<vmem>>) attributes {dimension_semantics = [], scalar_prefetch = 0 : i64, scratch_operands = 0 : i64, tpu.core_type = #tpu.core_type<tc>} {
    %c0 = arith.constant 0 : index
    %c0_0 = arith.constant 0 : index
    %0 = vector.load %arg1[%c0, %c0_0] : memref<1x32xi32, #tpu.memory_space<vmem>>, vector<1x32xi32>
    %c0_1 = arith.constant 0 : index
    %c0_2 = arith.constant 0 : index
    %1 = vector.load %arg0[%c0_1, %c0_2] : memref<4x32xf32, #tpu.memory_space<vmem>>, vector<4x32xf32>
    %c0_3 = arith.constant 0 : index
    %c0_4 = arith.constant 0 : index
    %2 = vector.load %arg2[%c0_3, %c0_4] : memref<8x4xf32, #tpu.memory_space<vmem>>, vector<8x4xf32>
    %cst = arith.constant dense<0.000000e+00> : vector<8x32xf32>
    %3 = tpu.matmul %2, %1, %cst {dimension_numbers = #tpu.dot_dimension_numbers<[1], [0], [0], [1], [0, 0, 1, 1], [], []>} : vector<8x4xf32>, vector<4x32xf32>, vector<8x32xf32> -> vector<8x32xf32>
    %cst_5 = arith.constant 0.000000e+00 : f32
    %4 = vector.broadcast %cst_5 : f32 to vector<8x19xf32>
    %5 = tpu.concatenate %4, %3, %4 in 1 : vector<8x19xf32>, vector<8x32xf32>, vector<8x19xf32> -> vector<8x70xf32>
    %cst_6 = arith.constant 0.000000e+00 : f32
    %6 = vector.broadcast %cst_6 : f32 to vector<8x32xf32>
    %cst_7 = arith.constant 0.000000e+00 : f32
    %7 = vector.broadcast %cst_7 : f32 to vector<8x32xf32>
    %cst_8 = arith.constant 0.000000e+00 : f32
    %8 = vector.broadcast %cst_8 : f32 to vector<8x32xf32>
    %cst_9 = arith.constant 0.000000e+00 : f32
    %9 = vector.broadcast %cst_9 : f32 to vector<8x32xf32>
    %10 = vector.extract_strided_slice %5 {offsets = [0, 4], sizes = [8, 32], strides = [1, 1]} : vector<8x70xf32> to vector<8x32xf32>
    %c15_i32 = arith.constant 15 : i32
    %11 = vector.broadcast %c15_i32 : i32 to vector<1x32xi32>
    %12 = arith.cmpi sge, %0, %11 : vector<1x32xi32>
    %c31_i32 = arith.constant 31 : i32
    %13 = vector.broadcast %c31_i32 : i32 to vector<1x32xi32>
    %14 = arith.cmpi slt, %0, %13 : vector<1x32xi32>
    %15 = arith.andi %12, %14 : vector<1x32xi1>
    %cst_10 = arith.constant 0.000000e+00 : f32
    %16 = vector.shape_cast %15 : vector<1x32xi1> to vector<1x32xi1>
    %17 = vector.broadcast %16 : vector<1x32xi1> to vector<8x32xi1>
    %18 = vector.broadcast %cst_10 : f32 to vector<8x32xf32>
    %19 = arith.select %17, %10, %18 : vector<8x32xi1>, vector<8x32xf32>
    %20 = vector.extract_strided_slice %5 {offsets = [0, 5], sizes = [8, 32], strides = [1, 1]} : vector<8x70xf32> to vector<8x32xf32>
    %c14_i32 = arith.constant 14 : i32
    %21 = vector.broadcast %c14_i32 : i32 to vector<1x32xi32>
    %22 = arith.cmpi sge, %0, %21 : vector<1x32xi32>
    %c30_i32 = arith.constant 30 : i32
    %23 = vector.broadcast %c30_i32 : i32 to vector<1x32xi32>
    %24 = arith.cmpi slt, %0, %23 : vector<1x32xi32>
    %25 = arith.andi %22, %24 : vector<1x32xi1>
    %cst_11 = arith.constant 0.000000e+00 : f32
    %26 = vector.shape_cast %25 : vector<1x32xi1> to vector<1x32xi1>
    %27 = vector.broadcast %26 : vector<1x32xi1> to vector<8x32xi1>
    %28 = vector.broadcast %cst_11 : f32 to vector<8x32xf32>
    %29 = arith.select %27, %20, %28 : vector<8x32xi1>, vector<8x32xf32>
    %30 = vector.extract_strided_slice %5 {offsets = [0, 6], sizes = [8, 32], strides = [1, 1]} : vector<8x70xf32> to vector<8x32xf32>
    %c13_i32 = arith.constant 13 : i32
    %31 = vector.broadcast %c13_i32 : i32 to vector<1x32xi32>
    %32 = arith.cmpi sge, %0, %31 : vector<1x32xi32>
    %c29_i32 = arith.constant 29 : i32
    %33 = vector.broadcast %c29_i32 : i32 to vector<1x32xi32>
    %34 = arith.cmpi slt, %0, %33 : vector<1x32xi32>
    %35 = arith.andi %32, %34 : vector<1x32xi1>
    %cst_12 = arith.constant 0.000000e+00 : f32
    %36 = vector.shape_cast %35 : vector<1x32xi1> to vector<1x32xi1>
    %37 = vector.broadcast %36 : vector<1x32xi1> to vector<8x32xi1>
    %38 = vector.broadcast %cst_12 : f32 to vector<8x32xf32>
    %39 = arith.select %37, %30, %38 : vector<8x32xi1>, vector<8x32xf32>
    %40 = vector.extract_strided_slice %5 {offsets = [0, 7], sizes = [8, 32], strides = [1, 1]} : vector<8x70xf32> to vector<8x32xf32>
    %c12_i32 = arith.constant 12 : i32
    %41 = vector.broadcast %c12_i32 : i32 to vector<1x32xi32>
    %42 = arith.cmpi sge, %0, %41 : vector<1x32xi32>
    %c28_i32 = arith.constant 28 : i32
    %43 = vector.broadcast %c28_i32 : i32 to vector<1x32xi32>
    %44 = arith.cmpi slt, %0, %43 : vector<1x32xi32>
    %45 = arith.andi %42, %44 : vector<1x32xi1>
    %cst_13 = arith.constant 0.000000e+00 : f32
    %46 = vector.shape_cast %45 : vector<1x32xi1> to vector<1x32xi1>
    %47 = vector.broadcast %46 : vector<1x32xi1> to vector<8x32xi1>
    %48 = vector.broadcast %cst_13 : f32 to vector<8x32xf32>
    %49 = arith.select %47, %40, %48 : vector<8x32xi1>, vector<8x32xf32>
    %50 = vector.extract_strided_slice %5 {offsets = [0, 8], sizes = [8, 32], strides = [1, 1]} : vector<8x70xf32> to vector<8x32xf32>
    %c11_i32 = arith.constant 11 : i32
    %51 = vector.broadcast %c11_i32 : i32 to vector<1x32xi32>
    %52 = arith.cmpi sge, %0, %51 : vector<1x32xi32>
    %c27_i32 = arith.constant 27 : i32
    %53 = vector.broadcast %c27_i32 : i32 to vector<1x32xi32>
    %54 = arith.cmpi slt, %0, %53 : vector<1x32xi32>
    %55 = arith.andi %52, %54 : vector<1x32xi1>
    %cst_14 = arith.constant 0.000000e+00 : f32
    %56 = vector.shape_cast %55 : vector<1x32xi1> to vector<1x32xi1>
    %57 = vector.broadcast %56 : vector<1x32xi1> to vector<8x32xi1>
    %58 = vector.broadcast %cst_14 : f32 to vector<8x32xf32>
    %59 = arith.select %57, %50, %58 : vector<8x32xi1>, vector<8x32xf32>
    %60 = vector.extract_strided_slice %5 {offsets = [0, 9], sizes = [8, 32], strides = [1, 1]} : vector<8x70xf32> to vector<8x32xf32>
    %c10_i32 = arith.constant 10 : i32
    %61 = vector.broadcast %c10_i32 : i32 to vector<1x32xi32>
    %62 = arith.cmpi sge, %0, %61 : vector<1x32xi32>
    %c26_i32 = arith.constant 26 : i32
    %63 = vector.broadcast %c26_i32 : i32 to vector<1x32xi32>
    %64 = arith.cmpi slt, %0, %63 : vector<1x32xi32>
    %65 = arith.andi %62, %64 : vector<1x32xi1>
    %cst_15 = arith.constant 0.000000e+00 : f32
    %66 = vector.shape_cast %65 : vector<1x32xi1> to vector<1x32xi1>
    %67 = vector.broadcast %66 : vector<1x32xi1> to vector<8x32xi1>
    %68 = vector.broadcast %cst_15 : f32 to vector<8x32xf32>
    %69 = arith.select %67, %60, %68 : vector<8x32xi1>, vector<8x32xf32>
    %70 = vector.extract_strided_slice %5 {offsets = [0, 10], sizes = [8, 32], strides = [1, 1]} : vector<8x70xf32> to vector<8x32xf32>
    %c9_i32 = arith.constant 9 : i32
    %71 = vector.broadcast %c9_i32 : i32 to vector<1x32xi32>
    %72 = arith.cmpi sge, %0, %71 : vector<1x32xi32>
    %c25_i32 = arith.constant 25 : i32
    %73 = vector.broadcast %c25_i32 : i32 to vector<1x32xi32>
    %74 = arith.cmpi slt, %0, %73 : vector<1x32xi32>
    %75 = arith.andi %72, %74 : vector<1x32xi1>
    %cst_16 = arith.constant 0.000000e+00 : f32
    %76 = vector.shape_cast %75 : vector<1x32xi1> to vector<1x32xi1>
    %77 = vector.broadcast %76 : vector<1x32xi1> to vector<8x32xi1>
    %78 = vector.broadcast %cst_16 : f32 to vector<8x32xf32>
    %79 = arith.select %77, %70, %78 : vector<8x32xi1>, vector<8x32xf32>
    %80 = vector.extract_strided_slice %5 {offsets = [0, 11], sizes = [8, 32], strides = [1, 1]} : vector<8x70xf32> to vector<8x32xf32>
    %c8_i32 = arith.constant 8 : i32
    %81 = vector.broadcast %c8_i32 : i32 to vector<1x32xi32>
    %82 = arith.cmpi sge, %0, %81 : vector<1x32xi32>
    %c24_i32 = arith.constant 24 : i32
    %83 = vector.broadcast %c24_i32 : i32 to vector<1x32xi32>
    %84 = arith.cmpi slt, %0, %83 : vector<1x32xi32>
    %85 = arith.andi %82, %84 : vector<1x32xi1>
    %cst_17 = arith.constant 0.000000e+00 : f32
    %86 = vector.shape_cast %85 : vector<1x32xi1> to vector<1x32xi1>
    %87 = vector.broadcast %86 : vector<1x32xi1> to vector<8x32xi1>
    %88 = vector.broadcast %cst_17 : f32 to vector<8x32xf32>
    %89 = arith.select %87, %80, %88 : vector<8x32xi1>, vector<8x32xf32>
    %90 = vector.extract_strided_slice %5 {offsets = [0, 12], sizes = [8, 32], strides = [1, 1]} : vector<8x70xf32> to vector<8x32xf32>
    %c7_i32 = arith.constant 7 : i32
    %91 = vector.broadcast %c7_i32 : i32 to vector<1x32xi32>
    %92 = arith.cmpi sge, %0, %91 : vector<1x32xi32>
    %c23_i32 = arith.constant 23 : i32
    %93 = vector.broadcast %c23_i32 : i32 to vector<1x32xi32>
    %94 = arith.cmpi slt, %0, %93 : vector<1x32xi32>
    %95 = arith.andi %92, %94 : vector<1x32xi1>
    %cst_18 = arith.constant 0.000000e+00 : f32
    %96 = vector.shape_cast %95 : vector<1x32xi1> to vector<1x32xi1>
    %97 = vector.broadcast %96 : vector<1x32xi1> to vector<8x32xi1>
    %98 = vector.broadcast %cst_18 : f32 to vector<8x32xf32>
    %99 = arith.select %97, %90, %98 : vector<8x32xi1>, vector<8x32xf32>
    %100 = vector.extract_strided_slice %5 {offsets = [0, 13], sizes = [8, 32], strides = [1, 1]} : vector<8x70xf32> to vector<8x32xf32>
    %c6_i32 = arith.constant 6 : i32
    %101 = vector.broadcast %c6_i32 : i32 to vector<1x32xi32>
    %102 = arith.cmpi sge, %0, %101 : vector<1x32xi32>
    %c22_i32 = arith.constant 22 : i32
    %103 = vector.broadcast %c22_i32 : i32 to vector<1x32xi32>
    %104 = arith.cmpi slt, %0, %103 : vector<1x32xi32>
    %105 = arith.andi %102, %104 : vector<1x32xi1>
    %cst_19 = arith.constant 0.000000e+00 : f32
    %106 = vector.shape_cast %105 : vector<1x32xi1> to vector<1x32xi1>
    %107 = vector.broadcast %106 : vector<1x32xi1> to vector<8x32xi1>
    %108 = vector.broadcast %cst_19 : f32 to vector<8x32xf32>
    %109 = arith.select %107, %100, %108 : vector<8x32xi1>, vector<8x32xf32>
    %110 = vector.extract_strided_slice %5 {offsets = [0, 14], sizes = [8, 32], strides = [1, 1]} : vector<8x70xf32> to vector<8x32xf32>
    %c5_i32 = arith.constant 5 : i32
    %111 = vector.broadcast %c5_i32 : i32 to vector<1x32xi32>
    %112 = arith.cmpi sge, %0, %111 : vector<1x32xi32>
    %c21_i32 = arith.constant 21 : i32
    %113 = vector.broadcast %c21_i32 : i32 to vector<1x32xi32>
    %114 = arith.cmpi slt, %0, %113 : vector<1x32xi32>
    %115 = arith.andi %112, %114 : vector<1x32xi1>
    %cst_20 = arith.constant 0.000000e+00 : f32
    %116 = vector.shape_cast %115 : vector<1x32xi1> to vector<1x32xi1>
    %117 = vector.broadcast %116 : vector<1x32xi1> to vector<8x32xi1>
    %118 = vector.broadcast %cst_20 : f32 to vector<8x32xf32>
    %119 = arith.select %117, %110, %118 : vector<8x32xi1>, vector<8x32xf32>
    %120 = vector.extract_strided_slice %5 {offsets = [0, 15], sizes = [8, 32], strides = [1, 1]} : vector<8x70xf32> to vector<8x32xf32>
    %c4_i32 = arith.constant 4 : i32
    %121 = vector.broadcast %c4_i32 : i32 to vector<1x32xi32>
    %122 = arith.cmpi sge, %0, %121 : vector<1x32xi32>
    %c20_i32 = arith.constant 20 : i32
    %123 = vector.broadcast %c20_i32 : i32 to vector<1x32xi32>
    %124 = arith.cmpi slt, %0, %123 : vector<1x32xi32>
    %125 = arith.andi %122, %124 : vector<1x32xi1>
    %cst_21 = arith.constant 0.000000e+00 : f32
    %126 = vector.shape_cast %125 : vector<1x32xi1> to vector<1x32xi1>
    %127 = vector.broadcast %126 : vector<1x32xi1> to vector<8x32xi1>
    %128 = vector.broadcast %cst_21 : f32 to vector<8x32xf32>
    %129 = arith.select %127, %120, %128 : vector<8x32xi1>, vector<8x32xf32>
    %130 = vector.extract_strided_slice %5 {offsets = [0, 16], sizes = [8, 32], strides = [1, 1]} : vector<8x70xf32> to vector<8x32xf32>
    %c3_i32 = arith.constant 3 : i32
    %131 = vector.broadcast %c3_i32 : i32 to vector<1x32xi32>
    %132 = arith.cmpi sge, %0, %131 : vector<1x32xi32>
    %c19_i32 = arith.constant 19 : i32
    %133 = vector.broadcast %c19_i32 : i32 to vector<1x32xi32>
    %134 = arith.cmpi slt, %0, %133 : vector<1x32xi32>
    %135 = arith.andi %132, %134 : vector<1x32xi1>
    %cst_22 = arith.constant 0.000000e+00 : f32
    %136 = vector.shape_cast %135 : vector<1x32xi1> to vector<1x32xi1>
    %137 = vector.broadcast %136 : vector<1x32xi1> to vector<8x32xi1>
    %138 = vector.broadcast %cst_22 : f32 to vector<8x32xf32>
    %139 = arith.select %137, %130, %138 : vector<8x32xi1>, vector<8x32xf32>
    %140 = vector.extract_strided_slice %5 {offsets = [0, 17], sizes = [8, 32], strides = [1, 1]} : vector<8x70xf32> to vector<8x32xf32>
    %c2_i32 = arith.constant 2 : i32
    %141 = vector.broadcast %c2_i32 : i32 to vector<1x32xi32>
    %142 = arith.cmpi sge, %0, %141 : vector<1x32xi32>
    %c18_i32 = arith.constant 18 : i32
    %143 = vector.broadcast %c18_i32 : i32 to vector<1x32xi32>
    %144 = arith.cmpi slt, %0, %143 : vector<1x32xi32>
    %145 = arith.andi %142, %144 : vector<1x32xi1>
    %cst_23 = arith.constant 0.000000e+00 : f32
    %146 = vector.shape_cast %145 : vector<1x32xi1> to vector<1x32xi1>
    %147 = vector.broadcast %146 : vector<1x32xi1> to vector<8x32xi1>
    %148 = vector.broadcast %cst_23 : f32 to vector<8x32xf32>
    %149 = arith.select %147, %140, %148 : vector<8x32xi1>, vector<8x32xf32>
    %150 = vector.extract_strided_slice %5 {offsets = [0, 18], sizes = [8, 32], strides = [1, 1]} : vector<8x70xf32> to vector<8x32xf32>
    %c1_i32 = arith.constant 1 : i32
    %151 = vector.broadcast %c1_i32 : i32 to vector<1x32xi32>
    %152 = arith.cmpi sge, %0, %151 : vector<1x32xi32>
    %c17_i32 = arith.constant 17 : i32
    %153 = vector.broadcast %c17_i32 : i32 to vector<1x32xi32>
    %154 = arith.cmpi slt, %0, %153 : vector<1x32xi32>
    %155 = arith.andi %152, %154 : vector<1x32xi1>
    %cst_24 = arith.constant 0.000000e+00 : f32
    %156 = vector.shape_cast %155 : vector<1x32xi1> to vector<1x32xi1>
    %157 = vector.broadcast %156 : vector<1x32xi1> to vector<8x32xi1>
    %158 = vector.broadcast %cst_24 : f32 to vector<8x32xf32>
    %159 = arith.select %157, %150, %158 : vector<8x32xi1>, vector<8x32xf32>
    %160 = vector.extract_strided_slice %5 {offsets = [0, 19], sizes = [8, 32], strides = [1, 1]} : vector<8x70xf32> to vector<8x32xf32>
    %161 = vector.extract_strided_slice %5 {offsets = [0, 20], sizes = [8, 32], strides = [1, 1]} : vector<8x70xf32> to vector<8x32xf32>
    %c-1_i32 = arith.constant -1 : i32
    %162 = vector.broadcast %c-1_i32 : i32 to vector<1x32xi32>
    %163 = arith.cmpi sge, %0, %162 : vector<1x32xi32>
    %c15_i32_25 = arith.constant 15 : i32
    %164 = vector.broadcast %c15_i32_25 : i32 to vector<1x32xi32>
    %165 = arith.cmpi slt, %0, %164 : vector<1x32xi32>
    %166 = arith.andi %163, %165 : vector<1x32xi1>
    %cst_26 = arith.constant 0.000000e+00 : f32
    %167 = vector.shape_cast %166 : vector<1x32xi1> to vector<1x32xi1>
    %168 = vector.broadcast %167 : vector<1x32xi1> to vector<8x32xi1>
    %169 = vector.broadcast %cst_26 : f32 to vector<8x32xf32>
    %170 = arith.select %168, %161, %169 : vector<8x32xi1>, vector<8x32xf32>
    %171 = vector.extract_strided_slice %5 {offsets = [0, 21], sizes = [8, 32], strides = [1, 1]} : vector<8x70xf32> to vector<8x32xf32>
    %c-2_i32 = arith.constant -2 : i32
    %172 = vector.broadcast %c-2_i32 : i32 to vector<1x32xi32>
    %173 = arith.cmpi sge, %0, %172 : vector<1x32xi32>
    %c14_i32_27 = arith.constant 14 : i32
    %174 = vector.broadcast %c14_i32_27 : i32 to vector<1x32xi32>
    %175 = arith.cmpi slt, %0, %174 : vector<1x32xi32>
    %176 = arith.andi %173, %175 : vector<1x32xi1>
    %cst_28 = arith.constant 0.000000e+00 : f32
    %177 = vector.shape_cast %176 : vector<1x32xi1> to vector<1x32xi1>
    %178 = vector.broadcast %177 : vector<1x32xi1> to vector<8x32xi1>
    %179 = vector.broadcast %cst_28 : f32 to vector<8x32xf32>
    %180 = arith.select %178, %171, %179 : vector<8x32xi1>, vector<8x32xf32>
    %181 = vector.extract_strided_slice %5 {offsets = [0, 22], sizes = [8, 32], strides = [1, 1]} : vector<8x70xf32> to vector<8x32xf32>
    %c-3_i32 = arith.constant -3 : i32
    %182 = vector.broadcast %c-3_i32 : i32 to vector<1x32xi32>
    %183 = arith.cmpi sge, %0, %182 : vector<1x32xi32>
    %c13_i32_29 = arith.constant 13 : i32
    %184 = vector.broadcast %c13_i32_29 : i32 to vector<1x32xi32>
    %185 = arith.cmpi slt, %0, %184 : vector<1x32xi32>
    %186 = arith.andi %183, %185 : vector<1x32xi1>
    %cst_30 = arith.constant 0.000000e+00 : f32
    %187 = vector.shape_cast %186 : vector<1x32xi1> to vector<1x32xi1>
    %188 = vector.broadcast %187 : vector<1x32xi1> to vector<8x32xi1>
    %189 = vector.broadcast %cst_30 : f32 to vector<8x32xf32>
    %190 = arith.select %188, %181, %189 : vector<8x32xi1>, vector<8x32xf32>
    %191 = vector.extract_strided_slice %5 {offsets = [0, 23], sizes = [8, 32], strides = [1, 1]} : vector<8x70xf32> to vector<8x32xf32>
    %c-4_i32 = arith.constant -4 : i32
    %192 = vector.broadcast %c-4_i32 : i32 to vector<1x32xi32>
    %193 = arith.cmpi sge, %0, %192 : vector<1x32xi32>
    %c12_i32_31 = arith.constant 12 : i32
    %194 = vector.broadcast %c12_i32_31 : i32 to vector<1x32xi32>
    %195 = arith.cmpi slt, %0, %194 : vector<1x32xi32>
    %196 = arith.andi %193, %195 : vector<1x32xi1>
    %cst_32 = arith.constant 0.000000e+00 : f32
    %197 = vector.shape_cast %196 : vector<1x32xi1> to vector<1x32xi1>
    %198 = vector.broadcast %197 : vector<1x32xi1> to vector<8x32xi1>
    %199 = vector.broadcast %cst_32 : f32 to vector<8x32xf32>
    %200 = arith.select %198, %191, %199 : vector<8x32xi1>, vector<8x32xf32>
    %201 = vector.extract_strided_slice %5 {offsets = [0, 24], sizes = [8, 32], strides = [1, 1]} : vector<8x70xf32> to vector<8x32xf32>
    %c-5_i32 = arith.constant -5 : i32
    %202 = vector.broadcast %c-5_i32 : i32 to vector<1x32xi32>
    %203 = arith.cmpi sge, %0, %202 : vector<1x32xi32>
    %c11_i32_33 = arith.constant 11 : i32
    %204 = vector.broadcast %c11_i32_33 : i32 to vector<1x32xi32>
    %205 = arith.cmpi slt, %0, %204 : vector<1x32xi32>
    %206 = arith.andi %203, %205 : vector<1x32xi1>
    %cst_34 = arith.constant 0.000000e+00 : f32
    %207 = vector.shape_cast %206 : vector<1x32xi1> to vector<1x32xi1>
    %208 = vector.broadcast %207 : vector<1x32xi1> to vector<8x32xi1>
    %209 = vector.broadcast %cst_34 : f32 to vector<8x32xf32>
    %210 = arith.select %208, %201, %209 : vector<8x32xi1>, vector<8x32xf32>
    %211 = vector.extract_strided_slice %5 {offsets = [0, 25], sizes = [8, 32], strides = [1, 1]} : vector<8x70xf32> to vector<8x32xf32>
    %c-6_i32 = arith.constant -6 : i32
    %212 = vector.broadcast %c-6_i32 : i32 to vector<1x32xi32>
    %213 = arith.cmpi sge, %0, %212 : vector<1x32xi32>
    %c10_i32_35 = arith.constant 10 : i32
    %214 = vector.broadcast %c10_i32_35 : i32 to vector<1x32xi32>
    %215 = arith.cmpi slt, %0, %214 : vector<1x32xi32>
    %216 = arith.andi %213, %215 : vector<1x32xi1>
    %cst_36 = arith.constant 0.000000e+00 : f32
    %217 = vector.shape_cast %216 : vector<1x32xi1> to vector<1x32xi1>
    %218 = vector.broadcast %217 : vector<1x32xi1> to vector<8x32xi1>
    %219 = vector.broadcast %cst_36 : f32 to vector<8x32xf32>
    %220 = arith.select %218, %211, %219 : vector<8x32xi1>, vector<8x32xf32>
    %221 = vector.extract_strided_slice %5 {offsets = [0, 26], sizes = [8, 32], strides = [1, 1]} : vector<8x70xf32> to vector<8x32xf32>
    %c-7_i32 = arith.constant -7 : i32
    %222 = vector.broadcast %c-7_i32 : i32 to vector<1x32xi32>
    %223 = arith.cmpi sge, %0, %222 : vector<1x32xi32>
    %c9_i32_37 = arith.constant 9 : i32
    %224 = vector.broadcast %c9_i32_37 : i32 to vector<1x32xi32>
    %225 = arith.cmpi slt, %0, %224 : vector<1x32xi32>
    %226 = arith.andi %223, %225 : vector<1x32xi1>
    %cst_38 = arith.constant 0.000000e+00 : f32
    %227 = vector.shape_cast %226 : vector<1x32xi1> to vector<1x32xi1>
    %228 = vector.broadcast %227 : vector<1x32xi1> to vector<8x32xi1>
    %229 = vector.broadcast %cst_38 : f32 to vector<8x32xf32>
    %230 = arith.select %228, %221, %229 : vector<8x32xi1>, vector<8x32xf32>
    %231 = vector.extract_strided_slice %5 {offsets = [0, 27], sizes = [8, 32], strides = [1, 1]} : vector<8x70xf32> to vector<8x32xf32>
    %c-8_i32 = arith.constant -8 : i32
    %232 = vector.broadcast %c-8_i32 : i32 to vector<1x32xi32>
    %233 = arith.cmpi sge, %0, %232 : vector<1x32xi32>
    %c8_i32_39 = arith.constant 8 : i32
    %234 = vector.broadcast %c8_i32_39 : i32 to vector<1x32xi32>
    %235 = arith.cmpi slt, %0, %234 : vector<1x32xi32>
    %236 = arith.andi %233, %235 : vector<1x32xi1>
    %cst_40 = arith.constant 0.000000e+00 : f32
    %237 = vector.shape_cast %236 : vector<1x32xi1> to vector<1x32xi1>
    %238 = vector.broadcast %237 : vector<1x32xi1> to vector<8x32xi1>
    %239 = vector.broadcast %cst_40 : f32 to vector<8x32xf32>
    %240 = arith.select %238, %231, %239 : vector<8x32xi1>, vector<8x32xf32>
    %241 = vector.extract_strided_slice %5 {offsets = [0, 28], sizes = [8, 32], strides = [1, 1]} : vector<8x70xf32> to vector<8x32xf32>
    %c-9_i32 = arith.constant -9 : i32
    %242 = vector.broadcast %c-9_i32 : i32 to vector<1x32xi32>
    %243 = arith.cmpi sge, %0, %242 : vector<1x32xi32>
    %c7_i32_41 = arith.constant 7 : i32
    %244 = vector.broadcast %c7_i32_41 : i32 to vector<1x32xi32>
    %245 = arith.cmpi slt, %0, %244 : vector<1x32xi32>
    %246 = arith.andi %243, %245 : vector<1x32xi1>
    %cst_42 = arith.constant 0.000000e+00 : f32
    %247 = vector.shape_cast %246 : vector<1x32xi1> to vector<1x32xi1>
    %248 = vector.broadcast %247 : vector<1x32xi1> to vector<8x32xi1>
    %249 = vector.broadcast %cst_42 : f32 to vector<8x32xf32>
    %250 = arith.select %248, %241, %249 : vector<8x32xi1>, vector<8x32xf32>
    %251 = vector.extract_strided_slice %5 {offsets = [0, 29], sizes = [8, 32], strides = [1, 1]} : vector<8x70xf32> to vector<8x32xf32>
    %c-10_i32 = arith.constant -10 : i32
    %252 = vector.broadcast %c-10_i32 : i32 to vector<1x32xi32>
    %253 = arith.cmpi sge, %0, %252 : vector<1x32xi32>
    %c6_i32_43 = arith.constant 6 : i32
    %254 = vector.broadcast %c6_i32_43 : i32 to vector<1x32xi32>
    %255 = arith.cmpi slt, %0, %254 : vector<1x32xi32>
    %256 = arith.andi %253, %255 : vector<1x32xi1>
    %cst_44 = arith.constant 0.000000e+00 : f32
    %257 = vector.shape_cast %256 : vector<1x32xi1> to vector<1x32xi1>
    %258 = vector.broadcast %257 : vector<1x32xi1> to vector<8x32xi1>
    %259 = vector.broadcast %cst_44 : f32 to vector<8x32xf32>
    %260 = arith.select %258, %251, %259 : vector<8x32xi1>, vector<8x32xf32>
    %261 = vector.extract_strided_slice %5 {offsets = [0, 30], sizes = [8, 32], strides = [1, 1]} : vector<8x70xf32> to vector<8x32xf32>
    %c-11_i32 = arith.constant -11 : i32
    %262 = vector.broadcast %c-11_i32 : i32 to vector<1x32xi32>
    %263 = arith.cmpi sge, %0, %262 : vector<1x32xi32>
    %c5_i32_45 = arith.constant 5 : i32
    %264 = vector.broadcast %c5_i32_45 : i32 to vector<1x32xi32>
    %265 = arith.cmpi slt, %0, %264 : vector<1x32xi32>
    %266 = arith.andi %263, %265 : vector<1x32xi1>
    %cst_46 = arith.constant 0.000000e+00 : f32
    %267 = vector.shape_cast %266 : vector<1x32xi1> to vector<1x32xi1>
    %268 = vector.broadcast %267 : vector<1x32xi1> to vector<8x32xi1>
    %269 = vector.broadcast %cst_46 : f32 to vector<8x32xf32>
    %270 = arith.select %268, %261, %269 : vector<8x32xi1>, vector<8x32xf32>
    %271 = vector.extract_strided_slice %5 {offsets = [0, 31], sizes = [8, 32], strides = [1, 1]} : vector<8x70xf32> to vector<8x32xf32>
    %c-12_i32 = arith.constant -12 : i32
    %272 = vector.broadcast %c-12_i32 : i32 to vector<1x32xi32>
    %273 = arith.cmpi sge, %0, %272 : vector<1x32xi32>
    %c4_i32_47 = arith.constant 4 : i32
    %274 = vector.broadcast %c4_i32_47 : i32 to vector<1x32xi32>
    %275 = arith.cmpi slt, %0, %274 : vector<1x32xi32>
    %276 = arith.andi %273, %275 : vector<1x32xi1>
    %cst_48 = arith.constant 0.000000e+00 : f32
    %277 = vector.shape_cast %276 : vector<1x32xi1> to vector<1x32xi1>
    %278 = vector.broadcast %277 : vector<1x32xi1> to vector<8x32xi1>
    %279 = vector.broadcast %cst_48 : f32 to vector<8x32xf32>
    %280 = arith.select %278, %271, %279 : vector<8x32xi1>, vector<8x32xf32>
    %281 = vector.extract_strided_slice %5 {offsets = [0, 32], sizes = [8, 32], strides = [1, 1]} : vector<8x70xf32> to vector<8x32xf32>
    %c-13_i32 = arith.constant -13 : i32
    %282 = vector.broadcast %c-13_i32 : i32 to vector<1x32xi32>
    %283 = arith.cmpi sge, %0, %282 : vector<1x32xi32>
    %c3_i32_49 = arith.constant 3 : i32
    %284 = vector.broadcast %c3_i32_49 : i32 to vector<1x32xi32>
    %285 = arith.cmpi slt, %0, %284 : vector<1x32xi32>
    %286 = arith.andi %283, %285 : vector<1x32xi1>
    %cst_50 = arith.constant 0.000000e+00 : f32
    %287 = vector.shape_cast %286 : vector<1x32xi1> to vector<1x32xi1>
    %288 = vector.broadcast %287 : vector<1x32xi1> to vector<8x32xi1>
    %289 = vector.broadcast %cst_50 : f32 to vector<8x32xf32>
    %290 = arith.select %288, %281, %289 : vector<8x32xi1>, vector<8x32xf32>
    %291 = vector.extract_strided_slice %5 {offsets = [0, 33], sizes = [8, 32], strides = [1, 1]} : vector<8x70xf32> to vector<8x32xf32>
    %c-14_i32 = arith.constant -14 : i32
    %292 = vector.broadcast %c-14_i32 : i32 to vector<1x32xi32>
    %293 = arith.cmpi sge, %0, %292 : vector<1x32xi32>
    %c2_i32_51 = arith.constant 2 : i32
    %294 = vector.broadcast %c2_i32_51 : i32 to vector<1x32xi32>
    %295 = arith.cmpi slt, %0, %294 : vector<1x32xi32>
    %296 = arith.andi %293, %295 : vector<1x32xi1>
    %cst_52 = arith.constant 0.000000e+00 : f32
    %297 = vector.shape_cast %296 : vector<1x32xi1> to vector<1x32xi1>
    %298 = vector.broadcast %297 : vector<1x32xi1> to vector<8x32xi1>
    %299 = vector.broadcast %cst_52 : f32 to vector<8x32xf32>
    %300 = arith.select %298, %291, %299 : vector<8x32xi1>, vector<8x32xf32>
    %301 = vector.extract_strided_slice %5 {offsets = [0, 34], sizes = [8, 32], strides = [1, 1]} : vector<8x70xf32> to vector<8x32xf32>
    %c-15_i32 = arith.constant -15 : i32
    %302 = vector.broadcast %c-15_i32 : i32 to vector<1x32xi32>
    %303 = arith.cmpi sge, %0, %302 : vector<1x32xi32>
    %c1_i32_53 = arith.constant 1 : i32
    %304 = vector.broadcast %c1_i32_53 : i32 to vector<1x32xi32>
    %305 = arith.cmpi slt, %0, %304 : vector<1x32xi32>
    %306 = arith.andi %303, %305 : vector<1x32xi1>
    %cst_54 = arith.constant 0.000000e+00 : f32
    %307 = vector.shape_cast %306 : vector<1x32xi1> to vector<1x32xi1>
    %308 = vector.broadcast %307 : vector<1x32xi1> to vector<8x32xi1>
    %309 = vector.broadcast %cst_54 : f32 to vector<8x32xf32>
    %310 = arith.select %308, %301, %309 : vector<8x32xi1>, vector<8x32xf32>
    %cst_55 = arith.constant 0.000000e+00 : f32
    %311 = vector.broadcast %cst_55 : f32 to vector<8x32xf32>
    %cst_56 = arith.constant 0.000000e+00 : f32
    %312 = vector.broadcast %cst_56 : f32 to vector<8x32xf32>
    %cst_57 = arith.constant 0.000000e+00 : f32
    %313 = vector.broadcast %cst_57 : f32 to vector<8x32xf32>
    %cst_58 = arith.constant 0.000000e+00 : f32
    %314 = vector.broadcast %cst_58 : f32 to vector<8x32xf32>
    %cst_59 = arith.constant 0xFF800000 : f32
    %315 = vector.broadcast %cst_59 : f32 to vector<4x1xf32>
    %316 = tpu.concatenate %315, %1, %315 in 1 : vector<4x1xf32>, vector<4x32xf32>, vector<4x1xf32> -> vector<4x34xf32>
    %c1_i32_60 = arith.constant 1 : i32
    %317 = vector.broadcast %c1_i32_60 : i32 to vector<1x32xi32>
    %318 = arith.cmpi sge, %0, %317 : vector<1x32xi32>
    %319 = vector.extract_strided_slice %316 {offsets = [0, 0], sizes = [4, 32], strides = [1, 1]} : vector<4x34xf32> to vector<4x32xf32>
    %cst_61 = arith.constant 0xFF800000 : f32
    %320 = vector.shape_cast %318 : vector<1x32xi1> to vector<1x32xi1>
    %321 = vector.broadcast %320 : vector<1x32xi1> to vector<4x32xi1>
    %322 = vector.broadcast %cst_61 : f32 to vector<4x32xf32>
    %323 = arith.select %321, %319, %322 : vector<4x32xi1>, vector<4x32xf32>
    %324 = vector.extract_strided_slice %316 {offsets = [0, 1], sizes = [4, 32], strides = [1, 1]} : vector<4x34xf32> to vector<4x32xf32>
    %c14_i32_62 = arith.constant 14 : i32
    %325 = vector.broadcast %c14_i32_62 : i32 to vector<1x32xi32>
    %326 = arith.cmpi sle, %0, %325 : vector<1x32xi32>
    %327 = vector.extract_strided_slice %316 {offsets = [0, 2], sizes = [4, 32], strides = [1, 1]} : vector<4x34xf32> to vector<4x32xf32>
    %cst_63 = arith.constant 0xFF800000 : f32
    %328 = vector.shape_cast %326 : vector<1x32xi1> to vector<1x32xi1>
    %329 = vector.broadcast %328 : vector<1x32xi1> to vector<4x32xi1>
    %330 = vector.broadcast %cst_63 : f32 to vector<4x32xf32>
    %331 = arith.select %329, %327, %330 : vector<4x32xi1>, vector<4x32xf32>
    %332 = arith.maximumf %323, %324 : vector<4x32xf32>
    %333 = arith.maximumf %332, %331 : vector<4x32xf32>
    %334 = tpu.concatenate %6, %7, %8, %9, %19, %29, %39, %49, %59, %69, %79, %89, %99, %109, %119, %129 in 0 : vector<8x32xf32>, vector<8x32xf32>, vector<8x32xf32>, vector<8x32xf32>, vector<8x32xf32>, vector<8x32xf32>, vector<8x32xf32>, vector<8x32xf32>, vector<8x32xf32>, vector<8x32xf32>, vector<8x32xf32>, vector<8x32xf32>, vector<8x32xf32>, vector<8x32xf32>, vector<8x32xf32>, vector<8x32xf32> -> vector<128x32xf32>
    %335 = tpu.concatenate %139, %149, %159, %160, %170, %180, %190, %200, %210, %220, %230, %240, %250, %260, %270, %280 in 0 : vector<8x32xf32>, vector<8x32xf32>, vector<8x32xf32>, vector<8x32xf32>, vector<8x32xf32>, vector<8x32xf32>, vector<8x32xf32>, vector<8x32xf32>, vector<8x32xf32>, vector<8x32xf32>, vector<8x32xf32>, vector<8x32xf32>, vector<8x32xf32>, vector<8x32xf32>, vector<8x32xf32>, vector<8x32xf32> -> vector<128x32xf32>
    %336 = tpu.concatenate %290, %300, %310, %311, %312, %313, %314, %333 in 0 : vector<8x32xf32>, vector<8x32xf32>, vector<8x32xf32>, vector<8x32xf32>, vector<8x32xf32>, vector<8x32xf32>, vector<8x32xf32>, vector<4x32xf32> -> vector<60x32xf32>
    %337 = tpu.concatenate %334, %335, %336 in 0 : vector<128x32xf32>, vector<128x32xf32>, vector<60x32xf32> -> vector<316x32xf32>
    %c0_64 = arith.constant 0 : index
    %c0_65 = arith.constant 0 : index
    %338 = vector.load %arg3[%c0_64, %c0_65] : memref<32x316xf32, #tpu.memory_space<vmem>>, vector<32x316xf32>
    %cst_66 = arith.constant dense<0.000000e+00> : vector<32x32xf32>
    %339 = tpu.matmul %338, %337, %cst_66 {dimension_numbers = #tpu.dot_dimension_numbers<[1], [0], [0], [1], [0, 0, 1, 1], [], []>} : vector<32x316xf32>, vector<316x32xf32>, vector<32x32xf32> -> vector<32x32xf32>
    %cst_67 = arith.constant dense<0.000000e+00> : vector<32xf32>
    %340 = vector.multi_reduction <add>, %339, %cst_67 [1] : vector<32x32xf32> to vector<32xf32>
    %341 = vector.shape_cast %340 : vector<32xf32> to vector<32x1xf32>
    %cst_68 = arith.constant 3.200000e+01 : f32
    %342 = vector.broadcast %cst_68 : f32 to vector<32x1xf32>
    %343 = arith.divf %341, %342 : vector<32x1xf32>
    %344 = vector.broadcast %343 : vector<32x1xf32> to vector<32x32xf32>
    %345 = arith.subf %339, %344 : vector<32x32xf32>
    %346 = arith.mulf %345, %345 : vector<32x32xf32>
    %cst_69 = arith.constant dense<0.000000e+00> : vector<32xf32>
    %347 = vector.multi_reduction <add>, %346, %cst_69 [1] : vector<32x32xf32> to vector<32xf32>
    %348 = vector.shape_cast %347 : vector<32xf32> to vector<32x1xf32>
    %cst_70 = arith.constant 3.200000e+01 : f32
    %349 = vector.broadcast %cst_70 : f32 to vector<32x1xf32>
    %350 = arith.divf %348, %349 : vector<32x1xf32>
    %351 = vector.broadcast %343 : vector<32x1xf32> to vector<32x32xf32>
    %352 = arith.subf %339, %351 : vector<32x32xf32>
    %cst_71 = arith.constant 9.99999974E-6 : f32
    %353 = vector.broadcast %cst_71 : f32 to vector<32x1xf32>
    %354 = arith.addf %350, %353 : vector<32x1xf32>
    %355 = math.rsqrt %354 : vector<32x1xf32>
    %356 = vector.broadcast %355 : vector<32x1xf32> to vector<32x32xf32>
    %357 = arith.mulf %352, %356 : vector<32x32xf32>
    %c0_72 = arith.constant 0 : index
    %c0_73 = arith.constant 0 : index
    %358 = vector.load %arg4[%c0_72, %c0_73] : memref<32x1xf32, #tpu.memory_space<vmem>>, vector<32x1xf32>
    %359 = vector.broadcast %358 : vector<32x1xf32> to vector<32x32xf32>
    %360 = arith.mulf %357, %359 : vector<32x32xf32>
    %c0_74 = arith.constant 0 : index
    %c0_75 = arith.constant 0 : index
    %361 = vector.load %arg5[%c0_74, %c0_75] : memref<32x1xf32, #tpu.memory_space<vmem>>, vector<32x1xf32>
    %362 = vector.broadcast %361 : vector<32x1xf32> to vector<32x32xf32>
    %363 = arith.addf %360, %362 : vector<32x32xf32>
    %cst_76 = arith.constant 0.000000e+00 : f32
    %364 = vector.broadcast %cst_76 : f32 to vector<32x32xf32>
    %365 = arith.maximumf %363, %364 : vector<32x32xf32>
    %c0_77 = arith.constant 0 : index
    %c0_78 = arith.constant 0 : index
    %366 = vector.load %arg6[%c0_77, %c0_78] : memref<8x32xf32, #tpu.memory_space<vmem>>, vector<8x32xf32>
    %cst_79 = arith.constant dense<0.000000e+00> : vector<8x32xf32>
    %367 = tpu.matmul %366, %365, %cst_79 {dimension_numbers = #tpu.dot_dimension_numbers<[1], [0], [0], [1], [0, 0, 1, 1], [], []>} : vector<8x32xf32>, vector<32x32xf32>, vector<8x32xf32> -> vector<8x32xf32>
    %cst_80 = arith.constant 0.000000e+00 : f32
    %368 = vector.broadcast %cst_80 : f32 to vector<8x19xf32>
    %369 = tpu.concatenate %368, %367, %368 in 1 : vector<8x19xf32>, vector<8x32xf32>, vector<8x19xf32> -> vector<8x70xf32>
    %cst_81 = arith.constant 0.000000e+00 : f32
    %370 = vector.broadcast %cst_81 : f32 to vector<8x32xf32>
    %cst_82 = arith.constant 0.000000e+00 : f32
    %371 = vector.broadcast %cst_82 : f32 to vector<8x32xf32>
    %cst_83 = arith.constant 0.000000e+00 : f32
    %372 = vector.broadcast %cst_83 : f32 to vector<8x32xf32>
    %cst_84 = arith.constant 0.000000e+00 : f32
    %373 = vector.broadcast %cst_84 : f32 to vector<8x32xf32>
    %374 = vector.extract_strided_slice %369 {offsets = [0, 4], sizes = [8, 32], strides = [1, 1]} : vector<8x70xf32> to vector<8x32xf32>
    %c15_i32_85 = arith.constant 15 : i32
    %375 = vector.broadcast %c15_i32_85 : i32 to vector<1x32xi32>
    %376 = arith.cmpi sge, %0, %375 : vector<1x32xi32>
    %c31_i32_86 = arith.constant 31 : i32
    %377 = vector.broadcast %c31_i32_86 : i32 to vector<1x32xi32>
    %378 = arith.cmpi slt, %0, %377 : vector<1x32xi32>
    %379 = arith.andi %376, %378 : vector<1x32xi1>
    %cst_87 = arith.constant 0.000000e+00 : f32
    %380 = vector.shape_cast %379 : vector<1x32xi1> to vector<1x32xi1>
    %381 = vector.broadcast %380 : vector<1x32xi1> to vector<8x32xi1>
    %382 = vector.broadcast %cst_87 : f32 to vector<8x32xf32>
    %383 = arith.select %381, %374, %382 : vector<8x32xi1>, vector<8x32xf32>
    %384 = vector.extract_strided_slice %369 {offsets = [0, 5], sizes = [8, 32], strides = [1, 1]} : vector<8x70xf32> to vector<8x32xf32>
    %c14_i32_88 = arith.constant 14 : i32
    %385 = vector.broadcast %c14_i32_88 : i32 to vector<1x32xi32>
    %386 = arith.cmpi sge, %0, %385 : vector<1x32xi32>
    %c30_i32_89 = arith.constant 30 : i32
    %387 = vector.broadcast %c30_i32_89 : i32 to vector<1x32xi32>
    %388 = arith.cmpi slt, %0, %387 : vector<1x32xi32>
    %389 = arith.andi %386, %388 : vector<1x32xi1>
    %cst_90 = arith.constant 0.000000e+00 : f32
    %390 = vector.shape_cast %389 : vector<1x32xi1> to vector<1x32xi1>
    %391 = vector.broadcast %390 : vector<1x32xi1> to vector<8x32xi1>
    %392 = vector.broadcast %cst_90 : f32 to vector<8x32xf32>
    %393 = arith.select %391, %384, %392 : vector<8x32xi1>, vector<8x32xf32>
    %394 = vector.extract_strided_slice %369 {offsets = [0, 6], sizes = [8, 32], strides = [1, 1]} : vector<8x70xf32> to vector<8x32xf32>
    %c13_i32_91 = arith.constant 13 : i32
    %395 = vector.broadcast %c13_i32_91 : i32 to vector<1x32xi32>
    %396 = arith.cmpi sge, %0, %395 : vector<1x32xi32>
    %c29_i32_92 = arith.constant 29 : i32
    %397 = vector.broadcast %c29_i32_92 : i32 to vector<1x32xi32>
    %398 = arith.cmpi slt, %0, %397 : vector<1x32xi32>
    %399 = arith.andi %396, %398 : vector<1x32xi1>
    %cst_93 = arith.constant 0.000000e+00 : f32
    %400 = vector.shape_cast %399 : vector<1x32xi1> to vector<1x32xi1>
    %401 = vector.broadcast %400 : vector<1x32xi1> to vector<8x32xi1>
    %402 = vector.broadcast %cst_93 : f32 to vector<8x32xf32>
    %403 = arith.select %401, %394, %402 : vector<8x32xi1>, vector<8x32xf32>
    %404 = vector.extract_strided_slice %369 {offsets = [0, 7], sizes = [8, 32], strides = [1, 1]} : vector<8x70xf32> to vector<8x32xf32>
    %c12_i32_94 = arith.constant 12 : i32
    %405 = vector.broadcast %c12_i32_94 : i32 to vector<1x32xi32>
    %406 = arith.cmpi sge, %0, %405 : vector<1x32xi32>
    %c28_i32_95 = arith.constant 28 : i32
    %407 = vector.broadcast %c28_i32_95 : i32 to vector<1x32xi32>
    %408 = arith.cmpi slt, %0, %407 : vector<1x32xi32>
    %409 = arith.andi %406, %408 : vector<1x32xi1>
    %cst_96 = arith.constant 0.000000e+00 : f32
    %410 = vector.shape_cast %409 : vector<1x32xi1> to vector<1x32xi1>
    %411 = vector.broadcast %410 : vector<1x32xi1> to vector<8x32xi1>
    %412 = vector.broadcast %cst_96 : f32 to vector<8x32xf32>
    %413 = arith.select %411, %404, %412 : vector<8x32xi1>, vector<8x32xf32>
    %414 = vector.extract_strided_slice %369 {offsets = [0, 8], sizes = [8, 32], strides = [1, 1]} : vector<8x70xf32> to vector<8x32xf32>
    %c11_i32_97 = arith.constant 11 : i32
    %415 = vector.broadcast %c11_i32_97 : i32 to vector<1x32xi32>
    %416 = arith.cmpi sge, %0, %415 : vector<1x32xi32>
    %c27_i32_98 = arith.constant 27 : i32
    %417 = vector.broadcast %c27_i32_98 : i32 to vector<1x32xi32>
    %418 = arith.cmpi slt, %0, %417 : vector<1x32xi32>
    %419 = arith.andi %416, %418 : vector<1x32xi1>
    %cst_99 = arith.constant 0.000000e+00 : f32
    %420 = vector.shape_cast %419 : vector<1x32xi1> to vector<1x32xi1>
    %421 = vector.broadcast %420 : vector<1x32xi1> to vector<8x32xi1>
    %422 = vector.broadcast %cst_99 : f32 to vector<8x32xf32>
    %423 = arith.select %421, %414, %422 : vector<8x32xi1>, vector<8x32xf32>
    %424 = vector.extract_strided_slice %369 {offsets = [0, 9], sizes = [8, 32], strides = [1, 1]} : vector<8x70xf32> to vector<8x32xf32>
    %c10_i32_100 = arith.constant 10 : i32
    %425 = vector.broadcast %c10_i32_100 : i32 to vector<1x32xi32>
    %426 = arith.cmpi sge, %0, %425 : vector<1x32xi32>
    %c26_i32_101 = arith.constant 26 : i32
    %427 = vector.broadcast %c26_i32_101 : i32 to vector<1x32xi32>
    %428 = arith.cmpi slt, %0, %427 : vector<1x32xi32>
    %429 = arith.andi %426, %428 : vector<1x32xi1>
    %cst_102 = arith.constant 0.000000e+00 : f32
    %430 = vector.shape_cast %429 : vector<1x32xi1> to vector<1x32xi1>
    %431 = vector.broadcast %430 : vector<1x32xi1> to vector<8x32xi1>
    %432 = vector.broadcast %cst_102 : f32 to vector<8x32xf32>
    %433 = arith.select %431, %424, %432 : vector<8x32xi1>, vector<8x32xf32>
    %434 = vector.extract_strided_slice %369 {offsets = [0, 10], sizes = [8, 32], strides = [1, 1]} : vector<8x70xf32> to vector<8x32xf32>
    %c9_i32_103 = arith.constant 9 : i32
    %435 = vector.broadcast %c9_i32_103 : i32 to vector<1x32xi32>
    %436 = arith.cmpi sge, %0, %435 : vector<1x32xi32>
    %c25_i32_104 = arith.constant 25 : i32
    %437 = vector.broadcast %c25_i32_104 : i32 to vector<1x32xi32>
    %438 = arith.cmpi slt, %0, %437 : vector<1x32xi32>
    %439 = arith.andi %436, %438 : vector<1x32xi1>
    %cst_105 = arith.constant 0.000000e+00 : f32
    %440 = vector.shape_cast %439 : vector<1x32xi1> to vector<1x32xi1>
    %441 = vector.broadcast %440 : vector<1x32xi1> to vector<8x32xi1>
    %442 = vector.broadcast %cst_105 : f32 to vector<8x32xf32>
    %443 = arith.select %441, %434, %442 : vector<8x32xi1>, vector<8x32xf32>
    %444 = vector.extract_strided_slice %369 {offsets = [0, 11], sizes = [8, 32], strides = [1, 1]} : vector<8x70xf32> to vector<8x32xf32>
    %c8_i32_106 = arith.constant 8 : i32
    %445 = vector.broadcast %c8_i32_106 : i32 to vector<1x32xi32>
    %446 = arith.cmpi sge, %0, %445 : vector<1x32xi32>
    %c24_i32_107 = arith.constant 24 : i32
    %447 = vector.broadcast %c24_i32_107 : i32 to vector<1x32xi32>
    %448 = arith.cmpi slt, %0, %447 : vector<1x32xi32>
    %449 = arith.andi %446, %448 : vector<1x32xi1>
    %cst_108 = arith.constant 0.000000e+00 : f32
    %450 = vector.shape_cast %449 : vector<1x32xi1> to vector<1x32xi1>
    %451 = vector.broadcast %450 : vector<1x32xi1> to vector<8x32xi1>
    %452 = vector.broadcast %cst_108 : f32 to vector<8x32xf32>
    %453 = arith.select %451, %444, %452 : vector<8x32xi1>, vector<8x32xf32>
    %454 = vector.extract_strided_slice %369 {offsets = [0, 12], sizes = [8, 32], strides = [1, 1]} : vector<8x70xf32> to vector<8x32xf32>
    %c7_i32_109 = arith.constant 7 : i32
    %455 = vector.broadcast %c7_i32_109 : i32 to vector<1x32xi32>
    %456 = arith.cmpi sge, %0, %455 : vector<1x32xi32>
    %c23_i32_110 = arith.constant 23 : i32
    %457 = vector.broadcast %c23_i32_110 : i32 to vector<1x32xi32>
    %458 = arith.cmpi slt, %0, %457 : vector<1x32xi32>
    %459 = arith.andi %456, %458 : vector<1x32xi1>
    %cst_111 = arith.constant 0.000000e+00 : f32
    %460 = vector.shape_cast %459 : vector<1x32xi1> to vector<1x32xi1>
    %461 = vector.broadcast %460 : vector<1x32xi1> to vector<8x32xi1>
    %462 = vector.broadcast %cst_111 : f32 to vector<8x32xf32>
    %463 = arith.select %461, %454, %462 : vector<8x32xi1>, vector<8x32xf32>
    %464 = vector.extract_strided_slice %369 {offsets = [0, 13], sizes = [8, 32], strides = [1, 1]} : vector<8x70xf32> to vector<8x32xf32>
    %c6_i32_112 = arith.constant 6 : i32
    %465 = vector.broadcast %c6_i32_112 : i32 to vector<1x32xi32>
    %466 = arith.cmpi sge, %0, %465 : vector<1x32xi32>
    %c22_i32_113 = arith.constant 22 : i32
    %467 = vector.broadcast %c22_i32_113 : i32 to vector<1x32xi32>
    %468 = arith.cmpi slt, %0, %467 : vector<1x32xi32>
    %469 = arith.andi %466, %468 : vector<1x32xi1>
    %cst_114 = arith.constant 0.000000e+00 : f32
    %470 = vector.shape_cast %469 : vector<1x32xi1> to vector<1x32xi1>
    %471 = vector.broadcast %470 : vector<1x32xi1> to vector<8x32xi1>
    %472 = vector.broadcast %cst_114 : f32 to vector<8x32xf32>
    %473 = arith.select %471, %464, %472 : vector<8x32xi1>, vector<8x32xf32>
    %474 = vector.extract_strided_slice %369 {offsets = [0, 14], sizes = [8, 32], strides = [1, 1]} : vector<8x70xf32> to vector<8x32xf32>
    %c5_i32_115 = arith.constant 5 : i32
    %475 = vector.broadcast %c5_i32_115 : i32 to vector<1x32xi32>
    %476 = arith.cmpi sge, %0, %475 : vector<1x32xi32>
    %c21_i32_116 = arith.constant 21 : i32
    %477 = vector.broadcast %c21_i32_116 : i32 to vector<1x32xi32>
    %478 = arith.cmpi slt, %0, %477 : vector<1x32xi32>
    %479 = arith.andi %476, %478 : vector<1x32xi1>
    %cst_117 = arith.constant 0.000000e+00 : f32
    %480 = vector.shape_cast %479 : vector<1x32xi1> to vector<1x32xi1>
    %481 = vector.broadcast %480 : vector<1x32xi1> to vector<8x32xi1>
    %482 = vector.broadcast %cst_117 : f32 to vector<8x32xf32>
    %483 = arith.select %481, %474, %482 : vector<8x32xi1>, vector<8x32xf32>
    %484 = vector.extract_strided_slice %369 {offsets = [0, 15], sizes = [8, 32], strides = [1, 1]} : vector<8x70xf32> to vector<8x32xf32>
    %c4_i32_118 = arith.constant 4 : i32
    %485 = vector.broadcast %c4_i32_118 : i32 to vector<1x32xi32>
    %486 = arith.cmpi sge, %0, %485 : vector<1x32xi32>
    %c20_i32_119 = arith.constant 20 : i32
    %487 = vector.broadcast %c20_i32_119 : i32 to vector<1x32xi32>
    %488 = arith.cmpi slt, %0, %487 : vector<1x32xi32>
    %489 = arith.andi %486, %488 : vector<1x32xi1>
    %cst_120 = arith.constant 0.000000e+00 : f32
    %490 = vector.shape_cast %489 : vector<1x32xi1> to vector<1x32xi1>
    %491 = vector.broadcast %490 : vector<1x32xi1> to vector<8x32xi1>
    %492 = vector.broadcast %cst_120 : f32 to vector<8x32xf32>
    %493 = arith.select %491, %484, %492 : vector<8x32xi1>, vector<8x32xf32>
    %494 = vector.extract_strided_slice %369 {offsets = [0, 16], sizes = [8, 32], strides = [1, 1]} : vector<8x70xf32> to vector<8x32xf32>
    %c3_i32_121 = arith.constant 3 : i32
    %495 = vector.broadcast %c3_i32_121 : i32 to vector<1x32xi32>
    %496 = arith.cmpi sge, %0, %495 : vector<1x32xi32>
    %c19_i32_122 = arith.constant 19 : i32
    %497 = vector.broadcast %c19_i32_122 : i32 to vector<1x32xi32>
    %498 = arith.cmpi slt, %0, %497 : vector<1x32xi32>
    %499 = arith.andi %496, %498 : vector<1x32xi1>
    %cst_123 = arith.constant 0.000000e+00 : f32
    %500 = vector.shape_cast %499 : vector<1x32xi1> to vector<1x32xi1>
    %501 = vector.broadcast %500 : vector<1x32xi1> to vector<8x32xi1>
    %502 = vector.broadcast %cst_123 : f32 to vector<8x32xf32>
    %503 = arith.select %501, %494, %502 : vector<8x32xi1>, vector<8x32xf32>
    %504 = vector.extract_strided_slice %369 {offsets = [0, 17], sizes = [8, 32], strides = [1, 1]} : vector<8x70xf32> to vector<8x32xf32>
    %c2_i32_124 = arith.constant 2 : i32
    %505 = vector.broadcast %c2_i32_124 : i32 to vector<1x32xi32>
    %506 = arith.cmpi sge, %0, %505 : vector<1x32xi32>
    %c18_i32_125 = arith.constant 18 : i32
    %507 = vector.broadcast %c18_i32_125 : i32 to vector<1x32xi32>
    %508 = arith.cmpi slt, %0, %507 : vector<1x32xi32>
    %509 = arith.andi %506, %508 : vector<1x32xi1>
    %cst_126 = arith.constant 0.000000e+00 : f32
    %510 = vector.shape_cast %509 : vector<1x32xi1> to vector<1x32xi1>
    %511 = vector.broadcast %510 : vector<1x32xi1> to vector<8x32xi1>
    %512 = vector.broadcast %cst_126 : f32 to vector<8x32xf32>
    %513 = arith.select %511, %504, %512 : vector<8x32xi1>, vector<8x32xf32>
    %514 = vector.extract_strided_slice %369 {offsets = [0, 18], sizes = [8, 32], strides = [1, 1]} : vector<8x70xf32> to vector<8x32xf32>
    %c1_i32_127 = arith.constant 1 : i32
    %515 = vector.broadcast %c1_i32_127 : i32 to vector<1x32xi32>
    %516 = arith.cmpi sge, %0, %515 : vector<1x32xi32>
    %c17_i32_128 = arith.constant 17 : i32
    %517 = vector.broadcast %c17_i32_128 : i32 to vector<1x32xi32>
    %518 = arith.cmpi slt, %0, %517 : vector<1x32xi32>
    %519 = arith.andi %516, %518 : vector<1x32xi1>
    %cst_129 = arith.constant 0.000000e+00 : f32
    %520 = vector.shape_cast %519 : vector<1x32xi1> to vector<1x32xi1>
    %521 = vector.broadcast %520 : vector<1x32xi1> to vector<8x32xi1>
    %522 = vector.broadcast %cst_129 : f32 to vector<8x32xf32>
    %523 = arith.select %521, %514, %522 : vector<8x32xi1>, vector<8x32xf32>
    %524 = vector.extract_strided_slice %369 {offsets = [0, 19], sizes = [8, 32], strides = [1, 1]} : vector<8x70xf32> to vector<8x32xf32>
    %525 = vector.extract_strided_slice %369 {offsets = [0, 20], sizes = [8, 32], strides = [1, 1]} : vector<8x70xf32> to vector<8x32xf32>
    %c-1_i32_130 = arith.constant -1 : i32
    %526 = vector.broadcast %c-1_i32_130 : i32 to vector<1x32xi32>
    %527 = arith.cmpi sge, %0, %526 : vector<1x32xi32>
    %c15_i32_131 = arith.constant 15 : i32
    %528 = vector.broadcast %c15_i32_131 : i32 to vector<1x32xi32>
    %529 = arith.cmpi slt, %0, %528 : vector<1x32xi32>
    %530 = arith.andi %527, %529 : vector<1x32xi1>
    %cst_132 = arith.constant 0.000000e+00 : f32
    %531 = vector.shape_cast %530 : vector<1x32xi1> to vector<1x32xi1>
    %532 = vector.broadcast %531 : vector<1x32xi1> to vector<8x32xi1>
    %533 = vector.broadcast %cst_132 : f32 to vector<8x32xf32>
    %534 = arith.select %532, %525, %533 : vector<8x32xi1>, vector<8x32xf32>
    %535 = vector.extract_strided_slice %369 {offsets = [0, 21], sizes = [8, 32], strides = [1, 1]} : vector<8x70xf32> to vector<8x32xf32>
    %c-2_i32_133 = arith.constant -2 : i32
    %536 = vector.broadcast %c-2_i32_133 : i32 to vector<1x32xi32>
    %537 = arith.cmpi sge, %0, %536 : vector<1x32xi32>
    %c14_i32_134 = arith.constant 14 : i32
    %538 = vector.broadcast %c14_i32_134 : i32 to vector<1x32xi32>
    %539 = arith.cmpi slt, %0, %538 : vector<1x32xi32>
    %540 = arith.andi %537, %539 : vector<1x32xi1>
    %cst_135 = arith.constant 0.000000e+00 : f32
    %541 = vector.shape_cast %540 : vector<1x32xi1> to vector<1x32xi1>
    %542 = vector.broadcast %541 : vector<1x32xi1> to vector<8x32xi1>
    %543 = vector.broadcast %cst_135 : f32 to vector<8x32xf32>
    %544 = arith.select %542, %535, %543 : vector<8x32xi1>, vector<8x32xf32>
    %545 = vector.extract_strided_slice %369 {offsets = [0, 22], sizes = [8, 32], strides = [1, 1]} : vector<8x70xf32> to vector<8x32xf32>
    %c-3_i32_136 = arith.constant -3 : i32
    %546 = vector.broadcast %c-3_i32_136 : i32 to vector<1x32xi32>
    %547 = arith.cmpi sge, %0, %546 : vector<1x32xi32>
    %c13_i32_137 = arith.constant 13 : i32
    %548 = vector.broadcast %c13_i32_137 : i32 to vector<1x32xi32>
    %549 = arith.cmpi slt, %0, %548 : vector<1x32xi32>
    %550 = arith.andi %547, %549 : vector<1x32xi1>
    %cst_138 = arith.constant 0.000000e+00 : f32
    %551 = vector.shape_cast %550 : vector<1x32xi1> to vector<1x32xi1>
    %552 = vector.broadcast %551 : vector<1x32xi1> to vector<8x32xi1>
    %553 = vector.broadcast %cst_138 : f32 to vector<8x32xf32>
    %554 = arith.select %552, %545, %553 : vector<8x32xi1>, vector<8x32xf32>
    %555 = vector.extract_strided_slice %369 {offsets = [0, 23], sizes = [8, 32], strides = [1, 1]} : vector<8x70xf32> to vector<8x32xf32>
    %c-4_i32_139 = arith.constant -4 : i32
    %556 = vector.broadcast %c-4_i32_139 : i32 to vector<1x32xi32>
    %557 = arith.cmpi sge, %0, %556 : vector<1x32xi32>
    %c12_i32_140 = arith.constant 12 : i32
    %558 = vector.broadcast %c12_i32_140 : i32 to vector<1x32xi32>
    %559 = arith.cmpi slt, %0, %558 : vector<1x32xi32>
    %560 = arith.andi %557, %559 : vector<1x32xi1>
    %cst_141 = arith.constant 0.000000e+00 : f32
    %561 = vector.shape_cast %560 : vector<1x32xi1> to vector<1x32xi1>
    %562 = vector.broadcast %561 : vector<1x32xi1> to vector<8x32xi1>
    %563 = vector.broadcast %cst_141 : f32 to vector<8x32xf32>
    %564 = arith.select %562, %555, %563 : vector<8x32xi1>, vector<8x32xf32>
    %565 = vector.extract_strided_slice %369 {offsets = [0, 24], sizes = [8, 32], strides = [1, 1]} : vector<8x70xf32> to vector<8x32xf32>
    %c-5_i32_142 = arith.constant -5 : i32
    %566 = vector.broadcast %c-5_i32_142 : i32 to vector<1x32xi32>
    %567 = arith.cmpi sge, %0, %566 : vector<1x32xi32>
    %c11_i32_143 = arith.constant 11 : i32
    %568 = vector.broadcast %c11_i32_143 : i32 to vector<1x32xi32>
    %569 = arith.cmpi slt, %0, %568 : vector<1x32xi32>
    %570 = arith.andi %567, %569 : vector<1x32xi1>
    %cst_144 = arith.constant 0.000000e+00 : f32
    %571 = vector.shape_cast %570 : vector<1x32xi1> to vector<1x32xi1>
    %572 = vector.broadcast %571 : vector<1x32xi1> to vector<8x32xi1>
    %573 = vector.broadcast %cst_144 : f32 to vector<8x32xf32>
    %574 = arith.select %572, %565, %573 : vector<8x32xi1>, vector<8x32xf32>
    %575 = vector.extract_strided_slice %369 {offsets = [0, 25], sizes = [8, 32], strides = [1, 1]} : vector<8x70xf32> to vector<8x32xf32>
    %c-6_i32_145 = arith.constant -6 : i32
    %576 = vector.broadcast %c-6_i32_145 : i32 to vector<1x32xi32>
    %577 = arith.cmpi sge, %0, %576 : vector<1x32xi32>
    %c10_i32_146 = arith.constant 10 : i32
    %578 = vector.broadcast %c10_i32_146 : i32 to vector<1x32xi32>
    %579 = arith.cmpi slt, %0, %578 : vector<1x32xi32>
    %580 = arith.andi %577, %579 : vector<1x32xi1>
    %cst_147 = arith.constant 0.000000e+00 : f32
    %581 = vector.shape_cast %580 : vector<1x32xi1> to vector<1x32xi1>
    %582 = vector.broadcast %581 : vector<1x32xi1> to vector<8x32xi1>
    %583 = vector.broadcast %cst_147 : f32 to vector<8x32xf32>
    %584 = arith.select %582, %575, %583 : vector<8x32xi1>, vector<8x32xf32>
    %585 = vector.extract_strided_slice %369 {offsets = [0, 26], sizes = [8, 32], strides = [1, 1]} : vector<8x70xf32> to vector<8x32xf32>
    %c-7_i32_148 = arith.constant -7 : i32
    %586 = vector.broadcast %c-7_i32_148 : i32 to vector<1x32xi32>
    %587 = arith.cmpi sge, %0, %586 : vector<1x32xi32>
    %c9_i32_149 = arith.constant 9 : i32
    %588 = vector.broadcast %c9_i32_149 : i32 to vector<1x32xi32>
    %589 = arith.cmpi slt, %0, %588 : vector<1x32xi32>
    %590 = arith.andi %587, %589 : vector<1x32xi1>
    %cst_150 = arith.constant 0.000000e+00 : f32
    %591 = vector.shape_cast %590 : vector<1x32xi1> to vector<1x32xi1>
    %592 = vector.broadcast %591 : vector<1x32xi1> to vector<8x32xi1>
    %593 = vector.broadcast %cst_150 : f32 to vector<8x32xf32>
    %594 = arith.select %592, %585, %593 : vector<8x32xi1>, vector<8x32xf32>
    %595 = vector.extract_strided_slice %369 {offsets = [0, 27], sizes = [8, 32], strides = [1, 1]} : vector<8x70xf32> to vector<8x32xf32>
    %c-8_i32_151 = arith.constant -8 : i32
    %596 = vector.broadcast %c-8_i32_151 : i32 to vector<1x32xi32>
    %597 = arith.cmpi sge, %0, %596 : vector<1x32xi32>
    %c8_i32_152 = arith.constant 8 : i32
    %598 = vector.broadcast %c8_i32_152 : i32 to vector<1x32xi32>
    %599 = arith.cmpi slt, %0, %598 : vector<1x32xi32>
    %600 = arith.andi %597, %599 : vector<1x32xi1>
    %cst_153 = arith.constant 0.000000e+00 : f32
    %601 = vector.shape_cast %600 : vector<1x32xi1> to vector<1x32xi1>
    %602 = vector.broadcast %601 : vector<1x32xi1> to vector<8x32xi1>
    %603 = vector.broadcast %cst_153 : f32 to vector<8x32xf32>
    %604 = arith.select %602, %595, %603 : vector<8x32xi1>, vector<8x32xf32>
    %605 = vector.extract_strided_slice %369 {offsets = [0, 28], sizes = [8, 32], strides = [1, 1]} : vector<8x70xf32> to vector<8x32xf32>
    %c-9_i32_154 = arith.constant -9 : i32
    %606 = vector.broadcast %c-9_i32_154 : i32 to vector<1x32xi32>
    %607 = arith.cmpi sge, %0, %606 : vector<1x32xi32>
    %c7_i32_155 = arith.constant 7 : i32
    %608 = vector.broadcast %c7_i32_155 : i32 to vector<1x32xi32>
    %609 = arith.cmpi slt, %0, %608 : vector<1x32xi32>
    %610 = arith.andi %607, %609 : vector<1x32xi1>
    %cst_156 = arith.constant 0.000000e+00 : f32
    %611 = vector.shape_cast %610 : vector<1x32xi1> to vector<1x32xi1>
    %612 = vector.broadcast %611 : vector<1x32xi1> to vector<8x32xi1>
    %613 = vector.broadcast %cst_156 : f32 to vector<8x32xf32>
    %614 = arith.select %612, %605, %613 : vector<8x32xi1>, vector<8x32xf32>
    %615 = vector.extract_strided_slice %369 {offsets = [0, 29], sizes = [8, 32], strides = [1, 1]} : vector<8x70xf32> to vector<8x32xf32>
    %c-10_i32_157 = arith.constant -10 : i32
    %616 = vector.broadcast %c-10_i32_157 : i32 to vector<1x32xi32>
    %617 = arith.cmpi sge, %0, %616 : vector<1x32xi32>
    %c6_i32_158 = arith.constant 6 : i32
    %618 = vector.broadcast %c6_i32_158 : i32 to vector<1x32xi32>
    %619 = arith.cmpi slt, %0, %618 : vector<1x32xi32>
    %620 = arith.andi %617, %619 : vector<1x32xi1>
    %cst_159 = arith.constant 0.000000e+00 : f32
    %621 = vector.shape_cast %620 : vector<1x32xi1> to vector<1x32xi1>
    %622 = vector.broadcast %621 : vector<1x32xi1> to vector<8x32xi1>
    %623 = vector.broadcast %cst_159 : f32 to vector<8x32xf32>
    %624 = arith.select %622, %615, %623 : vector<8x32xi1>, vector<8x32xf32>
    %625 = vector.extract_strided_slice %369 {offsets = [0, 30], sizes = [8, 32], strides = [1, 1]} : vector<8x70xf32> to vector<8x32xf32>
    %c-11_i32_160 = arith.constant -11 : i32
    %626 = vector.broadcast %c-11_i32_160 : i32 to vector<1x32xi32>
    %627 = arith.cmpi sge, %0, %626 : vector<1x32xi32>
    %c5_i32_161 = arith.constant 5 : i32
    %628 = vector.broadcast %c5_i32_161 : i32 to vector<1x32xi32>
    %629 = arith.cmpi slt, %0, %628 : vector<1x32xi32>
    %630 = arith.andi %627, %629 : vector<1x32xi1>
    %cst_162 = arith.constant 0.000000e+00 : f32
    %631 = vector.shape_cast %630 : vector<1x32xi1> to vector<1x32xi1>
    %632 = vector.broadcast %631 : vector<1x32xi1> to vector<8x32xi1>
    %633 = vector.broadcast %cst_162 : f32 to vector<8x32xf32>
    %634 = arith.select %632, %625, %633 : vector<8x32xi1>, vector<8x32xf32>
    %635 = vector.extract_strided_slice %369 {offsets = [0, 31], sizes = [8, 32], strides = [1, 1]} : vector<8x70xf32> to vector<8x32xf32>
    %c-12_i32_163 = arith.constant -12 : i32
    %636 = vector.broadcast %c-12_i32_163 : i32 to vector<1x32xi32>
    %637 = arith.cmpi sge, %0, %636 : vector<1x32xi32>
    %c4_i32_164 = arith.constant 4 : i32
    %638 = vector.broadcast %c4_i32_164 : i32 to vector<1x32xi32>
    %639 = arith.cmpi slt, %0, %638 : vector<1x32xi32>
    %640 = arith.andi %637, %639 : vector<1x32xi1>
    %cst_165 = arith.constant 0.000000e+00 : f32
    %641 = vector.shape_cast %640 : vector<1x32xi1> to vector<1x32xi1>
    %642 = vector.broadcast %641 : vector<1x32xi1> to vector<8x32xi1>
    %643 = vector.broadcast %cst_165 : f32 to vector<8x32xf32>
    %644 = arith.select %642, %635, %643 : vector<8x32xi1>, vector<8x32xf32>
    %645 = vector.extract_strided_slice %369 {offsets = [0, 32], sizes = [8, 32], strides = [1, 1]} : vector<8x70xf32> to vector<8x32xf32>
    %c-13_i32_166 = arith.constant -13 : i32
    %646 = vector.broadcast %c-13_i32_166 : i32 to vector<1x32xi32>
    %647 = arith.cmpi sge, %0, %646 : vector<1x32xi32>
    %c3_i32_167 = arith.constant 3 : i32
    %648 = vector.broadcast %c3_i32_167 : i32 to vector<1x32xi32>
    %649 = arith.cmpi slt, %0, %648 : vector<1x32xi32>
    %650 = arith.andi %647, %649 : vector<1x32xi1>
    %cst_168 = arith.constant 0.000000e+00 : f32
    %651 = vector.shape_cast %650 : vector<1x32xi1> to vector<1x32xi1>
    %652 = vector.broadcast %651 : vector<1x32xi1> to vector<8x32xi1>
    %653 = vector.broadcast %cst_168 : f32 to vector<8x32xf32>
    %654 = arith.select %652, %645, %653 : vector<8x32xi1>, vector<8x32xf32>
    %655 = vector.extract_strided_slice %369 {offsets = [0, 33], sizes = [8, 32], strides = [1, 1]} : vector<8x70xf32> to vector<8x32xf32>
    %c-14_i32_169 = arith.constant -14 : i32
    %656 = vector.broadcast %c-14_i32_169 : i32 to vector<1x32xi32>
    %657 = arith.cmpi sge, %0, %656 : vector<1x32xi32>
    %c2_i32_170 = arith.constant 2 : i32
    %658 = vector.broadcast %c2_i32_170 : i32 to vector<1x32xi32>
    %659 = arith.cmpi slt, %0, %658 : vector<1x32xi32>
    %660 = arith.andi %657, %659 : vector<1x32xi1>
    %cst_171 = arith.constant 0.000000e+00 : f32
    %661 = vector.shape_cast %660 : vector<1x32xi1> to vector<1x32xi1>
    %662 = vector.broadcast %661 : vector<1x32xi1> to vector<8x32xi1>
    %663 = vector.broadcast %cst_171 : f32 to vector<8x32xf32>
    %664 = arith.select %662, %655, %663 : vector<8x32xi1>, vector<8x32xf32>
    %665 = vector.extract_strided_slice %369 {offsets = [0, 34], sizes = [8, 32], strides = [1, 1]} : vector<8x70xf32> to vector<8x32xf32>
    %c-15_i32_172 = arith.constant -15 : i32
    %666 = vector.broadcast %c-15_i32_172 : i32 to vector<1x32xi32>
    %667 = arith.cmpi sge, %0, %666 : vector<1x32xi32>
    %c1_i32_173 = arith.constant 1 : i32
    %668 = vector.broadcast %c1_i32_173 : i32 to vector<1x32xi32>
    %669 = arith.cmpi slt, %0, %668 : vector<1x32xi32>
    %670 = arith.andi %667, %669 : vector<1x32xi1>
    %cst_174 = arith.constant 0.000000e+00 : f32
    %671 = vector.shape_cast %670 : vector<1x32xi1> to vector<1x32xi1>
    %672 = vector.broadcast %671 : vector<1x32xi1> to vector<8x32xi1>
    %673 = vector.broadcast %cst_174 : f32 to vector<8x32xf32>
    %674 = arith.select %672, %665, %673 : vector<8x32xi1>, vector<8x32xf32>
    %cst_175 = arith.constant 0.000000e+00 : f32
    %675 = vector.broadcast %cst_175 : f32 to vector<8x32xf32>
    %cst_176 = arith.constant 0.000000e+00 : f32
    %676 = vector.broadcast %cst_176 : f32 to vector<8x32xf32>
    %cst_177 = arith.constant 0.000000e+00 : f32
    %677 = vector.broadcast %cst_177 : f32 to vector<8x32xf32>
    %cst_178 = arith.constant 0.000000e+00 : f32
    %678 = vector.broadcast %cst_178 : f32 to vector<8x32xf32>
    %cst_179 = arith.constant 0xFF800000 : f32
    %679 = vector.broadcast %cst_179 : f32 to vector<32x1xf32>
    %680 = tpu.concatenate %679, %365, %679 in 1 : vector<32x1xf32>, vector<32x32xf32>, vector<32x1xf32> -> vector<32x34xf32>
    %c1_i32_180 = arith.constant 1 : i32
    %681 = vector.broadcast %c1_i32_180 : i32 to vector<1x32xi32>
    %682 = arith.cmpi sge, %0, %681 : vector<1x32xi32>
    %683 = vector.extract_strided_slice %680 {offsets = [0, 0], sizes = [32, 32], strides = [1, 1]} : vector<32x34xf32> to vector<32x32xf32>
    %cst_181 = arith.constant 0xFF800000 : f32
    %684 = vector.shape_cast %682 : vector<1x32xi1> to vector<1x32xi1>
    %685 = vector.broadcast %684 : vector<1x32xi1> to vector<32x32xi1>
    %686 = vector.broadcast %cst_181 : f32 to vector<32x32xf32>
    %687 = arith.select %685, %683, %686 : vector<32x32xi1>, vector<32x32xf32>
    %688 = vector.extract_strided_slice %680 {offsets = [0, 1], sizes = [32, 32], strides = [1, 1]} : vector<32x34xf32> to vector<32x32xf32>
    %c14_i32_182 = arith.constant 14 : i32
    %689 = vector.broadcast %c14_i32_182 : i32 to vector<1x32xi32>
    %690 = arith.cmpi sle, %0, %689 : vector<1x32xi32>
    %691 = vector.extract_strided_slice %680 {offsets = [0, 2], sizes = [32, 32], strides = [1, 1]} : vector<32x34xf32> to vector<32x32xf32>
    %cst_183 = arith.constant 0xFF800000 : f32
    %692 = vector.shape_cast %690 : vector<1x32xi1> to vector<1x32xi1>
    %693 = vector.broadcast %692 : vector<1x32xi1> to vector<32x32xi1>
    %694 = vector.broadcast %cst_183 : f32 to vector<32x32xf32>
    %695 = arith.select %693, %691, %694 : vector<32x32xi1>, vector<32x32xf32>
    %696 = arith.maximumf %687, %688 : vector<32x32xf32>
    %697 = arith.maximumf %696, %695 : vector<32x32xf32>
    %698 = tpu.concatenate %370, %371, %372, %373, %383, %393, %403, %413, %423, %433, %443, %453, %463, %473, %483, %493 in 0 : vector<8x32xf32>, vector<8x32xf32>, vector<8x32xf32>, vector<8x32xf32>, vector<8x32xf32>, vector<8x32xf32>, vector<8x32xf32>, vector<8x32xf32>, vector<8x32xf32>, vector<8x32xf32>, vector<8x32xf32>, vector<8x32xf32>, vector<8x32xf32>, vector<8x32xf32>, vector<8x32xf32>, vector<8x32xf32> -> vector<128x32xf32>
    %699 = tpu.concatenate %503, %513, %523, %524, %534, %544, %554, %564, %574, %584, %594, %604, %614, %624, %634, %644 in 0 : vector<8x32xf32>, vector<8x32xf32>, vector<8x32xf32>, vector<8x32xf32>, vector<8x32xf32>, vector<8x32xf32>, vector<8x32xf32>, vector<8x32xf32>, vector<8x32xf32>, vector<8x32xf32>, vector<8x32xf32>, vector<8x32xf32>, vector<8x32xf32>, vector<8x32xf32>, vector<8x32xf32>, vector<8x32xf32> -> vector<128x32xf32>
    %700 = tpu.concatenate %654, %664, %674, %675, %676, %677, %678, %697 in 0 : vector<8x32xf32>, vector<8x32xf32>, vector<8x32xf32>, vector<8x32xf32>, vector<8x32xf32>, vector<8x32xf32>, vector<8x32xf32>, vector<32x32xf32> -> vector<88x32xf32>
    %701 = tpu.concatenate %698, %699, %700 in 0 : vector<128x32xf32>, vector<128x32xf32>, vector<88x32xf32> -> vector<344x32xf32>
    %c0_184 = arith.constant 0 : index
    %c0_185 = arith.constant 0 : index
    %702 = vector.load %arg7[%c0_184, %c0_185] : memref<32x344xf32, #tpu.memory_space<vmem>>, vector<32x344xf32>
    %cst_186 = arith.constant dense<0.000000e+00> : vector<32x32xf32>
    %703 = tpu.matmul %702, %701, %cst_186 {dimension_numbers = #tpu.dot_dimension_numbers<[1], [0], [0], [1], [0, 0, 1, 1], [], []>} : vector<32x344xf32>, vector<344x32xf32>, vector<32x32xf32> -> vector<32x32xf32>
    %cst_187 = arith.constant dense<0.000000e+00> : vector<32xf32>
    %704 = vector.multi_reduction <add>, %703, %cst_187 [1] : vector<32x32xf32> to vector<32xf32>
    %705 = vector.shape_cast %704 : vector<32xf32> to vector<32x1xf32>
    %cst_188 = arith.constant 3.200000e+01 : f32
    %706 = vector.broadcast %cst_188 : f32 to vector<32x1xf32>
    %707 = arith.divf %705, %706 : vector<32x1xf32>
    %708 = vector.broadcast %707 : vector<32x1xf32> to vector<32x32xf32>
    %709 = arith.subf %703, %708 : vector<32x32xf32>
    %710 = arith.mulf %709, %709 : vector<32x32xf32>
    %cst_189 = arith.constant dense<0.000000e+00> : vector<32xf32>
    %711 = vector.multi_reduction <add>, %710, %cst_189 [1] : vector<32x32xf32> to vector<32xf32>
    %712 = vector.shape_cast %711 : vector<32xf32> to vector<32x1xf32>
    %cst_190 = arith.constant 3.200000e+01 : f32
    %713 = vector.broadcast %cst_190 : f32 to vector<32x1xf32>
    %714 = arith.divf %712, %713 : vector<32x1xf32>
    %715 = vector.broadcast %707 : vector<32x1xf32> to vector<32x32xf32>
    %716 = arith.subf %703, %715 : vector<32x32xf32>
    %cst_191 = arith.constant 9.99999974E-6 : f32
    %717 = vector.broadcast %cst_191 : f32 to vector<32x1xf32>
    %718 = arith.addf %714, %717 : vector<32x1xf32>
    %719 = math.rsqrt %718 : vector<32x1xf32>
    %720 = vector.broadcast %719 : vector<32x1xf32> to vector<32x32xf32>
    %721 = arith.mulf %716, %720 : vector<32x32xf32>
    %c0_192 = arith.constant 0 : index
    %c0_193 = arith.constant 0 : index
    %722 = vector.load %arg8[%c0_192, %c0_193] : memref<32x1xf32, #tpu.memory_space<vmem>>, vector<32x1xf32>
    %723 = vector.broadcast %722 : vector<32x1xf32> to vector<32x32xf32>
    %724 = arith.mulf %721, %723 : vector<32x32xf32>
    %c0_194 = arith.constant 0 : index
    %c0_195 = arith.constant 0 : index
    %725 = vector.load %arg9[%c0_194, %c0_195] : memref<32x1xf32, #tpu.memory_space<vmem>>, vector<32x1xf32>
    %726 = vector.broadcast %725 : vector<32x1xf32> to vector<32x32xf32>
    %727 = arith.addf %724, %726 : vector<32x32xf32>
    %cst_196 = arith.constant 0.000000e+00 : f32
    %728 = vector.broadcast %cst_196 : f32 to vector<32x32xf32>
    %729 = arith.maximumf %727, %728 : vector<32x32xf32>
    %c0_197 = arith.constant 0 : index
    %c0_198 = arith.constant 0 : index
    %730 = vector.load %arg10[%c0_197, %c0_198] : memref<8x32xf32, #tpu.memory_space<vmem>>, vector<8x32xf32>
    %cst_199 = arith.constant dense<0.000000e+00> : vector<8x32xf32>
    %731 = tpu.matmul %730, %729, %cst_199 {dimension_numbers = #tpu.dot_dimension_numbers<[1], [0], [0], [1], [0, 0, 1, 1], [], []>} : vector<8x32xf32>, vector<32x32xf32>, vector<8x32xf32> -> vector<8x32xf32>
    %cst_200 = arith.constant 0.000000e+00 : f32
    %732 = vector.broadcast %cst_200 : f32 to vector<8x19xf32>
    %733 = tpu.concatenate %732, %731, %732 in 1 : vector<8x19xf32>, vector<8x32xf32>, vector<8x19xf32> -> vector<8x70xf32>
    %cst_201 = arith.constant 0.000000e+00 : f32
    %734 = vector.broadcast %cst_201 : f32 to vector<8x32xf32>
    %cst_202 = arith.constant 0.000000e+00 : f32
    %735 = vector.broadcast %cst_202 : f32 to vector<8x32xf32>
    %cst_203 = arith.constant 0.000000e+00 : f32
    %736 = vector.broadcast %cst_203 : f32 to vector<8x32xf32>
    %cst_204 = arith.constant 0.000000e+00 : f32
    %737 = vector.broadcast %cst_204 : f32 to vector<8x32xf32>
    %738 = vector.extract_strided_slice %733 {offsets = [0, 4], sizes = [8, 32], strides = [1, 1]} : vector<8x70xf32> to vector<8x32xf32>
    %c15_i32_205 = arith.constant 15 : i32
    %739 = vector.broadcast %c15_i32_205 : i32 to vector<1x32xi32>
    %740 = arith.cmpi sge, %0, %739 : vector<1x32xi32>
    %c31_i32_206 = arith.constant 31 : i32
    %741 = vector.broadcast %c31_i32_206 : i32 to vector<1x32xi32>
    %742 = arith.cmpi slt, %0, %741 : vector<1x32xi32>
    %743 = arith.andi %740, %742 : vector<1x32xi1>
    %cst_207 = arith.constant 0.000000e+00 : f32
    %744 = vector.shape_cast %743 : vector<1x32xi1> to vector<1x32xi1>
    %745 = vector.broadcast %744 : vector<1x32xi1> to vector<8x32xi1>
    %746 = vector.broadcast %cst_207 : f32 to vector<8x32xf32>
    %747 = arith.select %745, %738, %746 : vector<8x32xi1>, vector<8x32xf32>
    %748 = vector.extract_strided_slice %733 {offsets = [0, 5], sizes = [8, 32], strides = [1, 1]} : vector<8x70xf32> to vector<8x32xf32>
    %c14_i32_208 = arith.constant 14 : i32
    %749 = vector.broadcast %c14_i32_208 : i32 to vector<1x32xi32>
    %750 = arith.cmpi sge, %0, %749 : vector<1x32xi32>
    %c30_i32_209 = arith.constant 30 : i32
    %751 = vector.broadcast %c30_i32_209 : i32 to vector<1x32xi32>
    %752 = arith.cmpi slt, %0, %751 : vector<1x32xi32>
    %753 = arith.andi %750, %752 : vector<1x32xi1>
    %cst_210 = arith.constant 0.000000e+00 : f32
    %754 = vector.shape_cast %753 : vector<1x32xi1> to vector<1x32xi1>
    %755 = vector.broadcast %754 : vector<1x32xi1> to vector<8x32xi1>
    %756 = vector.broadcast %cst_210 : f32 to vector<8x32xf32>
    %757 = arith.select %755, %748, %756 : vector<8x32xi1>, vector<8x32xf32>
    %758 = vector.extract_strided_slice %733 {offsets = [0, 6], sizes = [8, 32], strides = [1, 1]} : vector<8x70xf32> to vector<8x32xf32>
    %c13_i32_211 = arith.constant 13 : i32
    %759 = vector.broadcast %c13_i32_211 : i32 to vector<1x32xi32>
    %760 = arith.cmpi sge, %0, %759 : vector<1x32xi32>
    %c29_i32_212 = arith.constant 29 : i32
    %761 = vector.broadcast %c29_i32_212 : i32 to vector<1x32xi32>
    %762 = arith.cmpi slt, %0, %761 : vector<1x32xi32>
    %763 = arith.andi %760, %762 : vector<1x32xi1>
    %cst_213 = arith.constant 0.000000e+00 : f32
    %764 = vector.shape_cast %763 : vector<1x32xi1> to vector<1x32xi1>
    %765 = vector.broadcast %764 : vector<1x32xi1> to vector<8x32xi1>
    %766 = vector.broadcast %cst_213 : f32 to vector<8x32xf32>
    %767 = arith.select %765, %758, %766 : vector<8x32xi1>, vector<8x32xf32>
    %768 = vector.extract_strided_slice %733 {offsets = [0, 7], sizes = [8, 32], strides = [1, 1]} : vector<8x70xf32> to vector<8x32xf32>
    %c12_i32_214 = arith.constant 12 : i32
    %769 = vector.broadcast %c12_i32_214 : i32 to vector<1x32xi32>
    %770 = arith.cmpi sge, %0, %769 : vector<1x32xi32>
    %c28_i32_215 = arith.constant 28 : i32
    %771 = vector.broadcast %c28_i32_215 : i32 to vector<1x32xi32>
    %772 = arith.cmpi slt, %0, %771 : vector<1x32xi32>
    %773 = arith.andi %770, %772 : vector<1x32xi1>
    %cst_216 = arith.constant 0.000000e+00 : f32
    %774 = vector.shape_cast %773 : vector<1x32xi1> to vector<1x32xi1>
    %775 = vector.broadcast %774 : vector<1x32xi1> to vector<8x32xi1>
    %776 = vector.broadcast %cst_216 : f32 to vector<8x32xf32>
    %777 = arith.select %775, %768, %776 : vector<8x32xi1>, vector<8x32xf32>
    %778 = vector.extract_strided_slice %733 {offsets = [0, 8], sizes = [8, 32], strides = [1, 1]} : vector<8x70xf32> to vector<8x32xf32>
    %c11_i32_217 = arith.constant 11 : i32
    %779 = vector.broadcast %c11_i32_217 : i32 to vector<1x32xi32>
    %780 = arith.cmpi sge, %0, %779 : vector<1x32xi32>
    %c27_i32_218 = arith.constant 27 : i32
    %781 = vector.broadcast %c27_i32_218 : i32 to vector<1x32xi32>
    %782 = arith.cmpi slt, %0, %781 : vector<1x32xi32>
    %783 = arith.andi %780, %782 : vector<1x32xi1>
    %cst_219 = arith.constant 0.000000e+00 : f32
    %784 = vector.shape_cast %783 : vector<1x32xi1> to vector<1x32xi1>
    %785 = vector.broadcast %784 : vector<1x32xi1> to vector<8x32xi1>
    %786 = vector.broadcast %cst_219 : f32 to vector<8x32xf32>
    %787 = arith.select %785, %778, %786 : vector<8x32xi1>, vector<8x32xf32>
    %788 = vector.extract_strided_slice %733 {offsets = [0, 9], sizes = [8, 32], strides = [1, 1]} : vector<8x70xf32> to vector<8x32xf32>
    %c10_i32_220 = arith.constant 10 : i32
    %789 = vector.broadcast %c10_i32_220 : i32 to vector<1x32xi32>
    %790 = arith.cmpi sge, %0, %789 : vector<1x32xi32>
    %c26_i32_221 = arith.constant 26 : i32
    %791 = vector.broadcast %c26_i32_221 : i32 to vector<1x32xi32>
    %792 = arith.cmpi slt, %0, %791 : vector<1x32xi32>
    %793 = arith.andi %790, %792 : vector<1x32xi1>
    %cst_222 = arith.constant 0.000000e+00 : f32
    %794 = vector.shape_cast %793 : vector<1x32xi1> to vector<1x32xi1>
    %795 = vector.broadcast %794 : vector<1x32xi1> to vector<8x32xi1>
    %796 = vector.broadcast %cst_222 : f32 to vector<8x32xf32>
    %797 = arith.select %795, %788, %796 : vector<8x32xi1>, vector<8x32xf32>
    %798 = vector.extract_strided_slice %733 {offsets = [0, 10], sizes = [8, 32], strides = [1, 1]} : vector<8x70xf32> to vector<8x32xf32>
    %c9_i32_223 = arith.constant 9 : i32
    %799 = vector.broadcast %c9_i32_223 : i32 to vector<1x32xi32>
    %800 = arith.cmpi sge, %0, %799 : vector<1x32xi32>
    %c25_i32_224 = arith.constant 25 : i32
    %801 = vector.broadcast %c25_i32_224 : i32 to vector<1x32xi32>
    %802 = arith.cmpi slt, %0, %801 : vector<1x32xi32>
    %803 = arith.andi %800, %802 : vector<1x32xi1>
    %cst_225 = arith.constant 0.000000e+00 : f32
    %804 = vector.shape_cast %803 : vector<1x32xi1> to vector<1x32xi1>
    %805 = vector.broadcast %804 : vector<1x32xi1> to vector<8x32xi1>
    %806 = vector.broadcast %cst_225 : f32 to vector<8x32xf32>
    %807 = arith.select %805, %798, %806 : vector<8x32xi1>, vector<8x32xf32>
    %808 = vector.extract_strided_slice %733 {offsets = [0, 11], sizes = [8, 32], strides = [1, 1]} : vector<8x70xf32> to vector<8x32xf32>
    %c8_i32_226 = arith.constant 8 : i32
    %809 = vector.broadcast %c8_i32_226 : i32 to vector<1x32xi32>
    %810 = arith.cmpi sge, %0, %809 : vector<1x32xi32>
    %c24_i32_227 = arith.constant 24 : i32
    %811 = vector.broadcast %c24_i32_227 : i32 to vector<1x32xi32>
    %812 = arith.cmpi slt, %0, %811 : vector<1x32xi32>
    %813 = arith.andi %810, %812 : vector<1x32xi1>
    %cst_228 = arith.constant 0.000000e+00 : f32
    %814 = vector.shape_cast %813 : vector<1x32xi1> to vector<1x32xi1>
    %815 = vector.broadcast %814 : vector<1x32xi1> to vector<8x32xi1>
    %816 = vector.broadcast %cst_228 : f32 to vector<8x32xf32>
    %817 = arith.select %815, %808, %816 : vector<8x32xi1>, vector<8x32xf32>
    %818 = vector.extract_strided_slice %733 {offsets = [0, 12], sizes = [8, 32], strides = [1, 1]} : vector<8x70xf32> to vector<8x32xf32>
    %c7_i32_229 = arith.constant 7 : i32
    %819 = vector.broadcast %c7_i32_229 : i32 to vector<1x32xi32>
    %820 = arith.cmpi sge, %0, %819 : vector<1x32xi32>
    %c23_i32_230 = arith.constant 23 : i32
    %821 = vector.broadcast %c23_i32_230 : i32 to vector<1x32xi32>
    %822 = arith.cmpi slt, %0, %821 : vector<1x32xi32>
    %823 = arith.andi %820, %822 : vector<1x32xi1>
    %cst_231 = arith.constant 0.000000e+00 : f32
    %824 = vector.shape_cast %823 : vector<1x32xi1> to vector<1x32xi1>
    %825 = vector.broadcast %824 : vector<1x32xi1> to vector<8x32xi1>
    %826 = vector.broadcast %cst_231 : f32 to vector<8x32xf32>
    %827 = arith.select %825, %818, %826 : vector<8x32xi1>, vector<8x32xf32>
    %828 = vector.extract_strided_slice %733 {offsets = [0, 13], sizes = [8, 32], strides = [1, 1]} : vector<8x70xf32> to vector<8x32xf32>
    %c6_i32_232 = arith.constant 6 : i32
    %829 = vector.broadcast %c6_i32_232 : i32 to vector<1x32xi32>
    %830 = arith.cmpi sge, %0, %829 : vector<1x32xi32>
    %c22_i32_233 = arith.constant 22 : i32
    %831 = vector.broadcast %c22_i32_233 : i32 to vector<1x32xi32>
    %832 = arith.cmpi slt, %0, %831 : vector<1x32xi32>
    %833 = arith.andi %830, %832 : vector<1x32xi1>
    %cst_234 = arith.constant 0.000000e+00 : f32
    %834 = vector.shape_cast %833 : vector<1x32xi1> to vector<1x32xi1>
    %835 = vector.broadcast %834 : vector<1x32xi1> to vector<8x32xi1>
    %836 = vector.broadcast %cst_234 : f32 to vector<8x32xf32>
    %837 = arith.select %835, %828, %836 : vector<8x32xi1>, vector<8x32xf32>
    %838 = vector.extract_strided_slice %733 {offsets = [0, 14], sizes = [8, 32], strides = [1, 1]} : vector<8x70xf32> to vector<8x32xf32>
    %c5_i32_235 = arith.constant 5 : i32
    %839 = vector.broadcast %c5_i32_235 : i32 to vector<1x32xi32>
    %840 = arith.cmpi sge, %0, %839 : vector<1x32xi32>
    %c21_i32_236 = arith.constant 21 : i32
    %841 = vector.broadcast %c21_i32_236 : i32 to vector<1x32xi32>
    %842 = arith.cmpi slt, %0, %841 : vector<1x32xi32>
    %843 = arith.andi %840, %842 : vector<1x32xi1>
    %cst_237 = arith.constant 0.000000e+00 : f32
    %844 = vector.shape_cast %843 : vector<1x32xi1> to vector<1x32xi1>
    %845 = vector.broadcast %844 : vector<1x32xi1> to vector<8x32xi1>
    %846 = vector.broadcast %cst_237 : f32 to vector<8x32xf32>
    %847 = arith.select %845, %838, %846 : vector<8x32xi1>, vector<8x32xf32>
    %848 = vector.extract_strided_slice %733 {offsets = [0, 15], sizes = [8, 32], strides = [1, 1]} : vector<8x70xf32> to vector<8x32xf32>
    %c4_i32_238 = arith.constant 4 : i32
    %849 = vector.broadcast %c4_i32_238 : i32 to vector<1x32xi32>
    %850 = arith.cmpi sge, %0, %849 : vector<1x32xi32>
    %c20_i32_239 = arith.constant 20 : i32
    %851 = vector.broadcast %c20_i32_239 : i32 to vector<1x32xi32>
    %852 = arith.cmpi slt, %0, %851 : vector<1x32xi32>
    %853 = arith.andi %850, %852 : vector<1x32xi1>
    %cst_240 = arith.constant 0.000000e+00 : f32
    %854 = vector.shape_cast %853 : vector<1x32xi1> to vector<1x32xi1>
    %855 = vector.broadcast %854 : vector<1x32xi1> to vector<8x32xi1>
    %856 = vector.broadcast %cst_240 : f32 to vector<8x32xf32>
    %857 = arith.select %855, %848, %856 : vector<8x32xi1>, vector<8x32xf32>
    %858 = vector.extract_strided_slice %733 {offsets = [0, 16], sizes = [8, 32], strides = [1, 1]} : vector<8x70xf32> to vector<8x32xf32>
    %c3_i32_241 = arith.constant 3 : i32
    %859 = vector.broadcast %c3_i32_241 : i32 to vector<1x32xi32>
    %860 = arith.cmpi sge, %0, %859 : vector<1x32xi32>
    %c19_i32_242 = arith.constant 19 : i32
    %861 = vector.broadcast %c19_i32_242 : i32 to vector<1x32xi32>
    %862 = arith.cmpi slt, %0, %861 : vector<1x32xi32>
    %863 = arith.andi %860, %862 : vector<1x32xi1>
    %cst_243 = arith.constant 0.000000e+00 : f32
    %864 = vector.shape_cast %863 : vector<1x32xi1> to vector<1x32xi1>
    %865 = vector.broadcast %864 : vector<1x32xi1> to vector<8x32xi1>
    %866 = vector.broadcast %cst_243 : f32 to vector<8x32xf32>
    %867 = arith.select %865, %858, %866 : vector<8x32xi1>, vector<8x32xf32>
    %868 = vector.extract_strided_slice %733 {offsets = [0, 17], sizes = [8, 32], strides = [1, 1]} : vector<8x70xf32> to vector<8x32xf32>
    %c2_i32_244 = arith.constant 2 : i32
    %869 = vector.broadcast %c2_i32_244 : i32 to vector<1x32xi32>
    %870 = arith.cmpi sge, %0, %869 : vector<1x32xi32>
    %c18_i32_245 = arith.constant 18 : i32
    %871 = vector.broadcast %c18_i32_245 : i32 to vector<1x32xi32>
    %872 = arith.cmpi slt, %0, %871 : vector<1x32xi32>
    %873 = arith.andi %870, %872 : vector<1x32xi1>
    %cst_246 = arith.constant 0.000000e+00 : f32
    %874 = vector.shape_cast %873 : vector<1x32xi1> to vector<1x32xi1>
    %875 = vector.broadcast %874 : vector<1x32xi1> to vector<8x32xi1>
    %876 = vector.broadcast %cst_246 : f32 to vector<8x32xf32>
    %877 = arith.select %875, %868, %876 : vector<8x32xi1>, vector<8x32xf32>
    %878 = vector.extract_strided_slice %733 {offsets = [0, 18], sizes = [8, 32], strides = [1, 1]} : vector<8x70xf32> to vector<8x32xf32>
    %c1_i32_247 = arith.constant 1 : i32
    %879 = vector.broadcast %c1_i32_247 : i32 to vector<1x32xi32>
    %880 = arith.cmpi sge, %0, %879 : vector<1x32xi32>
    %c17_i32_248 = arith.constant 17 : i32
    %881 = vector.broadcast %c17_i32_248 : i32 to vector<1x32xi32>
    %882 = arith.cmpi slt, %0, %881 : vector<1x32xi32>
    %883 = arith.andi %880, %882 : vector<1x32xi1>
    %cst_249 = arith.constant 0.000000e+00 : f32
    %884 = vector.shape_cast %883 : vector<1x32xi1> to vector<1x32xi1>
    %885 = vector.broadcast %884 : vector<1x32xi1> to vector<8x32xi1>
    %886 = vector.broadcast %cst_249 : f32 to vector<8x32xf32>
    %887 = arith.select %885, %878, %886 : vector<8x32xi1>, vector<8x32xf32>
    %888 = vector.extract_strided_slice %733 {offsets = [0, 19], sizes = [8, 32], strides = [1, 1]} : vector<8x70xf32> to vector<8x32xf32>
    %889 = vector.extract_strided_slice %733 {offsets = [0, 20], sizes = [8, 32], strides = [1, 1]} : vector<8x70xf32> to vector<8x32xf32>
    %c-1_i32_250 = arith.constant -1 : i32
    %890 = vector.broadcast %c-1_i32_250 : i32 to vector<1x32xi32>
    %891 = arith.cmpi sge, %0, %890 : vector<1x32xi32>
    %c15_i32_251 = arith.constant 15 : i32
    %892 = vector.broadcast %c15_i32_251 : i32 to vector<1x32xi32>
    %893 = arith.cmpi slt, %0, %892 : vector<1x32xi32>
    %894 = arith.andi %891, %893 : vector<1x32xi1>
    %cst_252 = arith.constant 0.000000e+00 : f32
    %895 = vector.shape_cast %894 : vector<1x32xi1> to vector<1x32xi1>
    %896 = vector.broadcast %895 : vector<1x32xi1> to vector<8x32xi1>
    %897 = vector.broadcast %cst_252 : f32 to vector<8x32xf32>
    %898 = arith.select %896, %889, %897 : vector<8x32xi1>, vector<8x32xf32>
    %899 = vector.extract_strided_slice %733 {offsets = [0, 21], sizes = [8, 32], strides = [1, 1]} : vector<8x70xf32> to vector<8x32xf32>
    %c-2_i32_253 = arith.constant -2 : i32
    %900 = vector.broadcast %c-2_i32_253 : i32 to vector<1x32xi32>
    %901 = arith.cmpi sge, %0, %900 : vector<1x32xi32>
    %c14_i32_254 = arith.constant 14 : i32
    %902 = vector.broadcast %c14_i32_254 : i32 to vector<1x32xi32>
    %903 = arith.cmpi slt, %0, %902 : vector<1x32xi32>
    %904 = arith.andi %901, %903 : vector<1x32xi1>
    %cst_255 = arith.constant 0.000000e+00 : f32
    %905 = vector.shape_cast %904 : vector<1x32xi1> to vector<1x32xi1>
    %906 = vector.broadcast %905 : vector<1x32xi1> to vector<8x32xi1>
    %907 = vector.broadcast %cst_255 : f32 to vector<8x32xf32>
    %908 = arith.select %906, %899, %907 : vector<8x32xi1>, vector<8x32xf32>
    %909 = vector.extract_strided_slice %733 {offsets = [0, 22], sizes = [8, 32], strides = [1, 1]} : vector<8x70xf32> to vector<8x32xf32>
    %c-3_i32_256 = arith.constant -3 : i32
    %910 = vector.broadcast %c-3_i32_256 : i32 to vector<1x32xi32>
    %911 = arith.cmpi sge, %0, %910 : vector<1x32xi32>
    %c13_i32_257 = arith.constant 13 : i32
    %912 = vector.broadcast %c13_i32_257 : i32 to vector<1x32xi32>
    %913 = arith.cmpi slt, %0, %912 : vector<1x32xi32>
    %914 = arith.andi %911, %913 : vector<1x32xi1>
    %cst_258 = arith.constant 0.000000e+00 : f32
    %915 = vector.shape_cast %914 : vector<1x32xi1> to vector<1x32xi1>
    %916 = vector.broadcast %915 : vector<1x32xi1> to vector<8x32xi1>
    %917 = vector.broadcast %cst_258 : f32 to vector<8x32xf32>
    %918 = arith.select %916, %909, %917 : vector<8x32xi1>, vector<8x32xf32>
    %919 = vector.extract_strided_slice %733 {offsets = [0, 23], sizes = [8, 32], strides = [1, 1]} : vector<8x70xf32> to vector<8x32xf32>
    %c-4_i32_259 = arith.constant -4 : i32
    %920 = vector.broadcast %c-4_i32_259 : i32 to vector<1x32xi32>
    %921 = arith.cmpi sge, %0, %920 : vector<1x32xi32>
    %c12_i32_260 = arith.constant 12 : i32
    %922 = vector.broadcast %c12_i32_260 : i32 to vector<1x32xi32>
    %923 = arith.cmpi slt, %0, %922 : vector<1x32xi32>
    %924 = arith.andi %921, %923 : vector<1x32xi1>
    %cst_261 = arith.constant 0.000000e+00 : f32
    %925 = vector.shape_cast %924 : vector<1x32xi1> to vector<1x32xi1>
    %926 = vector.broadcast %925 : vector<1x32xi1> to vector<8x32xi1>
    %927 = vector.broadcast %cst_261 : f32 to vector<8x32xf32>
    %928 = arith.select %926, %919, %927 : vector<8x32xi1>, vector<8x32xf32>
    %929 = vector.extract_strided_slice %733 {offsets = [0, 24], sizes = [8, 32], strides = [1, 1]} : vector<8x70xf32> to vector<8x32xf32>
    %c-5_i32_262 = arith.constant -5 : i32
    %930 = vector.broadcast %c-5_i32_262 : i32 to vector<1x32xi32>
    %931 = arith.cmpi sge, %0, %930 : vector<1x32xi32>
    %c11_i32_263 = arith.constant 11 : i32
    %932 = vector.broadcast %c11_i32_263 : i32 to vector<1x32xi32>
    %933 = arith.cmpi slt, %0, %932 : vector<1x32xi32>
    %934 = arith.andi %931, %933 : vector<1x32xi1>
    %cst_264 = arith.constant 0.000000e+00 : f32
    %935 = vector.shape_cast %934 : vector<1x32xi1> to vector<1x32xi1>
    %936 = vector.broadcast %935 : vector<1x32xi1> to vector<8x32xi1>
    %937 = vector.broadcast %cst_264 : f32 to vector<8x32xf32>
    %938 = arith.select %936, %929, %937 : vector<8x32xi1>, vector<8x32xf32>
    %939 = vector.extract_strided_slice %733 {offsets = [0, 25], sizes = [8, 32], strides = [1, 1]} : vector<8x70xf32> to vector<8x32xf32>
    %c-6_i32_265 = arith.constant -6 : i32
    %940 = vector.broadcast %c-6_i32_265 : i32 to vector<1x32xi32>
    %941 = arith.cmpi sge, %0, %940 : vector<1x32xi32>
    %c10_i32_266 = arith.constant 10 : i32
    %942 = vector.broadcast %c10_i32_266 : i32 to vector<1x32xi32>
    %943 = arith.cmpi slt, %0, %942 : vector<1x32xi32>
    %944 = arith.andi %941, %943 : vector<1x32xi1>
    %cst_267 = arith.constant 0.000000e+00 : f32
    %945 = vector.shape_cast %944 : vector<1x32xi1> to vector<1x32xi1>
    %946 = vector.broadcast %945 : vector<1x32xi1> to vector<8x32xi1>
    %947 = vector.broadcast %cst_267 : f32 to vector<8x32xf32>
    %948 = arith.select %946, %939, %947 : vector<8x32xi1>, vector<8x32xf32>
    %949 = vector.extract_strided_slice %733 {offsets = [0, 26], sizes = [8, 32], strides = [1, 1]} : vector<8x70xf32> to vector<8x32xf32>
    %c-7_i32_268 = arith.constant -7 : i32
    %950 = vector.broadcast %c-7_i32_268 : i32 to vector<1x32xi32>
    %951 = arith.cmpi sge, %0, %950 : vector<1x32xi32>
    %c9_i32_269 = arith.constant 9 : i32
    %952 = vector.broadcast %c9_i32_269 : i32 to vector<1x32xi32>
    %953 = arith.cmpi slt, %0, %952 : vector<1x32xi32>
    %954 = arith.andi %951, %953 : vector<1x32xi1>
    %cst_270 = arith.constant 0.000000e+00 : f32
    %955 = vector.shape_cast %954 : vector<1x32xi1> to vector<1x32xi1>
    %956 = vector.broadcast %955 : vector<1x32xi1> to vector<8x32xi1>
    %957 = vector.broadcast %cst_270 : f32 to vector<8x32xf32>
    %958 = arith.select %956, %949, %957 : vector<8x32xi1>, vector<8x32xf32>
    %959 = vector.extract_strided_slice %733 {offsets = [0, 27], sizes = [8, 32], strides = [1, 1]} : vector<8x70xf32> to vector<8x32xf32>
    %c-8_i32_271 = arith.constant -8 : i32
    %960 = vector.broadcast %c-8_i32_271 : i32 to vector<1x32xi32>
    %961 = arith.cmpi sge, %0, %960 : vector<1x32xi32>
    %c8_i32_272 = arith.constant 8 : i32
    %962 = vector.broadcast %c8_i32_272 : i32 to vector<1x32xi32>
    %963 = arith.cmpi slt, %0, %962 : vector<1x32xi32>
    %964 = arith.andi %961, %963 : vector<1x32xi1>
    %cst_273 = arith.constant 0.000000e+00 : f32
    %965 = vector.shape_cast %964 : vector<1x32xi1> to vector<1x32xi1>
    %966 = vector.broadcast %965 : vector<1x32xi1> to vector<8x32xi1>
    %967 = vector.broadcast %cst_273 : f32 to vector<8x32xf32>
    %968 = arith.select %966, %959, %967 : vector<8x32xi1>, vector<8x32xf32>
    %969 = vector.extract_strided_slice %733 {offsets = [0, 28], sizes = [8, 32], strides = [1, 1]} : vector<8x70xf32> to vector<8x32xf32>
    %c-9_i32_274 = arith.constant -9 : i32
    %970 = vector.broadcast %c-9_i32_274 : i32 to vector<1x32xi32>
    %971 = arith.cmpi sge, %0, %970 : vector<1x32xi32>
    %c7_i32_275 = arith.constant 7 : i32
    %972 = vector.broadcast %c7_i32_275 : i32 to vector<1x32xi32>
    %973 = arith.cmpi slt, %0, %972 : vector<1x32xi32>
    %974 = arith.andi %971, %973 : vector<1x32xi1>
    %cst_276 = arith.constant 0.000000e+00 : f32
    %975 = vector.shape_cast %974 : vector<1x32xi1> to vector<1x32xi1>
    %976 = vector.broadcast %975 : vector<1x32xi1> to vector<8x32xi1>
    %977 = vector.broadcast %cst_276 : f32 to vector<8x32xf32>
    %978 = arith.select %976, %969, %977 : vector<8x32xi1>, vector<8x32xf32>
    %979 = vector.extract_strided_slice %733 {offsets = [0, 29], sizes = [8, 32], strides = [1, 1]} : vector<8x70xf32> to vector<8x32xf32>
    %c-10_i32_277 = arith.constant -10 : i32
    %980 = vector.broadcast %c-10_i32_277 : i32 to vector<1x32xi32>
    %981 = arith.cmpi sge, %0, %980 : vector<1x32xi32>
    %c6_i32_278 = arith.constant 6 : i32
    %982 = vector.broadcast %c6_i32_278 : i32 to vector<1x32xi32>
    %983 = arith.cmpi slt, %0, %982 : vector<1x32xi32>
    %984 = arith.andi %981, %983 : vector<1x32xi1>
    %cst_279 = arith.constant 0.000000e+00 : f32
    %985 = vector.shape_cast %984 : vector<1x32xi1> to vector<1x32xi1>
    %986 = vector.broadcast %985 : vector<1x32xi1> to vector<8x32xi1>
    %987 = vector.broadcast %cst_279 : f32 to vector<8x32xf32>
    %988 = arith.select %986, %979, %987 : vector<8x32xi1>, vector<8x32xf32>
    %989 = vector.extract_strided_slice %733 {offsets = [0, 30], sizes = [8, 32], strides = [1, 1]} : vector<8x70xf32> to vector<8x32xf32>
    %c-11_i32_280 = arith.constant -11 : i32
    %990 = vector.broadcast %c-11_i32_280 : i32 to vector<1x32xi32>
    %991 = arith.cmpi sge, %0, %990 : vector<1x32xi32>
    %c5_i32_281 = arith.constant 5 : i32
    %992 = vector.broadcast %c5_i32_281 : i32 to vector<1x32xi32>
    %993 = arith.cmpi slt, %0, %992 : vector<1x32xi32>
    %994 = arith.andi %991, %993 : vector<1x32xi1>
    %cst_282 = arith.constant 0.000000e+00 : f32
    %995 = vector.shape_cast %994 : vector<1x32xi1> to vector<1x32xi1>
    %996 = vector.broadcast %995 : vector<1x32xi1> to vector<8x32xi1>
    %997 = vector.broadcast %cst_282 : f32 to vector<8x32xf32>
    %998 = arith.select %996, %989, %997 : vector<8x32xi1>, vector<8x32xf32>
    %999 = vector.extract_strided_slice %733 {offsets = [0, 31], sizes = [8, 32], strides = [1, 1]} : vector<8x70xf32> to vector<8x32xf32>
    %c-12_i32_283 = arith.constant -12 : i32
    %1000 = vector.broadcast %c-12_i32_283 : i32 to vector<1x32xi32>
    %1001 = arith.cmpi sge, %0, %1000 : vector<1x32xi32>
    %c4_i32_284 = arith.constant 4 : i32
    %1002 = vector.broadcast %c4_i32_284 : i32 to vector<1x32xi32>
    %1003 = arith.cmpi slt, %0, %1002 : vector<1x32xi32>
    %1004 = arith.andi %1001, %1003 : vector<1x32xi1>
    %cst_285 = arith.constant 0.000000e+00 : f32
    %1005 = vector.shape_cast %1004 : vector<1x32xi1> to vector<1x32xi1>
    %1006 = vector.broadcast %1005 : vector<1x32xi1> to vector<8x32xi1>
    %1007 = vector.broadcast %cst_285 : f32 to vector<8x32xf32>
    %1008 = arith.select %1006, %999, %1007 : vector<8x32xi1>, vector<8x32xf32>
    %1009 = vector.extract_strided_slice %733 {offsets = [0, 32], sizes = [8, 32], strides = [1, 1]} : vector<8x70xf32> to vector<8x32xf32>
    %c-13_i32_286 = arith.constant -13 : i32
    %1010 = vector.broadcast %c-13_i32_286 : i32 to vector<1x32xi32>
    %1011 = arith.cmpi sge, %0, %1010 : vector<1x32xi32>
    %c3_i32_287 = arith.constant 3 : i32
    %1012 = vector.broadcast %c3_i32_287 : i32 to vector<1x32xi32>
    %1013 = arith.cmpi slt, %0, %1012 : vector<1x32xi32>
    %1014 = arith.andi %1011, %1013 : vector<1x32xi1>
    %cst_288 = arith.constant 0.000000e+00 : f32
    %1015 = vector.shape_cast %1014 : vector<1x32xi1> to vector<1x32xi1>
    %1016 = vector.broadcast %1015 : vector<1x32xi1> to vector<8x32xi1>
    %1017 = vector.broadcast %cst_288 : f32 to vector<8x32xf32>
    %1018 = arith.select %1016, %1009, %1017 : vector<8x32xi1>, vector<8x32xf32>
    %1019 = vector.extract_strided_slice %733 {offsets = [0, 33], sizes = [8, 32], strides = [1, 1]} : vector<8x70xf32> to vector<8x32xf32>
    %c-14_i32_289 = arith.constant -14 : i32
    %1020 = vector.broadcast %c-14_i32_289 : i32 to vector<1x32xi32>
    %1021 = arith.cmpi sge, %0, %1020 : vector<1x32xi32>
    %c2_i32_290 = arith.constant 2 : i32
    %1022 = vector.broadcast %c2_i32_290 : i32 to vector<1x32xi32>
    %1023 = arith.cmpi slt, %0, %1022 : vector<1x32xi32>
    %1024 = arith.andi %1021, %1023 : vector<1x32xi1>
    %cst_291 = arith.constant 0.000000e+00 : f32
    %1025 = vector.shape_cast %1024 : vector<1x32xi1> to vector<1x32xi1>
    %1026 = vector.broadcast %1025 : vector<1x32xi1> to vector<8x32xi1>
    %1027 = vector.broadcast %cst_291 : f32 to vector<8x32xf32>
    %1028 = arith.select %1026, %1019, %1027 : vector<8x32xi1>, vector<8x32xf32>
    %1029 = vector.extract_strided_slice %733 {offsets = [0, 34], sizes = [8, 32], strides = [1, 1]} : vector<8x70xf32> to vector<8x32xf32>
    %c-15_i32_292 = arith.constant -15 : i32
    %1030 = vector.broadcast %c-15_i32_292 : i32 to vector<1x32xi32>
    %1031 = arith.cmpi sge, %0, %1030 : vector<1x32xi32>
    %c1_i32_293 = arith.constant 1 : i32
    %1032 = vector.broadcast %c1_i32_293 : i32 to vector<1x32xi32>
    %1033 = arith.cmpi slt, %0, %1032 : vector<1x32xi32>
    %1034 = arith.andi %1031, %1033 : vector<1x32xi1>
    %cst_294 = arith.constant 0.000000e+00 : f32
    %1035 = vector.shape_cast %1034 : vector<1x32xi1> to vector<1x32xi1>
    %1036 = vector.broadcast %1035 : vector<1x32xi1> to vector<8x32xi1>
    %1037 = vector.broadcast %cst_294 : f32 to vector<8x32xf32>
    %1038 = arith.select %1036, %1029, %1037 : vector<8x32xi1>, vector<8x32xf32>
    %cst_295 = arith.constant 0.000000e+00 : f32
    %1039 = vector.broadcast %cst_295 : f32 to vector<8x32xf32>
    %cst_296 = arith.constant 0.000000e+00 : f32
    %1040 = vector.broadcast %cst_296 : f32 to vector<8x32xf32>
    %cst_297 = arith.constant 0.000000e+00 : f32
    %1041 = vector.broadcast %cst_297 : f32 to vector<8x32xf32>
    %cst_298 = arith.constant 0.000000e+00 : f32
    %1042 = vector.broadcast %cst_298 : f32 to vector<8x32xf32>
    %cst_299 = arith.constant 0xFF800000 : f32
    %1043 = vector.broadcast %cst_299 : f32 to vector<32x1xf32>
    %1044 = tpu.concatenate %1043, %729, %1043 in 1 : vector<32x1xf32>, vector<32x32xf32>, vector<32x1xf32> -> vector<32x34xf32>
    %c1_i32_300 = arith.constant 1 : i32
    %1045 = vector.broadcast %c1_i32_300 : i32 to vector<1x32xi32>
    %1046 = arith.cmpi sge, %0, %1045 : vector<1x32xi32>
    %1047 = vector.extract_strided_slice %1044 {offsets = [0, 0], sizes = [32, 32], strides = [1, 1]} : vector<32x34xf32> to vector<32x32xf32>
    %cst_301 = arith.constant 0xFF800000 : f32
    %1048 = vector.shape_cast %1046 : vector<1x32xi1> to vector<1x32xi1>
    %1049 = vector.broadcast %1048 : vector<1x32xi1> to vector<32x32xi1>
    %1050 = vector.broadcast %cst_301 : f32 to vector<32x32xf32>
    %1051 = arith.select %1049, %1047, %1050 : vector<32x32xi1>, vector<32x32xf32>
    %1052 = vector.extract_strided_slice %1044 {offsets = [0, 1], sizes = [32, 32], strides = [1, 1]} : vector<32x34xf32> to vector<32x32xf32>
    %c14_i32_302 = arith.constant 14 : i32
    %1053 = vector.broadcast %c14_i32_302 : i32 to vector<1x32xi32>
    %1054 = arith.cmpi sle, %0, %1053 : vector<1x32xi32>
    %1055 = vector.extract_strided_slice %1044 {offsets = [0, 2], sizes = [32, 32], strides = [1, 1]} : vector<32x34xf32> to vector<32x32xf32>
    %cst_303 = arith.constant 0xFF800000 : f32
    %1056 = vector.shape_cast %1054 : vector<1x32xi1> to vector<1x32xi1>
    %1057 = vector.broadcast %1056 : vector<1x32xi1> to vector<32x32xi1>
    %1058 = vector.broadcast %cst_303 : f32 to vector<32x32xf32>
    %1059 = arith.select %1057, %1055, %1058 : vector<32x32xi1>, vector<32x32xf32>
    %1060 = arith.maximumf %1051, %1052 : vector<32x32xf32>
    %1061 = arith.maximumf %1060, %1059 : vector<32x32xf32>
    %1062 = tpu.concatenate %734, %735, %736, %737, %747, %757, %767, %777, %787, %797, %807, %817, %827, %837, %847, %857 in 0 : vector<8x32xf32>, vector<8x32xf32>, vector<8x32xf32>, vector<8x32xf32>, vector<8x32xf32>, vector<8x32xf32>, vector<8x32xf32>, vector<8x32xf32>, vector<8x32xf32>, vector<8x32xf32>, vector<8x32xf32>, vector<8x32xf32>, vector<8x32xf32>, vector<8x32xf32>, vector<8x32xf32>, vector<8x32xf32> -> vector<128x32xf32>
    %1063 = tpu.concatenate %867, %877, %887, %888, %898, %908, %918, %928, %938, %948, %958, %968, %978, %988, %998, %1008 in 0 : vector<8x32xf32>, vector<8x32xf32>, vector<8x32xf32>, vector<8x32xf32>, vector<8x32xf32>, vector<8x32xf32>, vector<8x32xf32>, vector<8x32xf32>, vector<8x32xf32>, vector<8x32xf32>, vector<8x32xf32>, vector<8x32xf32>, vector<8x32xf32>, vector<8x32xf32>, vector<8x32xf32>, vector<8x32xf32> -> vector<128x32xf32>
    %1064 = tpu.concatenate %1018, %1028, %1038, %1039, %1040, %1041, %1042, %1061 in 0 : vector<8x32xf32>, vector<8x32xf32>, vector<8x32xf32>, vector<8x32xf32>, vector<8x32xf32>, vector<8x32xf32>, vector<8x32xf32>, vector<32x32xf32> -> vector<88x32xf32>
    %1065 = tpu.concatenate %1062, %1063, %1064 in 0 : vector<128x32xf32>, vector<128x32xf32>, vector<88x32xf32> -> vector<344x32xf32>
    %c0_304 = arith.constant 0 : index
    %c0_305 = arith.constant 0 : index
    %1066 = vector.load %arg11[%c0_304, %c0_305] : memref<32x344xf32, #tpu.memory_space<vmem>>, vector<32x344xf32>
    %cst_306 = arith.constant dense<0.000000e+00> : vector<32x32xf32>
    %1067 = tpu.matmul %1066, %1065, %cst_306 {dimension_numbers = #tpu.dot_dimension_numbers<[1], [0], [0], [1], [0, 0, 1, 1], [], []>} : vector<32x344xf32>, vector<344x32xf32>, vector<32x32xf32> -> vector<32x32xf32>
    %cst_307 = arith.constant dense<0.000000e+00> : vector<32xf32>
    %1068 = vector.multi_reduction <add>, %1067, %cst_307 [1] : vector<32x32xf32> to vector<32xf32>
    %1069 = vector.shape_cast %1068 : vector<32xf32> to vector<32x1xf32>
    %cst_308 = arith.constant 3.200000e+01 : f32
    %1070 = vector.broadcast %cst_308 : f32 to vector<32x1xf32>
    %1071 = arith.divf %1069, %1070 : vector<32x1xf32>
    %1072 = vector.broadcast %1071 : vector<32x1xf32> to vector<32x32xf32>
    %1073 = arith.subf %1067, %1072 : vector<32x32xf32>
    %1074 = arith.mulf %1073, %1073 : vector<32x32xf32>
    %cst_309 = arith.constant dense<0.000000e+00> : vector<32xf32>
    %1075 = vector.multi_reduction <add>, %1074, %cst_309 [1] : vector<32x32xf32> to vector<32xf32>
    %1076 = vector.shape_cast %1075 : vector<32xf32> to vector<32x1xf32>
    %cst_310 = arith.constant 3.200000e+01 : f32
    %1077 = vector.broadcast %cst_310 : f32 to vector<32x1xf32>
    %1078 = arith.divf %1076, %1077 : vector<32x1xf32>
    %1079 = vector.broadcast %1071 : vector<32x1xf32> to vector<32x32xf32>
    %1080 = arith.subf %1067, %1079 : vector<32x32xf32>
    %cst_311 = arith.constant 9.99999974E-6 : f32
    %1081 = vector.broadcast %cst_311 : f32 to vector<32x1xf32>
    %1082 = arith.addf %1078, %1081 : vector<32x1xf32>
    %1083 = math.rsqrt %1082 : vector<32x1xf32>
    %1084 = vector.broadcast %1083 : vector<32x1xf32> to vector<32x32xf32>
    %1085 = arith.mulf %1080, %1084 : vector<32x32xf32>
    %c0_312 = arith.constant 0 : index
    %c0_313 = arith.constant 0 : index
    %1086 = vector.load %arg12[%c0_312, %c0_313] : memref<32x1xf32, #tpu.memory_space<vmem>>, vector<32x1xf32>
    %1087 = vector.broadcast %1086 : vector<32x1xf32> to vector<32x32xf32>
    %1088 = arith.mulf %1085, %1087 : vector<32x32xf32>
    %c0_314 = arith.constant 0 : index
    %c0_315 = arith.constant 0 : index
    %1089 = vector.load %arg13[%c0_314, %c0_315] : memref<32x1xf32, #tpu.memory_space<vmem>>, vector<32x1xf32>
    %1090 = vector.broadcast %1089 : vector<32x1xf32> to vector<32x32xf32>
    %1091 = arith.addf %1088, %1090 : vector<32x32xf32>
    %cst_316 = arith.constant 0.000000e+00 : f32
    %1092 = vector.broadcast %cst_316 : f32 to vector<32x32xf32>
    %1093 = arith.maximumf %1091, %1092 : vector<32x32xf32>
    %c0_317 = arith.constant 0 : index
    %c0_318 = arith.constant 0 : index
    %1094 = vector.load %arg26[%c0_317, %c0_318] : memref<32x4xf32, #tpu.memory_space<vmem>>, vector<32x4xf32>
    %cst_319 = arith.constant dense<0.000000e+00> : vector<32x32xf32>
    %1095 = tpu.matmul %1094, %1, %cst_319 {dimension_numbers = #tpu.dot_dimension_numbers<[1], [0], [0], [1], [0, 0, 1, 1], [], []>} : vector<32x4xf32>, vector<4x32xf32>, vector<32x32xf32> -> vector<32x32xf32>
    %cst_320 = arith.constant dense<0.000000e+00> : vector<32xf32>
    %1096 = vector.multi_reduction <add>, %1095, %cst_320 [1] : vector<32x32xf32> to vector<32xf32>
    %1097 = vector.shape_cast %1096 : vector<32xf32> to vector<32x1xf32>
    %cst_321 = arith.constant 3.200000e+01 : f32
    %1098 = vector.broadcast %cst_321 : f32 to vector<32x1xf32>
    %1099 = arith.divf %1097, %1098 : vector<32x1xf32>
    %1100 = vector.broadcast %1099 : vector<32x1xf32> to vector<32x32xf32>
    %1101 = arith.subf %1095, %1100 : vector<32x32xf32>
    %1102 = arith.mulf %1101, %1101 : vector<32x32xf32>
    %cst_322 = arith.constant dense<0.000000e+00> : vector<32xf32>
    %1103 = vector.multi_reduction <add>, %1102, %cst_322 [1] : vector<32x32xf32> to vector<32xf32>
    %1104 = vector.shape_cast %1103 : vector<32xf32> to vector<32x1xf32>
    %cst_323 = arith.constant 3.200000e+01 : f32
    %1105 = vector.broadcast %cst_323 : f32 to vector<32x1xf32>
    %1106 = arith.divf %1104, %1105 : vector<32x1xf32>
    %1107 = vector.broadcast %1099 : vector<32x1xf32> to vector<32x32xf32>
    %1108 = arith.subf %1095, %1107 : vector<32x32xf32>
    %cst_324 = arith.constant 9.99999974E-6 : f32
    %1109 = vector.broadcast %cst_324 : f32 to vector<32x1xf32>
    %1110 = arith.addf %1106, %1109 : vector<32x1xf32>
    %1111 = math.rsqrt %1110 : vector<32x1xf32>
    %1112 = vector.broadcast %1111 : vector<32x1xf32> to vector<32x32xf32>
    %1113 = arith.mulf %1108, %1112 : vector<32x32xf32>
    %c0_325 = arith.constant 0 : index
    %c0_326 = arith.constant 0 : index
    %1114 = vector.load %arg27[%c0_325, %c0_326] : memref<32x1xf32, #tpu.memory_space<vmem>>, vector<32x1xf32>
    %1115 = vector.broadcast %1114 : vector<32x1xf32> to vector<32x32xf32>
    %1116 = arith.mulf %1113, %1115 : vector<32x32xf32>
    %c0_327 = arith.constant 0 : index
    %c0_328 = arith.constant 0 : index
    %1117 = vector.load %arg28[%c0_327, %c0_328] : memref<32x1xf32, #tpu.memory_space<vmem>>, vector<32x1xf32>
    %1118 = vector.broadcast %1117 : vector<32x1xf32> to vector<32x32xf32>
    %1119 = arith.addf %1116, %1118 : vector<32x32xf32>
    %1120 = arith.addf %1093, %1119 : vector<32x32xf32>
    %cst_329 = arith.constant 0.000000e+00 : f32
    %1121 = vector.broadcast %cst_329 : f32 to vector<32x32xf32>
    %1122 = arith.maximumf %1120, %1121 : vector<32x32xf32>
    %c0_330 = arith.constant 0 : index
    %c0_331 = arith.constant 0 : index
    %1123 = vector.load %arg14[%c0_330, %c0_331] : memref<8x32xf32, #tpu.memory_space<vmem>>, vector<8x32xf32>
    %cst_332 = arith.constant dense<0.000000e+00> : vector<8x32xf32>
    %1124 = tpu.matmul %1123, %1122, %cst_332 {dimension_numbers = #tpu.dot_dimension_numbers<[1], [0], [0], [1], [0, 0, 1, 1], [], []>} : vector<8x32xf32>, vector<32x32xf32>, vector<8x32xf32> -> vector<8x32xf32>
    %cst_333 = arith.constant 0.000000e+00 : f32
    %1125 = vector.broadcast %cst_333 : f32 to vector<8x19xf32>
    %1126 = tpu.concatenate %1125, %1124, %1125 in 1 : vector<8x19xf32>, vector<8x32xf32>, vector<8x19xf32> -> vector<8x70xf32>
    %cst_334 = arith.constant 0.000000e+00 : f32
    %1127 = vector.broadcast %cst_334 : f32 to vector<8x32xf32>
    %cst_335 = arith.constant 0.000000e+00 : f32
    %1128 = vector.broadcast %cst_335 : f32 to vector<8x32xf32>
    %cst_336 = arith.constant 0.000000e+00 : f32
    %1129 = vector.broadcast %cst_336 : f32 to vector<8x32xf32>
    %cst_337 = arith.constant 0.000000e+00 : f32
    %1130 = vector.broadcast %cst_337 : f32 to vector<8x32xf32>
    %1131 = vector.extract_strided_slice %1126 {offsets = [0, 4], sizes = [8, 32], strides = [1, 1]} : vector<8x70xf32> to vector<8x32xf32>
    %c15_i32_338 = arith.constant 15 : i32
    %1132 = vector.broadcast %c15_i32_338 : i32 to vector<1x32xi32>
    %1133 = arith.cmpi sge, %0, %1132 : vector<1x32xi32>
    %c31_i32_339 = arith.constant 31 : i32
    %1134 = vector.broadcast %c31_i32_339 : i32 to vector<1x32xi32>
    %1135 = arith.cmpi slt, %0, %1134 : vector<1x32xi32>
    %1136 = arith.andi %1133, %1135 : vector<1x32xi1>
    %cst_340 = arith.constant 0.000000e+00 : f32
    %1137 = vector.shape_cast %1136 : vector<1x32xi1> to vector<1x32xi1>
    %1138 = vector.broadcast %1137 : vector<1x32xi1> to vector<8x32xi1>
    %1139 = vector.broadcast %cst_340 : f32 to vector<8x32xf32>
    %1140 = arith.select %1138, %1131, %1139 : vector<8x32xi1>, vector<8x32xf32>
    %1141 = vector.extract_strided_slice %1126 {offsets = [0, 5], sizes = [8, 32], strides = [1, 1]} : vector<8x70xf32> to vector<8x32xf32>
    %c14_i32_341 = arith.constant 14 : i32
    %1142 = vector.broadcast %c14_i32_341 : i32 to vector<1x32xi32>
    %1143 = arith.cmpi sge, %0, %1142 : vector<1x32xi32>
    %c30_i32_342 = arith.constant 30 : i32
    %1144 = vector.broadcast %c30_i32_342 : i32 to vector<1x32xi32>
    %1145 = arith.cmpi slt, %0, %1144 : vector<1x32xi32>
    %1146 = arith.andi %1143, %1145 : vector<1x32xi1>
    %cst_343 = arith.constant 0.000000e+00 : f32
    %1147 = vector.shape_cast %1146 : vector<1x32xi1> to vector<1x32xi1>
    %1148 = vector.broadcast %1147 : vector<1x32xi1> to vector<8x32xi1>
    %1149 = vector.broadcast %cst_343 : f32 to vector<8x32xf32>
    %1150 = arith.select %1148, %1141, %1149 : vector<8x32xi1>, vector<8x32xf32>
    %1151 = vector.extract_strided_slice %1126 {offsets = [0, 6], sizes = [8, 32], strides = [1, 1]} : vector<8x70xf32> to vector<8x32xf32>
    %c13_i32_344 = arith.constant 13 : i32
    %1152 = vector.broadcast %c13_i32_344 : i32 to vector<1x32xi32>
    %1153 = arith.cmpi sge, %0, %1152 : vector<1x32xi32>
    %c29_i32_345 = arith.constant 29 : i32
    %1154 = vector.broadcast %c29_i32_345 : i32 to vector<1x32xi32>
    %1155 = arith.cmpi slt, %0, %1154 : vector<1x32xi32>
    %1156 = arith.andi %1153, %1155 : vector<1x32xi1>
    %cst_346 = arith.constant 0.000000e+00 : f32
    %1157 = vector.shape_cast %1156 : vector<1x32xi1> to vector<1x32xi1>
    %1158 = vector.broadcast %1157 : vector<1x32xi1> to vector<8x32xi1>
    %1159 = vector.broadcast %cst_346 : f32 to vector<8x32xf32>
    %1160 = arith.select %1158, %1151, %1159 : vector<8x32xi1>, vector<8x32xf32>
    %1161 = vector.extract_strided_slice %1126 {offsets = [0, 7], sizes = [8, 32], strides = [1, 1]} : vector<8x70xf32> to vector<8x32xf32>
    %c12_i32_347 = arith.constant 12 : i32
    %1162 = vector.broadcast %c12_i32_347 : i32 to vector<1x32xi32>
    %1163 = arith.cmpi sge, %0, %1162 : vector<1x32xi32>
    %c28_i32_348 = arith.constant 28 : i32
    %1164 = vector.broadcast %c28_i32_348 : i32 to vector<1x32xi32>
    %1165 = arith.cmpi slt, %0, %1164 : vector<1x32xi32>
    %1166 = arith.andi %1163, %1165 : vector<1x32xi1>
    %cst_349 = arith.constant 0.000000e+00 : f32
    %1167 = vector.shape_cast %1166 : vector<1x32xi1> to vector<1x32xi1>
    %1168 = vector.broadcast %1167 : vector<1x32xi1> to vector<8x32xi1>
    %1169 = vector.broadcast %cst_349 : f32 to vector<8x32xf32>
    %1170 = arith.select %1168, %1161, %1169 : vector<8x32xi1>, vector<8x32xf32>
    %1171 = vector.extract_strided_slice %1126 {offsets = [0, 8], sizes = [8, 32], strides = [1, 1]} : vector<8x70xf32> to vector<8x32xf32>
    %c11_i32_350 = arith.constant 11 : i32
    %1172 = vector.broadcast %c11_i32_350 : i32 to vector<1x32xi32>
    %1173 = arith.cmpi sge, %0, %1172 : vector<1x32xi32>
    %c27_i32_351 = arith.constant 27 : i32
    %1174 = vector.broadcast %c27_i32_351 : i32 to vector<1x32xi32>
    %1175 = arith.cmpi slt, %0, %1174 : vector<1x32xi32>
    %1176 = arith.andi %1173, %1175 : vector<1x32xi1>
    %cst_352 = arith.constant 0.000000e+00 : f32
    %1177 = vector.shape_cast %1176 : vector<1x32xi1> to vector<1x32xi1>
    %1178 = vector.broadcast %1177 : vector<1x32xi1> to vector<8x32xi1>
    %1179 = vector.broadcast %cst_352 : f32 to vector<8x32xf32>
    %1180 = arith.select %1178, %1171, %1179 : vector<8x32xi1>, vector<8x32xf32>
    %1181 = vector.extract_strided_slice %1126 {offsets = [0, 9], sizes = [8, 32], strides = [1, 1]} : vector<8x70xf32> to vector<8x32xf32>
    %c10_i32_353 = arith.constant 10 : i32
    %1182 = vector.broadcast %c10_i32_353 : i32 to vector<1x32xi32>
    %1183 = arith.cmpi sge, %0, %1182 : vector<1x32xi32>
    %c26_i32_354 = arith.constant 26 : i32
    %1184 = vector.broadcast %c26_i32_354 : i32 to vector<1x32xi32>
    %1185 = arith.cmpi slt, %0, %1184 : vector<1x32xi32>
    %1186 = arith.andi %1183, %1185 : vector<1x32xi1>
    %cst_355 = arith.constant 0.000000e+00 : f32
    %1187 = vector.shape_cast %1186 : vector<1x32xi1> to vector<1x32xi1>
    %1188 = vector.broadcast %1187 : vector<1x32xi1> to vector<8x32xi1>
    %1189 = vector.broadcast %cst_355 : f32 to vector<8x32xf32>
    %1190 = arith.select %1188, %1181, %1189 : vector<8x32xi1>, vector<8x32xf32>
    %1191 = vector.extract_strided_slice %1126 {offsets = [0, 10], sizes = [8, 32], strides = [1, 1]} : vector<8x70xf32> to vector<8x32xf32>
    %c9_i32_356 = arith.constant 9 : i32
    %1192 = vector.broadcast %c9_i32_356 : i32 to vector<1x32xi32>
    %1193 = arith.cmpi sge, %0, %1192 : vector<1x32xi32>
    %c25_i32_357 = arith.constant 25 : i32
    %1194 = vector.broadcast %c25_i32_357 : i32 to vector<1x32xi32>
    %1195 = arith.cmpi slt, %0, %1194 : vector<1x32xi32>
    %1196 = arith.andi %1193, %1195 : vector<1x32xi1>
    %cst_358 = arith.constant 0.000000e+00 : f32
    %1197 = vector.shape_cast %1196 : vector<1x32xi1> to vector<1x32xi1>
    %1198 = vector.broadcast %1197 : vector<1x32xi1> to vector<8x32xi1>
    %1199 = vector.broadcast %cst_358 : f32 to vector<8x32xf32>
    %1200 = arith.select %1198, %1191, %1199 : vector<8x32xi1>, vector<8x32xf32>
    %1201 = vector.extract_strided_slice %1126 {offsets = [0, 11], sizes = [8, 32], strides = [1, 1]} : vector<8x70xf32> to vector<8x32xf32>
    %c8_i32_359 = arith.constant 8 : i32
    %1202 = vector.broadcast %c8_i32_359 : i32 to vector<1x32xi32>
    %1203 = arith.cmpi sge, %0, %1202 : vector<1x32xi32>
    %c24_i32_360 = arith.constant 24 : i32
    %1204 = vector.broadcast %c24_i32_360 : i32 to vector<1x32xi32>
    %1205 = arith.cmpi slt, %0, %1204 : vector<1x32xi32>
    %1206 = arith.andi %1203, %1205 : vector<1x32xi1>
    %cst_361 = arith.constant 0.000000e+00 : f32
    %1207 = vector.shape_cast %1206 : vector<1x32xi1> to vector<1x32xi1>
    %1208 = vector.broadcast %1207 : vector<1x32xi1> to vector<8x32xi1>
    %1209 = vector.broadcast %cst_361 : f32 to vector<8x32xf32>
    %1210 = arith.select %1208, %1201, %1209 : vector<8x32xi1>, vector<8x32xf32>
    %1211 = vector.extract_strided_slice %1126 {offsets = [0, 12], sizes = [8, 32], strides = [1, 1]} : vector<8x70xf32> to vector<8x32xf32>
    %c7_i32_362 = arith.constant 7 : i32
    %1212 = vector.broadcast %c7_i32_362 : i32 to vector<1x32xi32>
    %1213 = arith.cmpi sge, %0, %1212 : vector<1x32xi32>
    %c23_i32_363 = arith.constant 23 : i32
    %1214 = vector.broadcast %c23_i32_363 : i32 to vector<1x32xi32>
    %1215 = arith.cmpi slt, %0, %1214 : vector<1x32xi32>
    %1216 = arith.andi %1213, %1215 : vector<1x32xi1>
    %cst_364 = arith.constant 0.000000e+00 : f32
    %1217 = vector.shape_cast %1216 : vector<1x32xi1> to vector<1x32xi1>
    %1218 = vector.broadcast %1217 : vector<1x32xi1> to vector<8x32xi1>
    %1219 = vector.broadcast %cst_364 : f32 to vector<8x32xf32>
    %1220 = arith.select %1218, %1211, %1219 : vector<8x32xi1>, vector<8x32xf32>
    %1221 = vector.extract_strided_slice %1126 {offsets = [0, 13], sizes = [8, 32], strides = [1, 1]} : vector<8x70xf32> to vector<8x32xf32>
    %c6_i32_365 = arith.constant 6 : i32
    %1222 = vector.broadcast %c6_i32_365 : i32 to vector<1x32xi32>
    %1223 = arith.cmpi sge, %0, %1222 : vector<1x32xi32>
    %c22_i32_366 = arith.constant 22 : i32
    %1224 = vector.broadcast %c22_i32_366 : i32 to vector<1x32xi32>
    %1225 = arith.cmpi slt, %0, %1224 : vector<1x32xi32>
    %1226 = arith.andi %1223, %1225 : vector<1x32xi1>
    %cst_367 = arith.constant 0.000000e+00 : f32
    %1227 = vector.shape_cast %1226 : vector<1x32xi1> to vector<1x32xi1>
    %1228 = vector.broadcast %1227 : vector<1x32xi1> to vector<8x32xi1>
    %1229 = vector.broadcast %cst_367 : f32 to vector<8x32xf32>
    %1230 = arith.select %1228, %1221, %1229 : vector<8x32xi1>, vector<8x32xf32>
    %1231 = vector.extract_strided_slice %1126 {offsets = [0, 14], sizes = [8, 32], strides = [1, 1]} : vector<8x70xf32> to vector<8x32xf32>
    %c5_i32_368 = arith.constant 5 : i32
    %1232 = vector.broadcast %c5_i32_368 : i32 to vector<1x32xi32>
    %1233 = arith.cmpi sge, %0, %1232 : vector<1x32xi32>
    %c21_i32_369 = arith.constant 21 : i32
    %1234 = vector.broadcast %c21_i32_369 : i32 to vector<1x32xi32>
    %1235 = arith.cmpi slt, %0, %1234 : vector<1x32xi32>
    %1236 = arith.andi %1233, %1235 : vector<1x32xi1>
    %cst_370 = arith.constant 0.000000e+00 : f32
    %1237 = vector.shape_cast %1236 : vector<1x32xi1> to vector<1x32xi1>
    %1238 = vector.broadcast %1237 : vector<1x32xi1> to vector<8x32xi1>
    %1239 = vector.broadcast %cst_370 : f32 to vector<8x32xf32>
    %1240 = arith.select %1238, %1231, %1239 : vector<8x32xi1>, vector<8x32xf32>
    %1241 = vector.extract_strided_slice %1126 {offsets = [0, 15], sizes = [8, 32], strides = [1, 1]} : vector<8x70xf32> to vector<8x32xf32>
    %c4_i32_371 = arith.constant 4 : i32
    %1242 = vector.broadcast %c4_i32_371 : i32 to vector<1x32xi32>
    %1243 = arith.cmpi sge, %0, %1242 : vector<1x32xi32>
    %c20_i32_372 = arith.constant 20 : i32
    %1244 = vector.broadcast %c20_i32_372 : i32 to vector<1x32xi32>
    %1245 = arith.cmpi slt, %0, %1244 : vector<1x32xi32>
    %1246 = arith.andi %1243, %1245 : vector<1x32xi1>
    %cst_373 = arith.constant 0.000000e+00 : f32
    %1247 = vector.shape_cast %1246 : vector<1x32xi1> to vector<1x32xi1>
    %1248 = vector.broadcast %1247 : vector<1x32xi1> to vector<8x32xi1>
    %1249 = vector.broadcast %cst_373 : f32 to vector<8x32xf32>
    %1250 = arith.select %1248, %1241, %1249 : vector<8x32xi1>, vector<8x32xf32>
    %1251 = vector.extract_strided_slice %1126 {offsets = [0, 16], sizes = [8, 32], strides = [1, 1]} : vector<8x70xf32> to vector<8x32xf32>
    %c3_i32_374 = arith.constant 3 : i32
    %1252 = vector.broadcast %c3_i32_374 : i32 to vector<1x32xi32>
    %1253 = arith.cmpi sge, %0, %1252 : vector<1x32xi32>
    %c19_i32_375 = arith.constant 19 : i32
    %1254 = vector.broadcast %c19_i32_375 : i32 to vector<1x32xi32>
    %1255 = arith.cmpi slt, %0, %1254 : vector<1x32xi32>
    %1256 = arith.andi %1253, %1255 : vector<1x32xi1>
    %cst_376 = arith.constant 0.000000e+00 : f32
    %1257 = vector.shape_cast %1256 : vector<1x32xi1> to vector<1x32xi1>
    %1258 = vector.broadcast %1257 : vector<1x32xi1> to vector<8x32xi1>
    %1259 = vector.broadcast %cst_376 : f32 to vector<8x32xf32>
    %1260 = arith.select %1258, %1251, %1259 : vector<8x32xi1>, vector<8x32xf32>
    %1261 = vector.extract_strided_slice %1126 {offsets = [0, 17], sizes = [8, 32], strides = [1, 1]} : vector<8x70xf32> to vector<8x32xf32>
    %c2_i32_377 = arith.constant 2 : i32
    %1262 = vector.broadcast %c2_i32_377 : i32 to vector<1x32xi32>
    %1263 = arith.cmpi sge, %0, %1262 : vector<1x32xi32>
    %c18_i32_378 = arith.constant 18 : i32
    %1264 = vector.broadcast %c18_i32_378 : i32 to vector<1x32xi32>
    %1265 = arith.cmpi slt, %0, %1264 : vector<1x32xi32>
    %1266 = arith.andi %1263, %1265 : vector<1x32xi1>
    %cst_379 = arith.constant 0.000000e+00 : f32
    %1267 = vector.shape_cast %1266 : vector<1x32xi1> to vector<1x32xi1>
    %1268 = vector.broadcast %1267 : vector<1x32xi1> to vector<8x32xi1>
    %1269 = vector.broadcast %cst_379 : f32 to vector<8x32xf32>
    %1270 = arith.select %1268, %1261, %1269 : vector<8x32xi1>, vector<8x32xf32>
    %1271 = vector.extract_strided_slice %1126 {offsets = [0, 18], sizes = [8, 32], strides = [1, 1]} : vector<8x70xf32> to vector<8x32xf32>
    %c1_i32_380 = arith.constant 1 : i32
    %1272 = vector.broadcast %c1_i32_380 : i32 to vector<1x32xi32>
    %1273 = arith.cmpi sge, %0, %1272 : vector<1x32xi32>
    %c17_i32_381 = arith.constant 17 : i32
    %1274 = vector.broadcast %c17_i32_381 : i32 to vector<1x32xi32>
    %1275 = arith.cmpi slt, %0, %1274 : vector<1x32xi32>
    %1276 = arith.andi %1273, %1275 : vector<1x32xi1>
    %cst_382 = arith.constant 0.000000e+00 : f32
    %1277 = vector.shape_cast %1276 : vector<1x32xi1> to vector<1x32xi1>
    %1278 = vector.broadcast %1277 : vector<1x32xi1> to vector<8x32xi1>
    %1279 = vector.broadcast %cst_382 : f32 to vector<8x32xf32>
    %1280 = arith.select %1278, %1271, %1279 : vector<8x32xi1>, vector<8x32xf32>
    %1281 = vector.extract_strided_slice %1126 {offsets = [0, 19], sizes = [8, 32], strides = [1, 1]} : vector<8x70xf32> to vector<8x32xf32>
    %1282 = vector.extract_strided_slice %1126 {offsets = [0, 20], sizes = [8, 32], strides = [1, 1]} : vector<8x70xf32> to vector<8x32xf32>
    %c-1_i32_383 = arith.constant -1 : i32
    %1283 = vector.broadcast %c-1_i32_383 : i32 to vector<1x32xi32>
    %1284 = arith.cmpi sge, %0, %1283 : vector<1x32xi32>
    %c15_i32_384 = arith.constant 15 : i32
    %1285 = vector.broadcast %c15_i32_384 : i32 to vector<1x32xi32>
    %1286 = arith.cmpi slt, %0, %1285 : vector<1x32xi32>
    %1287 = arith.andi %1284, %1286 : vector<1x32xi1>
    %cst_385 = arith.constant 0.000000e+00 : f32
    %1288 = vector.shape_cast %1287 : vector<1x32xi1> to vector<1x32xi1>
    %1289 = vector.broadcast %1288 : vector<1x32xi1> to vector<8x32xi1>
    %1290 = vector.broadcast %cst_385 : f32 to vector<8x32xf32>
    %1291 = arith.select %1289, %1282, %1290 : vector<8x32xi1>, vector<8x32xf32>
    %1292 = vector.extract_strided_slice %1126 {offsets = [0, 21], sizes = [8, 32], strides = [1, 1]} : vector<8x70xf32> to vector<8x32xf32>
    %c-2_i32_386 = arith.constant -2 : i32
    %1293 = vector.broadcast %c-2_i32_386 : i32 to vector<1x32xi32>
    %1294 = arith.cmpi sge, %0, %1293 : vector<1x32xi32>
    %c14_i32_387 = arith.constant 14 : i32
    %1295 = vector.broadcast %c14_i32_387 : i32 to vector<1x32xi32>
    %1296 = arith.cmpi slt, %0, %1295 : vector<1x32xi32>
    %1297 = arith.andi %1294, %1296 : vector<1x32xi1>
    %cst_388 = arith.constant 0.000000e+00 : f32
    %1298 = vector.shape_cast %1297 : vector<1x32xi1> to vector<1x32xi1>
    %1299 = vector.broadcast %1298 : vector<1x32xi1> to vector<8x32xi1>
    %1300 = vector.broadcast %cst_388 : f32 to vector<8x32xf32>
    %1301 = arith.select %1299, %1292, %1300 : vector<8x32xi1>, vector<8x32xf32>
    %1302 = vector.extract_strided_slice %1126 {offsets = [0, 22], sizes = [8, 32], strides = [1, 1]} : vector<8x70xf32> to vector<8x32xf32>
    %c-3_i32_389 = arith.constant -3 : i32
    %1303 = vector.broadcast %c-3_i32_389 : i32 to vector<1x32xi32>
    %1304 = arith.cmpi sge, %0, %1303 : vector<1x32xi32>
    %c13_i32_390 = arith.constant 13 : i32
    %1305 = vector.broadcast %c13_i32_390 : i32 to vector<1x32xi32>
    %1306 = arith.cmpi slt, %0, %1305 : vector<1x32xi32>
    %1307 = arith.andi %1304, %1306 : vector<1x32xi1>
    %cst_391 = arith.constant 0.000000e+00 : f32
    %1308 = vector.shape_cast %1307 : vector<1x32xi1> to vector<1x32xi1>
    %1309 = vector.broadcast %1308 : vector<1x32xi1> to vector<8x32xi1>
    %1310 = vector.broadcast %cst_391 : f32 to vector<8x32xf32>
    %1311 = arith.select %1309, %1302, %1310 : vector<8x32xi1>, vector<8x32xf32>
    %1312 = vector.extract_strided_slice %1126 {offsets = [0, 23], sizes = [8, 32], strides = [1, 1]} : vector<8x70xf32> to vector<8x32xf32>
    %c-4_i32_392 = arith.constant -4 : i32
    %1313 = vector.broadcast %c-4_i32_392 : i32 to vector<1x32xi32>
    %1314 = arith.cmpi sge, %0, %1313 : vector<1x32xi32>
    %c12_i32_393 = arith.constant 12 : i32
    %1315 = vector.broadcast %c12_i32_393 : i32 to vector<1x32xi32>
    %1316 = arith.cmpi slt, %0, %1315 : vector<1x32xi32>
    %1317 = arith.andi %1314, %1316 : vector<1x32xi1>
    %cst_394 = arith.constant 0.000000e+00 : f32
    %1318 = vector.shape_cast %1317 : vector<1x32xi1> to vector<1x32xi1>
    %1319 = vector.broadcast %1318 : vector<1x32xi1> to vector<8x32xi1>
    %1320 = vector.broadcast %cst_394 : f32 to vector<8x32xf32>
    %1321 = arith.select %1319, %1312, %1320 : vector<8x32xi1>, vector<8x32xf32>
    %1322 = vector.extract_strided_slice %1126 {offsets = [0, 24], sizes = [8, 32], strides = [1, 1]} : vector<8x70xf32> to vector<8x32xf32>
    %c-5_i32_395 = arith.constant -5 : i32
    %1323 = vector.broadcast %c-5_i32_395 : i32 to vector<1x32xi32>
    %1324 = arith.cmpi sge, %0, %1323 : vector<1x32xi32>
    %c11_i32_396 = arith.constant 11 : i32
    %1325 = vector.broadcast %c11_i32_396 : i32 to vector<1x32xi32>
    %1326 = arith.cmpi slt, %0, %1325 : vector<1x32xi32>
    %1327 = arith.andi %1324, %1326 : vector<1x32xi1>
    %cst_397 = arith.constant 0.000000e+00 : f32
    %1328 = vector.shape_cast %1327 : vector<1x32xi1> to vector<1x32xi1>
    %1329 = vector.broadcast %1328 : vector<1x32xi1> to vector<8x32xi1>
    %1330 = vector.broadcast %cst_397 : f32 to vector<8x32xf32>
    %1331 = arith.select %1329, %1322, %1330 : vector<8x32xi1>, vector<8x32xf32>
    %1332 = vector.extract_strided_slice %1126 {offsets = [0, 25], sizes = [8, 32], strides = [1, 1]} : vector<8x70xf32> to vector<8x32xf32>
    %c-6_i32_398 = arith.constant -6 : i32
    %1333 = vector.broadcast %c-6_i32_398 : i32 to vector<1x32xi32>
    %1334 = arith.cmpi sge, %0, %1333 : vector<1x32xi32>
    %c10_i32_399 = arith.constant 10 : i32
    %1335 = vector.broadcast %c10_i32_399 : i32 to vector<1x32xi32>
    %1336 = arith.cmpi slt, %0, %1335 : vector<1x32xi32>
    %1337 = arith.andi %1334, %1336 : vector<1x32xi1>
    %cst_400 = arith.constant 0.000000e+00 : f32
    %1338 = vector.shape_cast %1337 : vector<1x32xi1> to vector<1x32xi1>
    %1339 = vector.broadcast %1338 : vector<1x32xi1> to vector<8x32xi1>
    %1340 = vector.broadcast %cst_400 : f32 to vector<8x32xf32>
    %1341 = arith.select %1339, %1332, %1340 : vector<8x32xi1>, vector<8x32xf32>
    %1342 = vector.extract_strided_slice %1126 {offsets = [0, 26], sizes = [8, 32], strides = [1, 1]} : vector<8x70xf32> to vector<8x32xf32>
    %c-7_i32_401 = arith.constant -7 : i32
    %1343 = vector.broadcast %c-7_i32_401 : i32 to vector<1x32xi32>
    %1344 = arith.cmpi sge, %0, %1343 : vector<1x32xi32>
    %c9_i32_402 = arith.constant 9 : i32
    %1345 = vector.broadcast %c9_i32_402 : i32 to vector<1x32xi32>
    %1346 = arith.cmpi slt, %0, %1345 : vector<1x32xi32>
    %1347 = arith.andi %1344, %1346 : vector<1x32xi1>
    %cst_403 = arith.constant 0.000000e+00 : f32
    %1348 = vector.shape_cast %1347 : vector<1x32xi1> to vector<1x32xi1>
    %1349 = vector.broadcast %1348 : vector<1x32xi1> to vector<8x32xi1>
    %1350 = vector.broadcast %cst_403 : f32 to vector<8x32xf32>
    %1351 = arith.select %1349, %1342, %1350 : vector<8x32xi1>, vector<8x32xf32>
    %1352 = vector.extract_strided_slice %1126 {offsets = [0, 27], sizes = [8, 32], strides = [1, 1]} : vector<8x70xf32> to vector<8x32xf32>
    %c-8_i32_404 = arith.constant -8 : i32
    %1353 = vector.broadcast %c-8_i32_404 : i32 to vector<1x32xi32>
    %1354 = arith.cmpi sge, %0, %1353 : vector<1x32xi32>
    %c8_i32_405 = arith.constant 8 : i32
    %1355 = vector.broadcast %c8_i32_405 : i32 to vector<1x32xi32>
    %1356 = arith.cmpi slt, %0, %1355 : vector<1x32xi32>
    %1357 = arith.andi %1354, %1356 : vector<1x32xi1>
    %cst_406 = arith.constant 0.000000e+00 : f32
    %1358 = vector.shape_cast %1357 : vector<1x32xi1> to vector<1x32xi1>
    %1359 = vector.broadcast %1358 : vector<1x32xi1> to vector<8x32xi1>
    %1360 = vector.broadcast %cst_406 : f32 to vector<8x32xf32>
    %1361 = arith.select %1359, %1352, %1360 : vector<8x32xi1>, vector<8x32xf32>
    %1362 = vector.extract_strided_slice %1126 {offsets = [0, 28], sizes = [8, 32], strides = [1, 1]} : vector<8x70xf32> to vector<8x32xf32>
    %c-9_i32_407 = arith.constant -9 : i32
    %1363 = vector.broadcast %c-9_i32_407 : i32 to vector<1x32xi32>
    %1364 = arith.cmpi sge, %0, %1363 : vector<1x32xi32>
    %c7_i32_408 = arith.constant 7 : i32
    %1365 = vector.broadcast %c7_i32_408 : i32 to vector<1x32xi32>
    %1366 = arith.cmpi slt, %0, %1365 : vector<1x32xi32>
    %1367 = arith.andi %1364, %1366 : vector<1x32xi1>
    %cst_409 = arith.constant 0.000000e+00 : f32
    %1368 = vector.shape_cast %1367 : vector<1x32xi1> to vector<1x32xi1>
    %1369 = vector.broadcast %1368 : vector<1x32xi1> to vector<8x32xi1>
    %1370 = vector.broadcast %cst_409 : f32 to vector<8x32xf32>
    %1371 = arith.select %1369, %1362, %1370 : vector<8x32xi1>, vector<8x32xf32>
    %1372 = vector.extract_strided_slice %1126 {offsets = [0, 29], sizes = [8, 32], strides = [1, 1]} : vector<8x70xf32> to vector<8x32xf32>
    %c-10_i32_410 = arith.constant -10 : i32
    %1373 = vector.broadcast %c-10_i32_410 : i32 to vector<1x32xi32>
    %1374 = arith.cmpi sge, %0, %1373 : vector<1x32xi32>
    %c6_i32_411 = arith.constant 6 : i32
    %1375 = vector.broadcast %c6_i32_411 : i32 to vector<1x32xi32>
    %1376 = arith.cmpi slt, %0, %1375 : vector<1x32xi32>
    %1377 = arith.andi %1374, %1376 : vector<1x32xi1>
    %cst_412 = arith.constant 0.000000e+00 : f32
    %1378 = vector.shape_cast %1377 : vector<1x32xi1> to vector<1x32xi1>
    %1379 = vector.broadcast %1378 : vector<1x32xi1> to vector<8x32xi1>
    %1380 = vector.broadcast %cst_412 : f32 to vector<8x32xf32>
    %1381 = arith.select %1379, %1372, %1380 : vector<8x32xi1>, vector<8x32xf32>
    %1382 = vector.extract_strided_slice %1126 {offsets = [0, 30], sizes = [8, 32], strides = [1, 1]} : vector<8x70xf32> to vector<8x32xf32>
    %c-11_i32_413 = arith.constant -11 : i32
    %1383 = vector.broadcast %c-11_i32_413 : i32 to vector<1x32xi32>
    %1384 = arith.cmpi sge, %0, %1383 : vector<1x32xi32>
    %c5_i32_414 = arith.constant 5 : i32
    %1385 = vector.broadcast %c5_i32_414 : i32 to vector<1x32xi32>
    %1386 = arith.cmpi slt, %0, %1385 : vector<1x32xi32>
    %1387 = arith.andi %1384, %1386 : vector<1x32xi1>
    %cst_415 = arith.constant 0.000000e+00 : f32
    %1388 = vector.shape_cast %1387 : vector<1x32xi1> to vector<1x32xi1>
    %1389 = vector.broadcast %1388 : vector<1x32xi1> to vector<8x32xi1>
    %1390 = vector.broadcast %cst_415 : f32 to vector<8x32xf32>
    %1391 = arith.select %1389, %1382, %1390 : vector<8x32xi1>, vector<8x32xf32>
    %1392 = vector.extract_strided_slice %1126 {offsets = [0, 31], sizes = [8, 32], strides = [1, 1]} : vector<8x70xf32> to vector<8x32xf32>
    %c-12_i32_416 = arith.constant -12 : i32
    %1393 = vector.broadcast %c-12_i32_416 : i32 to vector<1x32xi32>
    %1394 = arith.cmpi sge, %0, %1393 : vector<1x32xi32>
    %c4_i32_417 = arith.constant 4 : i32
    %1395 = vector.broadcast %c4_i32_417 : i32 to vector<1x32xi32>
    %1396 = arith.cmpi slt, %0, %1395 : vector<1x32xi32>
    %1397 = arith.andi %1394, %1396 : vector<1x32xi1>
    %cst_418 = arith.constant 0.000000e+00 : f32
    %1398 = vector.shape_cast %1397 : vector<1x32xi1> to vector<1x32xi1>
    %1399 = vector.broadcast %1398 : vector<1x32xi1> to vector<8x32xi1>
    %1400 = vector.broadcast %cst_418 : f32 to vector<8x32xf32>
    %1401 = arith.select %1399, %1392, %1400 : vector<8x32xi1>, vector<8x32xf32>
    %1402 = vector.extract_strided_slice %1126 {offsets = [0, 32], sizes = [8, 32], strides = [1, 1]} : vector<8x70xf32> to vector<8x32xf32>
    %c-13_i32_419 = arith.constant -13 : i32
    %1403 = vector.broadcast %c-13_i32_419 : i32 to vector<1x32xi32>
    %1404 = arith.cmpi sge, %0, %1403 : vector<1x32xi32>
    %c3_i32_420 = arith.constant 3 : i32
    %1405 = vector.broadcast %c3_i32_420 : i32 to vector<1x32xi32>
    %1406 = arith.cmpi slt, %0, %1405 : vector<1x32xi32>
    %1407 = arith.andi %1404, %1406 : vector<1x32xi1>
    %cst_421 = arith.constant 0.000000e+00 : f32
    %1408 = vector.shape_cast %1407 : vector<1x32xi1> to vector<1x32xi1>
    %1409 = vector.broadcast %1408 : vector<1x32xi1> to vector<8x32xi1>
    %1410 = vector.broadcast %cst_421 : f32 to vector<8x32xf32>
    %1411 = arith.select %1409, %1402, %1410 : vector<8x32xi1>, vector<8x32xf32>
    %1412 = vector.extract_strided_slice %1126 {offsets = [0, 33], sizes = [8, 32], strides = [1, 1]} : vector<8x70xf32> to vector<8x32xf32>
    %c-14_i32_422 = arith.constant -14 : i32
    %1413 = vector.broadcast %c-14_i32_422 : i32 to vector<1x32xi32>
    %1414 = arith.cmpi sge, %0, %1413 : vector<1x32xi32>
    %c2_i32_423 = arith.constant 2 : i32
    %1415 = vector.broadcast %c2_i32_423 : i32 to vector<1x32xi32>
    %1416 = arith.cmpi slt, %0, %1415 : vector<1x32xi32>
    %1417 = arith.andi %1414, %1416 : vector<1x32xi1>
    %cst_424 = arith.constant 0.000000e+00 : f32
    %1418 = vector.shape_cast %1417 : vector<1x32xi1> to vector<1x32xi1>
    %1419 = vector.broadcast %1418 : vector<1x32xi1> to vector<8x32xi1>
    %1420 = vector.broadcast %cst_424 : f32 to vector<8x32xf32>
    %1421 = arith.select %1419, %1412, %1420 : vector<8x32xi1>, vector<8x32xf32>
    %1422 = vector.extract_strided_slice %1126 {offsets = [0, 34], sizes = [8, 32], strides = [1, 1]} : vector<8x70xf32> to vector<8x32xf32>
    %c-15_i32_425 = arith.constant -15 : i32
    %1423 = vector.broadcast %c-15_i32_425 : i32 to vector<1x32xi32>
    %1424 = arith.cmpi sge, %0, %1423 : vector<1x32xi32>
    %c1_i32_426 = arith.constant 1 : i32
    %1425 = vector.broadcast %c1_i32_426 : i32 to vector<1x32xi32>
    %1426 = arith.cmpi slt, %0, %1425 : vector<1x32xi32>
    %1427 = arith.andi %1424, %1426 : vector<1x32xi1>
    %cst_427 = arith.constant 0.000000e+00 : f32
    %1428 = vector.shape_cast %1427 : vector<1x32xi1> to vector<1x32xi1>
    %1429 = vector.broadcast %1428 : vector<1x32xi1> to vector<8x32xi1>
    %1430 = vector.broadcast %cst_427 : f32 to vector<8x32xf32>
    %1431 = arith.select %1429, %1422, %1430 : vector<8x32xi1>, vector<8x32xf32>
    %cst_428 = arith.constant 0.000000e+00 : f32
    %1432 = vector.broadcast %cst_428 : f32 to vector<8x32xf32>
    %cst_429 = arith.constant 0.000000e+00 : f32
    %1433 = vector.broadcast %cst_429 : f32 to vector<8x32xf32>
    %cst_430 = arith.constant 0.000000e+00 : f32
    %1434 = vector.broadcast %cst_430 : f32 to vector<8x32xf32>
    %cst_431 = arith.constant 0.000000e+00 : f32
    %1435 = vector.broadcast %cst_431 : f32 to vector<8x32xf32>
    %cst_432 = arith.constant 0xFF800000 : f32
    %1436 = vector.broadcast %cst_432 : f32 to vector<32x1xf32>
    %1437 = tpu.concatenate %1436, %1122, %1436 in 1 : vector<32x1xf32>, vector<32x32xf32>, vector<32x1xf32> -> vector<32x34xf32>
    %c1_i32_433 = arith.constant 1 : i32
    %1438 = vector.broadcast %c1_i32_433 : i32 to vector<1x32xi32>
    %1439 = arith.cmpi sge, %0, %1438 : vector<1x32xi32>
    %1440 = vector.extract_strided_slice %1437 {offsets = [0, 0], sizes = [32, 32], strides = [1, 1]} : vector<32x34xf32> to vector<32x32xf32>
    %cst_434 = arith.constant 0xFF800000 : f32
    %1441 = vector.shape_cast %1439 : vector<1x32xi1> to vector<1x32xi1>
    %1442 = vector.broadcast %1441 : vector<1x32xi1> to vector<32x32xi1>
    %1443 = vector.broadcast %cst_434 : f32 to vector<32x32xf32>
    %1444 = arith.select %1442, %1440, %1443 : vector<32x32xi1>, vector<32x32xf32>
    %1445 = vector.extract_strided_slice %1437 {offsets = [0, 1], sizes = [32, 32], strides = [1, 1]} : vector<32x34xf32> to vector<32x32xf32>
    %c14_i32_435 = arith.constant 14 : i32
    %1446 = vector.broadcast %c14_i32_435 : i32 to vector<1x32xi32>
    %1447 = arith.cmpi sle, %0, %1446 : vector<1x32xi32>
    %1448 = vector.extract_strided_slice %1437 {offsets = [0, 2], sizes = [32, 32], strides = [1, 1]} : vector<32x34xf32> to vector<32x32xf32>
    %cst_436 = arith.constant 0xFF800000 : f32
    %1449 = vector.shape_cast %1447 : vector<1x32xi1> to vector<1x32xi1>
    %1450 = vector.broadcast %1449 : vector<1x32xi1> to vector<32x32xi1>
    %1451 = vector.broadcast %cst_436 : f32 to vector<32x32xf32>
    %1452 = arith.select %1450, %1448, %1451 : vector<32x32xi1>, vector<32x32xf32>
    %1453 = arith.maximumf %1444, %1445 : vector<32x32xf32>
    %1454 = arith.maximumf %1453, %1452 : vector<32x32xf32>
    %1455 = tpu.concatenate %1127, %1128, %1129, %1130, %1140, %1150, %1160, %1170, %1180, %1190, %1200, %1210, %1220, %1230, %1240, %1250 in 0 : vector<8x32xf32>, vector<8x32xf32>, vector<8x32xf32>, vector<8x32xf32>, vector<8x32xf32>, vector<8x32xf32>, vector<8x32xf32>, vector<8x32xf32>, vector<8x32xf32>, vector<8x32xf32>, vector<8x32xf32>, vector<8x32xf32>, vector<8x32xf32>, vector<8x32xf32>, vector<8x32xf32>, vector<8x32xf32> -> vector<128x32xf32>
    %1456 = tpu.concatenate %1260, %1270, %1280, %1281, %1291, %1301, %1311, %1321, %1331, %1341, %1351, %1361, %1371, %1381, %1391, %1401 in 0 : vector<8x32xf32>, vector<8x32xf32>, vector<8x32xf32>, vector<8x32xf32>, vector<8x32xf32>, vector<8x32xf32>, vector<8x32xf32>, vector<8x32xf32>, vector<8x32xf32>, vector<8x32xf32>, vector<8x32xf32>, vector<8x32xf32>, vector<8x32xf32>, vector<8x32xf32>, vector<8x32xf32>, vector<8x32xf32> -> vector<128x32xf32>
    %1457 = tpu.concatenate %1411, %1421, %1431, %1432, %1433, %1434, %1435, %1454 in 0 : vector<8x32xf32>, vector<8x32xf32>, vector<8x32xf32>, vector<8x32xf32>, vector<8x32xf32>, vector<8x32xf32>, vector<8x32xf32>, vector<32x32xf32> -> vector<88x32xf32>
    %1458 = tpu.concatenate %1455, %1456, %1457 in 0 : vector<128x32xf32>, vector<128x32xf32>, vector<88x32xf32> -> vector<344x32xf32>
    %c0_437 = arith.constant 0 : index
    %c0_438 = arith.constant 0 : index
    %1459 = vector.load %arg15[%c0_437, %c0_438] : memref<32x344xf32, #tpu.memory_space<vmem>>, vector<32x344xf32>
    %cst_439 = arith.constant dense<0.000000e+00> : vector<32x32xf32>
    %1460 = tpu.matmul %1459, %1458, %cst_439 {dimension_numbers = #tpu.dot_dimension_numbers<[1], [0], [0], [1], [0, 0, 1, 1], [], []>} : vector<32x344xf32>, vector<344x32xf32>, vector<32x32xf32> -> vector<32x32xf32>
    %cst_440 = arith.constant dense<0.000000e+00> : vector<32xf32>
    %1461 = vector.multi_reduction <add>, %1460, %cst_440 [1] : vector<32x32xf32> to vector<32xf32>
    %1462 = vector.shape_cast %1461 : vector<32xf32> to vector<32x1xf32>
    %cst_441 = arith.constant 3.200000e+01 : f32
    %1463 = vector.broadcast %cst_441 : f32 to vector<32x1xf32>
    %1464 = arith.divf %1462, %1463 : vector<32x1xf32>
    %1465 = vector.broadcast %1464 : vector<32x1xf32> to vector<32x32xf32>
    %1466 = arith.subf %1460, %1465 : vector<32x32xf32>
    %1467 = arith.mulf %1466, %1466 : vector<32x32xf32>
    %cst_442 = arith.constant dense<0.000000e+00> : vector<32xf32>
    %1468 = vector.multi_reduction <add>, %1467, %cst_442 [1] : vector<32x32xf32> to vector<32xf32>
    %1469 = vector.shape_cast %1468 : vector<32xf32> to vector<32x1xf32>
    %cst_443 = arith.constant 3.200000e+01 : f32
    %1470 = vector.broadcast %cst_443 : f32 to vector<32x1xf32>
    %1471 = arith.divf %1469, %1470 : vector<32x1xf32>
    %1472 = vector.broadcast %1464 : vector<32x1xf32> to vector<32x32xf32>
    %1473 = arith.subf %1460, %1472 : vector<32x32xf32>
    %cst_444 = arith.constant 9.99999974E-6 : f32
    %1474 = vector.broadcast %cst_444 : f32 to vector<32x1xf32>
    %1475 = arith.addf %1471, %1474 : vector<32x1xf32>
    %1476 = math.rsqrt %1475 : vector<32x1xf32>
    %1477 = vector.broadcast %1476 : vector<32x1xf32> to vector<32x32xf32>
    %1478 = arith.mulf %1473, %1477 : vector<32x32xf32>
    %c0_445 = arith.constant 0 : index
    %c0_446 = arith.constant 0 : index
    %1479 = vector.load %arg16[%c0_445, %c0_446] : memref<32x1xf32, #tpu.memory_space<vmem>>, vector<32x1xf32>
    %1480 = vector.broadcast %1479 : vector<32x1xf32> to vector<32x32xf32>
    %1481 = arith.mulf %1478, %1480 : vector<32x32xf32>
    %c0_447 = arith.constant 0 : index
    %c0_448 = arith.constant 0 : index
    %1482 = vector.load %arg17[%c0_447, %c0_448] : memref<32x1xf32, #tpu.memory_space<vmem>>, vector<32x1xf32>
    %1483 = vector.broadcast %1482 : vector<32x1xf32> to vector<32x32xf32>
    %1484 = arith.addf %1481, %1483 : vector<32x32xf32>
    %cst_449 = arith.constant 0.000000e+00 : f32
    %1485 = vector.broadcast %cst_449 : f32 to vector<32x32xf32>
    %1486 = arith.maximumf %1484, %1485 : vector<32x32xf32>
    %c0_450 = arith.constant 0 : index
    %c0_451 = arith.constant 0 : index
    %1487 = vector.load %arg18[%c0_450, %c0_451] : memref<8x32xf32, #tpu.memory_space<vmem>>, vector<8x32xf32>
    %cst_452 = arith.constant dense<0.000000e+00> : vector<8x32xf32>
    %1488 = tpu.matmul %1487, %1486, %cst_452 {dimension_numbers = #tpu.dot_dimension_numbers<[1], [0], [0], [1], [0, 0, 1, 1], [], []>} : vector<8x32xf32>, vector<32x32xf32>, vector<8x32xf32> -> vector<8x32xf32>
    %cst_453 = arith.constant 0.000000e+00 : f32
    %1489 = vector.broadcast %cst_453 : f32 to vector<8x19xf32>
    %1490 = tpu.concatenate %1489, %1488, %1489 in 1 : vector<8x19xf32>, vector<8x32xf32>, vector<8x19xf32> -> vector<8x70xf32>
    %cst_454 = arith.constant 0.000000e+00 : f32
    %1491 = vector.broadcast %cst_454 : f32 to vector<8x32xf32>
    %cst_455 = arith.constant 0.000000e+00 : f32
    %1492 = vector.broadcast %cst_455 : f32 to vector<8x32xf32>
    %cst_456 = arith.constant 0.000000e+00 : f32
    %1493 = vector.broadcast %cst_456 : f32 to vector<8x32xf32>
    %cst_457 = arith.constant 0.000000e+00 : f32
    %1494 = vector.broadcast %cst_457 : f32 to vector<8x32xf32>
    %1495 = vector.extract_strided_slice %1490 {offsets = [0, 4], sizes = [8, 32], strides = [1, 1]} : vector<8x70xf32> to vector<8x32xf32>
    %c15_i32_458 = arith.constant 15 : i32
    %1496 = vector.broadcast %c15_i32_458 : i32 to vector<1x32xi32>
    %1497 = arith.cmpi sge, %0, %1496 : vector<1x32xi32>
    %c31_i32_459 = arith.constant 31 : i32
    %1498 = vector.broadcast %c31_i32_459 : i32 to vector<1x32xi32>
    %1499 = arith.cmpi slt, %0, %1498 : vector<1x32xi32>
    %1500 = arith.andi %1497, %1499 : vector<1x32xi1>
    %cst_460 = arith.constant 0.000000e+00 : f32
    %1501 = vector.shape_cast %1500 : vector<1x32xi1> to vector<1x32xi1>
    %1502 = vector.broadcast %1501 : vector<1x32xi1> to vector<8x32xi1>
    %1503 = vector.broadcast %cst_460 : f32 to vector<8x32xf32>
    %1504 = arith.select %1502, %1495, %1503 : vector<8x32xi1>, vector<8x32xf32>
    %1505 = vector.extract_strided_slice %1490 {offsets = [0, 5], sizes = [8, 32], strides = [1, 1]} : vector<8x70xf32> to vector<8x32xf32>
    %c14_i32_461 = arith.constant 14 : i32
    %1506 = vector.broadcast %c14_i32_461 : i32 to vector<1x32xi32>
    %1507 = arith.cmpi sge, %0, %1506 : vector<1x32xi32>
    %c30_i32_462 = arith.constant 30 : i32
    %1508 = vector.broadcast %c30_i32_462 : i32 to vector<1x32xi32>
    %1509 = arith.cmpi slt, %0, %1508 : vector<1x32xi32>
    %1510 = arith.andi %1507, %1509 : vector<1x32xi1>
    %cst_463 = arith.constant 0.000000e+00 : f32
    %1511 = vector.shape_cast %1510 : vector<1x32xi1> to vector<1x32xi1>
    %1512 = vector.broadcast %1511 : vector<1x32xi1> to vector<8x32xi1>
    %1513 = vector.broadcast %cst_463 : f32 to vector<8x32xf32>
    %1514 = arith.select %1512, %1505, %1513 : vector<8x32xi1>, vector<8x32xf32>
    %1515 = vector.extract_strided_slice %1490 {offsets = [0, 6], sizes = [8, 32], strides = [1, 1]} : vector<8x70xf32> to vector<8x32xf32>
    %c13_i32_464 = arith.constant 13 : i32
    %1516 = vector.broadcast %c13_i32_464 : i32 to vector<1x32xi32>
    %1517 = arith.cmpi sge, %0, %1516 : vector<1x32xi32>
    %c29_i32_465 = arith.constant 29 : i32
    %1518 = vector.broadcast %c29_i32_465 : i32 to vector<1x32xi32>
    %1519 = arith.cmpi slt, %0, %1518 : vector<1x32xi32>
    %1520 = arith.andi %1517, %1519 : vector<1x32xi1>
    %cst_466 = arith.constant 0.000000e+00 : f32
    %1521 = vector.shape_cast %1520 : vector<1x32xi1> to vector<1x32xi1>
    %1522 = vector.broadcast %1521 : vector<1x32xi1> to vector<8x32xi1>
    %1523 = vector.broadcast %cst_466 : f32 to vector<8x32xf32>
    %1524 = arith.select %1522, %1515, %1523 : vector<8x32xi1>, vector<8x32xf32>
    %1525 = vector.extract_strided_slice %1490 {offsets = [0, 7], sizes = [8, 32], strides = [1, 1]} : vector<8x70xf32> to vector<8x32xf32>
    %c12_i32_467 = arith.constant 12 : i32
    %1526 = vector.broadcast %c12_i32_467 : i32 to vector<1x32xi32>
    %1527 = arith.cmpi sge, %0, %1526 : vector<1x32xi32>
    %c28_i32_468 = arith.constant 28 : i32
    %1528 = vector.broadcast %c28_i32_468 : i32 to vector<1x32xi32>
    %1529 = arith.cmpi slt, %0, %1528 : vector<1x32xi32>
    %1530 = arith.andi %1527, %1529 : vector<1x32xi1>
    %cst_469 = arith.constant 0.000000e+00 : f32
    %1531 = vector.shape_cast %1530 : vector<1x32xi1> to vector<1x32xi1>
    %1532 = vector.broadcast %1531 : vector<1x32xi1> to vector<8x32xi1>
    %1533 = vector.broadcast %cst_469 : f32 to vector<8x32xf32>
    %1534 = arith.select %1532, %1525, %1533 : vector<8x32xi1>, vector<8x32xf32>
    %1535 = vector.extract_strided_slice %1490 {offsets = [0, 8], sizes = [8, 32], strides = [1, 1]} : vector<8x70xf32> to vector<8x32xf32>
    %c11_i32_470 = arith.constant 11 : i32
    %1536 = vector.broadcast %c11_i32_470 : i32 to vector<1x32xi32>
    %1537 = arith.cmpi sge, %0, %1536 : vector<1x32xi32>
    %c27_i32_471 = arith.constant 27 : i32
    %1538 = vector.broadcast %c27_i32_471 : i32 to vector<1x32xi32>
    %1539 = arith.cmpi slt, %0, %1538 : vector<1x32xi32>
    %1540 = arith.andi %1537, %1539 : vector<1x32xi1>
    %cst_472 = arith.constant 0.000000e+00 : f32
    %1541 = vector.shape_cast %1540 : vector<1x32xi1> to vector<1x32xi1>
    %1542 = vector.broadcast %1541 : vector<1x32xi1> to vector<8x32xi1>
    %1543 = vector.broadcast %cst_472 : f32 to vector<8x32xf32>
    %1544 = arith.select %1542, %1535, %1543 : vector<8x32xi1>, vector<8x32xf32>
    %1545 = vector.extract_strided_slice %1490 {offsets = [0, 9], sizes = [8, 32], strides = [1, 1]} : vector<8x70xf32> to vector<8x32xf32>
    %c10_i32_473 = arith.constant 10 : i32
    %1546 = vector.broadcast %c10_i32_473 : i32 to vector<1x32xi32>
    %1547 = arith.cmpi sge, %0, %1546 : vector<1x32xi32>
    %c26_i32_474 = arith.constant 26 : i32
    %1548 = vector.broadcast %c26_i32_474 : i32 to vector<1x32xi32>
    %1549 = arith.cmpi slt, %0, %1548 : vector<1x32xi32>
    %1550 = arith.andi %1547, %1549 : vector<1x32xi1>
    %cst_475 = arith.constant 0.000000e+00 : f32
    %1551 = vector.shape_cast %1550 : vector<1x32xi1> to vector<1x32xi1>
    %1552 = vector.broadcast %1551 : vector<1x32xi1> to vector<8x32xi1>
    %1553 = vector.broadcast %cst_475 : f32 to vector<8x32xf32>
    %1554 = arith.select %1552, %1545, %1553 : vector<8x32xi1>, vector<8x32xf32>
    %1555 = vector.extract_strided_slice %1490 {offsets = [0, 10], sizes = [8, 32], strides = [1, 1]} : vector<8x70xf32> to vector<8x32xf32>
    %c9_i32_476 = arith.constant 9 : i32
    %1556 = vector.broadcast %c9_i32_476 : i32 to vector<1x32xi32>
    %1557 = arith.cmpi sge, %0, %1556 : vector<1x32xi32>
    %c25_i32_477 = arith.constant 25 : i32
    %1558 = vector.broadcast %c25_i32_477 : i32 to vector<1x32xi32>
    %1559 = arith.cmpi slt, %0, %1558 : vector<1x32xi32>
    %1560 = arith.andi %1557, %1559 : vector<1x32xi1>
    %cst_478 = arith.constant 0.000000e+00 : f32
    %1561 = vector.shape_cast %1560 : vector<1x32xi1> to vector<1x32xi1>
    %1562 = vector.broadcast %1561 : vector<1x32xi1> to vector<8x32xi1>
    %1563 = vector.broadcast %cst_478 : f32 to vector<8x32xf32>
    %1564 = arith.select %1562, %1555, %1563 : vector<8x32xi1>, vector<8x32xf32>
    %1565 = vector.extract_strided_slice %1490 {offsets = [0, 11], sizes = [8, 32], strides = [1, 1]} : vector<8x70xf32> to vector<8x32xf32>
    %c8_i32_479 = arith.constant 8 : i32
    %1566 = vector.broadcast %c8_i32_479 : i32 to vector<1x32xi32>
    %1567 = arith.cmpi sge, %0, %1566 : vector<1x32xi32>
    %c24_i32_480 = arith.constant 24 : i32
    %1568 = vector.broadcast %c24_i32_480 : i32 to vector<1x32xi32>
    %1569 = arith.cmpi slt, %0, %1568 : vector<1x32xi32>
    %1570 = arith.andi %1567, %1569 : vector<1x32xi1>
    %cst_481 = arith.constant 0.000000e+00 : f32
    %1571 = vector.shape_cast %1570 : vector<1x32xi1> to vector<1x32xi1>
    %1572 = vector.broadcast %1571 : vector<1x32xi1> to vector<8x32xi1>
    %1573 = vector.broadcast %cst_481 : f32 to vector<8x32xf32>
    %1574 = arith.select %1572, %1565, %1573 : vector<8x32xi1>, vector<8x32xf32>
    %1575 = vector.extract_strided_slice %1490 {offsets = [0, 12], sizes = [8, 32], strides = [1, 1]} : vector<8x70xf32> to vector<8x32xf32>
    %c7_i32_482 = arith.constant 7 : i32
    %1576 = vector.broadcast %c7_i32_482 : i32 to vector<1x32xi32>
    %1577 = arith.cmpi sge, %0, %1576 : vector<1x32xi32>
    %c23_i32_483 = arith.constant 23 : i32
    %1578 = vector.broadcast %c23_i32_483 : i32 to vector<1x32xi32>
    %1579 = arith.cmpi slt, %0, %1578 : vector<1x32xi32>
    %1580 = arith.andi %1577, %1579 : vector<1x32xi1>
    %cst_484 = arith.constant 0.000000e+00 : f32
    %1581 = vector.shape_cast %1580 : vector<1x32xi1> to vector<1x32xi1>
    %1582 = vector.broadcast %1581 : vector<1x32xi1> to vector<8x32xi1>
    %1583 = vector.broadcast %cst_484 : f32 to vector<8x32xf32>
    %1584 = arith.select %1582, %1575, %1583 : vector<8x32xi1>, vector<8x32xf32>
    %1585 = vector.extract_strided_slice %1490 {offsets = [0, 13], sizes = [8, 32], strides = [1, 1]} : vector<8x70xf32> to vector<8x32xf32>
    %c6_i32_485 = arith.constant 6 : i32
    %1586 = vector.broadcast %c6_i32_485 : i32 to vector<1x32xi32>
    %1587 = arith.cmpi sge, %0, %1586 : vector<1x32xi32>
    %c22_i32_486 = arith.constant 22 : i32
    %1588 = vector.broadcast %c22_i32_486 : i32 to vector<1x32xi32>
    %1589 = arith.cmpi slt, %0, %1588 : vector<1x32xi32>
    %1590 = arith.andi %1587, %1589 : vector<1x32xi1>
    %cst_487 = arith.constant 0.000000e+00 : f32
    %1591 = vector.shape_cast %1590 : vector<1x32xi1> to vector<1x32xi1>
    %1592 = vector.broadcast %1591 : vector<1x32xi1> to vector<8x32xi1>
    %1593 = vector.broadcast %cst_487 : f32 to vector<8x32xf32>
    %1594 = arith.select %1592, %1585, %1593 : vector<8x32xi1>, vector<8x32xf32>
    %1595 = vector.extract_strided_slice %1490 {offsets = [0, 14], sizes = [8, 32], strides = [1, 1]} : vector<8x70xf32> to vector<8x32xf32>
    %c5_i32_488 = arith.constant 5 : i32
    %1596 = vector.broadcast %c5_i32_488 : i32 to vector<1x32xi32>
    %1597 = arith.cmpi sge, %0, %1596 : vector<1x32xi32>
    %c21_i32_489 = arith.constant 21 : i32
    %1598 = vector.broadcast %c21_i32_489 : i32 to vector<1x32xi32>
    %1599 = arith.cmpi slt, %0, %1598 : vector<1x32xi32>
    %1600 = arith.andi %1597, %1599 : vector<1x32xi1>
    %cst_490 = arith.constant 0.000000e+00 : f32
    %1601 = vector.shape_cast %1600 : vector<1x32xi1> to vector<1x32xi1>
    %1602 = vector.broadcast %1601 : vector<1x32xi1> to vector<8x32xi1>
    %1603 = vector.broadcast %cst_490 : f32 to vector<8x32xf32>
    %1604 = arith.select %1602, %1595, %1603 : vector<8x32xi1>, vector<8x32xf32>
    %1605 = vector.extract_strided_slice %1490 {offsets = [0, 15], sizes = [8, 32], strides = [1, 1]} : vector<8x70xf32> to vector<8x32xf32>
    %c4_i32_491 = arith.constant 4 : i32
    %1606 = vector.broadcast %c4_i32_491 : i32 to vector<1x32xi32>
    %1607 = arith.cmpi sge, %0, %1606 : vector<1x32xi32>
    %c20_i32_492 = arith.constant 20 : i32
    %1608 = vector.broadcast %c20_i32_492 : i32 to vector<1x32xi32>
    %1609 = arith.cmpi slt, %0, %1608 : vector<1x32xi32>
    %1610 = arith.andi %1607, %1609 : vector<1x32xi1>
    %cst_493 = arith.constant 0.000000e+00 : f32
    %1611 = vector.shape_cast %1610 : vector<1x32xi1> to vector<1x32xi1>
    %1612 = vector.broadcast %1611 : vector<1x32xi1> to vector<8x32xi1>
    %1613 = vector.broadcast %cst_493 : f32 to vector<8x32xf32>
    %1614 = arith.select %1612, %1605, %1613 : vector<8x32xi1>, vector<8x32xf32>
    %1615 = vector.extract_strided_slice %1490 {offsets = [0, 16], sizes = [8, 32], strides = [1, 1]} : vector<8x70xf32> to vector<8x32xf32>
    %c3_i32_494 = arith.constant 3 : i32
    %1616 = vector.broadcast %c3_i32_494 : i32 to vector<1x32xi32>
    %1617 = arith.cmpi sge, %0, %1616 : vector<1x32xi32>
    %c19_i32_495 = arith.constant 19 : i32
    %1618 = vector.broadcast %c19_i32_495 : i32 to vector<1x32xi32>
    %1619 = arith.cmpi slt, %0, %1618 : vector<1x32xi32>
    %1620 = arith.andi %1617, %1619 : vector<1x32xi1>
    %cst_496 = arith.constant 0.000000e+00 : f32
    %1621 = vector.shape_cast %1620 : vector<1x32xi1> to vector<1x32xi1>
    %1622 = vector.broadcast %1621 : vector<1x32xi1> to vector<8x32xi1>
    %1623 = vector.broadcast %cst_496 : f32 to vector<8x32xf32>
    %1624 = arith.select %1622, %1615, %1623 : vector<8x32xi1>, vector<8x32xf32>
    %1625 = vector.extract_strided_slice %1490 {offsets = [0, 17], sizes = [8, 32], strides = [1, 1]} : vector<8x70xf32> to vector<8x32xf32>
    %c2_i32_497 = arith.constant 2 : i32
    %1626 = vector.broadcast %c2_i32_497 : i32 to vector<1x32xi32>
    %1627 = arith.cmpi sge, %0, %1626 : vector<1x32xi32>
    %c18_i32_498 = arith.constant 18 : i32
    %1628 = vector.broadcast %c18_i32_498 : i32 to vector<1x32xi32>
    %1629 = arith.cmpi slt, %0, %1628 : vector<1x32xi32>
    %1630 = arith.andi %1627, %1629 : vector<1x32xi1>
    %cst_499 = arith.constant 0.000000e+00 : f32
    %1631 = vector.shape_cast %1630 : vector<1x32xi1> to vector<1x32xi1>
    %1632 = vector.broadcast %1631 : vector<1x32xi1> to vector<8x32xi1>
    %1633 = vector.broadcast %cst_499 : f32 to vector<8x32xf32>
    %1634 = arith.select %1632, %1625, %1633 : vector<8x32xi1>, vector<8x32xf32>
    %1635 = vector.extract_strided_slice %1490 {offsets = [0, 18], sizes = [8, 32], strides = [1, 1]} : vector<8x70xf32> to vector<8x32xf32>
    %c1_i32_500 = arith.constant 1 : i32
    %1636 = vector.broadcast %c1_i32_500 : i32 to vector<1x32xi32>
    %1637 = arith.cmpi sge, %0, %1636 : vector<1x32xi32>
    %c17_i32_501 = arith.constant 17 : i32
    %1638 = vector.broadcast %c17_i32_501 : i32 to vector<1x32xi32>
    %1639 = arith.cmpi slt, %0, %1638 : vector<1x32xi32>
    %1640 = arith.andi %1637, %1639 : vector<1x32xi1>
    %cst_502 = arith.constant 0.000000e+00 : f32
    %1641 = vector.shape_cast %1640 : vector<1x32xi1> to vector<1x32xi1>
    %1642 = vector.broadcast %1641 : vector<1x32xi1> to vector<8x32xi1>
    %1643 = vector.broadcast %cst_502 : f32 to vector<8x32xf32>
    %1644 = arith.select %1642, %1635, %1643 : vector<8x32xi1>, vector<8x32xf32>
    %1645 = vector.extract_strided_slice %1490 {offsets = [0, 19], sizes = [8, 32], strides = [1, 1]} : vector<8x70xf32> to vector<8x32xf32>
    %1646 = vector.extract_strided_slice %1490 {offsets = [0, 20], sizes = [8, 32], strides = [1, 1]} : vector<8x70xf32> to vector<8x32xf32>
    %c-1_i32_503 = arith.constant -1 : i32
    %1647 = vector.broadcast %c-1_i32_503 : i32 to vector<1x32xi32>
    %1648 = arith.cmpi sge, %0, %1647 : vector<1x32xi32>
    %c15_i32_504 = arith.constant 15 : i32
    %1649 = vector.broadcast %c15_i32_504 : i32 to vector<1x32xi32>
    %1650 = arith.cmpi slt, %0, %1649 : vector<1x32xi32>
    %1651 = arith.andi %1648, %1650 : vector<1x32xi1>
    %cst_505 = arith.constant 0.000000e+00 : f32
    %1652 = vector.shape_cast %1651 : vector<1x32xi1> to vector<1x32xi1>
    %1653 = vector.broadcast %1652 : vector<1x32xi1> to vector<8x32xi1>
    %1654 = vector.broadcast %cst_505 : f32 to vector<8x32xf32>
    %1655 = arith.select %1653, %1646, %1654 : vector<8x32xi1>, vector<8x32xf32>
    %1656 = vector.extract_strided_slice %1490 {offsets = [0, 21], sizes = [8, 32], strides = [1, 1]} : vector<8x70xf32> to vector<8x32xf32>
    %c-2_i32_506 = arith.constant -2 : i32
    %1657 = vector.broadcast %c-2_i32_506 : i32 to vector<1x32xi32>
    %1658 = arith.cmpi sge, %0, %1657 : vector<1x32xi32>
    %c14_i32_507 = arith.constant 14 : i32
    %1659 = vector.broadcast %c14_i32_507 : i32 to vector<1x32xi32>
    %1660 = arith.cmpi slt, %0, %1659 : vector<1x32xi32>
    %1661 = arith.andi %1658, %1660 : vector<1x32xi1>
    %cst_508 = arith.constant 0.000000e+00 : f32
    %1662 = vector.shape_cast %1661 : vector<1x32xi1> to vector<1x32xi1>
    %1663 = vector.broadcast %1662 : vector<1x32xi1> to vector<8x32xi1>
    %1664 = vector.broadcast %cst_508 : f32 to vector<8x32xf32>
    %1665 = arith.select %1663, %1656, %1664 : vector<8x32xi1>, vector<8x32xf32>
    %1666 = vector.extract_strided_slice %1490 {offsets = [0, 22], sizes = [8, 32], strides = [1, 1]} : vector<8x70xf32> to vector<8x32xf32>
    %c-3_i32_509 = arith.constant -3 : i32
    %1667 = vector.broadcast %c-3_i32_509 : i32 to vector<1x32xi32>
    %1668 = arith.cmpi sge, %0, %1667 : vector<1x32xi32>
    %c13_i32_510 = arith.constant 13 : i32
    %1669 = vector.broadcast %c13_i32_510 : i32 to vector<1x32xi32>
    %1670 = arith.cmpi slt, %0, %1669 : vector<1x32xi32>
    %1671 = arith.andi %1668, %1670 : vector<1x32xi1>
    %cst_511 = arith.constant 0.000000e+00 : f32
    %1672 = vector.shape_cast %1671 : vector<1x32xi1> to vector<1x32xi1>
    %1673 = vector.broadcast %1672 : vector<1x32xi1> to vector<8x32xi1>
    %1674 = vector.broadcast %cst_511 : f32 to vector<8x32xf32>
    %1675 = arith.select %1673, %1666, %1674 : vector<8x32xi1>, vector<8x32xf32>
    %1676 = vector.extract_strided_slice %1490 {offsets = [0, 23], sizes = [8, 32], strides = [1, 1]} : vector<8x70xf32> to vector<8x32xf32>
    %c-4_i32_512 = arith.constant -4 : i32
    %1677 = vector.broadcast %c-4_i32_512 : i32 to vector<1x32xi32>
    %1678 = arith.cmpi sge, %0, %1677 : vector<1x32xi32>
    %c12_i32_513 = arith.constant 12 : i32
    %1679 = vector.broadcast %c12_i32_513 : i32 to vector<1x32xi32>
    %1680 = arith.cmpi slt, %0, %1679 : vector<1x32xi32>
    %1681 = arith.andi %1678, %1680 : vector<1x32xi1>
    %cst_514 = arith.constant 0.000000e+00 : f32
    %1682 = vector.shape_cast %1681 : vector<1x32xi1> to vector<1x32xi1>
    %1683 = vector.broadcast %1682 : vector<1x32xi1> to vector<8x32xi1>
    %1684 = vector.broadcast %cst_514 : f32 to vector<8x32xf32>
    %1685 = arith.select %1683, %1676, %1684 : vector<8x32xi1>, vector<8x32xf32>
    %1686 = vector.extract_strided_slice %1490 {offsets = [0, 24], sizes = [8, 32], strides = [1, 1]} : vector<8x70xf32> to vector<8x32xf32>
    %c-5_i32_515 = arith.constant -5 : i32
    %1687 = vector.broadcast %c-5_i32_515 : i32 to vector<1x32xi32>
    %1688 = arith.cmpi sge, %0, %1687 : vector<1x32xi32>
    %c11_i32_516 = arith.constant 11 : i32
    %1689 = vector.broadcast %c11_i32_516 : i32 to vector<1x32xi32>
    %1690 = arith.cmpi slt, %0, %1689 : vector<1x32xi32>
    %1691 = arith.andi %1688, %1690 : vector<1x32xi1>
    %cst_517 = arith.constant 0.000000e+00 : f32
    %1692 = vector.shape_cast %1691 : vector<1x32xi1> to vector<1x32xi1>
    %1693 = vector.broadcast %1692 : vector<1x32xi1> to vector<8x32xi1>
    %1694 = vector.broadcast %cst_517 : f32 to vector<8x32xf32>
    %1695 = arith.select %1693, %1686, %1694 : vector<8x32xi1>, vector<8x32xf32>
    %1696 = vector.extract_strided_slice %1490 {offsets = [0, 25], sizes = [8, 32], strides = [1, 1]} : vector<8x70xf32> to vector<8x32xf32>
    %c-6_i32_518 = arith.constant -6 : i32
    %1697 = vector.broadcast %c-6_i32_518 : i32 to vector<1x32xi32>
    %1698 = arith.cmpi sge, %0, %1697 : vector<1x32xi32>
    %c10_i32_519 = arith.constant 10 : i32
    %1699 = vector.broadcast %c10_i32_519 : i32 to vector<1x32xi32>
    %1700 = arith.cmpi slt, %0, %1699 : vector<1x32xi32>
    %1701 = arith.andi %1698, %1700 : vector<1x32xi1>
    %cst_520 = arith.constant 0.000000e+00 : f32
    %1702 = vector.shape_cast %1701 : vector<1x32xi1> to vector<1x32xi1>
    %1703 = vector.broadcast %1702 : vector<1x32xi1> to vector<8x32xi1>
    %1704 = vector.broadcast %cst_520 : f32 to vector<8x32xf32>
    %1705 = arith.select %1703, %1696, %1704 : vector<8x32xi1>, vector<8x32xf32>
    %1706 = vector.extract_strided_slice %1490 {offsets = [0, 26], sizes = [8, 32], strides = [1, 1]} : vector<8x70xf32> to vector<8x32xf32>
    %c-7_i32_521 = arith.constant -7 : i32
    %1707 = vector.broadcast %c-7_i32_521 : i32 to vector<1x32xi32>
    %1708 = arith.cmpi sge, %0, %1707 : vector<1x32xi32>
    %c9_i32_522 = arith.constant 9 : i32
    %1709 = vector.broadcast %c9_i32_522 : i32 to vector<1x32xi32>
    %1710 = arith.cmpi slt, %0, %1709 : vector<1x32xi32>
    %1711 = arith.andi %1708, %1710 : vector<1x32xi1>
    %cst_523 = arith.constant 0.000000e+00 : f32
    %1712 = vector.shape_cast %1711 : vector<1x32xi1> to vector<1x32xi1>
    %1713 = vector.broadcast %1712 : vector<1x32xi1> to vector<8x32xi1>
    %1714 = vector.broadcast %cst_523 : f32 to vector<8x32xf32>
    %1715 = arith.select %1713, %1706, %1714 : vector<8x32xi1>, vector<8x32xf32>
    %1716 = vector.extract_strided_slice %1490 {offsets = [0, 27], sizes = [8, 32], strides = [1, 1]} : vector<8x70xf32> to vector<8x32xf32>
    %c-8_i32_524 = arith.constant -8 : i32
    %1717 = vector.broadcast %c-8_i32_524 : i32 to vector<1x32xi32>
    %1718 = arith.cmpi sge, %0, %1717 : vector<1x32xi32>
    %c8_i32_525 = arith.constant 8 : i32
    %1719 = vector.broadcast %c8_i32_525 : i32 to vector<1x32xi32>
    %1720 = arith.cmpi slt, %0, %1719 : vector<1x32xi32>
    %1721 = arith.andi %1718, %1720 : vector<1x32xi1>
    %cst_526 = arith.constant 0.000000e+00 : f32
    %1722 = vector.shape_cast %1721 : vector<1x32xi1> to vector<1x32xi1>
    %1723 = vector.broadcast %1722 : vector<1x32xi1> to vector<8x32xi1>
    %1724 = vector.broadcast %cst_526 : f32 to vector<8x32xf32>
    %1725 = arith.select %1723, %1716, %1724 : vector<8x32xi1>, vector<8x32xf32>
    %1726 = vector.extract_strided_slice %1490 {offsets = [0, 28], sizes = [8, 32], strides = [1, 1]} : vector<8x70xf32> to vector<8x32xf32>
    %c-9_i32_527 = arith.constant -9 : i32
    %1727 = vector.broadcast %c-9_i32_527 : i32 to vector<1x32xi32>
    %1728 = arith.cmpi sge, %0, %1727 : vector<1x32xi32>
    %c7_i32_528 = arith.constant 7 : i32
    %1729 = vector.broadcast %c7_i32_528 : i32 to vector<1x32xi32>
    %1730 = arith.cmpi slt, %0, %1729 : vector<1x32xi32>
    %1731 = arith.andi %1728, %1730 : vector<1x32xi1>
    %cst_529 = arith.constant 0.000000e+00 : f32
    %1732 = vector.shape_cast %1731 : vector<1x32xi1> to vector<1x32xi1>
    %1733 = vector.broadcast %1732 : vector<1x32xi1> to vector<8x32xi1>
    %1734 = vector.broadcast %cst_529 : f32 to vector<8x32xf32>
    %1735 = arith.select %1733, %1726, %1734 : vector<8x32xi1>, vector<8x32xf32>
    %1736 = vector.extract_strided_slice %1490 {offsets = [0, 29], sizes = [8, 32], strides = [1, 1]} : vector<8x70xf32> to vector<8x32xf32>
    %c-10_i32_530 = arith.constant -10 : i32
    %1737 = vector.broadcast %c-10_i32_530 : i32 to vector<1x32xi32>
    %1738 = arith.cmpi sge, %0, %1737 : vector<1x32xi32>
    %c6_i32_531 = arith.constant 6 : i32
    %1739 = vector.broadcast %c6_i32_531 : i32 to vector<1x32xi32>
    %1740 = arith.cmpi slt, %0, %1739 : vector<1x32xi32>
    %1741 = arith.andi %1738, %1740 : vector<1x32xi1>
    %cst_532 = arith.constant 0.000000e+00 : f32
    %1742 = vector.shape_cast %1741 : vector<1x32xi1> to vector<1x32xi1>
    %1743 = vector.broadcast %1742 : vector<1x32xi1> to vector<8x32xi1>
    %1744 = vector.broadcast %cst_532 : f32 to vector<8x32xf32>
    %1745 = arith.select %1743, %1736, %1744 : vector<8x32xi1>, vector<8x32xf32>
    %1746 = vector.extract_strided_slice %1490 {offsets = [0, 30], sizes = [8, 32], strides = [1, 1]} : vector<8x70xf32> to vector<8x32xf32>
    %c-11_i32_533 = arith.constant -11 : i32
    %1747 = vector.broadcast %c-11_i32_533 : i32 to vector<1x32xi32>
    %1748 = arith.cmpi sge, %0, %1747 : vector<1x32xi32>
    %c5_i32_534 = arith.constant 5 : i32
    %1749 = vector.broadcast %c5_i32_534 : i32 to vector<1x32xi32>
    %1750 = arith.cmpi slt, %0, %1749 : vector<1x32xi32>
    %1751 = arith.andi %1748, %1750 : vector<1x32xi1>
    %cst_535 = arith.constant 0.000000e+00 : f32
    %1752 = vector.shape_cast %1751 : vector<1x32xi1> to vector<1x32xi1>
    %1753 = vector.broadcast %1752 : vector<1x32xi1> to vector<8x32xi1>
    %1754 = vector.broadcast %cst_535 : f32 to vector<8x32xf32>
    %1755 = arith.select %1753, %1746, %1754 : vector<8x32xi1>, vector<8x32xf32>
    %1756 = vector.extract_strided_slice %1490 {offsets = [0, 31], sizes = [8, 32], strides = [1, 1]} : vector<8x70xf32> to vector<8x32xf32>
    %c-12_i32_536 = arith.constant -12 : i32
    %1757 = vector.broadcast %c-12_i32_536 : i32 to vector<1x32xi32>
    %1758 = arith.cmpi sge, %0, %1757 : vector<1x32xi32>
    %c4_i32_537 = arith.constant 4 : i32
    %1759 = vector.broadcast %c4_i32_537 : i32 to vector<1x32xi32>
    %1760 = arith.cmpi slt, %0, %1759 : vector<1x32xi32>
    %1761 = arith.andi %1758, %1760 : vector<1x32xi1>
    %cst_538 = arith.constant 0.000000e+00 : f32
    %1762 = vector.shape_cast %1761 : vector<1x32xi1> to vector<1x32xi1>
    %1763 = vector.broadcast %1762 : vector<1x32xi1> to vector<8x32xi1>
    %1764 = vector.broadcast %cst_538 : f32 to vector<8x32xf32>
    %1765 = arith.select %1763, %1756, %1764 : vector<8x32xi1>, vector<8x32xf32>
    %1766 = vector.extract_strided_slice %1490 {offsets = [0, 32], sizes = [8, 32], strides = [1, 1]} : vector<8x70xf32> to vector<8x32xf32>
    %c-13_i32_539 = arith.constant -13 : i32
    %1767 = vector.broadcast %c-13_i32_539 : i32 to vector<1x32xi32>
    %1768 = arith.cmpi sge, %0, %1767 : vector<1x32xi32>
    %c3_i32_540 = arith.constant 3 : i32
    %1769 = vector.broadcast %c3_i32_540 : i32 to vector<1x32xi32>
    %1770 = arith.cmpi slt, %0, %1769 : vector<1x32xi32>
    %1771 = arith.andi %1768, %1770 : vector<1x32xi1>
    %cst_541 = arith.constant 0.000000e+00 : f32
    %1772 = vector.shape_cast %1771 : vector<1x32xi1> to vector<1x32xi1>
    %1773 = vector.broadcast %1772 : vector<1x32xi1> to vector<8x32xi1>
    %1774 = vector.broadcast %cst_541 : f32 to vector<8x32xf32>
    %1775 = arith.select %1773, %1766, %1774 : vector<8x32xi1>, vector<8x32xf32>
    %1776 = vector.extract_strided_slice %1490 {offsets = [0, 33], sizes = [8, 32], strides = [1, 1]} : vector<8x70xf32> to vector<8x32xf32>
    %c-14_i32_542 = arith.constant -14 : i32
    %1777 = vector.broadcast %c-14_i32_542 : i32 to vector<1x32xi32>
    %1778 = arith.cmpi sge, %0, %1777 : vector<1x32xi32>
    %c2_i32_543 = arith.constant 2 : i32
    %1779 = vector.broadcast %c2_i32_543 : i32 to vector<1x32xi32>
    %1780 = arith.cmpi slt, %0, %1779 : vector<1x32xi32>
    %1781 = arith.andi %1778, %1780 : vector<1x32xi1>
    %cst_544 = arith.constant 0.000000e+00 : f32
    %1782 = vector.shape_cast %1781 : vector<1x32xi1> to vector<1x32xi1>
    %1783 = vector.broadcast %1782 : vector<1x32xi1> to vector<8x32xi1>
    %1784 = vector.broadcast %cst_544 : f32 to vector<8x32xf32>
    %1785 = arith.select %1783, %1776, %1784 : vector<8x32xi1>, vector<8x32xf32>
    %1786 = vector.extract_strided_slice %1490 {offsets = [0, 34], sizes = [8, 32], strides = [1, 1]} : vector<8x70xf32> to vector<8x32xf32>
    %c-15_i32_545 = arith.constant -15 : i32
    %1787 = vector.broadcast %c-15_i32_545 : i32 to vector<1x32xi32>
    %1788 = arith.cmpi sge, %0, %1787 : vector<1x32xi32>
    %c1_i32_546 = arith.constant 1 : i32
    %1789 = vector.broadcast %c1_i32_546 : i32 to vector<1x32xi32>
    %1790 = arith.cmpi slt, %0, %1789 : vector<1x32xi32>
    %1791 = arith.andi %1788, %1790 : vector<1x32xi1>
    %cst_547 = arith.constant 0.000000e+00 : f32
    %1792 = vector.shape_cast %1791 : vector<1x32xi1> to vector<1x32xi1>
    %1793 = vector.broadcast %1792 : vector<1x32xi1> to vector<8x32xi1>
    %1794 = vector.broadcast %cst_547 : f32 to vector<8x32xf32>
    %1795 = arith.select %1793, %1786, %1794 : vector<8x32xi1>, vector<8x32xf32>
    %cst_548 = arith.constant 0.000000e+00 : f32
    %1796 = vector.broadcast %cst_548 : f32 to vector<8x32xf32>
    %cst_549 = arith.constant 0.000000e+00 : f32
    %1797 = vector.broadcast %cst_549 : f32 to vector<8x32xf32>
    %cst_550 = arith.constant 0.000000e+00 : f32
    %1798 = vector.broadcast %cst_550 : f32 to vector<8x32xf32>
    %cst_551 = arith.constant 0.000000e+00 : f32
    %1799 = vector.broadcast %cst_551 : f32 to vector<8x32xf32>
    %cst_552 = arith.constant 0xFF800000 : f32
    %1800 = vector.broadcast %cst_552 : f32 to vector<32x1xf32>
    %1801 = tpu.concatenate %1800, %1486, %1800 in 1 : vector<32x1xf32>, vector<32x32xf32>, vector<32x1xf32> -> vector<32x34xf32>
    %c1_i32_553 = arith.constant 1 : i32
    %1802 = vector.broadcast %c1_i32_553 : i32 to vector<1x32xi32>
    %1803 = arith.cmpi sge, %0, %1802 : vector<1x32xi32>
    %1804 = vector.extract_strided_slice %1801 {offsets = [0, 0], sizes = [32, 32], strides = [1, 1]} : vector<32x34xf32> to vector<32x32xf32>
    %cst_554 = arith.constant 0xFF800000 : f32
    %1805 = vector.shape_cast %1803 : vector<1x32xi1> to vector<1x32xi1>
    %1806 = vector.broadcast %1805 : vector<1x32xi1> to vector<32x32xi1>
    %1807 = vector.broadcast %cst_554 : f32 to vector<32x32xf32>
    %1808 = arith.select %1806, %1804, %1807 : vector<32x32xi1>, vector<32x32xf32>
    %1809 = vector.extract_strided_slice %1801 {offsets = [0, 1], sizes = [32, 32], strides = [1, 1]} : vector<32x34xf32> to vector<32x32xf32>
    %c14_i32_555 = arith.constant 14 : i32
    %1810 = vector.broadcast %c14_i32_555 : i32 to vector<1x32xi32>
    %1811 = arith.cmpi sle, %0, %1810 : vector<1x32xi32>
    %1812 = vector.extract_strided_slice %1801 {offsets = [0, 2], sizes = [32, 32], strides = [1, 1]} : vector<32x34xf32> to vector<32x32xf32>
    %cst_556 = arith.constant 0xFF800000 : f32
    %1813 = vector.shape_cast %1811 : vector<1x32xi1> to vector<1x32xi1>
    %1814 = vector.broadcast %1813 : vector<1x32xi1> to vector<32x32xi1>
    %1815 = vector.broadcast %cst_556 : f32 to vector<32x32xf32>
    %1816 = arith.select %1814, %1812, %1815 : vector<32x32xi1>, vector<32x32xf32>
    %1817 = arith.maximumf %1808, %1809 : vector<32x32xf32>
    %1818 = arith.maximumf %1817, %1816 : vector<32x32xf32>
    %1819 = tpu.concatenate %1491, %1492, %1493, %1494, %1504, %1514, %1524, %1534, %1544, %1554, %1564, %1574, %1584, %1594, %1604, %1614 in 0 : vector<8x32xf32>, vector<8x32xf32>, vector<8x32xf32>, vector<8x32xf32>, vector<8x32xf32>, vector<8x32xf32>, vector<8x32xf32>, vector<8x32xf32>, vector<8x32xf32>, vector<8x32xf32>, vector<8x32xf32>, vector<8x32xf32>, vector<8x32xf32>, vector<8x32xf32>, vector<8x32xf32>, vector<8x32xf32> -> vector<128x32xf32>
    %1820 = tpu.concatenate %1624, %1634, %1644, %1645, %1655, %1665, %1675, %1685, %1695, %1705, %1715, %1725, %1735, %1745, %1755, %1765 in 0 : vector<8x32xf32>, vector<8x32xf32>, vector<8x32xf32>, vector<8x32xf32>, vector<8x32xf32>, vector<8x32xf32>, vector<8x32xf32>, vector<8x32xf32>, vector<8x32xf32>, vector<8x32xf32>, vector<8x32xf32>, vector<8x32xf32>, vector<8x32xf32>, vector<8x32xf32>, vector<8x32xf32>, vector<8x32xf32> -> vector<128x32xf32>
    %1821 = tpu.concatenate %1775, %1785, %1795, %1796, %1797, %1798, %1799, %1818 in 0 : vector<8x32xf32>, vector<8x32xf32>, vector<8x32xf32>, vector<8x32xf32>, vector<8x32xf32>, vector<8x32xf32>, vector<8x32xf32>, vector<32x32xf32> -> vector<88x32xf32>
    %1822 = tpu.concatenate %1819, %1820, %1821 in 0 : vector<128x32xf32>, vector<128x32xf32>, vector<88x32xf32> -> vector<344x32xf32>
    %c0_557 = arith.constant 0 : index
    %c0_558 = arith.constant 0 : index
    %1823 = vector.load %arg19[%c0_557, %c0_558] : memref<32x344xf32, #tpu.memory_space<vmem>>, vector<32x344xf32>
    %cst_559 = arith.constant dense<0.000000e+00> : vector<32x32xf32>
    %1824 = tpu.matmul %1823, %1822, %cst_559 {dimension_numbers = #tpu.dot_dimension_numbers<[1], [0], [0], [1], [0, 0, 1, 1], [], []>} : vector<32x344xf32>, vector<344x32xf32>, vector<32x32xf32> -> vector<32x32xf32>
    %cst_560 = arith.constant dense<0.000000e+00> : vector<32xf32>
    %1825 = vector.multi_reduction <add>, %1824, %cst_560 [1] : vector<32x32xf32> to vector<32xf32>
    %1826 = vector.shape_cast %1825 : vector<32xf32> to vector<32x1xf32>
    %cst_561 = arith.constant 3.200000e+01 : f32
    %1827 = vector.broadcast %cst_561 : f32 to vector<32x1xf32>
    %1828 = arith.divf %1826, %1827 : vector<32x1xf32>
    %1829 = vector.broadcast %1828 : vector<32x1xf32> to vector<32x32xf32>
    %1830 = arith.subf %1824, %1829 : vector<32x32xf32>
    %1831 = arith.mulf %1830, %1830 : vector<32x32xf32>
    %cst_562 = arith.constant dense<0.000000e+00> : vector<32xf32>
    %1832 = vector.multi_reduction <add>, %1831, %cst_562 [1] : vector<32x32xf32> to vector<32xf32>
    %1833 = vector.shape_cast %1832 : vector<32xf32> to vector<32x1xf32>
    %cst_563 = arith.constant 3.200000e+01 : f32
    %1834 = vector.broadcast %cst_563 : f32 to vector<32x1xf32>
    %1835 = arith.divf %1833, %1834 : vector<32x1xf32>
    %1836 = vector.broadcast %1828 : vector<32x1xf32> to vector<32x32xf32>
    %1837 = arith.subf %1824, %1836 : vector<32x32xf32>
    %cst_564 = arith.constant 9.99999974E-6 : f32
    %1838 = vector.broadcast %cst_564 : f32 to vector<32x1xf32>
    %1839 = arith.addf %1835, %1838 : vector<32x1xf32>
    %1840 = math.rsqrt %1839 : vector<32x1xf32>
    %1841 = vector.broadcast %1840 : vector<32x1xf32> to vector<32x32xf32>
    %1842 = arith.mulf %1837, %1841 : vector<32x32xf32>
    %c0_565 = arith.constant 0 : index
    %c0_566 = arith.constant 0 : index
    %1843 = vector.load %arg20[%c0_565, %c0_566] : memref<32x1xf32, #tpu.memory_space<vmem>>, vector<32x1xf32>
    %1844 = vector.broadcast %1843 : vector<32x1xf32> to vector<32x32xf32>
    %1845 = arith.mulf %1842, %1844 : vector<32x32xf32>
    %c0_567 = arith.constant 0 : index
    %c0_568 = arith.constant 0 : index
    %1846 = vector.load %arg21[%c0_567, %c0_568] : memref<32x1xf32, #tpu.memory_space<vmem>>, vector<32x1xf32>
    %1847 = vector.broadcast %1846 : vector<32x1xf32> to vector<32x32xf32>
    %1848 = arith.addf %1845, %1847 : vector<32x32xf32>
    %cst_569 = arith.constant 0.000000e+00 : f32
    %1849 = vector.broadcast %cst_569 : f32 to vector<32x32xf32>
    %1850 = arith.maximumf %1848, %1849 : vector<32x32xf32>
    %c0_570 = arith.constant 0 : index
    %c0_571 = arith.constant 0 : index
    %1851 = vector.load %arg22[%c0_570, %c0_571] : memref<8x32xf32, #tpu.memory_space<vmem>>, vector<8x32xf32>
    %cst_572 = arith.constant dense<0.000000e+00> : vector<8x32xf32>
    %1852 = tpu.matmul %1851, %1850, %cst_572 {dimension_numbers = #tpu.dot_dimension_numbers<[1], [0], [0], [1], [0, 0, 1, 1], [], []>} : vector<8x32xf32>, vector<32x32xf32>, vector<8x32xf32> -> vector<8x32xf32>
    %cst_573 = arith.constant 0.000000e+00 : f32
    %1853 = vector.broadcast %cst_573 : f32 to vector<8x19xf32>
    %1854 = tpu.concatenate %1853, %1852, %1853 in 1 : vector<8x19xf32>, vector<8x32xf32>, vector<8x19xf32> -> vector<8x70xf32>
    %cst_574 = arith.constant 0.000000e+00 : f32
    %1855 = vector.broadcast %cst_574 : f32 to vector<8x32xf32>
    %cst_575 = arith.constant 0.000000e+00 : f32
    %1856 = vector.broadcast %cst_575 : f32 to vector<8x32xf32>
    %cst_576 = arith.constant 0.000000e+00 : f32
    %1857 = vector.broadcast %cst_576 : f32 to vector<8x32xf32>
    %cst_577 = arith.constant 0.000000e+00 : f32
    %1858 = vector.broadcast %cst_577 : f32 to vector<8x32xf32>
    %1859 = vector.extract_strided_slice %1854 {offsets = [0, 4], sizes = [8, 32], strides = [1, 1]} : vector<8x70xf32> to vector<8x32xf32>
    %c15_i32_578 = arith.constant 15 : i32
    %1860 = vector.broadcast %c15_i32_578 : i32 to vector<1x32xi32>
    %1861 = arith.cmpi sge, %0, %1860 : vector<1x32xi32>
    %c31_i32_579 = arith.constant 31 : i32
    %1862 = vector.broadcast %c31_i32_579 : i32 to vector<1x32xi32>
    %1863 = arith.cmpi slt, %0, %1862 : vector<1x32xi32>
    %1864 = arith.andi %1861, %1863 : vector<1x32xi1>
    %cst_580 = arith.constant 0.000000e+00 : f32
    %1865 = vector.shape_cast %1864 : vector<1x32xi1> to vector<1x32xi1>
    %1866 = vector.broadcast %1865 : vector<1x32xi1> to vector<8x32xi1>
    %1867 = vector.broadcast %cst_580 : f32 to vector<8x32xf32>
    %1868 = arith.select %1866, %1859, %1867 : vector<8x32xi1>, vector<8x32xf32>
    %1869 = vector.extract_strided_slice %1854 {offsets = [0, 5], sizes = [8, 32], strides = [1, 1]} : vector<8x70xf32> to vector<8x32xf32>
    %c14_i32_581 = arith.constant 14 : i32
    %1870 = vector.broadcast %c14_i32_581 : i32 to vector<1x32xi32>
    %1871 = arith.cmpi sge, %0, %1870 : vector<1x32xi32>
    %c30_i32_582 = arith.constant 30 : i32
    %1872 = vector.broadcast %c30_i32_582 : i32 to vector<1x32xi32>
    %1873 = arith.cmpi slt, %0, %1872 : vector<1x32xi32>
    %1874 = arith.andi %1871, %1873 : vector<1x32xi1>
    %cst_583 = arith.constant 0.000000e+00 : f32
    %1875 = vector.shape_cast %1874 : vector<1x32xi1> to vector<1x32xi1>
    %1876 = vector.broadcast %1875 : vector<1x32xi1> to vector<8x32xi1>
    %1877 = vector.broadcast %cst_583 : f32 to vector<8x32xf32>
    %1878 = arith.select %1876, %1869, %1877 : vector<8x32xi1>, vector<8x32xf32>
    %1879 = vector.extract_strided_slice %1854 {offsets = [0, 6], sizes = [8, 32], strides = [1, 1]} : vector<8x70xf32> to vector<8x32xf32>
    %c13_i32_584 = arith.constant 13 : i32
    %1880 = vector.broadcast %c13_i32_584 : i32 to vector<1x32xi32>
    %1881 = arith.cmpi sge, %0, %1880 : vector<1x32xi32>
    %c29_i32_585 = arith.constant 29 : i32
    %1882 = vector.broadcast %c29_i32_585 : i32 to vector<1x32xi32>
    %1883 = arith.cmpi slt, %0, %1882 : vector<1x32xi32>
    %1884 = arith.andi %1881, %1883 : vector<1x32xi1>
    %cst_586 = arith.constant 0.000000e+00 : f32
    %1885 = vector.shape_cast %1884 : vector<1x32xi1> to vector<1x32xi1>
    %1886 = vector.broadcast %1885 : vector<1x32xi1> to vector<8x32xi1>
    %1887 = vector.broadcast %cst_586 : f32 to vector<8x32xf32>
    %1888 = arith.select %1886, %1879, %1887 : vector<8x32xi1>, vector<8x32xf32>
    %1889 = vector.extract_strided_slice %1854 {offsets = [0, 7], sizes = [8, 32], strides = [1, 1]} : vector<8x70xf32> to vector<8x32xf32>
    %c12_i32_587 = arith.constant 12 : i32
    %1890 = vector.broadcast %c12_i32_587 : i32 to vector<1x32xi32>
    %1891 = arith.cmpi sge, %0, %1890 : vector<1x32xi32>
    %c28_i32_588 = arith.constant 28 : i32
    %1892 = vector.broadcast %c28_i32_588 : i32 to vector<1x32xi32>
    %1893 = arith.cmpi slt, %0, %1892 : vector<1x32xi32>
    %1894 = arith.andi %1891, %1893 : vector<1x32xi1>
    %cst_589 = arith.constant 0.000000e+00 : f32
    %1895 = vector.shape_cast %1894 : vector<1x32xi1> to vector<1x32xi1>
    %1896 = vector.broadcast %1895 : vector<1x32xi1> to vector<8x32xi1>
    %1897 = vector.broadcast %cst_589 : f32 to vector<8x32xf32>
    %1898 = arith.select %1896, %1889, %1897 : vector<8x32xi1>, vector<8x32xf32>
    %1899 = vector.extract_strided_slice %1854 {offsets = [0, 8], sizes = [8, 32], strides = [1, 1]} : vector<8x70xf32> to vector<8x32xf32>
    %c11_i32_590 = arith.constant 11 : i32
    %1900 = vector.broadcast %c11_i32_590 : i32 to vector<1x32xi32>
    %1901 = arith.cmpi sge, %0, %1900 : vector<1x32xi32>
    %c27_i32_591 = arith.constant 27 : i32
    %1902 = vector.broadcast %c27_i32_591 : i32 to vector<1x32xi32>
    %1903 = arith.cmpi slt, %0, %1902 : vector<1x32xi32>
    %1904 = arith.andi %1901, %1903 : vector<1x32xi1>
    %cst_592 = arith.constant 0.000000e+00 : f32
    %1905 = vector.shape_cast %1904 : vector<1x32xi1> to vector<1x32xi1>
    %1906 = vector.broadcast %1905 : vector<1x32xi1> to vector<8x32xi1>
    %1907 = vector.broadcast %cst_592 : f32 to vector<8x32xf32>
    %1908 = arith.select %1906, %1899, %1907 : vector<8x32xi1>, vector<8x32xf32>
    %1909 = vector.extract_strided_slice %1854 {offsets = [0, 9], sizes = [8, 32], strides = [1, 1]} : vector<8x70xf32> to vector<8x32xf32>
    %c10_i32_593 = arith.constant 10 : i32
    %1910 = vector.broadcast %c10_i32_593 : i32 to vector<1x32xi32>
    %1911 = arith.cmpi sge, %0, %1910 : vector<1x32xi32>
    %c26_i32_594 = arith.constant 26 : i32
    %1912 = vector.broadcast %c26_i32_594 : i32 to vector<1x32xi32>
    %1913 = arith.cmpi slt, %0, %1912 : vector<1x32xi32>
    %1914 = arith.andi %1911, %1913 : vector<1x32xi1>
    %cst_595 = arith.constant 0.000000e+00 : f32
    %1915 = vector.shape_cast %1914 : vector<1x32xi1> to vector<1x32xi1>
    %1916 = vector.broadcast %1915 : vector<1x32xi1> to vector<8x32xi1>
    %1917 = vector.broadcast %cst_595 : f32 to vector<8x32xf32>
    %1918 = arith.select %1916, %1909, %1917 : vector<8x32xi1>, vector<8x32xf32>
    %1919 = vector.extract_strided_slice %1854 {offsets = [0, 10], sizes = [8, 32], strides = [1, 1]} : vector<8x70xf32> to vector<8x32xf32>
    %c9_i32_596 = arith.constant 9 : i32
    %1920 = vector.broadcast %c9_i32_596 : i32 to vector<1x32xi32>
    %1921 = arith.cmpi sge, %0, %1920 : vector<1x32xi32>
    %c25_i32_597 = arith.constant 25 : i32
    %1922 = vector.broadcast %c25_i32_597 : i32 to vector<1x32xi32>
    %1923 = arith.cmpi slt, %0, %1922 : vector<1x32xi32>
    %1924 = arith.andi %1921, %1923 : vector<1x32xi1>
    %cst_598 = arith.constant 0.000000e+00 : f32
    %1925 = vector.shape_cast %1924 : vector<1x32xi1> to vector<1x32xi1>
    %1926 = vector.broadcast %1925 : vector<1x32xi1> to vector<8x32xi1>
    %1927 = vector.broadcast %cst_598 : f32 to vector<8x32xf32>
    %1928 = arith.select %1926, %1919, %1927 : vector<8x32xi1>, vector<8x32xf32>
    %1929 = vector.extract_strided_slice %1854 {offsets = [0, 11], sizes = [8, 32], strides = [1, 1]} : vector<8x70xf32> to vector<8x32xf32>
    %c8_i32_599 = arith.constant 8 : i32
    %1930 = vector.broadcast %c8_i32_599 : i32 to vector<1x32xi32>
    %1931 = arith.cmpi sge, %0, %1930 : vector<1x32xi32>
    %c24_i32_600 = arith.constant 24 : i32
    %1932 = vector.broadcast %c24_i32_600 : i32 to vector<1x32xi32>
    %1933 = arith.cmpi slt, %0, %1932 : vector<1x32xi32>
    %1934 = arith.andi %1931, %1933 : vector<1x32xi1>
    %cst_601 = arith.constant 0.000000e+00 : f32
    %1935 = vector.shape_cast %1934 : vector<1x32xi1> to vector<1x32xi1>
    %1936 = vector.broadcast %1935 : vector<1x32xi1> to vector<8x32xi1>
    %1937 = vector.broadcast %cst_601 : f32 to vector<8x32xf32>
    %1938 = arith.select %1936, %1929, %1937 : vector<8x32xi1>, vector<8x32xf32>
    %1939 = vector.extract_strided_slice %1854 {offsets = [0, 12], sizes = [8, 32], strides = [1, 1]} : vector<8x70xf32> to vector<8x32xf32>
    %c7_i32_602 = arith.constant 7 : i32
    %1940 = vector.broadcast %c7_i32_602 : i32 to vector<1x32xi32>
    %1941 = arith.cmpi sge, %0, %1940 : vector<1x32xi32>
    %c23_i32_603 = arith.constant 23 : i32
    %1942 = vector.broadcast %c23_i32_603 : i32 to vector<1x32xi32>
    %1943 = arith.cmpi slt, %0, %1942 : vector<1x32xi32>
    %1944 = arith.andi %1941, %1943 : vector<1x32xi1>
    %cst_604 = arith.constant 0.000000e+00 : f32
    %1945 = vector.shape_cast %1944 : vector<1x32xi1> to vector<1x32xi1>
    %1946 = vector.broadcast %1945 : vector<1x32xi1> to vector<8x32xi1>
    %1947 = vector.broadcast %cst_604 : f32 to vector<8x32xf32>
    %1948 = arith.select %1946, %1939, %1947 : vector<8x32xi1>, vector<8x32xf32>
    %1949 = vector.extract_strided_slice %1854 {offsets = [0, 13], sizes = [8, 32], strides = [1, 1]} : vector<8x70xf32> to vector<8x32xf32>
    %c6_i32_605 = arith.constant 6 : i32
    %1950 = vector.broadcast %c6_i32_605 : i32 to vector<1x32xi32>
    %1951 = arith.cmpi sge, %0, %1950 : vector<1x32xi32>
    %c22_i32_606 = arith.constant 22 : i32
    %1952 = vector.broadcast %c22_i32_606 : i32 to vector<1x32xi32>
    %1953 = arith.cmpi slt, %0, %1952 : vector<1x32xi32>
    %1954 = arith.andi %1951, %1953 : vector<1x32xi1>
    %cst_607 = arith.constant 0.000000e+00 : f32
    %1955 = vector.shape_cast %1954 : vector<1x32xi1> to vector<1x32xi1>
    %1956 = vector.broadcast %1955 : vector<1x32xi1> to vector<8x32xi1>
    %1957 = vector.broadcast %cst_607 : f32 to vector<8x32xf32>
    %1958 = arith.select %1956, %1949, %1957 : vector<8x32xi1>, vector<8x32xf32>
    %1959 = vector.extract_strided_slice %1854 {offsets = [0, 14], sizes = [8, 32], strides = [1, 1]} : vector<8x70xf32> to vector<8x32xf32>
    %c5_i32_608 = arith.constant 5 : i32
    %1960 = vector.broadcast %c5_i32_608 : i32 to vector<1x32xi32>
    %1961 = arith.cmpi sge, %0, %1960 : vector<1x32xi32>
    %c21_i32_609 = arith.constant 21 : i32
    %1962 = vector.broadcast %c21_i32_609 : i32 to vector<1x32xi32>
    %1963 = arith.cmpi slt, %0, %1962 : vector<1x32xi32>
    %1964 = arith.andi %1961, %1963 : vector<1x32xi1>
    %cst_610 = arith.constant 0.000000e+00 : f32
    %1965 = vector.shape_cast %1964 : vector<1x32xi1> to vector<1x32xi1>
    %1966 = vector.broadcast %1965 : vector<1x32xi1> to vector<8x32xi1>
    %1967 = vector.broadcast %cst_610 : f32 to vector<8x32xf32>
    %1968 = arith.select %1966, %1959, %1967 : vector<8x32xi1>, vector<8x32xf32>
    %1969 = vector.extract_strided_slice %1854 {offsets = [0, 15], sizes = [8, 32], strides = [1, 1]} : vector<8x70xf32> to vector<8x32xf32>
    %c4_i32_611 = arith.constant 4 : i32
    %1970 = vector.broadcast %c4_i32_611 : i32 to vector<1x32xi32>
    %1971 = arith.cmpi sge, %0, %1970 : vector<1x32xi32>
    %c20_i32_612 = arith.constant 20 : i32
    %1972 = vector.broadcast %c20_i32_612 : i32 to vector<1x32xi32>
    %1973 = arith.cmpi slt, %0, %1972 : vector<1x32xi32>
    %1974 = arith.andi %1971, %1973 : vector<1x32xi1>
    %cst_613 = arith.constant 0.000000e+00 : f32
    %1975 = vector.shape_cast %1974 : vector<1x32xi1> to vector<1x32xi1>
    %1976 = vector.broadcast %1975 : vector<1x32xi1> to vector<8x32xi1>
    %1977 = vector.broadcast %cst_613 : f32 to vector<8x32xf32>
    %1978 = arith.select %1976, %1969, %1977 : vector<8x32xi1>, vector<8x32xf32>
    %1979 = vector.extract_strided_slice %1854 {offsets = [0, 16], sizes = [8, 32], strides = [1, 1]} : vector<8x70xf32> to vector<8x32xf32>
    %c3_i32_614 = arith.constant 3 : i32
    %1980 = vector.broadcast %c3_i32_614 : i32 to vector<1x32xi32>
    %1981 = arith.cmpi sge, %0, %1980 : vector<1x32xi32>
    %c19_i32_615 = arith.constant 19 : i32
    %1982 = vector.broadcast %c19_i32_615 : i32 to vector<1x32xi32>
    %1983 = arith.cmpi slt, %0, %1982 : vector<1x32xi32>
    %1984 = arith.andi %1981, %1983 : vector<1x32xi1>
    %cst_616 = arith.constant 0.000000e+00 : f32
    %1985 = vector.shape_cast %1984 : vector<1x32xi1> to vector<1x32xi1>
    %1986 = vector.broadcast %1985 : vector<1x32xi1> to vector<8x32xi1>
    %1987 = vector.broadcast %cst_616 : f32 to vector<8x32xf32>
    %1988 = arith.select %1986, %1979, %1987 : vector<8x32xi1>, vector<8x32xf32>
    %1989 = vector.extract_strided_slice %1854 {offsets = [0, 17], sizes = [8, 32], strides = [1, 1]} : vector<8x70xf32> to vector<8x32xf32>
    %c2_i32_617 = arith.constant 2 : i32
    %1990 = vector.broadcast %c2_i32_617 : i32 to vector<1x32xi32>
    %1991 = arith.cmpi sge, %0, %1990 : vector<1x32xi32>
    %c18_i32_618 = arith.constant 18 : i32
    %1992 = vector.broadcast %c18_i32_618 : i32 to vector<1x32xi32>
    %1993 = arith.cmpi slt, %0, %1992 : vector<1x32xi32>
    %1994 = arith.andi %1991, %1993 : vector<1x32xi1>
    %cst_619 = arith.constant 0.000000e+00 : f32
    %1995 = vector.shape_cast %1994 : vector<1x32xi1> to vector<1x32xi1>
    %1996 = vector.broadcast %1995 : vector<1x32xi1> to vector<8x32xi1>
    %1997 = vector.broadcast %cst_619 : f32 to vector<8x32xf32>
    %1998 = arith.select %1996, %1989, %1997 : vector<8x32xi1>, vector<8x32xf32>
    %1999 = vector.extract_strided_slice %1854 {offsets = [0, 18], sizes = [8, 32], strides = [1, 1]} : vector<8x70xf32> to vector<8x32xf32>
    %c1_i32_620 = arith.constant 1 : i32
    %2000 = vector.broadcast %c1_i32_620 : i32 to vector<1x32xi32>
    %2001 = arith.cmpi sge, %0, %2000 : vector<1x32xi32>
    %c17_i32_621 = arith.constant 17 : i32
    %2002 = vector.broadcast %c17_i32_621 : i32 to vector<1x32xi32>
    %2003 = arith.cmpi slt, %0, %2002 : vector<1x32xi32>
    %2004 = arith.andi %2001, %2003 : vector<1x32xi1>
    %cst_622 = arith.constant 0.000000e+00 : f32
    %2005 = vector.shape_cast %2004 : vector<1x32xi1> to vector<1x32xi1>
    %2006 = vector.broadcast %2005 : vector<1x32xi1> to vector<8x32xi1>
    %2007 = vector.broadcast %cst_622 : f32 to vector<8x32xf32>
    %2008 = arith.select %2006, %1999, %2007 : vector<8x32xi1>, vector<8x32xf32>
    %2009 = vector.extract_strided_slice %1854 {offsets = [0, 19], sizes = [8, 32], strides = [1, 1]} : vector<8x70xf32> to vector<8x32xf32>
    %2010 = vector.extract_strided_slice %1854 {offsets = [0, 20], sizes = [8, 32], strides = [1, 1]} : vector<8x70xf32> to vector<8x32xf32>
    %c-1_i32_623 = arith.constant -1 : i32
    %2011 = vector.broadcast %c-1_i32_623 : i32 to vector<1x32xi32>
    %2012 = arith.cmpi sge, %0, %2011 : vector<1x32xi32>
    %c15_i32_624 = arith.constant 15 : i32
    %2013 = vector.broadcast %c15_i32_624 : i32 to vector<1x32xi32>
    %2014 = arith.cmpi slt, %0, %2013 : vector<1x32xi32>
    %2015 = arith.andi %2012, %2014 : vector<1x32xi1>
    %cst_625 = arith.constant 0.000000e+00 : f32
    %2016 = vector.shape_cast %2015 : vector<1x32xi1> to vector<1x32xi1>
    %2017 = vector.broadcast %2016 : vector<1x32xi1> to vector<8x32xi1>
    %2018 = vector.broadcast %cst_625 : f32 to vector<8x32xf32>
    %2019 = arith.select %2017, %2010, %2018 : vector<8x32xi1>, vector<8x32xf32>
    %2020 = vector.extract_strided_slice %1854 {offsets = [0, 21], sizes = [8, 32], strides = [1, 1]} : vector<8x70xf32> to vector<8x32xf32>
    %c-2_i32_626 = arith.constant -2 : i32
    %2021 = vector.broadcast %c-2_i32_626 : i32 to vector<1x32xi32>
    %2022 = arith.cmpi sge, %0, %2021 : vector<1x32xi32>
    %c14_i32_627 = arith.constant 14 : i32
    %2023 = vector.broadcast %c14_i32_627 : i32 to vector<1x32xi32>
    %2024 = arith.cmpi slt, %0, %2023 : vector<1x32xi32>
    %2025 = arith.andi %2022, %2024 : vector<1x32xi1>
    %cst_628 = arith.constant 0.000000e+00 : f32
    %2026 = vector.shape_cast %2025 : vector<1x32xi1> to vector<1x32xi1>
    %2027 = vector.broadcast %2026 : vector<1x32xi1> to vector<8x32xi1>
    %2028 = vector.broadcast %cst_628 : f32 to vector<8x32xf32>
    %2029 = arith.select %2027, %2020, %2028 : vector<8x32xi1>, vector<8x32xf32>
    %2030 = vector.extract_strided_slice %1854 {offsets = [0, 22], sizes = [8, 32], strides = [1, 1]} : vector<8x70xf32> to vector<8x32xf32>
    %c-3_i32_629 = arith.constant -3 : i32
    %2031 = vector.broadcast %c-3_i32_629 : i32 to vector<1x32xi32>
    %2032 = arith.cmpi sge, %0, %2031 : vector<1x32xi32>
    %c13_i32_630 = arith.constant 13 : i32
    %2033 = vector.broadcast %c13_i32_630 : i32 to vector<1x32xi32>
    %2034 = arith.cmpi slt, %0, %2033 : vector<1x32xi32>
    %2035 = arith.andi %2032, %2034 : vector<1x32xi1>
    %cst_631 = arith.constant 0.000000e+00 : f32
    %2036 = vector.shape_cast %2035 : vector<1x32xi1> to vector<1x32xi1>
    %2037 = vector.broadcast %2036 : vector<1x32xi1> to vector<8x32xi1>
    %2038 = vector.broadcast %cst_631 : f32 to vector<8x32xf32>
    %2039 = arith.select %2037, %2030, %2038 : vector<8x32xi1>, vector<8x32xf32>
    %2040 = vector.extract_strided_slice %1854 {offsets = [0, 23], sizes = [8, 32], strides = [1, 1]} : vector<8x70xf32> to vector<8x32xf32>
    %c-4_i32_632 = arith.constant -4 : i32
    %2041 = vector.broadcast %c-4_i32_632 : i32 to vector<1x32xi32>
    %2042 = arith.cmpi sge, %0, %2041 : vector<1x32xi32>
    %c12_i32_633 = arith.constant 12 : i32
    %2043 = vector.broadcast %c12_i32_633 : i32 to vector<1x32xi32>
    %2044 = arith.cmpi slt, %0, %2043 : vector<1x32xi32>
    %2045 = arith.andi %2042, %2044 : vector<1x32xi1>
    %cst_634 = arith.constant 0.000000e+00 : f32
    %2046 = vector.shape_cast %2045 : vector<1x32xi1> to vector<1x32xi1>
    %2047 = vector.broadcast %2046 : vector<1x32xi1> to vector<8x32xi1>
    %2048 = vector.broadcast %cst_634 : f32 to vector<8x32xf32>
    %2049 = arith.select %2047, %2040, %2048 : vector<8x32xi1>, vector<8x32xf32>
    %2050 = vector.extract_strided_slice %1854 {offsets = [0, 24], sizes = [8, 32], strides = [1, 1]} : vector<8x70xf32> to vector<8x32xf32>
    %c-5_i32_635 = arith.constant -5 : i32
    %2051 = vector.broadcast %c-5_i32_635 : i32 to vector<1x32xi32>
    %2052 = arith.cmpi sge, %0, %2051 : vector<1x32xi32>
    %c11_i32_636 = arith.constant 11 : i32
    %2053 = vector.broadcast %c11_i32_636 : i32 to vector<1x32xi32>
    %2054 = arith.cmpi slt, %0, %2053 : vector<1x32xi32>
    %2055 = arith.andi %2052, %2054 : vector<1x32xi1>
    %cst_637 = arith.constant 0.000000e+00 : f32
    %2056 = vector.shape_cast %2055 : vector<1x32xi1> to vector<1x32xi1>
    %2057 = vector.broadcast %2056 : vector<1x32xi1> to vector<8x32xi1>
    %2058 = vector.broadcast %cst_637 : f32 to vector<8x32xf32>
    %2059 = arith.select %2057, %2050, %2058 : vector<8x32xi1>, vector<8x32xf32>
    %2060 = vector.extract_strided_slice %1854 {offsets = [0, 25], sizes = [8, 32], strides = [1, 1]} : vector<8x70xf32> to vector<8x32xf32>
    %c-6_i32_638 = arith.constant -6 : i32
    %2061 = vector.broadcast %c-6_i32_638 : i32 to vector<1x32xi32>
    %2062 = arith.cmpi sge, %0, %2061 : vector<1x32xi32>
    %c10_i32_639 = arith.constant 10 : i32
    %2063 = vector.broadcast %c10_i32_639 : i32 to vector<1x32xi32>
    %2064 = arith.cmpi slt, %0, %2063 : vector<1x32xi32>
    %2065 = arith.andi %2062, %2064 : vector<1x32xi1>
    %cst_640 = arith.constant 0.000000e+00 : f32
    %2066 = vector.shape_cast %2065 : vector<1x32xi1> to vector<1x32xi1>
    %2067 = vector.broadcast %2066 : vector<1x32xi1> to vector<8x32xi1>
    %2068 = vector.broadcast %cst_640 : f32 to vector<8x32xf32>
    %2069 = arith.select %2067, %2060, %2068 : vector<8x32xi1>, vector<8x32xf32>
    %2070 = vector.extract_strided_slice %1854 {offsets = [0, 26], sizes = [8, 32], strides = [1, 1]} : vector<8x70xf32> to vector<8x32xf32>
    %c-7_i32_641 = arith.constant -7 : i32
    %2071 = vector.broadcast %c-7_i32_641 : i32 to vector<1x32xi32>
    %2072 = arith.cmpi sge, %0, %2071 : vector<1x32xi32>
    %c9_i32_642 = arith.constant 9 : i32
    %2073 = vector.broadcast %c9_i32_642 : i32 to vector<1x32xi32>
    %2074 = arith.cmpi slt, %0, %2073 : vector<1x32xi32>
    %2075 = arith.andi %2072, %2074 : vector<1x32xi1>
    %cst_643 = arith.constant 0.000000e+00 : f32
    %2076 = vector.shape_cast %2075 : vector<1x32xi1> to vector<1x32xi1>
    %2077 = vector.broadcast %2076 : vector<1x32xi1> to vector<8x32xi1>
    %2078 = vector.broadcast %cst_643 : f32 to vector<8x32xf32>
    %2079 = arith.select %2077, %2070, %2078 : vector<8x32xi1>, vector<8x32xf32>
    %2080 = vector.extract_strided_slice %1854 {offsets = [0, 27], sizes = [8, 32], strides = [1, 1]} : vector<8x70xf32> to vector<8x32xf32>
    %c-8_i32_644 = arith.constant -8 : i32
    %2081 = vector.broadcast %c-8_i32_644 : i32 to vector<1x32xi32>
    %2082 = arith.cmpi sge, %0, %2081 : vector<1x32xi32>
    %c8_i32_645 = arith.constant 8 : i32
    %2083 = vector.broadcast %c8_i32_645 : i32 to vector<1x32xi32>
    %2084 = arith.cmpi slt, %0, %2083 : vector<1x32xi32>
    %2085 = arith.andi %2082, %2084 : vector<1x32xi1>
    %cst_646 = arith.constant 0.000000e+00 : f32
    %2086 = vector.shape_cast %2085 : vector<1x32xi1> to vector<1x32xi1>
    %2087 = vector.broadcast %2086 : vector<1x32xi1> to vector<8x32xi1>
    %2088 = vector.broadcast %cst_646 : f32 to vector<8x32xf32>
    %2089 = arith.select %2087, %2080, %2088 : vector<8x32xi1>, vector<8x32xf32>
    %2090 = vector.extract_strided_slice %1854 {offsets = [0, 28], sizes = [8, 32], strides = [1, 1]} : vector<8x70xf32> to vector<8x32xf32>
    %c-9_i32_647 = arith.constant -9 : i32
    %2091 = vector.broadcast %c-9_i32_647 : i32 to vector<1x32xi32>
    %2092 = arith.cmpi sge, %0, %2091 : vector<1x32xi32>
    %c7_i32_648 = arith.constant 7 : i32
    %2093 = vector.broadcast %c7_i32_648 : i32 to vector<1x32xi32>
    %2094 = arith.cmpi slt, %0, %2093 : vector<1x32xi32>
    %2095 = arith.andi %2092, %2094 : vector<1x32xi1>
    %cst_649 = arith.constant 0.000000e+00 : f32
    %2096 = vector.shape_cast %2095 : vector<1x32xi1> to vector<1x32xi1>
    %2097 = vector.broadcast %2096 : vector<1x32xi1> to vector<8x32xi1>
    %2098 = vector.broadcast %cst_649 : f32 to vector<8x32xf32>
    %2099 = arith.select %2097, %2090, %2098 : vector<8x32xi1>, vector<8x32xf32>
    %2100 = vector.extract_strided_slice %1854 {offsets = [0, 29], sizes = [8, 32], strides = [1, 1]} : vector<8x70xf32> to vector<8x32xf32>
    %c-10_i32_650 = arith.constant -10 : i32
    %2101 = vector.broadcast %c-10_i32_650 : i32 to vector<1x32xi32>
    %2102 = arith.cmpi sge, %0, %2101 : vector<1x32xi32>
    %c6_i32_651 = arith.constant 6 : i32
    %2103 = vector.broadcast %c6_i32_651 : i32 to vector<1x32xi32>
    %2104 = arith.cmpi slt, %0, %2103 : vector<1x32xi32>
    %2105 = arith.andi %2102, %2104 : vector<1x32xi1>
    %cst_652 = arith.constant 0.000000e+00 : f32
    %2106 = vector.shape_cast %2105 : vector<1x32xi1> to vector<1x32xi1>
    %2107 = vector.broadcast %2106 : vector<1x32xi1> to vector<8x32xi1>
    %2108 = vector.broadcast %cst_652 : f32 to vector<8x32xf32>
    %2109 = arith.select %2107, %2100, %2108 : vector<8x32xi1>, vector<8x32xf32>
    %2110 = vector.extract_strided_slice %1854 {offsets = [0, 30], sizes = [8, 32], strides = [1, 1]} : vector<8x70xf32> to vector<8x32xf32>
    %c-11_i32_653 = arith.constant -11 : i32
    %2111 = vector.broadcast %c-11_i32_653 : i32 to vector<1x32xi32>
    %2112 = arith.cmpi sge, %0, %2111 : vector<1x32xi32>
    %c5_i32_654 = arith.constant 5 : i32
    %2113 = vector.broadcast %c5_i32_654 : i32 to vector<1x32xi32>
    %2114 = arith.cmpi slt, %0, %2113 : vector<1x32xi32>
    %2115 = arith.andi %2112, %2114 : vector<1x32xi1>
    %cst_655 = arith.constant 0.000000e+00 : f32
    %2116 = vector.shape_cast %2115 : vector<1x32xi1> to vector<1x32xi1>
    %2117 = vector.broadcast %2116 : vector<1x32xi1> to vector<8x32xi1>
    %2118 = vector.broadcast %cst_655 : f32 to vector<8x32xf32>
    %2119 = arith.select %2117, %2110, %2118 : vector<8x32xi1>, vector<8x32xf32>
    %2120 = vector.extract_strided_slice %1854 {offsets = [0, 31], sizes = [8, 32], strides = [1, 1]} : vector<8x70xf32> to vector<8x32xf32>
    %c-12_i32_656 = arith.constant -12 : i32
    %2121 = vector.broadcast %c-12_i32_656 : i32 to vector<1x32xi32>
    %2122 = arith.cmpi sge, %0, %2121 : vector<1x32xi32>
    %c4_i32_657 = arith.constant 4 : i32
    %2123 = vector.broadcast %c4_i32_657 : i32 to vector<1x32xi32>
    %2124 = arith.cmpi slt, %0, %2123 : vector<1x32xi32>
    %2125 = arith.andi %2122, %2124 : vector<1x32xi1>
    %cst_658 = arith.constant 0.000000e+00 : f32
    %2126 = vector.shape_cast %2125 : vector<1x32xi1> to vector<1x32xi1>
    %2127 = vector.broadcast %2126 : vector<1x32xi1> to vector<8x32xi1>
    %2128 = vector.broadcast %cst_658 : f32 to vector<8x32xf32>
    %2129 = arith.select %2127, %2120, %2128 : vector<8x32xi1>, vector<8x32xf32>
    %2130 = vector.extract_strided_slice %1854 {offsets = [0, 32], sizes = [8, 32], strides = [1, 1]} : vector<8x70xf32> to vector<8x32xf32>
    %c-13_i32_659 = arith.constant -13 : i32
    %2131 = vector.broadcast %c-13_i32_659 : i32 to vector<1x32xi32>
    %2132 = arith.cmpi sge, %0, %2131 : vector<1x32xi32>
    %c3_i32_660 = arith.constant 3 : i32
    %2133 = vector.broadcast %c3_i32_660 : i32 to vector<1x32xi32>
    %2134 = arith.cmpi slt, %0, %2133 : vector<1x32xi32>
    %2135 = arith.andi %2132, %2134 : vector<1x32xi1>
    %cst_661 = arith.constant 0.000000e+00 : f32
    %2136 = vector.shape_cast %2135 : vector<1x32xi1> to vector<1x32xi1>
    %2137 = vector.broadcast %2136 : vector<1x32xi1> to vector<8x32xi1>
    %2138 = vector.broadcast %cst_661 : f32 to vector<8x32xf32>
    %2139 = arith.select %2137, %2130, %2138 : vector<8x32xi1>, vector<8x32xf32>
    %2140 = vector.extract_strided_slice %1854 {offsets = [0, 33], sizes = [8, 32], strides = [1, 1]} : vector<8x70xf32> to vector<8x32xf32>
    %c-14_i32_662 = arith.constant -14 : i32
    %2141 = vector.broadcast %c-14_i32_662 : i32 to vector<1x32xi32>
    %2142 = arith.cmpi sge, %0, %2141 : vector<1x32xi32>
    %c2_i32_663 = arith.constant 2 : i32
    %2143 = vector.broadcast %c2_i32_663 : i32 to vector<1x32xi32>
    %2144 = arith.cmpi slt, %0, %2143 : vector<1x32xi32>
    %2145 = arith.andi %2142, %2144 : vector<1x32xi1>
    %cst_664 = arith.constant 0.000000e+00 : f32
    %2146 = vector.shape_cast %2145 : vector<1x32xi1> to vector<1x32xi1>
    %2147 = vector.broadcast %2146 : vector<1x32xi1> to vector<8x32xi1>
    %2148 = vector.broadcast %cst_664 : f32 to vector<8x32xf32>
    %2149 = arith.select %2147, %2140, %2148 : vector<8x32xi1>, vector<8x32xf32>
    %2150 = vector.extract_strided_slice %1854 {offsets = [0, 34], sizes = [8, 32], strides = [1, 1]} : vector<8x70xf32> to vector<8x32xf32>
    %c-15_i32_665 = arith.constant -15 : i32
    %2151 = vector.broadcast %c-15_i32_665 : i32 to vector<1x32xi32>
    %2152 = arith.cmpi sge, %0, %2151 : vector<1x32xi32>
    %c1_i32_666 = arith.constant 1 : i32
    %2153 = vector.broadcast %c1_i32_666 : i32 to vector<1x32xi32>
    %2154 = arith.cmpi slt, %0, %2153 : vector<1x32xi32>
    %2155 = arith.andi %2152, %2154 : vector<1x32xi1>
    %cst_667 = arith.constant 0.000000e+00 : f32
    %2156 = vector.shape_cast %2155 : vector<1x32xi1> to vector<1x32xi1>
    %2157 = vector.broadcast %2156 : vector<1x32xi1> to vector<8x32xi1>
    %2158 = vector.broadcast %cst_667 : f32 to vector<8x32xf32>
    %2159 = arith.select %2157, %2150, %2158 : vector<8x32xi1>, vector<8x32xf32>
    %cst_668 = arith.constant 0.000000e+00 : f32
    %2160 = vector.broadcast %cst_668 : f32 to vector<8x32xf32>
    %cst_669 = arith.constant 0.000000e+00 : f32
    %2161 = vector.broadcast %cst_669 : f32 to vector<8x32xf32>
    %cst_670 = arith.constant 0.000000e+00 : f32
    %2162 = vector.broadcast %cst_670 : f32 to vector<8x32xf32>
    %cst_671 = arith.constant 0.000000e+00 : f32
    %2163 = vector.broadcast %cst_671 : f32 to vector<8x32xf32>
    %cst_672 = arith.constant 0xFF800000 : f32
    %2164 = vector.broadcast %cst_672 : f32 to vector<32x1xf32>
    %2165 = tpu.concatenate %2164, %1850, %2164 in 1 : vector<32x1xf32>, vector<32x32xf32>, vector<32x1xf32> -> vector<32x34xf32>
    %c1_i32_673 = arith.constant 1 : i32
    %2166 = vector.broadcast %c1_i32_673 : i32 to vector<1x32xi32>
    %2167 = arith.cmpi sge, %0, %2166 : vector<1x32xi32>
    %2168 = vector.extract_strided_slice %2165 {offsets = [0, 0], sizes = [32, 32], strides = [1, 1]} : vector<32x34xf32> to vector<32x32xf32>
    %cst_674 = arith.constant 0xFF800000 : f32
    %2169 = vector.shape_cast %2167 : vector<1x32xi1> to vector<1x32xi1>
    %2170 = vector.broadcast %2169 : vector<1x32xi1> to vector<32x32xi1>
    %2171 = vector.broadcast %cst_674 : f32 to vector<32x32xf32>
    %2172 = arith.select %2170, %2168, %2171 : vector<32x32xi1>, vector<32x32xf32>
    %2173 = vector.extract_strided_slice %2165 {offsets = [0, 1], sizes = [32, 32], strides = [1, 1]} : vector<32x34xf32> to vector<32x32xf32>
    %c14_i32_675 = arith.constant 14 : i32
    %2174 = vector.broadcast %c14_i32_675 : i32 to vector<1x32xi32>
    %2175 = arith.cmpi sle, %0, %2174 : vector<1x32xi32>
    %2176 = vector.extract_strided_slice %2165 {offsets = [0, 2], sizes = [32, 32], strides = [1, 1]} : vector<32x34xf32> to vector<32x32xf32>
    %cst_676 = arith.constant 0xFF800000 : f32
    %2177 = vector.shape_cast %2175 : vector<1x32xi1> to vector<1x32xi1>
    %2178 = vector.broadcast %2177 : vector<1x32xi1> to vector<32x32xi1>
    %2179 = vector.broadcast %cst_676 : f32 to vector<32x32xf32>
    %2180 = arith.select %2178, %2176, %2179 : vector<32x32xi1>, vector<32x32xf32>
    %2181 = arith.maximumf %2172, %2173 : vector<32x32xf32>
    %2182 = arith.maximumf %2181, %2180 : vector<32x32xf32>
    %2183 = tpu.concatenate %1855, %1856, %1857, %1858, %1868, %1878, %1888, %1898, %1908, %1918, %1928, %1938, %1948, %1958, %1968, %1978 in 0 : vector<8x32xf32>, vector<8x32xf32>, vector<8x32xf32>, vector<8x32xf32>, vector<8x32xf32>, vector<8x32xf32>, vector<8x32xf32>, vector<8x32xf32>, vector<8x32xf32>, vector<8x32xf32>, vector<8x32xf32>, vector<8x32xf32>, vector<8x32xf32>, vector<8x32xf32>, vector<8x32xf32>, vector<8x32xf32> -> vector<128x32xf32>
    %2184 = tpu.concatenate %1988, %1998, %2008, %2009, %2019, %2029, %2039, %2049, %2059, %2069, %2079, %2089, %2099, %2109, %2119, %2129 in 0 : vector<8x32xf32>, vector<8x32xf32>, vector<8x32xf32>, vector<8x32xf32>, vector<8x32xf32>, vector<8x32xf32>, vector<8x32xf32>, vector<8x32xf32>, vector<8x32xf32>, vector<8x32xf32>, vector<8x32xf32>, vector<8x32xf32>, vector<8x32xf32>, vector<8x32xf32>, vector<8x32xf32>, vector<8x32xf32> -> vector<128x32xf32>
    %2185 = tpu.concatenate %2139, %2149, %2159, %2160, %2161, %2162, %2163, %2182 in 0 : vector<8x32xf32>, vector<8x32xf32>, vector<8x32xf32>, vector<8x32xf32>, vector<8x32xf32>, vector<8x32xf32>, vector<8x32xf32>, vector<32x32xf32> -> vector<88x32xf32>
    %2186 = tpu.concatenate %2183, %2184, %2185 in 0 : vector<128x32xf32>, vector<128x32xf32>, vector<88x32xf32> -> vector<344x32xf32>
    %c0_677 = arith.constant 0 : index
    %c0_678 = arith.constant 0 : index
    %2187 = vector.load %arg23[%c0_677, %c0_678] : memref<32x344xf32, #tpu.memory_space<vmem>>, vector<32x344xf32>
    %cst_679 = arith.constant dense<0.000000e+00> : vector<32x32xf32>
    %2188 = tpu.matmul %2187, %2186, %cst_679 {dimension_numbers = #tpu.dot_dimension_numbers<[1], [0], [0], [1], [0, 0, 1, 1], [], []>} : vector<32x344xf32>, vector<344x32xf32>, vector<32x32xf32> -> vector<32x32xf32>
    %cst_680 = arith.constant dense<0.000000e+00> : vector<32xf32>
    %2189 = vector.multi_reduction <add>, %2188, %cst_680 [1] : vector<32x32xf32> to vector<32xf32>
    %2190 = vector.shape_cast %2189 : vector<32xf32> to vector<32x1xf32>
    %cst_681 = arith.constant 3.200000e+01 : f32
    %2191 = vector.broadcast %cst_681 : f32 to vector<32x1xf32>
    %2192 = arith.divf %2190, %2191 : vector<32x1xf32>
    %2193 = vector.broadcast %2192 : vector<32x1xf32> to vector<32x32xf32>
    %2194 = arith.subf %2188, %2193 : vector<32x32xf32>
    %2195 = arith.mulf %2194, %2194 : vector<32x32xf32>
    %cst_682 = arith.constant dense<0.000000e+00> : vector<32xf32>
    %2196 = vector.multi_reduction <add>, %2195, %cst_682 [1] : vector<32x32xf32> to vector<32xf32>
    %2197 = vector.shape_cast %2196 : vector<32xf32> to vector<32x1xf32>
    %cst_683 = arith.constant 3.200000e+01 : f32
    %2198 = vector.broadcast %cst_683 : f32 to vector<32x1xf32>
    %2199 = arith.divf %2197, %2198 : vector<32x1xf32>
    %2200 = vector.broadcast %2192 : vector<32x1xf32> to vector<32x32xf32>
    %2201 = arith.subf %2188, %2200 : vector<32x32xf32>
    %cst_684 = arith.constant 9.99999974E-6 : f32
    %2202 = vector.broadcast %cst_684 : f32 to vector<32x1xf32>
    %2203 = arith.addf %2199, %2202 : vector<32x1xf32>
    %2204 = math.rsqrt %2203 : vector<32x1xf32>
    %2205 = vector.broadcast %2204 : vector<32x1xf32> to vector<32x32xf32>
    %2206 = arith.mulf %2201, %2205 : vector<32x32xf32>
    %c0_685 = arith.constant 0 : index
    %c0_686 = arith.constant 0 : index
    %2207 = vector.load %arg24[%c0_685, %c0_686] : memref<32x1xf32, #tpu.memory_space<vmem>>, vector<32x1xf32>
    %2208 = vector.broadcast %2207 : vector<32x1xf32> to vector<32x32xf32>
    %2209 = arith.mulf %2206, %2208 : vector<32x32xf32>
    %c0_687 = arith.constant 0 : index
    %c0_688 = arith.constant 0 : index
    %2210 = vector.load %arg25[%c0_687, %c0_688] : memref<32x1xf32, #tpu.memory_space<vmem>>, vector<32x1xf32>
    %2211 = vector.broadcast %2210 : vector<32x1xf32> to vector<32x32xf32>
    %2212 = arith.addf %2209, %2211 : vector<32x32xf32>
    %cst_689 = arith.constant 0.000000e+00 : f32
    %2213 = vector.broadcast %cst_689 : f32 to vector<32x32xf32>
    %2214 = arith.maximumf %2212, %2213 : vector<32x32xf32>
    %cst_690 = arith.constant dense<0.000000e+00> : vector<32xf32>
    %2215 = vector.multi_reduction <add>, %1122, %cst_690 [1] : vector<32x32xf32> to vector<32xf32>
    %2216 = vector.shape_cast %2215 : vector<32xf32> to vector<32x1xf32>
    %cst_691 = arith.constant 3.200000e+01 : f32
    %2217 = vector.broadcast %cst_691 : f32 to vector<32x1xf32>
    %2218 = arith.divf %2216, %2217 : vector<32x1xf32>
    %2219 = vector.broadcast %2218 : vector<32x1xf32> to vector<32x32xf32>
    %2220 = arith.subf %1122, %2219 : vector<32x32xf32>
    %2221 = arith.mulf %2220, %2220 : vector<32x32xf32>
    %cst_692 = arith.constant dense<0.000000e+00> : vector<32xf32>
    %2222 = vector.multi_reduction <add>, %2221, %cst_692 [1] : vector<32x32xf32> to vector<32xf32>
    %2223 = vector.shape_cast %2222 : vector<32xf32> to vector<32x1xf32>
    %cst_693 = arith.constant 3.200000e+01 : f32
    %2224 = vector.broadcast %cst_693 : f32 to vector<32x1xf32>
    %2225 = arith.divf %2223, %2224 : vector<32x1xf32>
    %2226 = vector.broadcast %2218 : vector<32x1xf32> to vector<32x32xf32>
    %2227 = arith.subf %1122, %2226 : vector<32x32xf32>
    %cst_694 = arith.constant 9.99999974E-6 : f32
    %2228 = vector.broadcast %cst_694 : f32 to vector<32x1xf32>
    %2229 = arith.addf %2225, %2228 : vector<32x1xf32>
    %2230 = math.rsqrt %2229 : vector<32x1xf32>
    %2231 = vector.broadcast %2230 : vector<32x1xf32> to vector<32x32xf32>
    %2232 = arith.mulf %2227, %2231 : vector<32x32xf32>
    %c0_695 = arith.constant 0 : index
    %c0_696 = arith.constant 0 : index
    %2233 = vector.load %arg29[%c0_695, %c0_696] : memref<32x1xf32, #tpu.memory_space<vmem>>, vector<32x1xf32>
    %2234 = vector.broadcast %2233 : vector<32x1xf32> to vector<32x32xf32>
    %2235 = arith.mulf %2232, %2234 : vector<32x32xf32>
    %c0_697 = arith.constant 0 : index
    %c0_698 = arith.constant 0 : index
    %2236 = vector.load %arg30[%c0_697, %c0_698] : memref<32x1xf32, #tpu.memory_space<vmem>>, vector<32x1xf32>
    %2237 = vector.broadcast %2236 : vector<32x1xf32> to vector<32x32xf32>
    %2238 = arith.addf %2235, %2237 : vector<32x32xf32>
    %2239 = arith.addf %2214, %2238 : vector<32x32xf32>
    %cst_699 = arith.constant 0.000000e+00 : f32
    %2240 = vector.broadcast %cst_699 : f32 to vector<32x32xf32>
    %2241 = arith.maximumf %2239, %2240 : vector<32x32xf32>
    %c0_700 = arith.constant 0 : index
    %c0_701 = arith.constant 0 : index
    %2242 = vector.load %arg31[%c0_700, %c0_701] : memref<32x32xf32, #tpu.memory_space<vmem>>, vector<32x32xf32>
    tpu.vector_store %arg31[%c0_700, %c0_701], %2241 {strides = array<i32>} : memref<32x32xf32, #tpu.memory_space<vmem>>, vector<32x32xf32>,
    return
  }
}

</mosaic_0001>

<bundles_post_ra>
// kernel: tile.9
= control target key start
LH: loop header
LB: loop body
LE: loop exit
PB: predicated region body
PF: predicated region fallthrough
CT: control target
= control target key end

     0   :  { %vm7_vm0 = vcmask 130048   ;;  %vm13_vm1 = vcmask 261248   ;;  %s39_s0 = inlined_call_operand.vmem [shape: s32[2,16], index: 0, kind: input, shape index: {}]   ;;  %s40_s1 = inlined_call_operand.vmem [shape: s32[1,32], index: 1, kind: output, shape index: {}]  }
   0x1   :  { %v4_v0 = vld [vmem:[%s39_s0] sm:$0x3]  ;;  %s22_s0 = smov 16  }
   0x2   :  { %5 = vst [vmem:[#allocation1] sm:$0x3] %v4_v0 }
   0x9   :  { %v10_v1 = vld [vmem:[#allocation1 + $0x1] sm:$0x1]   ;;  %v6_v2 = vld [vmem:[#allocation1] sm:$0x1]  }
   0xa   :  { %11 = vrot.lane.b32.xlu0 %v10_v1, %s22_s0  ;;  %8 = vst.msk [vmem:[#allocation0] sm:$0x1] %vm7_vm0, %v6_v2  }
  0x7c   :  { %v12_v3 = vpop.permute.xlu0 %11  }
  0x7d   :  { %14 = vst.msk [vmem:[#allocation0] sm:$0x1] %vm13_vm1, %v12_v3  }
  0x84   :  { %v18_v4 = vld [vmem:[#allocation0] sm:$0x1] }
  0x85   :  { %20 = vst [vmem:[%s40_s1] sm:$0x1] %v18_v4 }

// kernel: inception_block_forward.1
= control target key start
LH: loop header
LB: loop body
LE: loop exit
PB: predicated region body
PF: predicated region fallthrough
CT: control target
= control target key end

     0   :  { %v5684_v0 = vmov 0.0   ;;  %vm7475_vm0 = vmmov 0   ;;  %s5686_s6 = smov 2   ;;  %vm7478_vm1 = vcmask 1043456   ;;  %vm7470_vm2 = vcmask 31744   ;;  %s7551_s10 = smov 19   ;;  %s7449_s0 = inlined_call_operand.smem [shape: u32[32], index: -1, kind: input, shape index: {}] }
   0x1   :  { %4819 = vmatprep.subr.mxu1 %v5684_v0  ;;  %s5762_s5 = sld [smem:[%s7449_s0]]   ;;  %4821 = vmatprep.mubr.msk.f32.mxu1 %vm7475_vm0, %v5684_v0  ;;  %s7553_s11 = smov 1   ;;  %v5689_v5 = vmov 0   ;;  %vm7472_vm3 = vcmask 154624   ;;  %vm7471_vm4 = vcmask 416768   ;;  %vm7474_vm5 = vcmask 7168  }
   0x2   :  { %s4189_s9 = sld [smem:[%s7449_s0 + %s5686_s6]]   ;;  %5543 = vset.pattern.permute.xlu1 %v5689_v5  ;;  %5542 = vset.pattern.permute.xlu0 %v5689_v5  ;;  %s7545_s12 = smov 110   ;;  %vm7473_vm6 = vcmask 269312   ;;  %vm7477_vm7 = vcmask 490496   ;;  %v223_v15 = vlaneseq  ;;  %v5724_v41 = vmov 0.0|0.0  }
   0x3   :  { %s7549_s13 = smov 112   ;;  %s7547_s14 = smov 108   ;;  %v7602_v52 = vmov 0  ;;  %v7606_v60 = vmov 0  ;;  %v7622_v32 = vmov 0  ;;  %v7661_v57 = vmov 0 }
   0x4   :  { %s7541_s15 = smov 111   ;;  %s7539_s16 = smov 124   ;;  %v224_v16 = vshrl.u32 %v223_v15, 7 }
   0x5   :  { %s7537_s17 = smov 109   ;;  %s7535_s18 = smov 106  }
   0x6   :  { %s7532_s19 = smov 107   ;;  %s7530_s20 = smov 122   ;;  %v5876_v19 = vsub.s32 0, %v224_v16  ;;  %v7647_v16 = vmov 0 }
   0x7   :  { %v131_v1 = vld [vmem:[%s5762_s5] sm:$0xf]  ;;  %s7520_s21 = smov 123   ;;  %s7518_s22 = smov 104  }
   0x8   :  { %v132_v2 = vld [vmem:[%s4189_s9] sm:$0xff]  ;;  %4820 = vmatpush3.msk.msra.mxu1 %vm7478_vm1, %v131_v1  ;;  %s7516_s23 = smov 105   ;;  %s7510_s24 = smov 120  }
   0x9   :  { %4822 = vmatmul.mubr.msk.f32.vlgmr.msra.gmra.mrb[0].mxu1 %vm7470_vm2, %v132_v2  ;;  %s7514_s25 = smov 121   ;;  %s7504_s26 = smov 102  }
   0xa   :  { %s7508_s27 = smov 103   ;;  %s7454_s28 = smov 118  }
   0xb   :  { %s7506_s29 = smov 119   ;;  %s7450_s30 = smov 100  }
   0xc   :  { %s7512_s1 = smov 101   ;;  %s7452_s2 = smov 116  }
   0xd   :  { %s7468_s3 = smov 117   ;;  %s7500_s4 = smov 96  }
   0xe   :  { %s7456_s6 = smov 99   ;;  %s5714_s7 = smov 3  }
   0xf   :  { %s7466_s8 = smov 94   ;;  %s7464_s9 = smov 97  }
  0xdc   :  { %v207_v3 = vpop.f32.mrb[0].mxu1 }
  0xdd   :  { %212 = vrot.lane.b32.xlu0 %v207_v3, %s7551_s10  ;;  %v4823_v4 = vpop.f32.mrb[1].mxu1 }
  0xe1   :  { %610 = vrot.lane.b32.xlu0 %v131_v1, %s7553_s11 }
 0x14f   :  { %v213_v6 = vpop.permute.xlu0 %212 }
 0x150   :  { %v216_v7 = vsel %vm7472_vm3, 0.0, %v213_v6 }
 0x151   :  { %v5778_v8 = vsel %vm7471_vm4, %v216_v7, 0.0 }
 0x152   :  { %411 = vrot.lane.b32.xlu0 %v5778_v8, %s7545_s12  ;;  %385 = vrot.lane.b32.xlu1 %v5778_v8, %s7549_s13 }
 0x153   :  { %v611_v10 = vpop.permute.xlu0 %610 }
 0x154   :  { %v614_v11 = vsel %vm7474_vm5, -inf, %v611_v10 }
 0x155   :  { %v5848_v12 = vsel %vm7473_vm6, %v614_v11, -inf }
 0x156   :  { %424 = vrot.lane.b32.xlu0 %v5778_v8, %s7547_s14  ;;  %398 = vrot.lane.b32.xlu1 %v5778_v8, %s7541_s15 }
 0x15a   :  { %229 = vrot.lane.b32.xlu0 %v5778_v8, %s7539_s16  ;;  %641 = vrot.lane.b32.xlu1 %v5778_v8, %s7537_s17 }
 0x15e   :  { %450 = vrot.lane.b32.xlu0 %v5778_v8, %s7535_s18  ;;  %437 = vrot.lane.b32.xlu1 %v5778_v8, %s7532_s19 }
 0x162   :  { %255 = vrot.lane.b32.xlu0 %v5778_v8, %s7530_s20  ;;  %242 = vrot.lane.b32.xlu1 %v5778_v8, %s7520_s21 }
 0x166   :  { %476 = vrot.lane.b32.xlu0 %v5778_v8, %s7518_s22  ;;  %463 = vrot.lane.b32.xlu1 %v5778_v8, %s7516_s23 }
 0x16a   :  { %281 = vrot.lane.b32.xlu0 %v5778_v8, %s7510_s24  ;;  %268 = vrot.lane.b32.xlu1 %v5778_v8, %s7514_s25 }
 0x16e   :  { %502 = vrot.lane.b32.xlu0 %v5778_v8, %s7504_s26  ;;  %489 = vrot.lane.b32.xlu1 %v5778_v8, %s7508_s27 }
 0x172   :  { %307 = vrot.lane.b32.xlu0 %v5778_v8, %s7454_s28  ;;  %294 = vrot.lane.b32.xlu1 %v5778_v8, %s7506_s29  ;;  %s7460_s28 = smov 115  }
 0x176   :  { %528 = vrot.lane.b32.xlu0 %v5778_v8, %s7450_s30  ;;  %515 = vrot.lane.b32.xlu1 %v5778_v8, %s7512_s1  ;;  %s5831_s30 = sld [smem:[%s7449_s0 + %s5714_s7]]   ;;  %s7502_s7 = smov 95  }
 0x17a   :  { %333 = vrot.lane.b32.xlu0 %v5778_v8, %s7452_s2  ;;  %320 = vrot.lane.b32.xlu1 %v5778_v8, %s7468_s3  ;;  %s7462_s2 = smov 98   ;;  %s4188_s3 = sld [smem:[%s7449_s0 + %s7553_s11]]  }
 0x17c   :  { %v645_v9 = vld [vmem:[%s5831_s30 + $0x8] sm:$0xff]  ;;  %v646_v13 = vld [vmem:[%s5831_s30 + $0x10] sm:$0xff]  ;;  %v644_v61 = vld [vmem:[%s5831_s30] sm:$0xff] }
 0x17d   :  { %736 = vmatprep.mubr.f32.mxu1 %v645_v9  ;;  %4840 = vmatprep.mubr.msk.f32.mxu0 %vm7477_vm7, %v646_v13  ;;  %v7612_v9 = vmov 0 }
 0x17e   :  { %580 = vrot.lane.b32.xlu0 %v5778_v8, %s7500_s4  ;;  %541 = vrot.lane.b32.xlu1 %v5778_v8, %s7456_s6  ;;  %s7458_s6 = smov 114   ;;  %s7681_s4 = smov 99  }
 0x180   :  { %v5862_v14 = vld [vmem:[%s4188_s3] sm:$0x1]  ;;  %s7677_s3 = smov 95  }
 0x181   :  { %vm376_vm8 = vcmp.ge.s32.totalorder %v5862_v14, 3  ;;  %vm377_vm9 = vcmp.lt.s32.totalorder %v5862_v14, 19  ;;  %vm389_vm10 = vcmp.ge.s32.totalorder %v5862_v14, 2  ;;  %vm390_vm11 = vcmp.lt.s32.totalorder %v5862_v14, 18 }
 0x182   :  { %554 = vrot.lane.b32.xlu0 %v5778_v8, %s7462_s2  ;;  %346 = vrot.lane.b32.xlu1 %v5778_v8, %s7460_s28  ;;  %s7557_s28 = smov 126   ;;  %s7555_s2 = smov 127   ;;  %vm378_vm12 = vmand %vm376_vm8, %vm377_vm9  ;;  %vm403_vm14 = vcmp.lt.s32.totalorder %v5862_v14, 17  ;;  %vm7481_vm15 = vcmp.ge.s32.totalorder %v5862_v14, 1  ;;  %vm415_vm4 = vcmp.ge.s32.totalorder %v5862_v14, 4294967295  ;;  %vm416_vm3 = vcmp.lt.s32.totalorder %v5862_v14, 15 }
 0x183   :  { %vm391_vm13 = vmand %vm389_vm10, %vm390_vm11  ;;  %v379_v17 = vsel %vm378_vm12, 1, %v5689_v5  ;;  %vm428_vm8 = vcmp.ge.s32.totalorder %v5862_v14, 4294967294  ;;  %vm429_vm9 = vcmp.lt.s32.totalorder %v5862_v14, 14  ;;  %vm219_vm12 = vcmp.ge.s32.totalorder %v5862_v14, 15 }
 0x184   :  { %v392_v18 = vsel %vm391_vm13, 1, %v5689_v5  ;;  %vm404_vm2 = vmand %vm7481_vm15, %vm403_vm14  ;;  %v383_v20 = vrot.slane %v379_v17, %v5876_v19  ;;  %vm220_vm13 = vcmp.lt.s32.totalorder %v5862_v14, 31  ;;  %vm233_vm14 = vcmp.ge.s32.totalorder %v5862_v14, 14 }
 0x185   :  { %v396_v21 = vrot.slane %v392_v18, %v5876_v19  ;;  %v405_v22 = vsel %vm404_vm2, 1, %v5689_v5  ;;  %vm417_vm10 = vmand %vm415_vm4, %vm416_vm3  ;;  %vm234_vm6 = vcmp.lt.s32.totalorder %v5862_v14, 30  ;;  %vm441_vm3 = vcmp.ge.s32.totalorder %v5862_v14, 4294967293 }
 0x186   :  { %359 = vrot.lane.b32.xlu0 %v5778_v8, %s7458_s6  ;;  %593 = vrot.lane.b32.xlu1 %v5778_v8, %s7502_s7  ;;  %s7498_s6 = smov 113   ;;  %vm430_vm11 = vmand %vm428_vm8, %vm429_vm9  ;;  %v409_v25 = vrot.slane %v405_v22, %v5876_v19  ;;  %v418_v26 = vsel %vm417_vm10, 1, %v5689_v5  ;;  %vm384_vm5 = vcmp.eq.s32.totalorder %v383_v20, 1  ;;  %vm442_vm4 = vcmp.lt.s32.totalorder %v5862_v14, 13 }
 0x187   :  { %vm397_vm0 = vcmp.eq.s32.totalorder %v396_v21, 1  ;;  %v431_v27 = vsel %vm430_vm11, 1, %v5689_v5  ;;  %vm221_vm2 = vmand %vm219_vm12, %vm220_vm13  ;;  %v422_v28 = vrot.slane %v418_v26, %v5876_v19  ;;  %vm454_vm9 = vcmp.ge.s32.totalorder %v5862_v14, 4294967292 }
 0x188   :  { %vm235_vm8 = vmand %vm233_vm14, %vm234_vm6  ;;  %vm455_vm10 = vcmp.lt.s32.totalorder %v5862_v14, 12  ;;  %vm5899_vm1 = vcmp.eq.s32.totalorder %v409_v25, 1  ;;  %v435_v34 = vrot.slane %v431_v27, %v5876_v19  ;;  %v222_v35 = vsel %vm221_vm2, 1, %v5689_v5 }
 0x189   :  { %vm5895_vm7 = vmpackc.low %vm397_vm0, %vm384_vm5  ;;  %v236_v36 = vsel %vm235_vm8, 1, %v5689_v5  ;;  %vm5912_vm0 = vcmp.eq.s32.totalorder %v422_v28, 1  ;;  %vm246_vm5 = vcmp.ge.s32.totalorder %v5862_v14, 13  ;;  %vm247_vm12 = vcmp.lt.s32.totalorder %v5862_v14, 29 }
 0x18a   :  { %606 = vrot.lane.b32.xlu0 %v5778_v8, %s7466_s8  ;;  %567 = vrot.lane.b32.xlu1 %v5778_v8, %s7464_s9  ;;  %vm443_vm6 = vmand %vm441_vm3, %vm442_vm4  ;;  %vm7479_vm13 = vmmov 1   ;;  %v226_v43 = vrot.slane %v222_v35, %v5876_v19  ;;  %vm259_vm2 = vcmp.ge.s32.totalorder %v5862_v14, 12  ;;  %vm260_vm3 = vcmp.lt.s32.totalorder %v5862_v14, 28  ;;  %s7678_s8 = smov 96  }
 0x18b   :  { %vm5906_vm11 = vmand %vm454_vm9, %vm455_vm10  ;;  %v444_v44 = vsel %vm443_vm6, 1, %v5689_v5  ;;  %vm436_vm4 = vcmp.eq.s32.totalorder %v435_v34, 1  ;;  %v240_v46 = vrot.slane %v236_v36, %v5876_v19  ;;  %vm467_vm8 = vcmp.ge.s32.totalorder %v5862_v14, 4294967291 }
 0x18c   :  { %vm5922_vm14 = vmpackc.low %vm7479_vm13, %vm5899_vm1  ;;  %v457_v47 = vsel %vm5906_vm11, 1, %v5689_v5  ;;  %vm468_vm9 = vcmp.lt.s32.totalorder %v5862_v14, 11  ;;  %v448_v49 = vrot.slane %v444_v44, %v5876_v19  ;;  %vm480_vm6 = vcmp.ge.s32.totalorder %v5862_v14, 4294967290 }
 0x18d   :  { %vm5938_vm1 = vmand %vm246_vm5, %vm247_vm12  ;;  %vm481_vm11 = vcmp.lt.s32.totalorder %v5862_v14, 10  ;;  %v461_v53 = vrot.slane %v457_v47, %v5876_v19  ;;  %vm227_vm12 = vcmp.eq.s32.totalorder %v226_v43, 1  ;;  %vm241_vm13 = vcmp.eq.s32.totalorder %v240_v46, 1 }
 0x18e   :  { %372 = vrot.lane.b32.xlu1 %v5778_v8, %s7498_s6  ;;  %632 = vrot.lane.b32.xlu0 %v5848_v12, %s7557_s28  ;;  %vm261_vm10 = vmand %vm259_vm2, %vm260_vm3  ;;  %v249_v55 = vsel %vm5938_vm1, 1, %v5689_v5  ;;  %vm273_vm15 = vcmp.lt.s32.totalorder %v5862_v14, 27  ;;  %v7616_v20 = vmov 0  ;;  %s5727_s6 = smov 5  }
 0x18f   :  { %vm5952_vm5 = vmpackc.low %vm436_vm4, %vm5912_vm0  ;;  %v262_v56 = vsel %vm261_vm10, 1, %v5689_v5  ;;  %vm5965_vm0 = vcmp.eq.s32.totalorder %v448_v49, 1  ;;  %vm272_vm4 = vcmp.ge.s32.totalorder %v5862_v14, 11  ;;  %vm5975_vm1 = vcmp.eq.s32.totalorder %v461_v53, 1  ;;  %s4192_s26 = sld [smem:[%s7449_s0 + %s5727_s6]]   ;;  %s7682_s6 = smov 100  }
 0x190   :  { %v7603_v52 = vsel %vm5952_vm5, 4294967295, %v7602_v52  ;;  %vm469_vm2 = vmand %vm467_vm8, %vm468_vm9  ;;  %vm285_vm9 = vcmp.ge.s32.totalorder %v5862_v14, 10  ;;  %vm286_vm10 = vcmp.lt.s32.totalorder %v5862_v14, 26  ;;  %v253_v1 = vrot.slane %v249_v55, %v5876_v19 }
 0x191   :  { %vm482_vm3 = vmand %vm480_vm6, %vm481_vm11  ;;  %v470_v62 = vsel %vm469_vm2, 1, %v5689_v5  ;;  %v266_v2 = vrot.slane %v262_v56, %v5876_v19  ;;  %vm493_vm6 = vcmp.ge.s32.totalorder %v5862_v14, 4294967289  ;;  %vm494_vm11 = vcmp.lt.s32.totalorder %v5862_v14, 9 }
 0x192   :  { %636 = vrot.lane.b32.xlu1 %v5848_v12, %s7555_s2  ;;  %vm5971_vm8 = vmpackc.low %vm241_vm13, %vm227_vm12  ;;  %v483_v3 = vsel %vm482_vm3, 1, %v5689_v5  ;;  %v474_v6 = vrot.slane %v470_v62, %v5876_v19  ;;  %vm506_vm2 = vcmp.ge.s32.totalorder %v5862_v14, 4294967288  ;;  %vm254_vm3 = vcmp.eq.s32.totalorder %v253_v1, 1 }
 0x193   :  { %v7607_v60 = vsel %vm5971_vm8, 4294967295, %v7606_v60  ;;  %vm5985_vm13 = vmand %vm272_vm4, %vm273_vm15  ;;  %v487_v10 = vrot.slane %v483_v3, %v5876_v19  ;;  %vm267_vm4 = vcmp.eq.s32.totalorder %v266_v2, 1  ;;  %v7630_v53 = vmov 0 }
 0x194   :  { %vm287_vm12 = vmand %vm285_vm9, %vm286_vm10  ;;  %v275_v13 = vsel %vm5985_vm13, 1, %v5689_v5  ;;  %v7638_v1 = vmov 0 }
 0x195   :  { %vm6000_vm15 = vmpackc.low %vm5975_vm1, %vm5965_vm0  ;;  %v288_v15 = vsel %vm287_vm12, 1, %v5689_v5  ;;  %vm6011_vm0 = vcmp.eq.s32.totalorder %v474_v6, 1  ;;  %vm298_vm1 = vcmp.ge.s32.totalorder %v5862_v14, 9  ;;  %vm6021_vm13 = vcmp.eq.s32.totalorder %v487_v10, 1 }
 0x196   :  { %v7613_v9 = vsel %vm6000_vm15, 4294967295, %v7612_v9  ;;  %vm495_vm9 = vmand %vm493_vm6, %vm494_vm11  ;;  %vm312_vm11 = vcmp.lt.s32.totalorder %v5862_v14, 24  ;;  %v292_v25 = vrot.slane %v288_v15, %v5876_v19 }
 0x197   :  { %vm6017_vm6 = vmpackc.low %vm267_vm4, %vm254_vm3  ;;  %v496_v22 = vsel %vm495_vm9, 1, %v5689_v5  ;;  %vm520_vm3 = vcmp.lt.s32.totalorder %v5862_v14, 7  ;;  %vm532_vm9 = vcmp.ge.s32.totalorder %v5862_v14, 4294967286 }
 0x198   :  { %v7617_v20 = vsel %vm6017_vm6, 4294967295, %v7616_v20  ;;  %v500_v28 = vrot.slane %v496_v22, %v5876_v19 }
 0x1c4   :  { %v386_v23 = vpop.permute.xlu1 %385  ;;  %v412_v24 = vpop.permute.xlu0 %411 }
 0x1c8   :  { %v399_v29 = vpop.permute.xlu1 %398  ;;  %v425_v30 = vpop.permute.xlu0 %424 }
 0x1c9   :  { %v5049_v33 = vpack.c.bf16 %v399_v29, %v386_v23 }
 0x1cb   :  { %5051 = vmatprep.subr.msk.bf16.mxu1 %vm5895_vm7, %v5049_v33 }
 0x1cc   :  { %v642_v39 = vpop.permute.xlu1 %641  ;;  %v230_v40 = vpop.permute.xlu0 %229  ;;  %5052 = vmatpush3.bf16.msra.mxu1 %v5724_v41 }
 0x1cd   :  { %v5053_v45 = vpack.c.bf16 %v642_v39, %v412_v24  ;;  %v279_v24 = vrot.slane %v275_v13, %v5876_v19 }
 0x1cf   :  { %5055 = vmatprep.subr.msk.bf16.mxu1 %vm5922_vm14, %v5053_v45 }
 0x1d0   :  { %v438_v50 = vpop.permute.xlu1 %437  ;;  %v451_v51 = vpop.permute.xlu0 %450  ;;  %5056 = vmatpush3.bf16.msra.mxu1 %v5724_v41 }
 0x1d1   :  { %v5057_v54 = vpack.c.bf16 %v438_v50, %v425_v30 }
 0x1d3   :  { %5059 = vmatprep.subr.msk.bf16.mxu1 %vm5952_vm5, %v5057_v54  ;;  %vm507_vm5 = vcmp.lt.s32.totalorder %v5862_v14, 8 }
 0x1d4   :  { %v243_v58 = vpop.permute.xlu1 %242  ;;  %v256_v59 = vpop.permute.xlu0 %255  ;;  %vm508_vm10 = vmand %vm506_vm2, %vm507_vm5  ;;  %vm311_vm5 = vcmp.ge.s32.totalorder %v5862_v14, 8  ;;  %vm519_vm2 = vcmp.ge.s32.totalorder %v5862_v14, 4294967287 }
 0x1d5   :  { %v5060_v63 = vpack.c.bf16 %v243_v58, %v230_v40  ;;  %v509_v26 = vsel %vm508_vm10, 1, %v5689_v5  ;;  %vm313_vm4 = vmand %vm311_vm5, %vm312_vm11  ;;  %vm280_vm10 = vcmp.eq.s32.totalorder %v279_v24, 1  ;;  %v7626_v40 = vmov 0 }
 0x1d6   :  { %v513_v33 = vrot.slane %v509_v26, %v5876_v19  ;;  %vm521_vm5 = vmand %vm519_vm2, %vm520_vm3  ;;  %v314_v36 = vsel %vm313_vm4, 1, %v5689_v5  ;;  %vm338_vm3 = vcmp.lt.s32.totalorder %v5862_v14, 22 }
 0x1d7   :  { %5062 = vmatpush3.bf16.msk.msra.mxu1 %vm5971_vm8, %v5060_v63  ;;  %vm299_vm8 = vcmp.lt.s32.totalorder %v5862_v14, 25  ;;  %v522_v44 = vsel %vm521_vm5, 1, %v5689_v5  ;;  %v318_v47 = vrot.slane %v314_v36, %v5876_v19  ;;  %vm584_vm5 = vcmp.ge.s32.totalorder %v5862_v14, 4294967282 }
 0x1d8   :  { %v464_v7 = vpop.permute.xlu1 %463  ;;  %v477_v8 = vpop.permute.xlu0 %476  ;;  %vm6031_vm12 = vmand %vm298_vm1, %vm299_vm8  ;;  %vm293_vm1 = vcmp.eq.s32.totalorder %v292_v25, 1  ;;  %v526_v49 = vrot.slane %v522_v44, %v5876_v19 }
 0x1d9   :  { %v5063_v11 = vpack.c.bf16 %v464_v7, %v451_v51  ;;  %vm6046_vm8 = vmpackc.low %vm6021_vm13, %vm6011_vm0  ;;  %v301_v35 = vsel %vm6031_vm12, 1, %v5689_v5  ;;  %vm6057_vm0 = vcmp.eq.s32.totalorder %v500_v28, 1  ;;  %vm324_vm13 = vcmp.ge.s32.totalorder %v5862_v14, 7 }
 0x1da   :  { %v7623_v32 = vsel %vm6046_vm8, 4294967295, %v7622_v32  ;;  %vm6063_vm2 = vmpackc.low %vm293_vm1, %vm280_vm10  ;;  %vm6067_vm12 = vcmp.eq.s32.totalorder %v513_v33, 1  ;;  %v305_v46 = vrot.slane %v301_v35, %v5876_v19  ;;  %vm572_vm10 = vcmp.lt.s32.totalorder %v5862_v14, 3 }
 0x1db   :  { %5065 = vmatprep.subr.msk.bf16.mxu1 %vm6000_vm15, %v5063_v11  ;;  %vm533_vm15 = vcmp.lt.s32.totalorder %v5862_v14, 6  ;;  %v7627_v40 = vsel %vm6063_vm2, 4294967295, %v7626_v40  ;;  %v7649_v28 = vmov 0  ;;  %v649_v11 = vld [vmem:[%s5831_s30 + $0x28] sm:$0xff] }
 0x1dc   :  { %v269_v17 = vpop.permute.xlu1 %268  ;;  %v282_v18 = vpop.permute.xlu0 %281  ;;  %vm534_vm11 = vmand %vm532_vm9, %vm533_vm15  ;;  %vm337_vm15 = vcmp.ge.s32.totalorder %v5862_v14, 6  ;;  %vm571_vm9 = vcmp.ge.s32.totalorder %v5862_v14, 4294967283 }
 0x1dd   :  { %v5066_v23 = vpack.c.bf16 %v269_v17, %v256_v59  ;;  %v535_v48 = vsel %vm534_vm11, 1, %v5689_v5  ;;  %vm339_vm1 = vmand %vm337_vm15, %vm338_vm3  ;;  %vm306_vm11 = vcmp.eq.s32.totalorder %v305_v46, 1 }
 0x1de   :  { %v539_v54 = vrot.slane %v535_v48, %v5876_v19  ;;  %vm6096_vm15 = vmand %vm571_vm9, %vm572_vm10  ;;  %v340_v58 = vsel %vm339_vm1, 1, %v5689_v5  ;;  %vm545_vm9 = vcmp.ge.s32.totalorder %v5862_v14, 4294967285  ;;  %vm546_vm10 = vcmp.lt.s32.totalorder %v5862_v14, 5 }
 0x1df   :  { %5068 = vmatpush3.bf16.msk.msra.mxu1 %vm6017_vm6, %v5066_v23  ;;  %vm325_vm6 = vcmp.lt.s32.totalorder %v5862_v14, 23  ;;  %vm558_vm1 = vcmp.ge.s32.totalorder %v5862_v14, 4294967284  ;;  %v344_v7 = vrot.slane %v340_v58, %v5876_v19  ;;  %v7663_v58 = vmov 0 }
 0x1e0   :  { %v490_v29 = vpop.permute.xlu1 %489  ;;  %v503_v30 = vpop.permute.xlu0 %502  ;;  %vm326_vm4 = vmand %vm324_vm13, %vm325_vm6  ;;  %vm319_vm13 = vcmp.eq.s32.totalorder %v318_v47, 1  ;;  %v7655_v47 = vmov 0 }
 0x1e1   :  { %v5069_v34 = vpack.c.bf16 %v490_v29, %v477_v8  ;;  %vm6088_vm6 = vmpackc.low %vm6067_vm12, %vm6057_vm0  ;;  %v327_v56 = vsel %vm326_vm4, 1, %v5689_v5  ;;  %vm598_vm0 = vcmp.lt.s32.totalorder %v5862_v14, 1  ;;  %vm6109_vm4 = vcmp.eq.s32.totalorder %v526_v49, 1 }
 0x1e2   :  { %v7631_v53 = vsel %vm6088_vm6, 4294967295, %v7630_v53  ;;  %vm6115_vm3 = vmpackc.low %vm319_vm13, %vm306_vm11  ;;  %v331_v3 = vrot.slane %v327_v56, %v5876_v19  ;;  %v574_v8 = vsel %vm6096_vm15, 1, %v5689_v5  ;;  %vm350_vm13 = vcmp.ge.s32.totalorder %v5862_v14, 5 }
 0x1e3   :  { %5071 = vmatprep.subr.msk.bf16.mxu1 %vm6046_vm8, %v5069_v34  ;;  %vm585_vm8 = vcmp.lt.s32.totalorder %v5862_v14, 2  ;;  %v7639_v1 = vsel %vm6115_vm3, 4294967295, %v7638_v1  ;;  %vm6139_vm11 = vmand %vm545_vm9, %vm546_vm10  ;;  %v578_v17 = vrot.slane %v574_v8, %v5876_v19  ;;  %vm364_vm9 = vcmp.lt.s32.totalorder %v5862_v14, 20  ;;  %v651_v8 = vld [vmem:[%s5831_s30 + $0x38] sm:$0xff] }
 0x1e4   :  { %v295_v38 = vpop.permute.xlu1 %294  ;;  %v308_v39 = vpop.permute.xlu0 %307  ;;  %vm6103_vm12 = vmand %vm584_vm5, %vm585_vm8  ;;  %vm6119_vm8 = vcmp.eq.s32.totalorder %v539_v54, 1  ;;  %vm559_vm5 = vcmp.lt.s32.totalorder %v5862_v14, 4  ;;  %vm332_vm10 = vcmp.eq.s32.totalorder %v331_v3, 1  ;;  %v548_v23 = vsel %vm6139_vm11, 1, %v5689_v5  ;;  %v648_v3 = vld [vmem:[%s5831_s30 + $0x20] sm:$0xff] }
 0x1e5   :  { %v5072_v45 = vpack.c.bf16 %v295_v38, %v282_v18  ;;  %v587_v10 = vsel %vm6103_vm12, 1, %v5689_v5  ;;  %vm6151_vm15 = vmpackc.low %vm6119_vm8, %vm6109_vm4  ;;  %vm363_vm12 = vcmp.ge.s32.totalorder %v5862_v14, 4  ;;  %vm624_vm11 = vcmp.le.s32.totalorder %v5862_v14, 14 }
 0x1e6   :  { %v7648_v16 = vsel %vm6151_vm15, 4294967295, %v7647_v16  ;;  %v591_v18 = vrot.slane %v587_v10, %v5876_v19  ;;  %vm365_vm8 = vmand %vm363_vm12, %vm364_vm9  ;;  %v625_v46 = vsel %vm624_vm11, 1, %v5689_v5  ;;  %v7659_v56 = vmov 0  ;;  %v650_v10 = vld [vmem:[%s5831_s30 + $0x30] sm:$0xff] }
 0x1e7   :  { %5074 = vmatpush3.bf16.msk.msra.mxu1 %vm6063_vm2, %v5072_v45  ;;  %v366_v35 = vsel %vm365_vm8, 1, %v5689_v5  ;;  %v629_v54 = vrot.slane %v625_v46, %v5876_v19 }
 0x1e8   :  { %v516_v50 = vpop.permute.xlu1 %515  ;;  %v529_v51 = vpop.permute.xlu0 %528  ;;  %v370_v45 = vrot.slane %v366_v35, %v5876_v19 }
 0x1e9   :  { %v5075_v55 = vpack.c.bf16 %v516_v50, %v503_v30  ;;  %v552_v30 = vrot.slane %v548_v23, %v5876_v19  ;;  %v7657_v50 = vmov 0 }
 0x1ea   :  { %vm371_vm8 = vcmp.eq.s32.totalorder %v370_v45, 1 }
 0x1eb   :  { %5077 = vmatprep.subr.msk.bf16.mxu1 %vm6088_vm6, %v5075_v55  ;;  %vm7642_vm6 = vcmp.ge.s32.totalorder %v5862_v14, 4294967281  ;;  %vm553_vm12 = vcmp.eq.s32.totalorder %v552_v30, 1 }
 0x1ec   :  { %v321_v62 = vpop.permute.xlu1 %320  ;;  %v334_v63 = vpop.permute.xlu0 %333  ;;  %vm6128_vm2 = vmand %vm7642_vm6, %vm598_vm0  ;;  %vm351_vm0 = vcmp.lt.s32.totalorder %v5862_v14, 21 }
 0x1ed   :  { %v5078_v6 = vpack.c.bf16 %v321_v62, %v308_v39  ;;  %vm560_vm6 = vmand %vm558_vm1, %vm559_vm5  ;;  %v600_v21 = vsel %vm6128_vm2, 1, %v5689_v5  ;;  %vm345_vm1 = vcmp.eq.s32.totalorder %v344_v7, 1  ;;  %vm579_vm5 = vcmp.eq.s32.totalorder %v578_v17, 1  ;;  %v647_v7 = vld [vmem:[%s5831_s30 + $0x18] sm:$0xff]  ;;  %v653_v17 = vld [vmem:[%s5831_s30 + $0x48] sm:$0xff] }
 0x1ee   :  { %v561_v24 = vsel %vm560_vm6, 1, %v5689_v5  ;;  %vm352_vm4 = vmand %vm350_vm13, %vm351_vm0  ;;  %v604_v25 = vrot.slane %v600_v21, %v5876_v19  ;;  %vm7651_vm13 = vcmp.ge.s32.totalorder %v5862_v14, 1  ;;  %v7652_v39 = vmov 0 }
 0x1ef   :  { %5080 = vmatpush3.bf16.msk.msra.mxu1 %vm6115_vm3, %v5078_v6  ;;  %vm6171_vm2 = vmpackc.low %vm345_vm1, %vm332_vm10  ;;  %vm592_vm3 = vcmp.eq.s32.totalorder %v591_v18, 1  ;;  %v565_v33 = vrot.slane %v561_v24, %v5876_v19  ;;  %v353_v34 = vsel %vm352_vm4, 1, %v5689_v5  ;;  %v617_v36 = vsel %vm7651_vm13, 1, %v5689_v5  ;;  %v655_v18 = vld [vmem:[%s5831_s30 + $0x58] sm:$0xff] }
 0x1f0   :  { %v542_v13 = vpop.permute.xlu1 %541  ;;  %v581_v15 = vpop.permute.xlu0 %580  ;;  %v7650_v28 = vsel %vm6171_vm2, 4294967295, %v7649_v28  ;;  %vm605_vm6 = vcmp.eq.s32.totalorder %v604_v25, 1  ;;  %vm6185_vm0 = vmpackc.low %vm592_vm3, %vm579_vm5  ;;  %v357_v43 = vrot.slane %v353_v34, %v5876_v19  ;;  %vm7654_vm10 = vmmov 1  }
 0x1f1   :  { %v5081_v22 = vpack.c.bf16 %v542_v13, %v529_v51  ;;  %v7653_v39 = vsel %vm6185_vm0, 4294967295, %v7652_v39  ;;  %vm566_vm9 = vcmp.eq.s32.totalorder %v565_v33, 1  ;;  %vm6193_vm1 = vmpackc.low %vm7654_vm10, %vm605_vm6  ;;  %v621_v14 = vrot.slane %v617_v36, %v5876_v19  ;;  %v654_v13 = vld [vmem:[%s5831_s30 + $0x50] sm:$0xff] }
 0x1f2   :  { %v7656_v47 = vsel %vm6193_vm1, 4294967295, %v7655_v47  ;;  %vm6202_vm3 = vmpackc.low %vm566_vm9, %vm553_vm12  ;;  %vm358_vm4 = vcmp.eq.s32.totalorder %v357_v43, 1  ;;  %vm6222_vm6 = vcmp.eq.s32.totalorder %v629_v54, 1  ;;  %vm7665_vm13 = vcmask 1043456  }
 0x1f3   :  { %5083 = vmatprep.subr.msk.bf16.mxu1 %vm6151_vm15, %v5081_v22  ;;  %v7658_v50 = vsel %vm6202_vm3, 4294967295, %v7657_v50  ;;  %vm6214_vm5 = vmpackc.low %vm371_vm8, %vm358_vm4  ;;  %vm6218_vm11 = vcmp.eq.s32.totalorder %v621_v14, 1  ;;  %v7664_v58 = vsel %vm6222_vm6, 4294967295, %v7663_v58  ;;  %vm7666_vm9 = vcmask 490496  }
 0x1f4   :  { %v347_v26 = vpop.permute.xlu1 %346  ;;  %v555_v27 = vpop.permute.xlu0 %554  ;;  %v7660_v56 = vsel %vm6214_vm5, 4294967295, %v7659_v56  ;;  %v7662_v57 = vsel %vm6218_vm11, 4294967295, %v7661_v57  ;;  %vm5108_vm12 = vmpackc.low %vm7665_vm13, %vm7654_vm10  ;;  %vm7669_vm8 = vmmov 0   ;;  %vm7522_vm13 = vcmask 261120  }
 0x1f5   :  { %v5084_v29 = vpack.c.bf16 %v347_v26, %v334_v63  ;;  %v623_v63 = vsel %vm6218_vm11, %v5848_v12, -inf  ;;  %vm7667_vm10 = vmmov %vm7666_vm9 }
 0x1f6   :  { %vm7668_vm4 = vmmov %vm7666_vm9 }
 0x1f7   :  { %5086 = vmatpush3.bf16.msk.msra.mxu1 %vm6171_vm2, %v5084_v29 }
 0x1f8   :  { %v594_v37 = vpop.permute.xlu1 %593  ;;  %v360_v38 = vpop.permute.xlu0 %359 }
 0x1f9   :  { %v5093_v44 = vpack.c.bf16 %v594_v37, %v581_v15  ;;  %v652_v15 = vld [vmem:[%s5831_s30 + $0x40] sm:$0xff]  ;;  %s5726_s30 = smov 4  }
 0x1fa   :  { %s4191_s9 = sld [smem:[%s7449_s0 + %s5726_s30]]   ;;  %s7676_s30 = smov 102  }
 0x1fb   :  { %5095 = vmatprep.subr.msk.bf16.mxu0 %vm6185_vm0, %v5093_v44 }
 0x1fc   :  { %v568_v48 = vpop.permute.xlu1 %567  ;;  %5098 = vmatpush3.bf16.msk.msra.mxu0 %vm6185_vm0, %v5093_v44  ;;  %v607_v49 = vpop.permute.xlu0 %606 }
 0x1fd   :  { %v5087_v5 = vpack.c.bf16 %v568_v48, %v555_v27  ;;  %v5099_v51 = vpack.c.bf16 %v5684_v0, %v607_v49 }
 0x1ff   :  { %5089 = vmatprep.subr.msk.bf16.mxu1 %vm6202_vm3, %v5087_v5  ;;  %5101 = vmatprep.subr.msk.bf16.mxu0 %vm6193_vm1, %v5099_v51 }
 0x200   :  { %v373_v55 = vpop.permute.xlu1 %372  ;;  %5104 = vmatpush3.bf16.msk.msra.mxu0 %vm6193_vm1, %v5099_v51  ;;  %v633_v59 = vpop.permute.xlu0 %632 }
 0x201   :  { %v5090_v19 = vpack.c.bf16 %v373_v55, %v360_v38  ;;  %5105 = vmatprep.subr.bf16.mxu0 %v5724_v41  ;;  %v635_v2 = vsel %vm6222_vm6, %v633_v59, -inf }
 0x203   :  { %5092 = vmatpush3.bf16.msk.msra.mxu1 %vm6214_vm5, %v5090_v19 }
 0x204   :  { %v637_v62 = vpop.permute.xlu1 %636  ;;  %5106 = vmatpush3.bf16.msra.mxu0 %v5724_v41 }
 0x205   :  { %v639_v4 = vmax.f32 %v623_v63, %v637_v62 }
 0x206   :  { %737 = vmatmul.mubr.f32.vlgmr.msra.gmra.mrb[2].mxu1 %v644_v61 }
 0x207   :  { %v640_v6 = vmax.f32 %v639_v4, %v635_v2  ;;  %741 = vmatprep.mubr.f32.mxu1 %v648_v3 }
 0x209   :  { %v5107_v12 = vpack.c.bf16 %v640_v6, %v5684_v0 }
 0x20a   :  { %742 = vmatmul.mubr.f32.gmra.mrb[4].mxu1 %v647_v7 }
 0x20b   :  { %5109 = vmatprep.subr.msk.bf16.mxu0 %vm5108_vm12, %v5107_v12  ;;  %746 = vmatprep.mubr.f32.mxu1 %v651_v8 }
 0x20c   :  { %5112 = vmatpush3.bf16.msk.msra.mxu0 %vm5108_vm12, %v5107_v12  ;;  %vm7670_vm12 = vcmask 7168  }
 0x20d   :  { %5113 = vmatprep.subr.bf16.mxu0 %v5724_v41 }
 0x20e   :  { %747 = vmatmul.mubr.f32.gmra.mrb[6].mxu1 %v650_v10 }
 0x20f   :  { %4841 = vmatmul.mubr.msk.f32.vlgmr.msra.gmra.mrb[0].mxu0 %vm7666_vm9, %v649_v11  ;;  %751 = vmatprep.mubr.f32.mxu1 %v654_v13  ;;  %v897_v11 = vld [vmem:[%s4191_s9 + $0x8] sm:$0xff]  ;;  %v924_v13 = vld [vmem:[%s4192_s26] sm:$0xff]  ;;  %vm7671_vm9 = vmmov %vm7670_vm12 }
 0x210   :  { %4843 = vmatprep.mubr.msk.f32.mxu0 %vm7667_vm10, %v652_v15  ;;  %v925_v15 = vld [vmem:[%s4192_s26 + $0x8] sm:$0xff]  ;;  %vm7672_vm10 = vcmask 269312  }
 0x212   :  { %752 = vmatmul.mubr.f32.gmra.mrb[8].mxu1 %v653_v17  ;;  %v896_v17 = vld [vmem:[%s4191_s9] sm:$0xff] }
 0x213   :  { %4844 = vmatmul.mubr.msk.f32.gmra.mrb[2].mxu0 %vm7668_vm4, %v655_v18  ;;  %v898_v18 = vld [vmem:[%s4191_s9 + $0x10] sm:$0xff]  ;;  %vm7673_vm4 = vmmov %vm7672_vm10 }
 0x214   :  { %4854 = vmatprep.mubr.msk.f32.mxu0 %vm7669_vm8, %v5684_v0 }
 0x2d9   :  { %v4470_v21 = vpop.f32.mrb[2].mxu1 }
 0x2da   :  { %v4471_v22 = vpop.f32.mrb[3].mxu1 }
 0x2db   :  { %v4472_v23 = vadd.f32 %v4471_v22, %v4470_v21  ;;  %v899_v21 = vld [vmem:[%s4191_s9 + $0x18] sm:$0xff]  ;;  %v926_v22 = vld [vmem:[%s4192_s26 + $0x10] sm:$0xff]  ;;  %s7679_s9 = smov 117  }
 0x2dd   :  { %v4473_v24 = vpop.f32.mrb[4].mxu1 }
 0x2de   :  { %v4474_v25 = vpop.f32.mrb[5].mxu1 }
 0x2df   :  { %v4475_v26 = vadd.f32 %v4474_v25, %v4473_v24 }
 0x2e1   :  { %v4476_v27 = vpop.f32.mrb[6].mxu1 }
 0x2e2   :  { %v4842_v29 = vpop.f32.mrb[0].mxu0  ;;  %v4477_v30 = vpop.f32.mrb[7].mxu1 }
 0x2e3   :  { %v829_v33 = vadd.f32 %v4842_v29, %v4475_v26  ;;  %v823_v34 = vpop.f32.mrb[1].mxu0  ;;  %v4478_v35 = vadd.f32 %v4477_v30, %v4476_v27  ;;  %v927_v29 = vld [vmem:[%s4192_s26 + $0x18] sm:$0xff]  ;;  %s5728_s26 = smov 6  }
 0x2e4   :  { %v824_v36 = vadd.f32 %v4472_v23, %v823_v34  ;;  %s4193_s7 = sld [smem:[%s7449_s0 + %s5728_s26]]   ;;  %s7680_s26 = smov 118  }
 0x2e5   :  { %v4479_v37 = vpop.f32.mrb[8].mxu1  ;;  %v846_v38 = vsel %vm7522_vm13, %v829_v33, 0.0 }
 0x2e6   :  { %v4480_v43 = vpop.f32.mrb[9].mxu1  ;;  %v4845_v44 = vpop.f32.mrb[2].mxu0  ;;  %847 = vadd.xlane.f32.xlu0 %v846_v38  ;;  %v843_v45 = vsel %vm7522_vm13, %v824_v36, 0.0 }
 0x2e7   :  { %v4481_v46 = vadd.f32 %v4480_v43, %v4479_v37  ;;  %v833_v14 = vpop.f32.mrb[3].mxu0  ;;  %844 = vadd.xlane.f32.xlu1 %v843_v45 }
 0x2e8   :  { %v834_v48 = vadd.f32 %v4478_v35, %v833_v14 }
 0x2e9   :  { %v839_v49 = vadd.f32 %v4845_v44, %v4481_v46 }
 0x2ea   :  { %v849_v5 = vsel %vm7522_vm13, %v834_v48, 0.0 }
 0x2eb   :  { %850 = vadd.xlane.f32.xlu0 %v849_v5  ;;  %v852_v51 = vsel %vm7522_vm13, %v839_v49, 0.0 }
 0x2ec   :  { %853 = vadd.xlane.f32.xlu1 %v852_v51 }
 0x373   :  { %v848_v54 = vpop.xlane.xlu0 %847 }
 0x374   :  { %v857_v55 = vmul.f32 0.03125, %v848_v54  ;;  %v845_v19 = vpop.xlane.xlu1 %844 }
 0x375   :  { %v856_v59 = vmul.f32 0.03125, %v845_v19 }
 0x376   :  { %v861_v61 = vsub.f32 %v829_v33, %v857_v55 }
 0x377   :  { %v860_v62 = vsub.f32 %v824_v36, %v856_v59 }
 0x378   :  { %v851_v63 = vpop.xlane.xlu0 %850  ;;  %v865_v2 = vmul.f32 %v861_v61, %v861_v61 }
 0x379   :  { %v858_v3 = vmul.f32 0.03125, %v851_v63  ;;  %v864_v4 = vmul.f32 %v860_v62, %v860_v62  ;;  %v854_v23 = vpop.xlane.xlu1 %853 }
 0x37a   :  { %v871_v6 = vsel %vm7522_vm13, %v865_v2, 0.0  ;;  %v859_v24 = vmul.f32 0.03125, %v854_v23 }
 0x37b   :  { %v6259_v7 = vsub.f32 %v834_v48, %v858_v3  ;;  %872 = vadd.xlane.f32.xlu1 %v871_v6  ;;  %v868_v8 = vsel %vm7522_vm13, %v864_v4, 0.0 }
 0x37c   :  { %869 = vadd.xlane.f32.xlu0 %v868_v8  ;;  %v863_v25 = vsub.f32 %v839_v49, %v859_v24 }
 0x37d   :  { %v866_v12 = vmul.f32 %v6259_v7, %v6259_v7 }
 0x37e   :  { %v867_v26 = vmul.f32 %v863_v25, %v863_v25 }
 0x37f   :  { %v874_v10 = vsel %vm7522_vm13, %v866_v12, 0.0 }
 0x380   :  { %875 = vadd.xlane.f32.xlu0 %v874_v10  ;;  %v877_v27 = vsel %vm7522_vm13, %v867_v26, 0.0 }
 0x38c   :  { %907 = vperm.xlu1 %5543, %v897_v11  }
 0x390   :  { %930 = vperm.xlu1 %5543, %v924_v13  }
 0x394   :  { %935 = vperm.xlu1 %5543, %v925_v15  }
 0x396   :  { %902 = vperm.xlu0 %5542, %v896_v17  }
 0x398   :  { %912 = vperm.xlu1 %5543, %v898_v18  }
 0x39c   :  { %917 = vperm.xlu1 %5543, %v899_v21  }
 0x3a0   :  { %940 = vperm.xlu1 %5543, %v926_v22  }
 0x3c4   :  { %878 = vadd.xlane.f32.xlu1 %v877_v27 }
 0x3d5   :  { %945 = vperm.xlu1 %5543, %v927_v29  }
 0x408   :  { %v873_v30 = vpop.xlane.xlu1 %872 }
 0x409   :  { %v881_v33 = vmul.f32 0.03125, %v873_v30  ;;  %v870_v34 = vpop.xlane.xlu0 %869 }
 0x40a   :  { %v880_v35 = vmul.f32 0.03125, %v870_v34 }
 0x40b   :  { %v885_v36 = vadd.f32 1e-05, %v881_v33  ;;  %v956_v33 = vld [vmem:[%s4193_s7] sm:$0xff]  ;;  %s5729_s7 = smov 7  }
 0x40c   :  { %v884_v37 = vadd.f32 1e-05, %v880_v35  ;;  %v908_v38 = vpop.permute.xlu1 %907 }
 0x40d   :  { %5619 = vrsqrt.f32 %v885_v36  ;;  %v876_v43 = vpop.xlane.xlu0 %875 }
 0x40e   :  { %5621 = vrsqrt.f32 %v884_v37  ;;  %v882_v6 = vmul.f32 0.03125, %v876_v43 }
 0x410   :  { %v931_v44 = vpop.permute.xlu1 %930 }
 0x414   :  { %v936_v51 = vpop.permute.xlu1 %935 }
 0x415   :  { %v903_v48 = vpop.permute.xlu0 %902 }
 0x417   :  { %v5620_v45 = vpop.eup %5619 }
 0x418   :  { %v5622_v46 = vpop.eup %5621  ;;  %v893_v14 = vmul.f32 %v5620_v45, %v861_v61  ;;  %v913_v4 = vpop.permute.xlu1 %912  ;;  %v886_v61 = vadd.f32 1e-05, %v882_v6 }
 0x419   :  { %v892_v49 = vmul.f32 %v5622_v46, %v860_v62 }
 0x41a   :  { %v921_v5 = vmul.f32 %v908_v38, %v893_v14  ;;  %5623 = vrsqrt.f32 %v886_v61 }
 0x41b   :  { %v920_v54 = vmul.f32 %v903_v48, %v892_v49 }
 0x41c   :  { %v949_v55 = vadd.f32 %v936_v51, %v921_v5  ;;  %v918_v8 = vpop.permute.xlu1 %917 }
 0x41d   :  { %v948_v19 = vadd.f32 %v931_v44, %v920_v54 }
 0x41e   :  { %v953_v59 = vmax.f32 %v949_v55, 0.0 }
 0x41f   :  { %v952_v63 = vmax.f32 %v948_v19, 0.0 }
 0x420   :  { %v941_v12 = vpop.permute.xlu1 %940 }
 0x421   :  { %v5114_v2 = vpack.c.bf16 %v953_v59, %v952_v63  ;;  %v5544_v3 = vpack.i.bf16 %v953_v59, %v952_v63 }
 0x423   :  { %5545 = vrot.lane.b32.xlu0 %v5544_v3, %s7553_s11  ;;  %5115 = vmatpush3.bf16.msra.mxu0 %v5114_v2 }
 0x424   :  { %5116 = vmatprep.subr.bf16.mxu0 %v5724_v41  ;;  %v5624_v13 = vpop.eup %5623 }
 0x425   :  { %v894_v15 = vmul.f32 %v5624_v13, %v6259_v7 }
 0x427   :  { %v922_v17 = vmul.f32 %v913_v4, %v894_v15 }
 0x429   :  { %v950_v22 = vadd.f32 %v941_v12, %v922_v17 }
 0x42b   :  { %v954_v27 = vmax.f32 %v950_v22, 0.0 }
 0x451   :  { %v879_v62 = vpop.xlane.xlu1 %878 }
 0x452   :  { %v883_v10 = vmul.f32 0.03125, %v879_v62 }
 0x454   :  { %v887_v11 = vadd.f32 1e-05, %v883_v10 }
 0x455   :  { %v946_v24 = vpop.permute.xlu1 %945 }
 0x456   :  { %5625 = vrsqrt.f32 %v887_v11 }
 0x460   :  { %v5626_v18 = vpop.eup %5625 }
 0x461   :  { %v895_v21 = vmul.f32 %v5626_v18, %v863_v25 }
 0x463   :  { %v923_v23 = vmul.f32 %v918_v8, %v895_v21 }
 0x465   :  { %v951_v26 = vadd.f32 %v946_v24, %v923_v23 }
 0x467   :  { %v955_v29 = vmax.f32 %v951_v26, 0.0 }
 0x469   :  { %v5117_v30 = vpack.c.bf16 %v955_v29, %v954_v27  ;;  %1167 = vrot.lane.b32.xlu0 %v955_v29, %s7553_s11 }
 0x46b   :  { %5118 = vmatpush3.bf16.msra.mxu0 %v5117_v30 }
 0x46e   :  { %4855 = vmatmul.mubr.msk.f32.vlgmr.msra.gmra.mrb[4].mxu0 %vm7522_vm13, %v956_v33  ;;  %vm7696_vm13 = vnez %v7617_v20 }
 0x495   :  { %v5546_v7 = vpop.permute.xlu0 %5545 }
 0x496   :  { %v5548_v25 = vunpack.i.h.bf16 %v5546_v7  ;;  %v5547_v34 = vunpack.i.l.bf16 %v5546_v7 }
 0x498   :  { %v1174_v35 = vsel %vm7670_vm12, -inf, %v5548_v25  ;;  %v1173_v36 = vsel %vm7671_vm9, -inf, %v5547_v34  ;;  %vm7674_vm12 = vcmask 154624   ;;  %vm7675_vm9 = vcmask 416768  }
 0x499   :  { %v6283_v37 = vsel %vm7672_vm10, %v1173_v36, -inf  ;;  %v6286_v38 = vsel %vm7673_vm4, %v1174_v35, -inf  ;;  %vm7687_vm10 = vcmask 7168  }
 0x49a   :  { %v5549_v43 = vpack.i.bf16 %v6286_v38, %v6283_v37 }
 0x49c   :  { %5550 = vrot.lane.b32.xlu0 %v5549_v43, %s7555_s2 }
 0x4db   :  { %v1168_v54 = vpop.permute.xlu0 %1167 }
 0x50e   :  { %v6353_v3 = vpop.permute.xlu0 %5550 }
 0x541   :  { %v1026_v44 = vpop.f32.mrb[4].mxu0 }
 0x542   :  { %1031 = vrot.lane.b32.xlu1 %v1026_v44, %s7551_s10  ;;  %v4856_v45 = vpop.f32.mrb[5].mxu0 }
 0x546   :  { %1165 = vrot.lane.b32.xlu1 %v954_v27, %s7553_s11 }
 0x54a   :  { %1189 = vrot.lane.b32.xlu1 %v6283_v37, %s7557_s28 }
 0x5b4   :  { %v1032_v46 = vpop.permute.xlu1 %1031 }
 0x5b5   :  { %v1034_v14 = vsel %vm7674_vm12, 0.0, %v1032_v46  ;;  %vm7690_vm12 = vmmov %vm7687_vm10 }
 0x5b6   :  { %v1035_v48 = vsel %vm7675_vm9, %v1034_v14, 0.0  ;;  %v1176_v19 = vsel %vm7690_vm12, -inf, %v1168_v54  ;;  %vm7523_vm9 = vcmask 719872   ;;  %vm7694_vm12 = vnez %v7607_v60 }
 0x5b7   :  { %1089 = vrot.lane.b32.xlu0 %v1035_v48, %s7541_s15  ;;  %1085 = vrot.lane.b32.xlu1 %v1035_v48, %s7549_s13 }
 0x5b8   :  { %v1166_v5 = vpop.permute.xlu1 %1165 }
 0x5b9   :  { %v1175_v51 = vsel %vm7687_vm10, -inf, %v1166_v5  ;;  %vm7692_vm10 = vmmov %vm7673_vm4 }
 0x5ba   :  { %v6335_v55 = vsel %vm7673_vm4, %v1175_v51, -inf  ;;  %v6345_v2 = vsel %vm7692_vm10, %v1176_v19, -inf  ;;  %vm7693_vm4 = vnez %v7603_v52  ;;  %vm7695_vm10 = vnez %v7613_v9 }
 0x5bb   :  { %1225 = vrot.lane.b32.xlu0 %v1035_v48, %s7537_s17  ;;  %1093 = vrot.lane.b32.xlu1 %v1035_v48, %s7545_s12  ;;  %v5554_v59 = vpack.i.bf16 %v6335_v55, %v6286_v38  ;;  %v5552_v19 = vunpack.i.l.bf16 %v6353_v3  ;;  %s7726_s17 = smov 123  }
 0x5bc   :  { %v1190_v4 = vpop.permute.xlu1 %1189 }
 0x5bf   :  { %1101 = vrot.lane.b32.xlu0 %v1035_v48, %s7532_s19  ;;  %1097 = vrot.lane.b32.xlu1 %v1035_v48, %s7547_s14 }
 0x5c3   :  { %1041 = vrot.lane.b32.xlu0 %v1035_v48, %s7520_s21  ;;  %1037 = vrot.lane.b32.xlu1 %v1035_v48, %s7539_s16  ;;  %s7688_s21 = smov 113   ;;  %s7725_s16 = smov 122  }
 0x5c7   :  { %1109 = vrot.lane.b32.xlu0 %v1035_v48, %s7516_s23  ;;  %1105 = vrot.lane.b32.xlu1 %v1035_v48, %s7535_s18  ;;  %s7685_s23 = smov 98   ;;  %s5731_s18 = smov 9  }
 0x5c8   :  { %s6445_s15 = sld [smem:[%s7449_s0 + %s5731_s18]]  }
 0x5cb   :  { %1049 = vrot.lane.b32.xlu0 %v1035_v48, %s7514_s25  ;;  %1045 = vrot.lane.b32.xlu1 %v1035_v48, %s7530_s20  ;;  %s7684_s25 = smov 94   ;;  %s7721_s20 = smov 124  }
 0x5cf   :  { %1117 = vrot.lane.b32.xlu0 %v1035_v48, %s7508_s27  ;;  %1113 = vrot.lane.b32.xlu1 %v1035_v48, %s7518_s22  ;;  %s7686_s22 = smov 115   ;;  %s7689_s27 = smov 97  }
 0x5d3   :  { %1057 = vrot.lane.b32.xlu0 %v1035_v48, %s7506_s29  ;;  %1053 = vrot.lane.b32.xlu1 %v1035_v48, %s7510_s24  ;;  %s6324_s24 = sld [smem:[%s7449_s0 + %s5729_s7]]   ;;  %s7691_s29 = smov 114  }
 0x5d4   :  { %s7723_s7 = smov 106  }
 0x5d7   :  { %1125 = vrot.lane.b32.xlu0 %v1035_v48, %s7512_s1  ;;  %1121 = vrot.lane.b32.xlu1 %v1035_v48, %s7676_s30  ;;  %s7683_s1 = smov 116  }
 0x5d9   :  { %v1229_v49 = vld [vmem:[%s6324_s24 + $0x8] sm:$0xff]  ;;  %v1230_v63 = vld [vmem:[%s6324_s24 + $0x10] sm:$0xff] }
 0x5da   :  { %1317 = vmatprep.mubr.f32.mxu0 %v1229_v49  ;;  %4879 = vmatprep.mubr.msk.f32.mxu1 %vm7523_vm9, %v1230_v63  ;;  %vm7697_vm9 = vnez %v7623_v32  ;;  %v1181_v63 = vsel %vm6218_vm11, %v6283_v37, -inf }
 0x5db   :  { %1149 = vrot.lane.b32.xlu0 %v1035_v48, %s7677_s3  ;;  %1145 = vrot.lane.b32.xlu1 %v1035_v48, %s7678_s8 }
 0x5df   :  { %1065 = vrot.lane.b32.xlu0 %v1035_v48, %s7679_s9  ;;  %1061 = vrot.lane.b32.xlu1 %v1035_v48, %s7680_s26 }
 0x5e3   :  { %1133 = vrot.lane.b32.xlu0 %v1035_v48, %s7681_s4  ;;  %1129 = vrot.lane.b32.xlu1 %v1035_v48, %s7682_s6 }
 0x5e7   :  { %1069 = vrot.lane.b32.xlu0 %v1035_v48, %s7683_s1  ;;  %1153 = vrot.lane.b32.xlu1 %v1035_v48, %s7684_s25 }
 0x5eb   :  { %1137 = vrot.lane.b32.xlu0 %v1035_v48, %s7685_s23  ;;  %1073 = vrot.lane.b32.xlu1 %v1035_v48, %s7686_s22 }
 0x5ef   :  { %1081 = vrot.lane.b32.xlu0 %v1035_v48, %s7688_s21  ;;  %1141 = vrot.lane.b32.xlu1 %v1035_v48, %s7689_s27 }
 0x5f3   :  { %1077 = vrot.lane.b32.xlu1 %v1035_v48, %s7691_s29  ;;  %1209 = vrot.lane.b32.xlu0 %v6335_v55, %s7555_s2 }
 0x5f7   :  { %5555 = vrot.lane.b32.xlu1 %v5554_v59, %s7557_s28  ;;  %1211 = vrot.lane.b32.xlu0 %v6345_v2, %s7555_s2 }
 0x5fb   :  { %1195 = vrot.lane.b32.xlu1 %v6345_v2, %s7557_s28 }
 0x629   :  { %v1090_v6 = vpop.permute.xlu0 %1089  ;;  %v1086_v8 = vpop.permute.xlu1 %1085 }
 0x62a   :  { %v5119_v61 = vpack.c.bf16 %v1090_v6, %v1086_v8  ;;  %v1201_v6 = vsel %vm6222_vm6, %v1190_v4, -inf }
 0x62c   :  { %5121 = vmatprep.subr.msk.bf16.mxu0 %vm5895_vm7, %v5119_v61 }
 0x62d   :  { %v1226_v12 = vpop.permute.xlu0 %1225  ;;  %v1094_v62 = vpop.permute.xlu1 %1093  ;;  %5122 = vmatpush3.bf16.msra.mxu0 %v5724_v41 }
 0x62e   :  { %v5123_v10 = vpack.c.bf16 %v1226_v12, %v1094_v62  ;;  %v1217_v12 = vmax.f32 %v1181_v63, %v5552_v19  ;;  %v1238_v19 = vld [vmem:[%s6324_s24 + $0x50] sm:$0xff]  ;;  %v1237_v63 = vld [vmem:[%s6324_s24 + $0x48] sm:$0xff] }
 0x630   :  { %5125 = vmatprep.subr.msk.bf16.mxu0 %vm5922_vm14, %v5123_v10  ;;  %v1221_v10 = vmax.f32 %v1217_v12, %v1201_v6  ;;  %v1239_v6 = vld [vmem:[%s6324_s24 + $0x58] sm:$0xff] }
 0x631   :  { %v1102_v11 = vpop.permute.xlu0 %1101  ;;  %v1098_v13 = vpop.permute.xlu1 %1097  ;;  %5126 = vmatpush3.bf16.msra.mxu0 %v5724_v41 }
 0x632   :  { %v5127_v15 = vpack.c.bf16 %v1102_v11, %v1098_v13  ;;  %v5177_v37 = vpack.c.bf16 %v1221_v10, %v5684_v0 }
 0x634   :  { %5129 = vmatprep.subr.msk.bf16.mxu0 %vm7693_vm4, %v5127_v15 }
 0x635   :  { %v1042_v17 = vpop.permute.xlu0 %1041  ;;  %v1038_v18 = vpop.permute.xlu1 %1037 }
 0x636   :  { %v5130_v21 = vpack.c.bf16 %v1042_v17, %v1038_v18 }
 0x638   :  { %5132 = vmatpush3.bf16.msk.msra.mxu0 %vm7694_vm12, %v5130_v21  ;;  %vm7698_vm12 = vnez %v7627_v40 }
 0x639   :  { %v1110_v22 = vpop.permute.xlu0 %1109  ;;  %v1106_v23 = vpop.permute.xlu1 %1105 }
 0x63a   :  { %v5133_v24 = vpack.c.bf16 %v1110_v22, %v1106_v23 }
 0x63c   :  { %5135 = vmatprep.subr.msk.bf16.mxu0 %vm7695_vm10, %v5133_v24  ;;  %vm7699_vm10 = vnez %v7631_v53  ;;  %v5553_v24 = vunpack.i.h.bf16 %v6353_v3 }
 0x63d   :  { %v1050_v26 = vpop.permute.xlu0 %1049  ;;  %v1046_v27 = vpop.permute.xlu1 %1045 }
 0x63e   :  { %v5136_v29 = vpack.c.bf16 %v1050_v26, %v1046_v27  ;;  %v1228_v26 = vld [vmem:[%s6324_s24] sm:$0xff] }
 0x640   :  { %5138 = vmatpush3.bf16.msk.msra.mxu0 %vm7696_vm13, %v5136_v29  ;;  %v1232_v29 = vld [vmem:[%s6324_s24 + $0x20] sm:$0xff] }
 0x641   :  { %v1118_v30 = vpop.permute.xlu0 %1117  ;;  %v1114_v33 = vpop.permute.xlu1 %1113 }
 0x642   :  { %v5139_v7 = vpack.c.bf16 %v1118_v30, %v1114_v33  ;;  %v1182_v30 = vsel %vm6218_vm11, %v6286_v38, -inf  ;;  %v1183_v33 = vsel %vm6218_vm11, %v6335_v55, -inf  ;;  %v1231_v38 = vld [vmem:[%s6324_s24 + $0x18] sm:$0xff] }
 0x643   :  { %v1235_v55 = vld [vmem:[%s6324_s24 + $0x38] sm:$0xff] }
 0x644   :  { %5141 = vmatprep.subr.msk.bf16.mxu0 %vm7697_vm9, %v5139_v7 }
 0x645   :  { %v1058_v25 = vpop.permute.xlu0 %1057  ;;  %v1054_v34 = vpop.permute.xlu1 %1053 }
 0x646   :  { %v5142_v35 = vpack.c.bf16 %v1058_v25, %v1054_v34  ;;  %v1218_v34 = vmax.f32 %v1182_v30, %v5553_v24 }
 0x648   :  { %5144 = vmatpush3.bf16.msk.msra.mxu0 %vm7698_vm12, %v5142_v35  ;;  %vm7700_vm12 = vnez %v7639_v1 }
 0x649   :  { %v1126_v36 = vpop.permute.xlu0 %1125  ;;  %v1122_v43 = vpop.permute.xlu1 %1121 }
 0x64a   :  { %v5145_v44 = vpack.c.bf16 %v1126_v36, %v1122_v43 }
 0x64c   :  { %5147 = vmatprep.subr.msk.bf16.mxu0 %vm7699_vm10, %v5145_v44 }
 0x64d   :  { %v1150_v45 = vpop.permute.xlu0 %1149  ;;  %v1146_v46 = vpop.permute.xlu1 %1145 }
 0x64e   :  { %v5163_v14 = vpack.c.bf16 %v1150_v45, %v1146_v46 }
 0x650   :  { %5165 = vmatprep.subr.msk.bf16.mxu1 %vm6185_vm0, %v5163_v14 }
 0x651   :  { %v1066_v48 = vpop.permute.xlu0 %1065  ;;  %5168 = vmatpush3.bf16.msk.msra.mxu1 %vm6185_vm0, %v5163_v14  ;;  %v1062_v49 = vpop.permute.xlu1 %1061  ;;  %v1184_v14 = vsel %vm6218_vm11, %v6345_v2, -inf  ;;  %v1236_v2 = vld [vmem:[%s6324_s24 + $0x40] sm:$0xff] }
 0x652   :  { %v5148_v5 = vpack.c.bf16 %v1066_v48, %v1062_v49 }
 0x654   :  { %5150 = vmatpush3.bf16.msk.msra.mxu0 %vm7700_vm12, %v5148_v5 }
 0x655   :  { %v1134_v51 = vpop.permute.xlu0 %1133  ;;  %v1130_v54 = vpop.permute.xlu1 %1129 }
 0x656   :  { %v5151_v59 = vpack.c.bf16 %v1134_v51, %v1130_v54  ;;  %v1234_v51 = vld [vmem:[%s6324_s24 + $0x30] sm:$0xff] }
 0x658   :  { %5153 = vmatprep.subr.msk.bf16.mxu0 %vm6151_vm15, %v5151_v59  ;;  %v1233_v59 = vld [vmem:[%s6324_s24 + $0x28] sm:$0xff]  ;;  %s5730_s24 = smov 8  }
 0x659   :  { %v1070_v8 = vpop.permute.xlu0 %1069  ;;  %v1154_v61 = vpop.permute.xlu1 %1153  ;;  %s4195_s19 = sld [smem:[%s7449_s0 + %s5730_s24]]   ;;  %s7722_s24 = smov 109  }
 0x65a   :  { %v5169_v62 = vpack.c.bf16 %v5684_v0, %v1154_v61 }
 0x65c   :  { %5171 = vmatprep.subr.msk.bf16.mxu1 %vm6193_vm1, %v5169_v62 }
 0x65d   :  { %v1138_v11 = vpop.permute.xlu0 %1137  ;;  %5174 = vmatpush3.bf16.msk.msra.mxu1 %vm6193_vm1, %v5169_v62  ;;  %v1074_v13 = vpop.permute.xlu1 %1073 }
 0x65e   :  { %v5154_v15 = vpack.c.bf16 %v1074_v13, %v1070_v8  ;;  %5175 = vmatprep.subr.bf16.mxu1 %v5724_v41 }
 0x660   :  { %5156 = vmatpush3.bf16.msk.msra.mxu0 %vm6171_vm2, %v5154_v15 }
 0x661   :  { %v1082_v4 = vpop.permute.xlu0 %1081  ;;  %5176 = vmatpush3.bf16.msra.mxu1 %v5724_v41  ;;  %v1142_v17 = vpop.permute.xlu1 %1141 }
 0x662   :  { %v5157_v18 = vpack.c.bf16 %v1142_v17, %v1138_v11  ;;  %5178 = vmatprep.subr.bf16.mxu1 %v5177_v37 }
 0x664   :  { %5159 = vmatprep.subr.msk.bf16.mxu0 %vm6202_vm3, %v5157_v18 }
 0x665   :  { %5180 = vmatpush3.bf16.msra.mxu1 %v5177_v37  ;;  %v1078_v21 = vpop.permute.xlu1 %1077  ;;  %v1210_v22 = vpop.permute.xlu0 %1209 }
 0x666   :  { %v5160_v23 = vpack.c.bf16 %v1082_v4, %v1078_v21  ;;  %v1219_v3 = vmax.f32 %v1183_v33, %v1210_v22 }
 0x668   :  { %5162 = vmatpush3.bf16.msk.msra.mxu0 %vm6214_vm5, %v5160_v23  ;;  %vm7701_vm5 = vcmask 719872  }
 0x669   :  { %v5556_v27 = vpop.permute.xlu1 %5555  ;;  %v1212_v35 = vpop.permute.xlu0 %1211  ;;  %vm7702_vm3 = vmmov %vm7701_vm5 }
 0x66a   :  { %v5558_v7 = vunpack.i.h.bf16 %v5556_v27  ;;  %v5557_v25 = vunpack.i.l.bf16 %v5556_v27  ;;  %v1220_v49 = vmax.f32 %v1184_v14, %v1212_v35  ;;  %vm7703_vm2 = vmmov %vm7702_vm3  ;;  %v1503_v35 = vld [vmem:[%s6445_s15] sm:$0xff] }
 0x66b   :  { %1318 = vmatmul.mubr.f32.vlgmr.msra.gmra.mrb[6].mxu0 %v1228_v26 }
 0x66c   :  { %v1203_v36 = vsel %vm6222_vm6, %v5558_v7, -inf  ;;  %v1202_v43 = vsel %vm6222_vm6, %v5557_v25, -inf  ;;  %1322 = vmatprep.mubr.f32.mxu0 %v1232_v29 }
 0x66d   :  { %v1196_v44 = vpop.permute.xlu1 %1195  ;;  %v1222_v45 = vmax.f32 %v1218_v34, %v1202_v43  ;;  %v1223_v46 = vmax.f32 %v1219_v3, %v1203_v36  ;;  %v1475_v3 = vld [vmem:[%s4195_s19] sm:$0xff]  ;;  %v1504_v36 = vld [vmem:[%s6445_s15 + $0x8] sm:$0xff]  ;;  %v1478_v43 = vld [vmem:[%s4195_s19 + $0x18] sm:$0xff] }
 0x66e   :  { %v1204_v48 = vsel %vm6222_vm6, %v1196_v44, -inf  ;;  %v1477_v44 = vld [vmem:[%s4195_s19 + $0x10] sm:$0xff] }
 0x66f   :  { %1323 = vmatmul.mubr.f32.gmra.mrb[8].mxu0 %v1231_v38  ;;  %v5181_v5 = vpack.c.bf16 %v1223_v46, %v1222_v45  ;;  %v1224_v54 = vmax.f32 %v1220_v49, %v1204_v48  ;;  %v1476_v38 = vld [vmem:[%s4195_s19 + $0x8] sm:$0xff]  ;;  %s7720_s19 = smov 111  }
 0x670   :  { %1327 = vmatprep.mubr.f32.mxu0 %v1235_v55 }
 0x671   :  { %5182 = vmatprep.subr.bf16.mxu1 %v5181_v5 }
 0x672   :  { %5184 = vmatpush3.bf16.msra.mxu1 %v5181_v5 }
 0x673   :  { %4877 = vmatprep.subr.mxu1 %v1224_v54  ;;  %1328 = vmatmul.mubr.f32.gmra.mrb[10].mxu0 %v1234_v51 }
 0x674   :  { %1332 = vmatprep.mubr.f32.mxu0 %v1238_v19 }
 0x676   :  { %4878 = vmatpush3.msra.mxu1 %v1224_v54 }
 0x677   :  { %4880 = vmatmul.mubr.msk.f32.vlgmr.msra.gmra.mrb[10].mxu1 %vm7701_vm5, %v1233_v59  ;;  %1333 = vmatmul.mubr.f32.gmra.mrb[12].mxu0 %v1237_v63 }
 0x678   :  { %4882 = vmatprep.mubr.msk.f32.mxu1 %vm7702_vm3, %v1236_v2  ;;  %5185 = vmatprep.subr.bf16.mxu1 %v5724_v41 }
 0x67b   :  { %4883 = vmatmul.mubr.msk.f32.gmra.mrb[12].mxu1 %vm7703_vm2, %v1239_v6  ;;  %vm7704_vm2 = vcmask 261120  }
 0x67c   :  { %4893 = vmatprep.mubr.msk.f32.mxu1 %vm7669_vm8, %v5684_v0  ;;  %vm7705_vm3 = vmmov %vm7704_vm2 }
 0x67d   :  { %vm7706_vm5 = vmmov %vm7704_vm2 }
 0x67e   :  { %vm7707_vm8 = vmmov %vm7704_vm2 }
 0x73e   :  { %v4531_v8 = vpop.f32.mrb[6].mxu0 }
 0x73f   :  { %v4532_v61 = vpop.f32.mrb[7].mxu0 }
 0x740   :  { %v4533_v12 = vadd.f32 %v4532_v61, %v4531_v8 }
 0x742   :  { %v4534_v62 = vpop.f32.mrb[8].mxu0 }
 0x743   :  { %v4535_v10 = vpop.f32.mrb[9].mxu0 }
 0x744   :  { %v4536_v11 = vadd.f32 %v4535_v10, %v4534_v62 }
 0x746   :  { %v4537_v13 = vpop.f32.mrb[10].mxu0 }
 0x747   :  { %v4538_v15 = vpop.f32.mrb[11].mxu0 }
 0x748   :  { %v4539_v37 = vadd.f32 %v4538_v15, %v4537_v13  ;;  %v1506_v13 = vld [vmem:[%s6445_s15 + $0x18] sm:$0xff]  ;;  %v1505_v15 = vld [vmem:[%s6445_s15 + $0x10] sm:$0xff]  ;;  %s5732_s15 = smov 10  }
 0x749   :  { %s4197_s18 = sld [smem:[%s7449_s0 + %s5732_s15]]   ;;  %s7724_s15 = smov 107  }
 0x74a   :  { %v4881_v4 = vpop.f32.mrb[10].mxu1  ;;  %v4540_v17 = vpop.f32.mrb[12].mxu0 }
 0x74b   :  { %v1410_v18 = vadd.f32 %v4881_v4, %v4536_v11  ;;  %v1404_v21 = vpop.f32.mrb[11].mxu1  ;;  %v4541_v22 = vpop.f32.mrb[13].mxu0 }
 0x74c   :  { %v1405_v23 = vadd.f32 %v4533_v12, %v1404_v21  ;;  %v4542_v24 = vadd.f32 %v4541_v22, %v4540_v17 }
 0x74d   :  { %v1426_v26 = vsel %vm7704_vm2, %v1410_v18, 0.0 }
 0x74e   :  { %v4884_v27 = vpop.f32.mrb[12].mxu1  ;;  %1427 = vadd.xlane.f32.xlu1 %v1426_v26  ;;  %v1423_v29 = vsel %vm7705_vm3, %v1405_v23, 0.0  ;;  %vm7709_vm3 = vmmov %vm7704_vm2 }
 0x74f   :  { %v1420_v30 = vadd.f32 %v4884_v27, %v4542_v24  ;;  %v1414_v33 = vpop.f32.mrb[13].mxu1  ;;  %1424 = vadd.xlane.f32.xlu0 %v1423_v29 }
 0x750   :  { %v1415_v7 = vadd.f32 %v4539_v37, %v1414_v33 }
 0x751   :  { %v1432_v34 = vsel %vm7707_vm8, %v1420_v30, 0.0  ;;  %vm7708_vm8 = vmmov %vm7704_vm2 }
 0x752   :  { %v1429_v25 = vsel %vm7706_vm5, %v1415_v7, 0.0  ;;  %vm7710_vm5 = vmmov %vm7704_vm2 }
 0x753   :  { %1430 = vadd.xlane.f32.xlu0 %v1429_v25 }
 0x757   :  { %1433 = vadd.xlane.f32.xlu0 %v1432_v34 }
 0x75f   :  { %1481 = vperm.xlu1 %5543, %v1475_v3  }
 0x763   :  { %1509 = vperm.xlu1 %5543, %v1503_v35  }
 0x767   :  { %1514 = vperm.xlu1 %5543, %v1504_v36  }
 0x76b   :  { %1496 = vperm.xlu1 %5543, %v1478_v43  }
 0x76d   :  { %1486 = vperm.xlu0 %5542, %v1476_v38  }
 0x771   :  { %1491 = vperm.xlu0 %5542, %v1477_v44  }
 0x7db   :  { %v1428_v45 = vpop.xlane.xlu1 %1427 }
 0x7dc   :  { %v1436_v46 = vmul.f32 0.03125, %v1428_v45  ;;  %v1425_v55 = vpop.xlane.xlu0 %1424 }
 0x7dd   :  { %v1435_v14 = vmul.f32 0.03125, %v1425_v55 }
 0x7de   :  { %v1440_v48 = vsub.f32 %v1410_v18, %v1436_v46 }
 0x7df   :  { %v1439_v49 = vsub.f32 %v1405_v23, %v1435_v14  ;;  %v1482_v37 = vpop.permute.xlu1 %1481 }
 0x7e0   :  { %v1431_v5 = vpop.xlane.xlu0 %1430  ;;  %v1444_v51 = vmul.f32 %v1440_v48, %v1440_v48 }
 0x7e1   :  { %v1437_v54 = vmul.f32 0.03125, %v1431_v5  ;;  %v1443_v19 = vmul.f32 %v1439_v49, %v1439_v49 }
 0x7e2   :  { %v1450_v59 = vsel %vm7708_vm8, %v1444_v51, 0.0  ;;  %vm7711_vm8 = vmmov %vm7704_vm2 }
 0x7e3   :  { %v1441_v63 = vsub.f32 %v1415_v7, %v1437_v54  ;;  %1451 = vadd.xlane.f32.xlu0 %v1450_v59  ;;  %v1447_v2 = vsel %vm7704_vm2, %v1443_v19, 0.0  ;;  %v1510_v4 = vpop.permute.xlu1 %1509  ;;  %vm7712_vm2 = vcmask 7168  }
 0x7e4   :  { %1448 = vadd.xlane.f32.xlu1 %v1447_v2  ;;  %v1434_v6 = vpop.xlane.xlu0 %1433 }
 0x7e5   :  { %v1438_v8 = vmul.f32 0.03125, %v1434_v6  ;;  %v1445_v61 = vmul.f32 %v1441_v63, %v1441_v63 }
 0x7e7   :  { %v1442_v12 = vsub.f32 %v1420_v30, %v1438_v8  ;;  %v1453_v62 = vsel %vm7709_vm3, %v1445_v61, 0.0  ;;  %v1515_v18 = vpop.permute.xlu1 %1514  ;;  %vm7713_vm3 = vmmov %vm7712_vm2 }
 0x7e8   :  { %1454 = vadd.xlane.f32.xlu1 %v1453_v62 }
 0x7e9   :  { %v1446_v10 = vmul.f32 %v1442_v12, %v1442_v12 }
 0x7eb   :  { %v1456_v11 = vsel %vm7710_vm5, %v1446_v10, 0.0  ;;  %v1497_v22 = vpop.permute.xlu1 %1496  ;;  %vm7714_vm5 = vcmask 269312  }
 0x7ec   :  { %1457 = vadd.xlane.f32.xlu0 %v1456_v11  ;;  %v1487_v17 = vpop.permute.xlu0 %1486  ;;  %vm7715_vm15 = vmmov %vm7714_vm5 }
 0x7f0   :  { %v1492_v21 = vpop.permute.xlu0 %1491 }
 0x7f9   :  { %1524 = vperm.xlu1 %5543, %v1506_v13  }
 0x802   :  { %1519 = vperm.xlu0 %5542, %v1505_v15   ;;  %v1535_v15 = vld [vmem:[%s4197_s18] sm:$0xff]  ;;  %s7727_s18 = smov 104  }
 0x870   :  { %v1452_v23 = vpop.xlane.xlu0 %1451 }
 0x871   :  { %v1460_v24 = vmul.f32 0.03125, %v1452_v23  ;;  %v1449_v26 = vpop.xlane.xlu1 %1448 }
 0x872   :  { %v1459_v27 = vmul.f32 0.03125, %v1449_v26 }
 0x873   :  { %v1464_v29 = vadd.f32 1e-05, %v1460_v24 }
 0x874   :  { %v1463_v30 = vadd.f32 1e-05, %v1459_v27 }
 0x875   :  { %5627 = vrsqrt.f32 %v1464_v29  ;;  %v1455_v33 = vpop.xlane.xlu1 %1454 }
 0x876   :  { %5629 = vrsqrt.f32 %v1463_v30  ;;  %v1461_v7 = vmul.f32 0.03125, %v1455_v33 }
 0x878   :  { %v1465_v25 = vadd.f32 1e-05, %v1461_v7 }
 0x879   :  { %v1458_v34 = vpop.xlane.xlu0 %1457 }
 0x87a   :  { %5631 = vrsqrt.f32 %v1465_v25  ;;  %v1462_v3 = vmul.f32 0.03125, %v1458_v34 }
 0x87c   :  { %v1466_v35 = vadd.f32 1e-05, %v1462_v3 }
 0x87e   :  { %5633 = vrsqrt.f32 %v1466_v35 }
 0x87f   :  { %v5628_v36 = vpop.eup %5627 }
 0x880   :  { %v5630_v43 = vpop.eup %5629  ;;  %v1472_v38 = vmul.f32 %v5628_v36, %v1440_v48  ;;  %v1525_v48 = vpop.permute.xlu1 %1524 }
 0x881   :  { %v1471_v44 = vmul.f32 %v5630_v43, %v1439_v49  ;;  %v1520_v62 = vpop.permute.xlu0 %1519 }
 0x882   :  { %v1500_v45 = vmul.f32 %v1487_v17, %v1472_v38 }
 0x883   :  { %v1499_v46 = vmul.f32 %v1482_v37, %v1471_v44 }
 0x884   :  { %v5632_v55 = vpop.eup %5631  ;;  %v1528_v14 = vadd.f32 %v1515_v18, %v1500_v45 }
 0x885   :  { %v1473_v5 = vmul.f32 %v5632_v55, %v1441_v63  ;;  %v1527_v51 = vadd.f32 %v1510_v4, %v1499_v46 }
 0x886   :  { %v1532_v54 = vmax.f32 %v1528_v14, 0.0 }
 0x887   :  { %v1501_v19 = vmul.f32 %v1492_v21, %v1473_v5  ;;  %v1531_v59 = vmax.f32 %v1527_v51, 0.0 }
 0x888   :  { %v5634_v2 = vpop.eup %5633 }
 0x889   :  { %v1474_v6 = vmul.f32 %v5634_v2, %v1442_v12  ;;  %v5559_v8 = vpack.i.bf16 %v1532_v54, %v1531_v59  ;;  %v5186_v61 = vpack.c.bf16 %v1532_v54, %v1531_v59  ;;  %v1529_v11 = vadd.f32 %v1520_v62, %v1501_v19 }
 0x88b   :  { %v1502_v10 = vmul.f32 %v1497_v22, %v1474_v6  ;;  %5560 = vrot.lane.b32.xlu1 %v5559_v8, %s7553_s11  ;;  %5187 = vmatpush3.bf16.msra.mxu1 %v5186_v61  ;;  %v1533_v13 = vmax.f32 %v1529_v11, 0.0 }
 0x88c   :  { %5188 = vmatprep.subr.bf16.mxu1 %v5724_v41 }
 0x88d   :  { %v1530_v49 = vadd.f32 %v1525_v48, %v1502_v10 }
 0x88f   :  { %v1534_v63 = vmax.f32 %v1530_v49, 0.0 }
 0x891   :  { %v5189_v12 = vpack.c.bf16 %v1534_v63, %v1533_v13  ;;  %1746 = vrot.lane.b32.xlu1 %v1534_v63, %s7553_s11 }
 0x893   :  { %5190 = vmatpush3.bf16.msra.mxu1 %v5189_v12 }
 0x896   :  { %4894 = vmatmul.mubr.msk.f32.vlgmr.msra.gmra.mrb[14].mxu1 %vm7711_vm8, %v1535_v15  ;;  %vm7716_vm8 = vcmask 154624  }
 0x8fd   :  { %v5561_v37 = vpop.permute.xlu1 %5560 }
 0x8fe   :  { %v5563_v4 = vunpack.i.h.bf16 %v5561_v37  ;;  %v5562_v17 = vunpack.i.l.bf16 %v5561_v37 }
 0x900   :  { %v1753_v18 = vsel %vm7712_vm2, -inf, %v5563_v4  ;;  %v1752_v21 = vsel %vm7713_vm3, -inf, %v5562_v17  ;;  %vm7717_vm2 = vcmask 416768  }
 0x901   :  { %v6465_v22 = vsel %vm7714_vm5, %v1753_v18, -inf  ;;  %v6468_v23 = vsel %vm7715_vm15, %v1752_v21, -inf  ;;  %vm7718_vm15 = vmmov %vm7713_vm3 }
 0x902   :  { %v5564_v24 = vpack.i.bf16 %v6465_v22, %v6468_v23  ;;  %vm7719_vm3 = vmmov %vm7714_vm5  ;;  %vm7734_vm5 = vcmask 719872  }
 0x903   :  { %v1747_v35 = vpop.permute.xlu1 %1746 }
 0x904   :  { %5565 = vrot.lane.b32.xlu1 %v5564_v24, %s7555_s2 }
 0x969   :  { %v1605_v26 = vpop.f32.mrb[14].mxu1 }
 0x96a   :  { %1610 = vrot.lane.b32.xlu0 %v1605_v26, %s7551_s10  ;;  %v4895_v27 = vpop.f32.mrb[15].mxu1  ;;  %s7731_s10 = smov 103  }
 0x96e   :  { %1744 = vrot.lane.b32.xlu0 %v1533_v13, %s7553_s11  ;;  %s7732_s11 = smov 119  }
 0x972   :  { %1768 = vrot.lane.b32.xlu0 %v6468_v23, %s7557_s28  ;;  %s5733_s28 = smov 11  }
 0x976   :  { %v6557_v59 = vpop.permute.xlu1 %5565 }
 0x9dc   :  { %v1611_v29 = vpop.permute.xlu0 %1610 }
 0x9dd   :  { %v1613_v30 = vsel %vm7716_vm8, 0.0, %v1611_v29  ;;  %vm7735_vm8 = vmmov %vm7718_vm15 }
 0x9de   :  { %v1614_v33 = vsel %vm7717_vm2, %v1613_v30, 0.0  ;;  %v1755_v38 = vsel %vm7735_vm8, -inf, %v1747_v35  ;;  %vm7737_vm2 = vmmov %vm7719_vm3  ;;  %vm7742_vm8 = vnez %v7648_v16 }
 0x9df   :  { %1664 = vrot.lane.b32.xlu0 %v1614_v33, %s7549_s13  ;;  %s7730_s13 = smov 120   ;;  %v6539_v44 = vsel %vm7737_vm2, %v1755_v38, -inf  ;;  %vm7743_vm2 = vnez %v7650_v28 }
 0x9e0   :  { %v1745_v7 = vpop.permute.xlu0 %1744 }
 0x9e1   :  { %v1754_v25 = vsel %vm7718_vm15, -inf, %v1745_v7  ;;  %vm7739_vm15 = vnez %v7607_v60 }
 0x9e2   :  { %v6482_v34 = vsel %vm7719_vm3, %v1754_v25, -inf  ;;  %vm7740_vm3 = vnez %v7613_v9 }
 0x9e3   :  { %1672 = vrot.lane.b32.xlu0 %v1614_v33, %s7545_s12  ;;  %1788 = vrot.lane.b32.xlu1 %v6482_v34, %s7555_s2  ;;  %s7728_s12 = smov 105   ;;  %s7733_s2 = smov 101   ;;  %v5569_v36 = vpack.i.bf16 %v6482_v34, %v6465_v22 }
 0x9e4   :  { %v1769_v19 = vpop.permute.xlu0 %1768 }
 0x9e7   :  { %1676 = vrot.lane.b32.xlu0 %v1614_v33, %s7547_s14  ;;  %1668 = vrot.lane.b32.xlu1 %v1614_v33, %s7720_s19  ;;  %s7729_s14 = smov 121  }
 0x9eb   :  { %1616 = vrot.lane.b32.xlu0 %v1614_v33, %s7721_s20  ;;  %1804 = vrot.lane.b32.xlu1 %v1614_v33, %s7722_s24 }
 0x9ef   :  { %1684 = vrot.lane.b32.xlu0 %v1614_v33, %s7723_s7  ;;  %1680 = vrot.lane.b32.xlu1 %v1614_v33, %s7724_s15 }
 0x9f3   :  { %1624 = vrot.lane.b32.xlu0 %v1614_v33, %s7725_s16  ;;  %1620 = vrot.lane.b32.xlu1 %v1614_v33, %s7726_s17 }
 0x9f7   :  { %1692 = vrot.lane.b32.xlu0 %v1614_v33, %s7727_s18  ;;  %1688 = vrot.lane.b32.xlu1 %v1614_v33, %s7728_s12  ;;  %s6512_s18 = sld [smem:[%s7449_s0 + %s5733_s28]]   ;;  %s7738_s28 = smov 127  }
 0x9fb   :  { %1724 = vrot.lane.b32.xlu0 %v1614_v33, %s7678_s8  ;;  %1628 = vrot.lane.b32.xlu1 %v1614_v33, %s7729_s14  ;;  %s5736_s8 = smov 27  }
 0x9fd   :  { %v1808_v3 = vld [vmem:[%s6512_s18 + $0x8] sm:$0xff]  ;;  %v1809_v43 = vld [vmem:[%s6512_s18 + $0x10] sm:$0xff] }
 0x9fe   :  { %1895 = vmatprep.mubr.f32.mxu0 %v1808_v3  ;;  %4918 = vmatprep.mubr.msk.f32.mxu1 %vm7734_vm5, %v1809_v43  ;;  %v5567_v3 = vunpack.i.l.bf16 %v6557_v59  ;;  %v1780_v43 = vsel %vm6222_vm6, %v1769_v19, -inf  ;;  %vm7741_vm5 = vnez %v7627_v40 }
 0x9ff   :  { %1632 = vrot.lane.b32.xlu0 %v1614_v33, %s7730_s13  ;;  %1696 = vrot.lane.b32.xlu1 %v1614_v33, %s7731_s10  ;;  %s5734_s13 = smov 12  }
 0xa03   :  { %1700 = vrot.lane.b32.xlu0 %v1614_v33, %s7676_s30  ;;  %1728 = vrot.lane.b32.xlu1 %v1614_v33, %s7677_s3 }
 0xa07   :  { %1732 = vrot.lane.b32.xlu0 %v1614_v33, %s7684_s25  ;;  %1636 = vrot.lane.b32.xlu1 %v1614_v33, %s7732_s11  ;;  %s6524_s25 = sld [smem:[%s7449_s0 + %s5734_s13]]  }
 0xa0b   :  { %1644 = vrot.lane.b32.xlu0 %v1614_v33, %s7679_s9  ;;  %1704 = vrot.lane.b32.xlu1 %v1614_v33, %s7733_s2 }
 0xa0d   :  { %v2053_v45 = vld [vmem:[%s6524_s25] sm:$0xff]  ;;  %v2054_v46 = vld [vmem:[%s6524_s25 + $0x8] sm:$0xff]  ;;  %v2055_v54 = vld [vmem:[%s6524_s25 + $0x10] sm:$0xff] }
 0xa0f   :  { %1712 = vrot.lane.b32.xlu0 %v1614_v33, %s7681_s4  ;;  %1640 = vrot.lane.b32.xlu1 %v1614_v33, %s7680_s26 }
 0xa13   :  { %1648 = vrot.lane.b32.xlu0 %v1614_v33, %s7683_s1  ;;  %1708 = vrot.lane.b32.xlu1 %v1614_v33, %s7682_s6  ;;  %s7770_s1 = smov 1  }
 0xa17   :  { %1720 = vrot.lane.b32.xlu0 %v1614_v33, %s7689_s27  ;;  %1652 = vrot.lane.b32.xlu1 %v1614_v33, %s7686_s22  ;;  %s5735_s27 = smov 13   ;;  %s6550_s22 = sld [smem:[%s7449_s0 + %s5736_s8]]  }
 0xa18   :  { %s6536_s13 = sld [smem:[%s7449_s0 + %s5735_s27]]   ;;  %s7781_s8 = smov 108  }
 0xa1b   :  { %1656 = vrot.lane.b32.xlu0 %v1614_v33, %s7691_s29  ;;  %1716 = vrot.lane.b32.xlu1 %v1614_v33, %s7685_s23  ;;  %s7736_s29 = smov 126  }
 0xa1d   :  { %v2267_v5 = vld [vmem:[%s6550_s22 + $0x8] sm:$0xff]  ;;  %v2266_v51 = vld [vmem:[%s6550_s22] sm:$0xff] }
 0xa1e   :  { %v2082_v55 = vld [vmem:[%s6536_s13 + $0x8] sm:$0xff]  ;;  %v2081_v14 = vld [vmem:[%s6536_s13] sm:$0xff] }
 0xa1f   :  { %5570 = vrot.lane.b32.xlu0 %v5569_v36, %s7736_s29  ;;  %1660 = vrot.lane.b32.xlu1 %v1614_v33, %s7688_s21  ;;  %v1760_v36 = vsel %vm6218_vm11, %v6468_v23, -inf  ;;  %s5737_s21 = smov 26  }
 0xa20   :  { %s4213_s27 = sld [smem:[%s7449_s0 + %s5737_s21]]  }
 0xa23   :  { %1774 = vrot.lane.b32.xlu0 %v6539_v44, %s7736_s29  ;;  %1790 = vrot.lane.b32.xlu1 %v6539_v44, %s7738_s28 }
 0xa27   :  { %2059 = vperm.xlu0 %5542, %v2053_v45   ;;  %2064 = vperm.xlu1 %5543, %v2054_v46   ;;  %v1796_v46 = vmax.f32 %v1760_v36, %v5567_v3 }
 0xa2b   :  { %2092 = vperm.xlu0 %5542, %v2082_v55   ;;  %2087 = vperm.xlu1 %5543, %v2081_v14  }
 0xa2f   :  { %2277 = vperm.xlu0 %5542, %v2267_v5   ;;  %2272 = vperm.xlu1 %5543, %v2266_v51   ;;  %v1800_v5 = vmax.f32 %v1796_v46, %v1780_v43  ;;  %v1810_v46 = vld [vmem:[%s6512_s18 + $0x18] sm:$0xff] }
 0xa31   :  { %v5249_v19 = vpack.c.bf16 %v1800_v5, %v5684_v0  ;;  %v1817_v5 = vld [vmem:[%s6512_s18 + $0x50] sm:$0xff] }
 0xa33   :  { %2069 = vperm.xlu1 %5543, %v2055_v54  }
 0xa51   :  { %v1665_v2 = vpop.permute.xlu0 %1664 }
 0xa55   :  { %v6559_v6 = vpop.permute.xlu1 %1788  ;;  %v1673_v8 = vpop.permute.xlu0 %1672 }
 0xa59   :  { %v1669_v61 = vpop.permute.xlu1 %1668  ;;  %v1677_v62 = vpop.permute.xlu0 %1676 }
 0xa5a   :  { %v5191_v10 = vpack.c.bf16 %v1669_v61, %v1665_v2 }
 0xa5c   :  { %5193 = vmatprep.subr.msk.bf16.mxu0 %vm5895_vm7, %v5191_v10 }
 0xa5d   :  { %v1805_v11 = vpop.permute.xlu1 %1804  ;;  %v1617_v48 = vpop.permute.xlu0 %1616  ;;  %5194 = vmatpush3.bf16.msra.mxu0 %v5724_v41 }
 0xa5e   :  { %v5195_v49 = vpack.c.bf16 %v1805_v11, %v1673_v8 }
 0xa60   :  { %5197 = vmatprep.subr.msk.bf16.mxu0 %vm5922_vm14, %v5195_v49 }
 0xa61   :  { %v1681_v63 = vpop.permute.xlu1 %1680  ;;  %v1685_v13 = vpop.permute.xlu0 %1684  ;;  %5198 = vmatpush3.bf16.msra.mxu0 %v5724_v41 }
 0xa62   :  { %v5199_v12 = vpack.c.bf16 %v1681_v63, %v1677_v62 }
 0xa64   :  { %5201 = vmatprep.subr.msk.bf16.mxu0 %vm7693_vm4, %v5199_v12 }
 0xa65   :  { %v1621_v15 = vpop.permute.xlu1 %1620  ;;  %v1625_v37 = vpop.permute.xlu0 %1624 }
 0xa66   :  { %v5202_v4 = vpack.c.bf16 %v1621_v15, %v1617_v48 }
 0xa68   :  { %5204 = vmatpush3.bf16.msk.msra.mxu0 %vm7739_vm15, %v5202_v4  ;;  %v1761_v4 = vsel %vm6218_vm11, %v6465_v22, -inf }
 0xa69   :  { %v1689_v17 = vpop.permute.xlu1 %1688  ;;  %v1693_v18 = vpop.permute.xlu0 %1692 }
 0xa6a   :  { %v5205_v21 = vpack.c.bf16 %v1689_v17, %v1685_v13 }
 0xa6c   :  { %5207 = vmatprep.subr.msk.bf16.mxu0 %vm7740_vm3, %v5205_v21  ;;  %v1762_v21 = vsel %vm6218_vm11, %v6482_v34, -inf  ;;  %v1763_v34 = vsel %vm6218_vm11, %v6539_v44, -inf  ;;  %v1814_v44 = vld [vmem:[%s6512_s18 + $0x38] sm:$0xff] }
 0xa6d   :  { %v1629_v24 = vpop.permute.xlu1 %1628  ;;  %v1725_v26 = vpop.permute.xlu0 %1724 }
 0xa6e   :  { %v5208_v27 = vpack.c.bf16 %v1629_v24, %v1625_v37  ;;  %v5568_v37 = vunpack.i.h.bf16 %v6557_v59  ;;  %v1798_v59 = vmax.f32 %v1762_v21, %v6559_v6 }
 0xa70   :  { %5210 = vmatpush3.bf16.msk.msra.mxu0 %vm7696_vm13, %v5208_v27 }
 0xa71   :  { %v1697_v29 = vpop.permute.xlu1 %1696  ;;  %v1633_v30 = vpop.permute.xlu0 %1632 }
 0xa72   :  { %v5211_v33 = vpack.c.bf16 %v1697_v29, %v1693_v18  ;;  %v1797_v29 = vmax.f32 %v1761_v4, %v5568_v37 }
 0xa74   :  { %5213 = vmatprep.subr.msk.bf16.mxu0 %vm7697_vm9, %v5211_v33  ;;  %v1807_v33 = vld [vmem:[%s6512_s18] sm:$0xff] }
 0xa75   :  { %v1729_v7 = vpop.permute.xlu1 %1728  ;;  %v1701_v25 = vpop.permute.xlu0 %1700 }
 0xa76   :  { %v5235_v35 = vpack.c.bf16 %v1729_v7, %v1725_v26 }
 0xa78   :  { %5237 = vmatprep.subr.msk.bf16.mxu1 %vm6185_vm0, %v5235_v35 }
 0xa79   :  { %v1637_v38 = vpop.permute.xlu1 %1636  ;;  %5240 = vmatpush3.bf16.msk.msra.mxu1 %vm6185_vm0, %v5235_v35  ;;  %v1733_v45 = vpop.permute.xlu0 %1732  ;;  %v1811_v35 = vld [vmem:[%s6512_s18 + $0x20] sm:$0xff] }
 0xa7a   :  { %v5214_v55 = vpack.c.bf16 %v1637_v38, %v1633_v30  ;;  %v5241_v14 = vpack.c.bf16 %v5684_v0, %v1733_v45 }
 0xa7c   :  { %5216 = vmatpush3.bf16.msk.msra.mxu0 %vm7741_vm5, %v5214_v55  ;;  %5243 = vmatprep.subr.msk.bf16.mxu1 %vm6193_vm1, %v5241_v14  ;;  %v1813_v55 = vld [vmem:[%s6512_s18 + $0x30] sm:$0xff] }
 0xa7d   :  { %v1705_v23 = vpop.permute.xlu1 %1704  ;;  %5246 = vmatpush3.bf16.msk.msra.mxu1 %vm6193_vm1, %v5241_v14  ;;  %v1645_v51 = vpop.permute.xlu0 %1644  ;;  %vm7744_vm1 = vnez %v7658_v50  ;;  %v1812_v14 = vld [vmem:[%s6512_s18 + $0x28] sm:$0xff] }
 0xa7e   :  { %v5217_v54 = vpack.c.bf16 %v1705_v23, %v1701_v25  ;;  %5247 = vmatprep.subr.bf16.mxu1 %v5724_v41  ;;  %v1815_v23 = vld [vmem:[%s6512_s18 + $0x40] sm:$0xff] }
 0xa80   :  { %5219 = vmatprep.subr.msk.bf16.mxu0 %vm7699_vm10, %v5217_v54  ;;  %v1816_v54 = vld [vmem:[%s6512_s18 + $0x48] sm:$0xff] }
 0xa81   :  { %v1641_v2 = vpop.permute.xlu1 %1640  ;;  %5248 = vmatpush3.bf16.msra.mxu1 %v5724_v41  ;;  %v1713_v8 = vpop.permute.xlu0 %1712 }
 0xa82   :  { %v5220_v61 = vpack.c.bf16 %v1645_v51, %v1641_v2  ;;  %5250 = vmatprep.subr.bf16.mxu1 %v5249_v19  ;;  %v5683_v51 = vld [vmem:[%s5762_s5] sm:$0xf]  ;;  %s5738_s5 = smov 28  }
 0xa83   :  { %v2113_v2 = vld [vmem:[%s4213_s27] sm:$0xff]  ;;  %s6675_s21 = sld [smem:[%s7449_s0 + %s5738_s5]]   ;;  %s7779_s5 = smov 112  }
 0xa84   :  { %5222 = vmatpush3.bf16.msk.msra.mxu0 %vm7700_vm12, %v5220_v61  ;;  %vm7751_vm12 = vcmask 31744   ;;  %v2115_v61 = vld [vmem:[%s4213_s27 + $0x10] sm:$0xff] }
 0xa85   :  { %v1709_v62 = vpop.permute.xlu1 %1708  ;;  %5252 = vmatpush3.bf16.msra.mxu1 %v5249_v19  ;;  %v1649_v10 = vpop.permute.xlu0 %1648  ;;  %v1818_v19 = vld [vmem:[%s6512_s18 + $0x58] sm:$0xff]  ;;  %s7780_s18 = smov 110  }
 0xa86   :  { %v5223_v11 = vpack.c.bf16 %v1713_v8, %v1709_v62  ;;  %v2114_v8 = vld [vmem:[%s4213_s27 + $0x8] sm:$0xff]  ;;  %v2116_v62 = vld [vmem:[%s4213_s27 + $0x18] sm:$0xff]  ;;  %s7776_s27 = smov 19  }
 0xa88   :  { %5225 = vmatprep.subr.msk.bf16.mxu0 %vm7742_vm8, %v5223_v11 }
 0xa89   :  { %v1653_v48 = vpop.permute.xlu1 %1652  ;;  %v1721_v49 = vpop.permute.xlu0 %1720 }
 0xa8a   :  { %v5226_v63 = vpack.c.bf16 %v1653_v48, %v1649_v10 }
 0xa8c   :  { %5228 = vmatpush3.bf16.msk.msra.mxu0 %vm7743_vm2, %v5226_v63  ;;  %vm7747_vm2 = vcmask 1043456  }
 0xa8d   :  { %v1717_v13 = vpop.permute.xlu1 %1716  ;;  %v1657_v12 = vpop.permute.xlu0 %1656 }
 0xa8e   :  { %v5229_v15 = vpack.c.bf16 %v1721_v49, %v1717_v13 }
 0xa90   :  { %5231 = vmatprep.subr.msk.bf16.mxu0 %vm7744_vm1, %v5229_v15  ;;  %vm7745_vm1 = vnez %v7660_v56 }
 0xa91   :  { %v1661_v17 = vpop.permute.xlu1 %1660  ;;  %v5571_v18 = vpop.permute.xlu0 %5570 }
 0xa92   :  { %v5232_v24 = vpack.c.bf16 %v1661_v17, %v1657_v12  ;;  %v5573_v26 = vunpack.i.h.bf16 %v5571_v18  ;;  %v5572_v27 = vunpack.i.l.bf16 %v5571_v18 }
 0xa94   :  { %v1782_v30 = vsel %vm6222_vm6, %v5573_v26, -inf  ;;  %v1781_v22 = vsel %vm6222_vm6, %v5572_v27, -inf  ;;  %5234 = vmatpush3.bf16.msk.msra.mxu0 %vm7745_vm1, %v5232_v24  ;;  %vm7746_vm1 = vcmask 719872  }
 0xa95   :  { %v1791_v7 = vpop.permute.xlu1 %1790  ;;  %v1775_v25 = vpop.permute.xlu0 %1774  ;;  %v1801_v3 = vmax.f32 %v1797_v29, %v1781_v22  ;;  %v1802_v6 = vmax.f32 %v1798_v59, %v1782_v30  ;;  %vm7749_vm11 = vmmov %vm7746_vm1 }
 0xa96   :  { %v1799_v36 = vmax.f32 %v1763_v34, %v1791_v7  ;;  %v1783_v43 = vsel %vm6222_vm6, %v1775_v25, -inf  ;;  %vm7748_vm6 = vmmov %vm7747_vm2 }
 0xa97   :  { %1896 = vmatmul.mubr.f32.vlgmr.msra.gmra.mrb[14].mxu0 %v1807_v33  ;;  %v5253_v38 = vpack.c.bf16 %v1802_v6, %v1801_v3  ;;  %vm7750_vm8 = vmmov %vm7746_vm1 }
 0xa98   :  { %v1803_v45 = vmax.f32 %v1799_v36, %v1783_v43  ;;  %1900 = vmatprep.mubr.f32.mxu0 %v1811_v35 }
 0xa99   :  { %5254 = vmatprep.subr.bf16.mxu1 %v5253_v38 }
 0xa9a   :  { %5256 = vmatpush3.bf16.msra.mxu1 %v5253_v38 }
 0xa9b   :  { %1901 = vmatmul.mubr.f32.gmra.mrb[16].mxu0 %v1810_v46  ;;  %4916 = vmatprep.subr.mxu1 %v1803_v45 }
 0xa9c   :  { %1905 = vmatprep.mubr.f32.mxu0 %v1814_v44  ;;  %v2294_v44 = vld [vmem:[%s6675_s21] sm:$0xff] }
 0xa9e   :  { %4917 = vmatpush3.msra.mxu1 %v1803_v45 }
 0xa9f   :  { %1906 = vmatmul.mubr.f32.gmra.mrb[18].mxu0 %v1813_v55  ;;  %4919 = vmatmul.mubr.msk.f32.vlgmr.msra.gmra.mrb[16].mxu1 %vm7746_vm1, %v1812_v14  ;;  %vm7752_vm1 = vmmov %vm7751_vm12  ;;  %v2083_v55 = vld [vmem:[%s6536_s13 + $0x10] sm:$0xff]  ;;  %v2056_v14 = vld [vmem:[%s6524_s25 + $0x18] sm:$0xff]  ;;  %s5739_s25 = smov 14  }
 0xaa0   :  { %4924 = vmatprep.subr.msk.mxu1 %vm7747_vm2, %v5683_v51  ;;  %1910 = vmatprep.mubr.f32.mxu0 %v1817_v5  ;;  %vm7753_vm2 = vmmov %vm7752_vm1  ;;  %v2268_v5 = vld [vmem:[%s6550_s22 + $0x10] sm:$0xff]  ;;  %s4201_s23 = sld [smem:[%s7449_s0 + %s5739_s25]]   ;;  %s7783_s25 = smov 120  }
 0xaa1   :  { %4925 = vmatpush3.msk.msra.mxu1 %vm7748_vm6, %v5683_v51  ;;  %4921 = vmatprep.mubr.msk.f32.mxu1 %vm7749_vm11, %v1815_v23  ;;  %vm7754_vm0 = vmmov %vm7752_vm1  ;;  %vm7755_vm6 = vmmov 0   ;;  %v2295_v23 = vld [vmem:[%s6675_s21 + $0x8] sm:$0xff]  ;;  %v2084_v51 = vld [vmem:[%s6536_s13 + $0x18] sm:$0xff]  ;;  %s7784_s13 = smov 96  }
 0xaa2   :  { %5257 = vmatprep.subr.bf16.mxu1 %v5724_v41 }
 0xaa3   :  { %1911 = vmatmul.mubr.f32.gmra.mrb[20].mxu0 %v1816_v54  ;;  %4922 = vmatmul.mubr.msk.f32.gmra.mrb[18].mxu1 %vm7750_vm8, %v1818_v19  ;;  %v2269_v54 = vld [vmem:[%s6550_s22 + $0x18] sm:$0xff]  ;;  %s5740_s22 = smov 15  }
 0xaa4   :  { %4926 = vmatprep.mubr.msk.f32.mxu1 %vm7751_vm12, %v2113_v2 }
 0xaa6   :  { %v6684_v19 = vpop.permute.xlu1 %2064 }
 0xaa7   :  { %4927 = vmatmul.mubr.msk.f32.vlgmr.msra.gmra.mrb[20].mxu1 %vm7752_vm1, %v2114_v8  ;;  %v6688_v8 = vpop.permute.xlu0 %2059 }
 0xaa8   :  { %4929 = vmatprep.mubr.msk.f32.mxu1 %vm7753_vm2, %v2115_v61 }
 0xaaa   :  { %v6686_v2 = vpop.permute.xlu1 %2087 }
 0xaab   :  { %4930 = vmatmul.mubr.msk.f32.gmra.mrb[22].mxu1 %vm7754_vm0, %v2116_v62  ;;  %vm7756_vm0 = vcmask 261120   ;;  %v6692_v62 = vpop.permute.xlu0 %2092 }
 0xaac   :  { %4940 = vmatprep.mubr.msk.f32.mxu1 %vm7755_vm6, %v5684_v0  ;;  %vm7757_vm11 = vmmov %vm7756_vm0 }
 0xaad   :  { %vm7758_vm12 = vmmov %vm7756_vm0 }
 0xaae   :  { %vm7759_vm8 = vmmov %vm7756_vm0  ;;  %v6690_v61 = vpop.permute.xlu1 %2272 }
 0xaaf   :  { %vm7760_vm1 = vmmov %vm7756_vm0 }
 0xab0   :  { %vm7761_vm2 = vmmov %vm7756_vm0 }
 0xb6a   :  { %v4595_v10 = vpop.f32.mrb[14].mxu0 }
 0xb6b   :  { %v4596_v11 = vpop.f32.mrb[15].mxu0 }
 0xb6c   :  { %v4597_v48 = vadd.f32 %v4596_v11, %v4595_v10  ;;  %v6694_v10 = vpop.permute.xlu1 %2069  ;;  %v6696_v11 = vpop.permute.xlu0 %2277 }
 0xb6e   :  { %v4598_v49 = vpop.f32.mrb[16].mxu0 }
 0xb6f   :  { %v4599_v63 = vpop.f32.mrb[17].mxu0 }
 0xb70   :  { %v4600_v13 = vadd.f32 %v4599_v63, %v4598_v49 }
 0xb72   :  { %v4920_v12 = vpop.f32.mrb[16].mxu1  ;;  %v4601_v15 = vpop.f32.mrb[18].mxu0 }
 0xb73   :  { %v6652_v37 = vadd.f32 %v4920_v12, %v4600_v13  ;;  %v1982_v4 = vpop.f32.mrb[17].mxu1  ;;  %v4602_v17 = vpop.f32.mrb[19].mxu0 }
 0xb74   :  { %v6654_v18 = vadd.f32 %v4597_v48, %v1982_v4  ;;  %v4603_v21 = vadd.f32 %v4602_v17, %v4601_v15 }
 0xb75   :  { %v2004_v38 = vsel %vm7761_vm2, %v6652_v37, 0.0  ;;  %vm7766_vm2 = vmmov %vm7756_vm0 }
 0xb76   :  { %v4604_v24 = vpop.f32.mrb[20].mxu0  ;;  %v4923_v26 = vpop.f32.mrb[18].mxu1  ;;  %v2001_v43 = vsel %vm7760_vm1, %v6654_v18, 0.0  ;;  %vm7765_vm1 = vmmov %vm7756_vm0 }
 0xb77   :  { %v4605_v27 = vpop.f32.mrb[21].mxu0  ;;  %v1992_v29 = vpop.f32.mrb[19].mxu1 }
 0xb78   :  { %v4606_v59 = vadd.f32 %v4605_v27, %v4604_v24  ;;  %v6656_v30 = vadd.f32 %v4603_v21, %v1992_v29 }
 0xb7a   :  { %v6658_v22 = vadd.f32 %v4923_v26, %v4606_v59  ;;  %v4928_v33 = vpop.f32.mrb[20].mxu1 }
 0xb7b   :  { %v2195_v34 = vpop.f32.mrb[21].mxu1  ;;  %v2217_v7 = vsel %vm7756_vm0, %v4928_v33, 0.0 }
 0xb7c   :  { %2218 = vadd.xlane.f32.xlu1 %v2217_v7  ;;  %v2214_v25 = vsel %vm7757_vm11, %v2195_v34, 0.0  ;;  %v2010_v45 = vsel %vm7756_vm0, %v6658_v22, 0.0  ;;  %vm7762_vm11 = vmmov %vm7756_vm0 }
 0xb7d   :  { %2215 = vadd.xlane.f32.xlu0 %v2214_v25  ;;  %v2007_v46 = vsel %vm7762_vm11, %v6656_v30, 0.0  ;;  %vm7767_vm11 = vmmov %vm7756_vm0 }
 0xb7e   :  { %v4931_v3 = vpop.f32.mrb[22].mxu1 }
 0xb7f   :  { %v2205_v6 = vpop.f32.mrb[23].mxu1  ;;  %v2223_v35 = vsel %vm7758_vm12, %v4931_v3, 0.0  ;;  %vm7763_vm12 = vmmov %vm7756_vm0 }
 0xb80   :  { %2224 = vadd.xlane.f32.xlu1 %v2223_v35  ;;  %v2220_v36 = vsel %vm7759_vm8, %v2205_v6, 0.0  ;;  %vm7764_vm8 = vmmov %vm7756_vm0 }
 0xb81   :  { %2221 = vadd.xlane.f32.xlu0 %v2220_v36 }
 0xb84   :  { %2002 = vadd.xlane.f32.xlu1 %v2001_v43 }
 0xb85   :  { %2005 = vadd.xlane.f32.xlu0 %v2004_v38 }
 0xb88   :  { %2011 = vadd.xlane.f32.xlu1 %v2010_v45 }
 0xb89   :  { %2008 = vadd.xlane.f32.xlu0 %v2007_v46 }
 0xb99   :  { %2300 = vperm.xlu1 %5543, %v2294_v44  }
 0xb9d   :  { %2097 = vperm.xlu1 %5543, %v2083_v55  }
 0xb9f   :  { %2074 = vperm.xlu0 %5542, %v2056_v14  }
 0xba1   :  { %2282 = vperm.xlu1 %5543, %v2268_v5  }
 0xba3   :  { %2305 = vperm.xlu0 %5542, %v2295_v23  }
 0xba7   :  { %2102 = vperm.xlu0 %5542, %v2084_v51  }
 0xbab   :  { %2287 = vperm.xlu0 %5542, %v2269_v54  }
 0xc09   :  { %v2219_v48 = vpop.xlane.xlu1 %2218 }
 0xc0a   :  { %v2227_v49 = vmul.f32 0.03125, %v2219_v48  ;;  %v2216_v63 = vpop.xlane.xlu0 %2215 }
 0xc0b   :  { %v2226_v13 = vmul.f32 0.03125, %v2216_v63 }
 0xc0c   :  { %v6698_v12 = vsub.f32 %v4928_v33, %v2227_v49 }
 0xc0d   :  { %v6700_v15 = vsub.f32 %v2195_v34, %v2226_v13  ;;  %v2225_v4 = vpop.xlane.xlu1 %2224 }
 0xc0e   :  { %v2229_v17 = vmul.f32 0.03125, %v2225_v4  ;;  %v2222_v21 = vpop.xlane.xlu0 %2221  ;;  %v2235_v24 = vmul.f32 %v6698_v12, %v6698_v12  ;;  %v2296_v4 = vld [vmem:[%s6675_s21 + $0x10] sm:$0xff] }
 0xc0f   :  { %v2228_v26 = vmul.f32 0.03125, %v2222_v21  ;;  %v2234_v27 = vmul.f32 %v6700_v15, %v6700_v15 }
 0xc10   :  { %v6706_v29 = vsub.f32 %v4931_v3, %v2229_v17  ;;  %v2241_v59 = vsel %vm7763_vm12, %v2235_v24, 0.0  ;;  %vm7768_vm12 = vmmov %vm7756_vm0 }
 0xc11   :  { %v6709_v7 = vsub.f32 %v2205_v6, %v2228_v26  ;;  %2242 = vadd.xlane.f32.xlu1 %v2241_v59  ;;  %v2003_v33 = vpop.xlane.xlu1 %2002  ;;  %v2238_v34 = vsel %vm7764_vm8, %v2234_v27, 0.0  ;;  %vm7769_vm8 = vmmov %vm7756_vm0 }
 0xc12   :  { %v2013_v25 = vmul.f32 0.03125, %v2003_v33  ;;  %v2006_v35 = vpop.xlane.xlu0 %2005  ;;  %2239 = vadd.xlane.f32.xlu0 %v2238_v34  ;;  %v2237_v36 = vmul.f32 %v6706_v29, %v6706_v29 }
 0xc13   :  { %v2014_v43 = vmul.f32 0.03125, %v2006_v35  ;;  %v2236_v38 = vmul.f32 %v6709_v7, %v6709_v7 }
 0xc14   :  { %v6717_v3 = vsub.f32 %v6654_v18, %v2013_v25  ;;  %v2247_v6 = vsel %vm7765_vm1, %v2237_v36, 0.0  ;;  %vm7771_vm1 = vmmov %vm7756_vm0 }
 0xc15   :  { %v6721_v45 = vsub.f32 %v6652_v37, %v2014_v43  ;;  %2248 = vadd.xlane.f32.xlu1 %v2247_v6  ;;  %v2012_v46 = vpop.xlane.xlu1 %2011  ;;  %v2244_v44 = vsel %vm7766_vm2, %v2236_v38, 0.0  ;;  %vm7772_vm2 = vcmask 7168  }
 0xc16   :  { %v2016_v55 = vmul.f32 0.03125, %v2012_v46  ;;  %2245 = vadd.xlane.f32.xlu0 %v2244_v44  ;;  %v2009_v14 = vpop.xlane.xlu0 %2008  ;;  %v2021_v5 = vmul.f32 %v6717_v3, %v6717_v3 }
 0xc17   :  { %v2015_v23 = vmul.f32 0.03125, %v2009_v14  ;;  %v2022_v18 = vmul.f32 %v6721_v45, %v6721_v45 }
 0xc18   :  { %v6729_v51 = vsub.f32 %v6658_v22, %v2016_v55  ;;  %v2025_v37 = vsel %vm7756_vm0, %v2021_v5, 0.0  ;;  %vm7773_vm0 = vmmov %vm7772_vm2 }
 0xc19   :  { %v6733_v54 = vsub.f32 %v6656_v30, %v2015_v23  ;;  %v2028_v48 = vsel %vm7767_vm11, %v2022_v18, 0.0  ;;  %v2297_v30 = vld [vmem:[%s6675_s21 + $0x18] sm:$0xff]  ;;  %v2301_v21 = vpop.permute.xlu1 %2300  ;;  %vm7774_vm11 = vcmask 269312   ;;  %s7782_s21 = smov 104  }
 0xc1a   :  { %2029 = vadd.xlane.f32.xlu1 %v2028_v48  ;;  %2026 = vadd.xlane.f32.xlu0 %v2025_v37  ;;  %v2024_v49 = vmul.f32 %v6729_v51, %v6729_v51 }
 0xc1b   :  { %v2023_v63 = vmul.f32 %v6733_v54, %v6733_v54 }
 0xc1c   :  { %v2034_v13 = vsel %vm7768_vm12, %v2024_v49, 0.0  ;;  %vm7775_vm12 = vmmov %vm7774_vm11 }
 0xc1d   :  { %v2031_v22 = vsel %vm7769_vm8, %v2023_v63, 0.0  ;;  %v6748_v26 = vpop.permute.xlu1 %2097  ;;  %vm7777_vm8 = vcmask 154624  }
 0xc1e   :  { %2032 = vadd.xlane.f32.xlu0 %v2031_v22  ;;  %2035 = vadd.xlane.f32.xlu1 %v2034_v13  ;;  %v6744_v17 = vpop.permute.xlu0 %2074 }
 0xc21   :  { %v2283_v59 = vpop.permute.xlu1 %2282 }
 0xc22   :  { %v6746_v24 = vpop.permute.xlu0 %2305 }
 0xc26   :  { %v6750_v27 = vpop.permute.xlu0 %2102 }
 0xc2a   :  { %v2288_v33 = vpop.permute.xlu0 %2287 }
 0xc2f   :  { %2310 = vperm.xlu1 %5543, %v2296_v4  }
 0xc34   :  { %2315 = vperm.xlu0 %5542, %v2297_v30  }
 0xc9e   :  { %v2243_v34 = vpop.xlane.xlu1 %2242 }
 0xc9f   :  { %v2240_v25 = vpop.xlane.xlu0 %2239  ;;  %v2251_v36 = vmul.f32 0.03125, %v2243_v34 }
 0xca0   :  { %v2250_v35 = vmul.f32 0.03125, %v2240_v25 }
 0xca1   :  { %v2255_v55 = vadd.f32 1e-05, %v2251_v36 }
 0xca2   :  { %v2249_v43 = vpop.xlane.xlu1 %2248  ;;  %v2254_v46 = vadd.f32 1e-05, %v2250_v35 }
 0xca3   :  { %v2253_v38 = vmul.f32 0.03125, %v2249_v43  ;;  %v2246_v6 = vpop.xlane.xlu0 %2245 }
 0xca4   :  { %v2252_v44 = vmul.f32 0.03125, %v2246_v6  ;;  %5635 = vrsqrt.f32 %v2254_v46 }
 0xca5   :  { %v2257_v14 = vadd.f32 1e-05, %v2253_v38  ;;  %5637 = vrsqrt.f32 %v2255_v55 }
 0xca6   :  { %v2256_v5 = vadd.f32 1e-05, %v2252_v44 }
 0xca7   :  { %v2027_v23 = vpop.xlane.xlu0 %2026  ;;  %v2030_v18 = vpop.xlane.xlu1 %2029  ;;  %5639 = vrsqrt.f32 %v2257_v14 }
 0xca8   :  { %v2037_v37 = vmul.f32 0.03125, %v2027_v23  ;;  %v2038_v48 = vmul.f32 0.03125, %v2030_v18  ;;  %5641 = vrsqrt.f32 %v2256_v5 }
 0xcaa   :  { %v2041_v49 = vadd.f32 1e-05, %v2037_v37  ;;  %v2042_v63 = vadd.f32 1e-05, %v2038_v48 }
 0xcab   :  { %v2033_v13 = vpop.xlane.xlu0 %2032  ;;  %v2036_v22 = vpop.xlane.xlu1 %2035 }
 0xcac   :  { %5643 = vrsqrt.f32 %v2041_v49  ;;  %v2039_v4 = vmul.f32 0.03125, %v2033_v13  ;;  %v2040_v30 = vmul.f32 0.03125, %v2036_v22 }
 0xcad   :  { %5645 = vrsqrt.f32 %v2042_v63 }
 0xcae   :  { %v2043_v34 = vadd.f32 1e-05, %v2039_v4  ;;  %v2044_v25 = vadd.f32 1e-05, %v2040_v30  ;;  %v5636_v35 = vpop.eup %5635 }
 0xcaf   :  { %v5638_v36 = vpop.eup %5637  ;;  %v2262_v6 = vmul.f32 %v5636_v35, %v6700_v15 }
 0xcb0   :  { %5647 = vrsqrt.f32 %v2043_v34  ;;  %v2263_v44 = vmul.f32 %v5638_v36, %v6698_v12 }
 0xcb1   :  { %5649 = vrsqrt.f32 %v2044_v25  ;;  %v5640_v43 = vpop.eup %5639  ;;  %v2290_v23 = vmul.f32 %v6690_v61, %v2262_v6  ;;  %v2311_v25 = vpop.permute.xlu1 %2310 }
 0xcb2   :  { %v5642_v38 = vpop.eup %5641  ;;  %v2291_v49 = vmul.f32 %v6696_v11, %v2263_v44  ;;  %v2265_v15 = vmul.f32 %v5640_v43, %v6706_v29 }
 0xcb3   :  { %v2264_v37 = vmul.f32 %v5642_v38, %v6709_v7  ;;  %v2318_v22 = vadd.f32 %v2301_v21, %v2290_v23  ;;  %v2316_v21 = vpop.permute.xlu0 %2315 }
 0xcb4   :  { %v2319_v11 = vadd.f32 %v6746_v24, %v2291_v49  ;;  %v2293_v30 = vmul.f32 %v2288_v33, %v2265_v15 }
 0xcb5   :  { %v2292_v7 = vmul.f32 %v2283_v59, %v2264_v37 }
 0xcb6   :  { %v5644_v46 = vpop.eup %5643  ;;  %v2321_v59 = vadd.f32 %v2316_v21, %v2293_v30 }
 0xcb7   :  { %v5646_v55 = vpop.eup %5645  ;;  %v2049_v14 = vmul.f32 %v5644_v46, %v6717_v3  ;;  %v2330_v46 = vld [vmem:[%s4201_s23] sm:$0xff]  ;;  %s7826_s23 = smov 95  }
 0xcb8   :  { %v2050_v5 = vmul.f32 %v5646_v55, %v6721_v45 }
 0xcb9   :  { %v2077_v18 = vmul.f32 %v6688_v8, %v2049_v14 }
 0xcba   :  { %v5648_v48 = vpop.eup %5647  ;;  %v2078_v63 = vmul.f32 %v6684_v19, %v2050_v5 }
 0xcbb   :  { %v5650_v13 = vpop.eup %5649  ;;  %v2105_v12 = vadd.f32 %v6686_v2, %v2077_v18  ;;  %v2051_v3 = vmul.f32 %v5648_v48, %v6733_v54 }
 0xcbc   :  { %v2106_v45 = vadd.f32 %v6692_v62, %v2078_v63  ;;  %v2052_v61 = vmul.f32 %v5650_v13, %v6729_v51  ;;  %v2320_v51 = vadd.f32 %v2311_v25, %v2292_v7 }
 0xcbd   :  { %v2079_v8 = vmul.f32 %v6694_v10, %v2051_v3  ;;  %v2109_v4 = vmax.f32 %v2105_v12, 0.0 }
 0xcbe   :  { %v2080_v19 = vmul.f32 %v6744_v17, %v2052_v61  ;;  %v2110_v29 = vmax.f32 %v2106_v45, 0.0 }
 0xcbf   :  { %v2107_v34 = vadd.f32 %v6748_v26, %v2079_v8  ;;  %v2322_v2 = vadd.f32 %v2318_v22, %v2109_v4 }
 0xcc0   :  { %v2108_v54 = vadd.f32 %v6750_v27, %v2080_v19  ;;  %v2323_v62 = vadd.f32 %v2319_v11, %v2110_v29 }
 0xcc1   :  { %v2111_v35 = vmax.f32 %v2107_v34, 0.0  ;;  %v6771_v36 = vmax.f32 %v2322_v2, 0.0 }
 0xcc2   :  { %v2112_v10 = vmax.f32 %v2108_v54, 0.0  ;;  %v6773_v43 = vmax.f32 %v2323_v62, 0.0 }
 0xcc3   :  { %v2324_v17 = vadd.f32 %v2320_v51, %v2111_v35 }
 0xcc4   :  { %v2325_v24 = vadd.f32 %v2321_v59, %v2112_v10  ;;  %v5574_v26 = vpack.i.bf16 %v6773_v43, %v6771_v36  ;;  %v5258_v27 = vpack.c.bf16 %v6773_v43, %v6771_v36 }
 0xcc5   :  { %v6782_v33 = vmax.f32 %v2324_v17, 0.0 }
 0xcc6   :  { %v6784_v38 = vmax.f32 %v2325_v24, 0.0  ;;  %5575 = vrot.lane.b32.xlu0 %v5574_v26, %s7770_s1  ;;  %5259 = vmatpush3.bf16.msra.mxu1 %v5258_v27 }
 0xcc7   :  { %5260 = vmatprep.subr.bf16.mxu1 %v5724_v41 }
 0xcc8   :  { %v5261_v6 = vpack.c.bf16 %v6784_v38, %v6782_v33 }
 0xcca   :  { %2541 = vrot.lane.b32.xlu0 %v6784_v38, %s7770_s1  ;;  %5262 = vmatpush3.bf16.msra.mxu1 %v5261_v6 }
 0xccd   :  { %4941 = vmatmul.mubr.msk.f32.vlgmr.msra.gmra.mrb[24].mxu1 %vm7771_vm1, %v2330_v46  ;;  %vm7778_vm1 = vcmask 416768  }
 0xd38   :  { %v5576_v44 = vpop.permute.xlu0 %5575 }
 0xd39   :  { %v5578_v55 = vunpack.i.h.bf16 %v5576_v44  ;;  %v5577_v14 = vunpack.i.l.bf16 %v5576_v44 }
 0xd3b   :  { %v2548_v5 = vsel %vm7772_vm2, -inf, %v5578_v55  ;;  %v2547_v23 = vsel %vm7773_vm0, -inf, %v5577_v14  ;;  %vm7789_vm2 = vmmov %vm7773_vm0 }
 0xd3c   :  { %v6796_v18 = vsel %vm7774_vm11, %v2548_v5, -inf  ;;  %v6799_v37 = vsel %vm7775_vm12, %v2547_v23, -inf  ;;  %v2542_v22 = vpop.permute.xlu0 %2541  ;;  %vm7792_vm0 = vmmov %vm7774_vm11 }
 0xd3d   :  { %v5579_v48 = vpack.i.bf16 %v6796_v18, %v6799_v37  ;;  %vm7793_vm11 = vmmov %vm7789_vm2 }
 0xd3e   :  { %v2550_v7 = vsel %vm7793_vm11, -inf, %v2542_v22  ;;  %vm7795_vm12 = vmmov %vm7792_vm0  ;;  %vm7800_vm11 = vnez %v7662_v57 }
 0xd3f   :  { %5580 = vrot.lane.b32.xlu0 %v5579_v48, %s7738_s28  ;;  %v6859_v19 = vsel %vm7795_vm12, %v2550_v7, -inf  ;;  %vm7801_vm12 = vnez %v7664_v58 }
 0xda0   :  { %v2400_v49 = vpop.f32.mrb[24].mxu1 }
 0xda1   :  { %2405 = vrot.lane.b32.xlu1 %v2400_v49, %s7776_s27  ;;  %v4942_v63 = vpop.f32.mrb[25].mxu1 }
 0xda5   :  { %2539 = vrot.lane.b32.xlu1 %v6782_v33, %s7770_s1 }
 0xda9   :  { %2563 = vrot.lane.b32.xlu1 %v6799_v37, %s7736_s29 }
 0xdb1   :  { %v6867_v30 = vpop.permute.xlu0 %5580 }
 0xe13   :  { %v2406_v15 = vpop.permute.xlu1 %2405 }
 0xe14   :  { %v2408_v13 = vsel %vm7777_vm8, 0.0, %v2406_v15  ;;  %vm7796_vm8 = vcmask 719872  }
 0xe15   :  { %v2409_v12 = vsel %vm7778_vm1, %v2408_v13, 0.0  ;;  %vm7797_vm1 = vnez %v7653_v39 }
 0xe16   :  { %2463 = vrot.lane.b32.xlu0 %v2409_v12, %s7720_s19  ;;  %2459 = vrot.lane.b32.xlu1 %v2409_v12, %s7779_s5 }
 0xe17   :  { %v2540_v45 = vpop.permute.xlu1 %2539 }
 0xe18   :  { %v2549_v61 = vsel %vm7789_vm2, -inf, %v2540_v45  ;;  %vm7798_vm2 = vnez %v7639_v1 }
 0xe19   :  { %v6849_v8 = vsel %vm7792_vm0, %v2549_v61, -inf  ;;  %vm7799_vm0 = vnez %v7648_v16 }
 0xe1a   :  { %2599 = vrot.lane.b32.xlu0 %v2409_v12, %s7722_s24  ;;  %2467 = vrot.lane.b32.xlu1 %v2409_v12, %s7780_s18  ;;  %v5584_v4 = vpack.i.bf16 %v6849_v8, %v6796_v18 }
 0xe1b   :  { %v2564_v29 = vpop.permute.xlu1 %2563 }
 0xe1e   :  { %2475 = vrot.lane.b32.xlu0 %v2409_v12, %s7724_s15  ;;  %2471 = vrot.lane.b32.xlu1 %v2409_v12, %s7781_s8 }
 0xe22   :  { %2415 = vrot.lane.b32.xlu0 %v2409_v12, %s7726_s17  ;;  %2411 = vrot.lane.b32.xlu1 %v2409_v12, %s7721_s20 }
 0xe26   :  { %2483 = vrot.lane.b32.xlu0 %v2409_v12, %s7728_s12  ;;  %2479 = vrot.lane.b32.xlu1 %v2409_v12, %s7723_s7 }
 0xe2a   :  { %2423 = vrot.lane.b32.xlu0 %v2409_v12, %s7729_s14  ;;  %2419 = vrot.lane.b32.xlu1 %v2409_v12, %s7725_s16 }
 0xe2e   :  { %2491 = vrot.lane.b32.xlu0 %v2409_v12, %s7731_s10  ;;  %2487 = vrot.lane.b32.xlu1 %v2409_v12, %s7782_s21 }
 0xe32   :  { %2431 = vrot.lane.b32.xlu0 %v2409_v12, %s7732_s11  ;;  %2427 = vrot.lane.b32.xlu1 %v2409_v12, %s7783_s25  ;;  %s6838_s25 = sld [smem:[%s7449_s0 + %s5740_s22]]   ;;  %s7791_s11 = smov 97  }
 0xe33   :  { %s7794_s22 = smov 114  }
 0xe36   :  { %2499 = vrot.lane.b32.xlu0 %v2409_v12, %s7733_s2  ;;  %2495 = vrot.lane.b32.xlu1 %v2409_v12, %s7676_s30  ;;  %s7785_s2 = smov 116  }
 0xe38   :  { %v2603_v3 = vld [vmem:[%s6838_s25 + $0x8] sm:$0xff]  ;;  %v2604_v11 = vld [vmem:[%s6838_s25 + $0x10] sm:$0xff] }
 0xe39   :  { %2690 = vmatprep.mubr.f32.mxu0 %v2603_v3  ;;  %4965 = vmatprep.mubr.msk.f32.mxu1 %vm7796_vm8, %v2604_v11  ;;  %vm7802_vm8 = vnez %v7656_v47 }
 0xe3a   :  { %2523 = vrot.lane.b32.xlu0 %v2409_v12, %s7677_s3  ;;  %2519 = vrot.lane.b32.xlu1 %v2409_v12, %s7784_s13  ;;  %s7786_s3 = smov 94  }
 0xe3e   :  { %2439 = vrot.lane.b32.xlu0 %v2409_v12, %s7679_s9  ;;  %2435 = vrot.lane.b32.xlu1 %v2409_v12, %s7680_s26  ;;  %s7787_s9 = smov 98   ;;  %s7788_s26 = smov 115  }
 0xe42   :  { %2507 = vrot.lane.b32.xlu0 %v2409_v12, %s7681_s4  ;;  %2503 = vrot.lane.b32.xlu1 %v2409_v12, %s7682_s6  ;;  %s7790_s6 = smov 113  }
 0xe46   :  { %2443 = vrot.lane.b32.xlu0 %v2409_v12, %s7785_s2  ;;  %2527 = vrot.lane.b32.xlu1 %v2409_v12, %s7786_s3 }
 0xe4a   :  { %2511 = vrot.lane.b32.xlu0 %v2409_v12, %s7787_s9  ;;  %2447 = vrot.lane.b32.xlu1 %v2409_v12, %s7788_s26  ;;  %s7828_s9 = smov 118   ;;  %s7834_s26 = smov 113  }
 0xe4e   :  { %2455 = vrot.lane.b32.xlu0 %v2409_v12, %s7790_s6  ;;  %2515 = vrot.lane.b32.xlu1 %v2409_v12, %s7791_s11  ;;  %s5742_s6 = smov 17  }
 0xe4f   :  { %s6959_s3 = sld [smem:[%s7449_s0 + %s5742_s6]]  }
 0xe52   :  { %2451 = vrot.lane.b32.xlu1 %v2409_v12, %s7794_s22  ;;  %2583 = vrot.lane.b32.xlu0 %v6849_v8, %s7738_s28  ;;  %s7824_s22 = smov 120  }
 0xe56   :  { %5585 = vrot.lane.b32.xlu1 %v5584_v4, %s7736_s29  ;;  %2585 = vrot.lane.b32.xlu0 %v6859_v19, %s7738_s28 }
 0xe5a   :  { %2569 = vrot.lane.b32.xlu1 %v6859_v19, %s7736_s29 }
 0xe88   :  { %v2464_v34 = vpop.permute.xlu0 %2463  ;;  %v2460_v2 = vpop.permute.xlu1 %2459 }
 0xe89   :  { %v5263_v25 = vpack.c.bf16 %v2464_v34, %v2460_v2  ;;  %v5582_v2 = vunpack.i.l.bf16 %v6867_v30 }
 0xe8b   :  { %5265 = vmatprep.subr.msk.bf16.mxu0 %vm5895_vm7, %v5263_v25 }
 0xe8c   :  { %v2600_v54 = vpop.permute.xlu0 %2599  ;;  %v2468_v62 = vpop.permute.xlu1 %2467  ;;  %5266 = vmatpush3.bf16.msra.mxu0 %v5724_v41 }
 0xe8d   :  { %v5267_v35 = vpack.c.bf16 %v2600_v54, %v2468_v62  ;;  %v2555_v54 = vsel %vm7800_vm11, %v6799_v37, -inf  ;;  %v2575_v62 = vsel %vm7801_vm12, %v2564_v29, -inf }
 0xe8f   :  { %5269 = vmatprep.subr.msk.bf16.mxu0 %vm5922_vm14, %v5267_v35 }
 0xe90   :  { %v2476_v51 = vpop.permute.xlu0 %2475  ;;  %v2472_v21 = vpop.permute.xlu1 %2471  ;;  %5270 = vmatpush3.bf16.msra.mxu0 %v5724_v41 }
 0xe91   :  { %v5271_v10 = vpack.c.bf16 %v2476_v51, %v2472_v21  ;;  %v2591_v21 = vmax.f32 %v2555_v54, %v5582_v2  ;;  %v2608_v54 = vld [vmem:[%s6838_s25 + $0x30] sm:$0xff] }
 0xe93   :  { %5273 = vmatprep.subr.msk.bf16.mxu0 %vm7693_vm4, %v5271_v10 }
 0xe94   :  { %v2416_v59 = vpop.permute.xlu0 %2415  ;;  %v2412_v17 = vpop.permute.xlu1 %2411 }
 0xe95   :  { %v5274_v24 = vpack.c.bf16 %v2416_v59, %v2412_v17  ;;  %v2595_v59 = vmax.f32 %v2591_v21, %v2575_v62  ;;  %v2611_v21 = vld [vmem:[%s6838_s25 + $0x48] sm:$0xff] }
 0xe97   :  { %5276 = vmatpush3.bf16.msk.msra.mxu0 %vm7739_vm15, %v5274_v24  ;;  %v5321_v37 = vpack.c.bf16 %v2595_v59, %v5684_v0 }
 0xe98   :  { %v2484_v26 = vpop.permute.xlu0 %2483  ;;  %v2480_v27 = vpop.permute.xlu1 %2479 }
 0xe99   :  { %v5277_v6 = vpack.c.bf16 %v2484_v26, %v2480_v27 }
 0xe9b   :  { %5279 = vmatprep.subr.msk.bf16.mxu0 %vm7740_vm3, %v5277_v6 }
 0xe9c   :  { %v2424_v46 = vpop.permute.xlu0 %2423  ;;  %v2420_v44 = vpop.permute.xlu1 %2419 }
 0xe9d   :  { %v5280_v55 = vpack.c.bf16 %v2424_v46, %v2420_v44 }
 0xe9f   :  { %5282 = vmatpush3.bf16.msk.msra.mxu0 %vm7696_vm13, %v5280_v55 }
 0xea0   :  { %v2492_v14 = vpop.permute.xlu0 %2491  ;;  %v2488_v5 = vpop.permute.xlu1 %2487 }
 0xea1   :  { %v5283_v23 = vpack.c.bf16 %v2492_v14, %v2488_v5  ;;  %v5583_v14 = vunpack.i.h.bf16 %v6867_v30  ;;  %v2602_v5 = vld [vmem:[%s6838_s25] sm:$0xff] }
 0xea3   :  { %5285 = vmatprep.subr.msk.bf16.mxu0 %vm7697_vm9, %v5283_v23 }
 0xea4   :  { %v2432_v48 = vpop.permute.xlu0 %2431  ;;  %v2428_v49 = vpop.permute.xlu1 %2427 }
 0xea5   :  { %v5286_v63 = vpack.c.bf16 %v2432_v48, %v2428_v49  ;;  %v2606_v48 = vld [vmem:[%s6838_s25 + $0x20] sm:$0xff]  ;;  %v2556_v49 = vsel %vm7800_vm11, %v6796_v18, -inf  ;;  %v2605_v18 = vld [vmem:[%s6838_s25 + $0x18] sm:$0xff] }
 0xea7   :  { %5288 = vmatpush3.bf16.msk.msra.mxu0 %vm7741_vm5, %v5286_v63  ;;  %v2557_v63 = vsel %vm7800_vm11, %v6849_v8, -inf  ;;  %v2609_v8 = vld [vmem:[%s6838_s25 + $0x38] sm:$0xff] }
 0xea8   :  { %v2500_v15 = vpop.permute.xlu0 %2499  ;;  %v2496_v13 = vpop.permute.xlu1 %2495 }
 0xea9   :  { %v5289_v12 = vpack.c.bf16 %v2500_v15, %v2496_v13 }
 0xeab   :  { %5291 = vmatprep.subr.msk.bf16.mxu0 %vm7699_vm10, %v5289_v12  ;;  %v2592_v12 = vmax.f32 %v2556_v49, %v5583_v14 }
 0xeac   :  { %v2524_v3 = vpop.permute.xlu0 %2523  ;;  %v2520_v45 = vpop.permute.xlu1 %2519 }
 0xead   :  { %v5307_v61 = vpack.c.bf16 %v2524_v3, %v2520_v45 }
 0xeaf   :  { %5309 = vmatprep.subr.msk.bf16.mxu1 %vm7797_vm1, %v5307_v61 }
 0xeb0   :  { %v2440_v22 = vpop.permute.xlu0 %2439  ;;  %5312 = vmatpush3.bf16.msk.msra.mxu1 %vm7797_vm1, %v5307_v61  ;;  %v2436_v7 = vpop.permute.xlu1 %2435 }
 0xeb1   :  { %v5292_v4 = vpack.c.bf16 %v2440_v22, %v2436_v7 }
 0xeb3   :  { %5294 = vmatpush3.bf16.msk.msra.mxu0 %vm7798_vm2, %v5292_v4  ;;  %vm7804_vm2 = vnez %v7658_v50 }
 0xeb4   :  { %v2508_v11 = vpop.permute.xlu0 %2507  ;;  %v2504_v34 = vpop.permute.xlu1 %2503 }
 0xeb5   :  { %v5295_v25 = vpack.c.bf16 %v2508_v11, %v2504_v34  ;;  %v2558_v11 = vsel %vm7800_vm11, %v6859_v19, -inf  ;;  %v2610_v19 = vld [vmem:[%s6838_s25 + $0x40] sm:$0xff] }
 0xeb7   :  { %5297 = vmatprep.subr.msk.bf16.mxu0 %vm7799_vm0, %v5295_v25  ;;  %vm7803_vm0 = vnez %v7650_v28 }
 0xeb8   :  { %v2444_v35 = vpop.permute.xlu0 %2443  ;;  %v2528_v51 = vpop.permute.xlu1 %2527 }
 0xeb9   :  { %v5313_v10 = vpack.c.bf16 %v5684_v0, %v2528_v51  ;;  %v2607_v51 = vld [vmem:[%s6838_s25 + $0x28] sm:$0xff] }
 0xebb   :  { %5315 = vmatprep.subr.msk.bf16.mxu1 %vm7802_vm8, %v5313_v10 }
 0xebc   :  { %v2512_v17 = vpop.permute.xlu0 %2511  ;;  %5318 = vmatpush3.bf16.msk.msra.mxu1 %vm7802_vm8, %v5313_v10  ;;  %v2448_v24 = vpop.permute.xlu1 %2447  ;;  %v2613_v10 = vld [vmem:[%s6838_s25 + $0x58] sm:$0xff] }
 0xebd   :  { %v5298_v26 = vpack.c.bf16 %v2448_v24, %v2444_v35  ;;  %5319 = vmatprep.subr.bf16.mxu1 %v5724_v41  ;;  %v2612_v35 = vld [vmem:[%s6838_s25 + $0x50] sm:$0xff]  ;;  %s5741_s25 = smov 16  }
 0xebe   :  { %s4203_s11 = sld [smem:[%s7449_s0 + %s5741_s25]]   ;;  %s7825_s25 = smov 101  }
 0xebf   :  { %5300 = vmatpush3.bf16.msk.msra.mxu0 %vm7803_vm0, %v5298_v26  ;;  %vm7805_vm0 = vnez %v7660_v56 }
 0xec0   :  { %v2456_v29 = vpop.permute.xlu0 %2455  ;;  %5320 = vmatpush3.bf16.msra.mxu1 %v5724_v41  ;;  %v2516_v27 = vpop.permute.xlu1 %2515 }
 0xec1   :  { %v5301_v6 = vpack.c.bf16 %v2516_v27, %v2512_v17  ;;  %5322 = vmatprep.subr.bf16.mxu1 %v5321_v37 }
 0xec3   :  { %5303 = vmatprep.subr.msk.bf16.mxu0 %vm7804_vm2, %v5301_v6 }
 0xec4   :  { %5324 = vmatpush3.bf16.msra.mxu1 %v5321_v37  ;;  %v2452_v46 = vpop.permute.xlu1 %2451  ;;  %v2584_v44 = vpop.permute.xlu0 %2583 }
 0xec5   :  { %v5304_v55 = vpack.c.bf16 %v2456_v29, %v2452_v46  ;;  %v2593_v30 = vmax.f32 %v2557_v63, %v2584_v44 }
 0xec7   :  { %5306 = vmatpush3.bf16.msk.msra.mxu0 %vm7805_vm0, %v5304_v55  ;;  %vm7806_vm0 = vcmask 719872  }
 0xec8   :  { %v5586_v23 = vpop.permute.xlu1 %5585  ;;  %v2586_v3 = vpop.permute.xlu0 %2585  ;;  %vm7807_vm2 = vmmov %vm7806_vm0 }
 0xec9   :  { %v5588_v15 = vunpack.i.h.bf16 %v5586_v23  ;;  %v5587_v13 = vunpack.i.l.bf16 %v5586_v23  ;;  %v2594_v2 = vmax.f32 %v2558_v11, %v2586_v3  ;;  %vm7808_vm8 = vmmov %vm7806_vm0  ;;  %v2850_v11 = vld [vmem:[%s4203_s11 + $0x10] sm:$0xff] }
 0xeca   :  { %2691 = vmatmul.mubr.f32.vlgmr.msra.gmra.mrb[22].mxu0 %v2602_v5 }
 0xecb   :  { %v2577_v45 = vsel %vm7801_vm12, %v5588_v15, -inf  ;;  %v2576_v61 = vsel %vm7801_vm12, %v5587_v13, -inf  ;;  %2695 = vmatprep.mubr.f32.mxu0 %v2606_v48 }
 0xecc   :  { %v2570_v22 = vpop.permute.xlu1 %2569  ;;  %v2596_v7 = vmax.f32 %v2592_v12, %v2576_v61  ;;  %v2597_v4 = vmax.f32 %v2593_v30, %v2577_v45 }
 0xecd   :  { %v2578_v34 = vsel %vm7801_vm12, %v2570_v22, -inf  ;;  %v2876_v22 = vld [vmem:[%s6959_s3] sm:$0xff] }
 0xece   :  { %2696 = vmatmul.mubr.f32.gmra.mrb[24].mxu0 %v2605_v18  ;;  %v5325_v25 = vpack.c.bf16 %v2597_v4, %v2596_v7  ;;  %v2598_v62 = vmax.f32 %v2594_v2, %v2578_v34  ;;  %v2848_v18 = vld [vmem:[%s4203_s11] sm:$0xff]  ;;  %v2877_v7 = vld [vmem:[%s6959_s3 + $0x8] sm:$0xff]  ;;  %v2851_v4 = vld [vmem:[%s4203_s11 + $0x18] sm:$0xff] }
 0xecf   :  { %2700 = vmatprep.mubr.f32.mxu0 %v2609_v8  ;;  %v2849_v8 = vld [vmem:[%s4203_s11 + $0x8] sm:$0xff]  ;;  %s7823_s11 = smov 119  }
 0xed0   :  { %5326 = vmatprep.subr.bf16.mxu1 %v5325_v25 }
 0xed1   :  { %5328 = vmatpush3.bf16.msra.mxu1 %v5325_v25 }
 0xed2   :  { %4963 = vmatprep.subr.mxu1 %v2598_v62  ;;  %2701 = vmatmul.mubr.f32.gmra.mrb[26].mxu0 %v2608_v54 }
 0xed3   :  { %2705 = vmatprep.mubr.f32.mxu0 %v2612_v35 }
 0xed5   :  { %4964 = vmatpush3.msra.mxu1 %v2598_v62 }
 0xed6   :  { %4966 = vmatmul.mubr.msk.f32.vlgmr.msra.gmra.mrb[26].mxu1 %vm7806_vm0, %v2607_v51  ;;  %2706 = vmatmul.mubr.f32.gmra.mrb[28].mxu0 %v2611_v21 }
 0xed7   :  { %4968 = vmatprep.mubr.msk.f32.mxu1 %vm7807_vm2, %v2610_v19  ;;  %5329 = vmatprep.subr.bf16.mxu1 %v5724_v41  ;;  %vm7809_vm2 = vcmask 261120  }
 0xed8   :  { %vm7810_vm0 = vmmov %vm7809_vm2 }
 0xeda   :  { %4969 = vmatmul.mubr.msk.f32.gmra.mrb[28].mxu1 %vm7808_vm8, %v2613_v10  ;;  %vm7811_vm8 = vmmov %vm7810_vm0 }
 0xedb   :  { %4979 = vmatprep.mubr.msk.f32.mxu1 %vm7755_vm6, %v5684_v0  ;;  %vm7812_vm6 = vmmov %vm7810_vm0 }
 0xf9d   :  { %v4664_v59 = vpop.f32.mrb[22].mxu0 }
 0xf9e   :  { %v4665_v17 = vpop.f32.mrb[23].mxu0 }
 0xf9f   :  { %v4666_v24 = vadd.f32 %v4665_v17, %v4664_v59 }
 0xfa1   :  { %v4667_v26 = vpop.f32.mrb[24].mxu0 }
 0xfa2   :  { %v4668_v37 = vpop.f32.mrb[25].mxu0 }
 0xfa3   :  { %v4669_v29 = vadd.f32 %v4668_v37, %v4667_v26 }
 0xfa5   :  { %v4670_v27 = vpop.f32.mrb[26].mxu0 }
 0xfa6   :  { %v4671_v6 = vpop.f32.mrb[27].mxu0 }
 0xfa7   :  { %v4672_v46 = vadd.f32 %v4671_v6, %v4670_v27 }
 0xfa9   :  { %v4967_v44 = vpop.f32.mrb[26].mxu1  ;;  %v4673_v55 = vpop.f32.mrb[28].mxu0 }
 0xfaa   :  { %v2783_v14 = vadd.f32 %v4967_v44, %v4669_v29  ;;  %v2777_v5 = vpop.f32.mrb[27].mxu1  ;;  %v4674_v23 = vpop.f32.mrb[29].mxu0 }
 0xfab   :  { %v2778_v48 = vadd.f32 %v4666_v24, %v2777_v5  ;;  %v4675_v49 = vadd.f32 %v4674_v23, %v4673_v55  ;;  %v2879_v55 = vld [vmem:[%s6959_s3 + $0x18] sm:$0xff] }
 0xfac   :  { %v2799_v63 = vsel %vm7809_vm2, %v2783_v14, 0.0  ;;  %vm7814_vm2 = vmmov %vm7810_vm0 }
 0xfad   :  { %2800 = vadd.xlane.f32.xlu1 %v2799_v63  ;;  %v4970_v15 = vpop.f32.mrb[28].mxu1  ;;  %v2796_v13 = vsel %vm7810_vm0, %v2778_v48, 0.0 }
 0xfae   :  { %v2793_v12 = vadd.f32 %v4970_v15, %v4675_v49  ;;  %v2787_v30 = vpop.f32.mrb[29].mxu1  ;;  %2797 = vadd.xlane.f32.xlu0 %v2796_v13 }
 0xfaf   :  { %v2788_v3 = vadd.f32 %v4672_v46, %v2787_v30 }
 0xfb0   :  { %v2805_v61 = vsel %vm7812_vm6, %v2793_v12, 0.0  ;;  %vm7813_vm6 = vmmov %vm7810_vm0 }
 0xfb1   :  { %v2802_v45 = vsel %vm7811_vm8, %v2788_v3, 0.0  ;;  %vm7815_vm8 = vmmov %vm7810_vm0 }
 0xfb2   :  { %2803 = vadd.xlane.f32.xlu0 %v2802_v45 }
 0xfb6   :  { %2806 = vadd.xlane.f32.xlu0 %v2805_v61 }
 0xfbe   :  { %2854 = vperm.xlu1 %5543, %v2848_v18  }
 0xfc2   :  { %2882 = vperm.xlu1 %5543, %v2876_v22  }
 0xfc6   :  { %2887 = vperm.xlu1 %5543, %v2877_v7  }
 0xfca   :  { %2869 = vperm.xlu1 %5543, %v2851_v4  }
 0xfcc   :  { %2859 = vperm.xlu0 %5542, %v2849_v8  }
 0xfd0   :  { %2864 = vperm.xlu0 %5542, %v2850_v11  }
0x103a   :  { %v2801_v34 = vpop.xlane.xlu1 %2800 }
0x103b   :  { %v2809_v2 = vmul.f32 0.03125, %v2801_v34  ;;  %v2798_v25 = vpop.xlane.xlu0 %2797 }
0x103c   :  { %v2808_v54 = vmul.f32 0.03125, %v2798_v25 }
0x103d   :  { %v2813_v62 = vsub.f32 %v2783_v14, %v2809_v2  ;;  %v2878_v14 = vld [vmem:[%s6959_s3 + $0x10] sm:$0xff]  ;;  %s5743_s3 = smov 18  }
0x103e   :  { %v2812_v35 = vsub.f32 %v2778_v48, %v2808_v54  ;;  %v2855_v5 = vpop.permute.xlu1 %2854  ;;  %s4205_s6 = sld [smem:[%s7449_s0 + %s5743_s3]]   ;;  %s7827_s3 = smov 117  }
0x103f   :  { %v2804_v51 = vpop.xlane.xlu0 %2803  ;;  %v2817_v21 = vmul.f32 %v2813_v62, %v2813_v62 }
0x1040   :  { %v2810_v19 = vmul.f32 0.03125, %v2804_v51  ;;  %v2816_v10 = vmul.f32 %v2812_v35, %v2812_v35 }
0x1041   :  { %v2823_v59 = vsel %vm7813_vm6, %v2817_v21, 0.0  ;;  %vm7816_vm6 = vmmov %vm7810_vm0 }
0x1042   :  { %v2814_v17 = vsub.f32 %v2788_v3, %v2810_v19  ;;  %2824 = vadd.xlane.f32.xlu0 %v2823_v59  ;;  %v2820_v24 = vsel %vm7814_vm2, %v2816_v10, 0.0  ;;  %v2883_v23 = vpop.permute.xlu1 %2882  ;;  %vm7817_vm2 = vcmask 7168  }
0x1043   :  { %2821 = vadd.xlane.f32.xlu1 %v2820_v24  ;;  %v2807_v26 = vpop.xlane.xlu0 %2806 }
0x1044   :  { %v2811_v37 = vmul.f32 0.03125, %v2807_v26  ;;  %v2818_v29 = vmul.f32 %v2814_v17, %v2814_v17 }
0x1046   :  { %v2815_v27 = vsub.f32 %v2793_v12, %v2811_v37  ;;  %v2826_v6 = vsel %vm7810_vm0, %v2818_v29, 0.0  ;;  %v2888_v49 = vpop.permute.xlu1 %2887  ;;  %vm7818_vm0 = vmmov %vm7817_vm2 }
0x1047   :  { %2827 = vadd.xlane.f32.xlu1 %v2826_v6 }
0x1048   :  { %v2819_v46 = vmul.f32 %v2815_v27, %v2815_v27 }
0x104a   :  { %v2829_v44 = vsel %vm7815_vm8, %v2819_v46, 0.0  ;;  %v2870_v15 = vpop.permute.xlu1 %2869  ;;  %vm7819_vm8 = vcmask 269312  }
0x104b   :  { %2830 = vadd.xlane.f32.xlu0 %v2829_v44  ;;  %v2860_v48 = vpop.permute.xlu0 %2859  ;;  %vm7820_vm12 = vmmov %vm7819_vm8 }
0x104f   :  { %v2865_v63 = vpop.permute.xlu0 %2864 }
0x1058   :  { %2897 = vperm.xlu1 %5543, %v2879_v55  }
0x1061   :  { %2892 = vperm.xlu0 %5542, %v2878_v14  }
0x10cf   :  { %v2825_v13 = vpop.xlane.xlu0 %2824 }
0x10d0   :  { %v2833_v30 = vmul.f32 0.03125, %v2825_v13  ;;  %v2822_v12 = vpop.xlane.xlu1 %2821 }
0x10d1   :  { %v2832_v3 = vmul.f32 0.03125, %v2822_v12 }
0x10d2   :  { %v2837_v45 = vadd.f32 1e-05, %v2833_v30 }
0x10d3   :  { %v2836_v61 = vadd.f32 1e-05, %v2832_v3 }
0x10d4   :  { %5651 = vrsqrt.f32 %v2837_v45  ;;  %v2828_v18 = vpop.xlane.xlu1 %2827 }
0x10d5   :  { %5653 = vrsqrt.f32 %v2836_v61  ;;  %v2834_v22 = vmul.f32 0.03125, %v2828_v18 }
0x10d7   :  { %v2838_v7 = vadd.f32 1e-05, %v2834_v22 }
0x10d8   :  { %v2831_v4 = vpop.xlane.xlu0 %2830 }
0x10d9   :  { %5655 = vrsqrt.f32 %v2838_v7  ;;  %v2835_v8 = vmul.f32 0.03125, %v2831_v4 }
0x10db   :  { %v2839_v11 = vadd.f32 1e-05, %v2835_v8 }
0x10dd   :  { %5657 = vrsqrt.f32 %v2839_v11 }
0x10de   :  { %v5652_v34 = vpop.eup %5651 }
0x10df   :  { %v5654_v2 = vpop.eup %5653  ;;  %v2845_v25 = vmul.f32 %v5652_v34, %v2813_v62  ;;  %v2898_v62 = vpop.permute.xlu1 %2897 }
0x10e0   :  { %v2844_v54 = vmul.f32 %v5654_v2, %v2812_v35  ;;  %v2893_v14 = vpop.permute.xlu0 %2892 }
0x10e1   :  { %v2873_v51 = vmul.f32 %v2860_v48, %v2845_v25 }
0x10e2   :  { %v2872_v21 = vmul.f32 %v2855_v5, %v2844_v54 }
0x10e3   :  { %v5656_v19 = vpop.eup %5655  ;;  %v2901_v10 = vadd.f32 %v2888_v49, %v2873_v51 }
0x10e4   :  { %v2846_v59 = vmul.f32 %v5656_v19, %v2814_v17  ;;  %v2900_v24 = vadd.f32 %v2883_v23, %v2872_v21  ;;  %v2908_v23 = vld [vmem:[%s4205_s6] sm:$0xff]  ;;  %s7835_s6 = smov 97  }
0x10e5   :  { %v2905_v26 = vmax.f32 %v2901_v10, 0.0 }
0x10e6   :  { %v2874_v37 = vmul.f32 %v2865_v63, %v2846_v59  ;;  %v2904_v29 = vmax.f32 %v2900_v24, 0.0 }
0x10e7   :  { %v5658_v6 = vpop.eup %5657 }
0x10e8   :  { %v2847_v46 = vmul.f32 %v5658_v6, %v2815_v27  ;;  %v5589_v44 = vpack.i.bf16 %v2905_v26, %v2904_v29  ;;  %v5330_v55 = vpack.c.bf16 %v2905_v26, %v2904_v29  ;;  %v2902_v30 = vadd.f32 %v2893_v14, %v2874_v37 }
0x10ea   :  { %v2875_v13 = vmul.f32 %v2870_v15, %v2847_v46  ;;  %5590 = vrot.lane.b32.xlu1 %v5589_v44, %s7770_s1  ;;  %5331 = vmatpush3.bf16.msra.mxu1 %v5330_v55  ;;  %v2906_v5 = vmax.f32 %v2902_v30, 0.0 }
0x10eb   :  { %5332 = vmatprep.subr.bf16.mxu1 %v5724_v41 }
0x10ec   :  { %v2903_v35 = vadd.f32 %v2898_v62, %v2875_v13 }
0x10ee   :  { %v2907_v17 = vmax.f32 %v2903_v35, 0.0 }
0x10f0   :  { %v5333_v27 = vpack.c.bf16 %v2907_v17, %v2906_v5  ;;  %3119 = vrot.lane.b32.xlu1 %v2907_v17, %s7770_s1 }
0x10f2   :  { %5334 = vmatpush3.bf16.msra.mxu1 %v5333_v27 }
0x10f5   :  { %4980 = vmatmul.mubr.msk.f32.vlgmr.msra.gmra.mrb[30].mxu1 %vm7816_vm6, %v2908_v23  ;;  %vm7821_vm6 = vcmask 154624  }
0x115c   :  { %v5591_v48 = vpop.permute.xlu1 %5590 }
0x115d   :  { %v5593_v49 = vunpack.i.h.bf16 %v5591_v48  ;;  %v5592_v63 = vunpack.i.l.bf16 %v5591_v48 }
0x115f   :  { %v3126_v15 = vsel %vm7817_vm2, -inf, %v5593_v49  ;;  %v3125_v12 = vsel %vm7818_vm0, -inf, %v5592_v63  ;;  %vm7822_vm2 = vcmask 416768  }
0x1160   :  { %v6979_v3 = vsel %vm7819_vm8, %v3126_v15, -inf  ;;  %v6982_v45 = vsel %vm7820_vm12, %v3125_v12, -inf  ;;  %vm7833_vm12 = vmmov %vm7818_vm0 }
0x1161   :  { %v5594_v61 = vpack.i.bf16 %v6979_v3, %v6982_v45  ;;  %vm7836_vm0 = vmmov %vm7819_vm8 }
0x1162   :  { %v3120_v25 = vpop.permute.xlu1 %3119  ;;  %vm7837_vm8 = vmmov %vm7833_vm12 }
0x1163   :  { %5595 = vrot.lane.b32.xlu1 %v5594_v61, %s7738_s28  ;;  %v3128_v51 = vsel %vm7837_vm8, -inf, %v3120_v25  ;;  %vm7843_vm8 = vnez %v7664_v58 }
0x11c8   :  { %v2978_v18 = vpop.f32.mrb[30].mxu1 }
0x11c9   :  { %2983 = vrot.lane.b32.xlu0 %v2978_v18, %s7776_s27  ;;  %v4981_v22 = vpop.f32.mrb[31].mxu1 }
0x11cd   :  { %3117 = vrot.lane.b32.xlu0 %v2906_v5, %s7770_s1 }
0x11d1   :  { %3141 = vrot.lane.b32.xlu0 %v6982_v45, %s7736_s29 }
0x11d5   :  { %v7050_v59 = vpop.permute.xlu1 %5595 }
0x123b   :  { %v2984_v7 = vpop.permute.xlu0 %2983 }
0x123c   :  { %v2986_v4 = vsel %vm7821_vm6, 0.0, %v2984_v7  ;;  %vm7839_vm6 = vmmov %vm7836_vm0 }
0x123d   :  { %v2987_v8 = vsel %vm7822_vm2, %v2986_v4, 0.0  ;;  %v7042_v10 = vsel %vm7839_vm6, %v3128_v51, -inf  ;;  %vm7840_vm2 = vcmask 719872   ;;  %vm7844_vm6 = vnez %v7656_v47 }
0x123e   :  { %3041 = vrot.lane.b32.xlu1 %v2987_v8, %s7720_s19  ;;  %3037 = vrot.lane.b32.xlu0 %v2987_v8, %s7779_s5 }
0x123f   :  { %v3118_v34 = vpop.permute.xlu0 %3117 }
0x1240   :  { %v3127_v2 = vsel %vm7833_vm12, -inf, %v3118_v34  ;;  %vm7841_vm12 = vnez %v7639_v1 }
0x1241   :  { %v7032_v54 = vsel %vm7836_vm0, %v3127_v2, -inf  ;;  %vm7842_vm0 = vnez %v7648_v16 }
0x1242   :  { %3177 = vrot.lane.b32.xlu1 %v2987_v8, %s7722_s24  ;;  %3045 = vrot.lane.b32.xlu0 %v2987_v8, %s7780_s18  ;;  %v5599_v21 = vpack.i.bf16 %v7032_v54, %v6979_v3 }
0x1243   :  { %v3142_v24 = vpop.permute.xlu0 %3141 }
0x1246   :  { %3053 = vrot.lane.b32.xlu1 %v2987_v8, %s7724_s15  ;;  %3049 = vrot.lane.b32.xlu0 %v2987_v8, %s7781_s8 }
0x124a   :  { %2993 = vrot.lane.b32.xlu1 %v2987_v8, %s7726_s17  ;;  %2989 = vrot.lane.b32.xlu0 %v2987_v8, %s7721_s20 }
0x124e   :  { %3061 = vrot.lane.b32.xlu1 %v2987_v8, %s7728_s12  ;;  %3057 = vrot.lane.b32.xlu0 %v2987_v8, %s7723_s7 }
0x1252   :  { %3001 = vrot.lane.b32.xlu1 %v2987_v8, %s7729_s14  ;;  %2997 = vrot.lane.b32.xlu0 %v2987_v8, %s7725_s16 }
0x1256   :  { %3069 = vrot.lane.b32.xlu1 %v2987_v8, %s7731_s10  ;;  %3065 = vrot.lane.b32.xlu0 %v2987_v8, %s7782_s21  ;;  %s7019_s21 = sld [smem:[%s7449_s0 + %s7776_s27]]  }
0x125a   :  { %3009 = vrot.lane.b32.xlu1 %v2987_v8, %s7823_s11  ;;  %3005 = vrot.lane.b32.xlu0 %v2987_v8, %s7824_s22 }
0x125c   :  { %v3181_v11 = vld [vmem:[%s7019_s21 + $0x8] sm:$0xff]  ;;  %v3182_v19 = vld [vmem:[%s7019_s21 + $0x10] sm:$0xff] }
0x125d   :  { %3268 = vmatprep.mubr.f32.mxu0 %v3181_v11  ;;  %5004 = vmatprep.mubr.msk.f32.mxu1 %vm7840_vm2, %v3182_v19  ;;  %vm7845_vm2 = vnez %v7650_v28 }
0x125e   :  { %3077 = vrot.lane.b32.xlu1 %v2987_v8, %s7825_s25  ;;  %3073 = vrot.lane.b32.xlu0 %v2987_v8, %s7676_s30  ;;  %s7829_s25 = smov 100  }
0x1262   :  { %3101 = vrot.lane.b32.xlu1 %v2987_v8, %s7826_s23  ;;  %3097 = vrot.lane.b32.xlu0 %v2987_v8, %s7784_s13  ;;  %s7830_s23 = smov 94  }
0x1266   :  { %3017 = vrot.lane.b32.xlu1 %v2987_v8, %s7827_s3  ;;  %3013 = vrot.lane.b32.xlu0 %v2987_v8, %s7828_s9  ;;  %s7831_s3 = smov 98   ;;  %s7832_s9 = smov 115  }
0x126a   :  { %3085 = vrot.lane.b32.xlu1 %v2987_v8, %s7681_s4  ;;  %3081 = vrot.lane.b32.xlu0 %v2987_v8, %s7829_s25 }
0x126e   :  { %3021 = vrot.lane.b32.xlu1 %v2987_v8, %s7785_s2  ;;  %3105 = vrot.lane.b32.xlu0 %v2987_v8, %s7830_s23  ;;  %s7838_s23 = smov 114   ;;  %s5746_s2 = smov 22  }
0x1272   :  { %3089 = vrot.lane.b32.xlu1 %v2987_v8, %s7831_s3  ;;  %3025 = vrot.lane.b32.xlu0 %v2987_v8, %s7832_s9  ;;  %s5745_s9 = smov 21   ;;  %s4209_s3 = sld [smem:[%s7449_s0 + %s5746_s2]]  }
0x1273   :  { %s7142_s25 = sld [smem:[%s7449_s0 + %s5745_s9]]  }
0x1276   :  { %3033 = vrot.lane.b32.xlu1 %v2987_v8, %s7834_s26  ;;  %3093 = vrot.lane.b32.xlu0 %v2987_v8, %s7835_s6 }
0x127a   :  { %3029 = vrot.lane.b32.xlu0 %v2987_v8, %s7838_s23  ;;  %3161 = vrot.lane.b32.xlu1 %v7032_v54, %s7738_s28 }
0x127e   :  { %5600 = vrot.lane.b32.xlu0 %v5599_v21, %s7736_s29  ;;  %3163 = vrot.lane.b32.xlu1 %v7042_v10, %s7738_s28 }
0x1282   :  { %3147 = vrot.lane.b32.xlu0 %v7042_v10, %s7736_s29 }
0x12b0   :  { %v3042_v26 = vpop.permute.xlu1 %3041  ;;  %v3038_v37 = vpop.permute.xlu0 %3037 }
0x12b1   :  { %v5335_v29 = vpack.c.bf16 %v3042_v26, %v3038_v37  ;;  %v5597_v37 = vunpack.i.l.bf16 %v7050_v59 }
0x12b3   :  { %5337 = vmatprep.subr.msk.bf16.mxu0 %vm5895_vm7, %v5335_v29 }
0x12b4   :  { %v3178_v6 = vpop.permute.xlu1 %3177  ;;  %v3046_v46 = vpop.permute.xlu0 %3045  ;;  %5338 = vmatpush3.bf16.msra.mxu0 %v5724_v41 }
0x12b5   :  { %v5339_v44 = vpack.c.bf16 %v3178_v6, %v3046_v46  ;;  %v3133_v6 = vsel %vm7800_vm11, %v6982_v45, -inf  ;;  %v3153_v46 = vsel %vm7843_vm8, %v3142_v24, -inf }
0x12b7   :  { %5341 = vmatprep.subr.msk.bf16.mxu0 %vm5922_vm14, %v5339_v44 }
0x12b8   :  { %v3054_v55 = vpop.permute.xlu1 %3053  ;;  %v3050_v14 = vpop.permute.xlu0 %3049  ;;  %5342 = vmatpush3.bf16.msra.mxu0 %v5724_v41 }
0x12b9   :  { %v5343_v13 = vpack.c.bf16 %v3054_v55, %v3050_v14  ;;  %v3169_v14 = vmax.f32 %v3133_v6, %v5597_v37  ;;  %v3186_v6 = vld [vmem:[%s7019_s21 + $0x30] sm:$0xff] }
0x12bb   :  { %5345 = vmatprep.subr.msk.bf16.mxu0 %vm7693_vm4, %v5343_v13 }
0x12bc   :  { %v2994_v30 = vpop.permute.xlu1 %2993  ;;  %v2990_v62 = vpop.permute.xlu0 %2989 }
0x12bd   :  { %v5346_v35 = vpack.c.bf16 %v2994_v30, %v2990_v62  ;;  %v3173_v30 = vmax.f32 %v3169_v14, %v3153_v46  ;;  %v3189_v14 = vld [vmem:[%s7019_s21 + $0x48] sm:$0xff] }
0x12bf   :  { %5348 = vmatpush3.bf16.msk.msra.mxu0 %vm7739_vm15, %v5346_v35  ;;  %v5393_v45 = vpack.c.bf16 %v3173_v30, %v5684_v0 }
0x12c0   :  { %v3062_v17 = vpop.permute.xlu1 %3061  ;;  %v3058_v5 = vpop.permute.xlu0 %3057 }
0x12c1   :  { %v5349_v27 = vpack.c.bf16 %v3062_v17, %v3058_v5 }
0x12c3   :  { %5351 = vmatprep.subr.msk.bf16.mxu0 %vm7740_vm3, %v5349_v27 }
0x12c4   :  { %v3002_v23 = vpop.permute.xlu1 %3001  ;;  %v2998_v48 = vpop.permute.xlu0 %2997 }
0x12c5   :  { %v5352_v49 = vpack.c.bf16 %v3002_v23, %v2998_v48 }
0x12c7   :  { %5354 = vmatpush3.bf16.msk.msra.mxu0 %vm7696_vm13, %v5352_v49 }
0x12c8   :  { %v3070_v63 = vpop.permute.xlu1 %3069  ;;  %v3066_v15 = vpop.permute.xlu0 %3065 }
0x12c9   :  { %v5355_v12 = vpack.c.bf16 %v3070_v63, %v3066_v15  ;;  %v5598_v63 = vunpack.i.h.bf16 %v7050_v59  ;;  %v3180_v15 = vld [vmem:[%s7019_s21] sm:$0xff] }
0x12cb   :  { %5357 = vmatprep.subr.msk.bf16.mxu0 %vm7697_vm9, %v5355_v12 }
0x12cc   :  { %v3010_v61 = vpop.permute.xlu1 %3009  ;;  %v3006_v18 = vpop.permute.xlu0 %3005 }
0x12cd   :  { %v5358_v22 = vpack.c.bf16 %v3010_v61, %v3006_v18  ;;  %v3184_v61 = vld [vmem:[%s7019_s21 + $0x20] sm:$0xff]  ;;  %v3134_v18 = vsel %vm7800_vm11, %v6979_v3, -inf  ;;  %v3183_v3 = vld [vmem:[%s7019_s21 + $0x18] sm:$0xff] }
0x12cf   :  { %5360 = vmatpush3.bf16.msk.msra.mxu0 %vm7741_vm5, %v5358_v22  ;;  %v3135_v22 = vsel %vm7800_vm11, %v7032_v54, -inf  ;;  %v3187_v54 = vld [vmem:[%s7019_s21 + $0x38] sm:$0xff] }
0x12d0   :  { %v3078_v7 = vpop.permute.xlu1 %3077  ;;  %v3074_v4 = vpop.permute.xlu0 %3073 }
0x12d1   :  { %v5361_v8 = vpack.c.bf16 %v3078_v7, %v3074_v4 }
0x12d3   :  { %5363 = vmatprep.subr.msk.bf16.mxu0 %vm7699_vm10, %v5361_v8  ;;  %v3170_v8 = vmax.f32 %v3134_v18, %v5598_v63 }
0x12d4   :  { %v3102_v11 = vpop.permute.xlu1 %3101  ;;  %v3098_v34 = vpop.permute.xlu0 %3097 }
0x12d5   :  { %v5379_v2 = vpack.c.bf16 %v3102_v11, %v3098_v34 }
0x12d7   :  { %5381 = vmatprep.subr.msk.bf16.mxu1 %vm7797_vm1, %v5379_v2 }
0x12d8   :  { %v3018_v25 = vpop.permute.xlu1 %3017  ;;  %5384 = vmatpush3.bf16.msk.msra.mxu1 %vm7797_vm1, %v5379_v2  ;;  %v3014_v51 = vpop.permute.xlu0 %3013 }
0x12d9   :  { %v5364_v21 = vpack.c.bf16 %v3018_v25, %v3014_v51 }
0x12db   :  { %5366 = vmatpush3.bf16.msk.msra.mxu0 %vm7841_vm12, %v5364_v21 }
0x12dc   :  { %v3086_v19 = vpop.permute.xlu1 %3085  ;;  %v3082_v26 = vpop.permute.xlu0 %3081 }
0x12dd   :  { %v5367_v29 = vpack.c.bf16 %v3086_v19, %v3082_v26  ;;  %v3136_v19 = vsel %vm7800_vm11, %v7042_v10, -inf  ;;  %v3188_v10 = vld [vmem:[%s7019_s21 + $0x40] sm:$0xff] }
0x12df   :  { %5369 = vmatprep.subr.msk.bf16.mxu0 %vm7842_vm0, %v5367_v29  ;;  %vm7846_vm0 = vnez %v7658_v50 }
0x12e0   :  { %v3022_v44 = vpop.permute.xlu1 %3021  ;;  %v3106_v55 = vpop.permute.xlu0 %3105 }
0x12e1   :  { %v5385_v13 = vpack.c.bf16 %v5684_v0, %v3106_v55  ;;  %v3185_v55 = vld [vmem:[%s7019_s21 + $0x28] sm:$0xff] }
0x12e3   :  { %5387 = vmatprep.subr.msk.bf16.mxu1 %vm7844_vm6, %v5385_v13 }
0x12e4   :  { %v3090_v62 = vpop.permute.xlu1 %3089  ;;  %5390 = vmatpush3.bf16.msk.msra.mxu1 %vm7844_vm6, %v5385_v13  ;;  %v3026_v35 = vpop.permute.xlu0 %3025  ;;  %v3191_v13 = vld [vmem:[%s7019_s21 + $0x58] sm:$0xff] }
0x12e5   :  { %v5370_v17 = vpack.c.bf16 %v3026_v35, %v3022_v44  ;;  %5391 = vmatprep.subr.bf16.mxu1 %v5724_v41  ;;  %v3190_v44 = vld [vmem:[%s7019_s21 + $0x50] sm:$0xff]  ;;  %s5744_s21 = smov 20  }
0x12e6   :  { %s4207_s26 = sld [smem:[%s7449_s0 + %s5744_s21]]   ;;  %s5750_s21 = smov 29  }
0x12e7   :  { %5372 = vmatpush3.bf16.msk.msra.mxu0 %vm7845_vm2, %v5370_v17  ;;  %vm7847_vm2 = vnez %v7660_v56  ;;  %s4216_s23 = sld [smem:[%s7449_s0 + %s5750_s21]]  }
0x12e8   :  { %v3034_v24 = vpop.permute.xlu1 %3033  ;;  %5392 = vmatpush3.bf16.msra.mxu1 %v5724_v41  ;;  %v3094_v5 = vpop.permute.xlu0 %3093 }
0x12e9   :  { %v5373_v27 = vpack.c.bf16 %v3094_v5, %v3090_v62  ;;  %5394 = vmatprep.subr.bf16.mxu1 %v5393_v45 }
0x12eb   :  { %5375 = vmatprep.subr.msk.bf16.mxu0 %vm7846_vm0, %v5373_v27 }
0x12ec   :  { %5396 = vmatpush3.bf16.msra.mxu1 %v5393_v45  ;;  %v3030_v23 = vpop.permute.xlu0 %3029  ;;  %v3162_v48 = vpop.permute.xlu1 %3161 }
0x12ed   :  { %v5376_v49 = vpack.c.bf16 %v3034_v24, %v3030_v23  ;;  %v3171_v59 = vmax.f32 %v3135_v22, %v3162_v48 }
0x12ef   :  { %5378 = vmatpush3.bf16.msk.msra.mxu0 %vm7847_vm2, %v5376_v49  ;;  %vm7848_vm2 = vcmask 719872  }
0x12f0   :  { %v5601_v12 = vpop.permute.xlu0 %5600  ;;  %v3164_v11 = vpop.permute.xlu1 %3163  ;;  %vm7849_vm0 = vmmov %vm7848_vm2 }
0x12f1   :  { %v5603_v7 = vunpack.i.h.bf16 %v5601_v12  ;;  %v5602_v4 = vunpack.i.l.bf16 %v5601_v12  ;;  %v3172_v37 = vmax.f32 %v3136_v19, %v3164_v11  ;;  %vm7850_vm6 = vmmov %vm7849_vm0  ;;  %v3429_v19 = vld [vmem:[%s4207_s26 + $0x18] sm:$0xff] }
0x12f2   :  { %3269 = vmatmul.mubr.f32.vlgmr.msra.gmra.mrb[30].mxu0 %v3180_v15 }
0x12f3   :  { %v3155_v34 = vsel %vm7843_vm8, %v5603_v7, -inf  ;;  %v3154_v2 = vsel %vm7843_vm8, %v5602_v4, -inf  ;;  %3273 = vmatprep.mubr.f32.mxu0 %v3184_v61 }
0x12f4   :  { %v3175_v25 = vmax.f32 %v3171_v59, %v3155_v34  ;;  %v3174_v51 = vmax.f32 %v3170_v8, %v3154_v2  ;;  %v3148_v21 = vpop.permute.xlu0 %3147 }
0x12f5   :  { %v3156_v26 = vsel %vm7843_vm8, %v3148_v21, -inf  ;;  %vm7851_vm8 = vmmov 0   ;;  %v3428_v21 = vld [vmem:[%s4207_s26 + $0x10] sm:$0xff] }
0x12f6   :  { %3274 = vmatmul.mubr.f32.gmra.mrb[32].mxu0 %v3183_v3  ;;  %v5397_v29 = vpack.c.bf16 %v3175_v25, %v3174_v51  ;;  %v3176_v46 = vmax.f32 %v3172_v37, %v3156_v26  ;;  %v3427_v3 = vld [vmem:[%s4207_s26 + $0x8] sm:$0xff]  ;;  %v3454_v25 = vld [vmem:[%s7142_s25] sm:$0xff] }
0x12f7   :  { %3278 = vmatprep.mubr.f32.mxu0 %v3187_v54  ;;  %v3426_v51 = vld [vmem:[%s4207_s26] sm:$0xff]  ;;  %v3455_v54 = vld [vmem:[%s7142_s25 + $0x8] sm:$0xff] }
0x12f8   :  { %5398 = vmatprep.subr.bf16.mxu1 %v5397_v29 }
0x12f9   :  { %5400 = vmatpush3.bf16.msra.mxu1 %v5397_v29 }
0x12fa   :  { %5002 = vmatprep.subr.mxu1 %v3176_v46  ;;  %3279 = vmatmul.mubr.f32.gmra.mrb[34].mxu0 %v3186_v6 }
0x12fb   :  { %3283 = vmatprep.mubr.f32.mxu0 %v3190_v44 }
0x12fd   :  { %5003 = vmatpush3.msra.mxu1 %v3176_v46 }
0x12fe   :  { %5005 = vmatmul.mubr.msk.f32.vlgmr.msra.gmra.mrb[32].mxu1 %vm7848_vm2, %v3185_v55  ;;  %3284 = vmatmul.mubr.f32.gmra.mrb[36].mxu0 %v3189_v14 }
0x12ff   :  { %5007 = vmatprep.mubr.msk.f32.mxu1 %vm7849_vm0, %v3188_v10  ;;  %5401 = vmatprep.subr.bf16.mxu1 %v5724_v41  ;;  %vm7852_vm0 = vcmask 261120  }
0x1300   :  { %vm7855_vm2 = vmmov %vm7852_vm0 }
0x1302   :  { %5008 = vmatmul.mubr.msk.f32.gmra.mrb[34].mxu1 %vm7850_vm6, %v3191_v13  ;;  %vm7854_vm6 = vmmov %vm7852_vm0 }
0x1303   :  { %5018 = vmatprep.mubr.msk.f32.mxu1 %vm7851_vm8, %v5684_v0  ;;  %vm7853_vm8 = vmmov %vm7852_vm0 }
0x13c5   :  { %v4728_v30 = vpop.f32.mrb[30].mxu0 }
0x13c6   :  { %v4729_v62 = vpop.f32.mrb[31].mxu0 }
0x13c7   :  { %v4730_v35 = vadd.f32 %v4729_v62, %v4728_v30 }
0x13c9   :  { %v4731_v17 = vpop.f32.mrb[32].mxu0 }
0x13ca   :  { %v4732_v45 = vpop.f32.mrb[33].mxu0 }
0x13cb   :  { %v4733_v24 = vadd.f32 %v4732_v45, %v4731_v17 }
0x13cd   :  { %v4734_v5 = vpop.f32.mrb[34].mxu0 }
0x13ce   :  { %v4735_v27 = vpop.f32.mrb[35].mxu0 }
0x13cf   :  { %v4736_v23 = vadd.f32 %v4735_v27, %v4734_v5 }
0x13d1   :  { %v5006_v48 = vpop.f32.mrb[32].mxu1  ;;  %v4737_v49 = vpop.f32.mrb[36].mxu0 }
0x13d2   :  { %v3361_v63 = vadd.f32 %v5006_v48, %v4733_v24  ;;  %v3355_v15 = vpop.f32.mrb[33].mxu1  ;;  %v4738_v12 = vpop.f32.mrb[37].mxu0 }
0x13d3   :  { %v3356_v61 = vadd.f32 %v4730_v35, %v3355_v15  ;;  %v4739_v18 = vadd.f32 %v4738_v12, %v4737_v49  ;;  %v3456_v49 = vld [vmem:[%s7142_s25 + $0x10] sm:$0xff] }
0x13d4   :  { %v3377_v22 = vsel %vm7852_vm0, %v3361_v63, 0.0 }
0x13d5   :  { %3378 = vadd.xlane.f32.xlu0 %v3377_v22  ;;  %v5009_v7 = vpop.f32.mrb[34].mxu1  ;;  %v3374_v4 = vsel %vm7853_vm8, %v3356_v61, 0.0  ;;  %vm7856_vm8 = vmmov %vm7852_vm0 }
0x13d6   :  { %v3371_v8 = vadd.f32 %v5009_v7, %v4739_v18  ;;  %v3365_v59 = vpop.f32.mrb[35].mxu1  ;;  %3375 = vadd.xlane.f32.xlu1 %v3374_v4 }
0x13d7   :  { %v3366_v11 = vadd.f32 %v4736_v23, %v3365_v59 }
0x13d8   :  { %v3383_v34 = vsel %vm7854_vm6, %v3371_v8, 0.0  ;;  %vm7857_vm6 = vmmov %vm7852_vm0 }
0x13d9   :  { %v3380_v2 = vsel %vm7855_vm2, %v3366_v11, 0.0  ;;  %vm7858_vm2 = vmmov %vm7852_vm0 }
0x13da   :  { %3381 = vadd.xlane.f32.xlu0 %v3380_v2  ;;  %3384 = vadd.xlane.f32.xlu1 %v3383_v34 }
0x13eb   :  { %3437 = vperm.xlu1 %5543, %v3427_v3  }
0x13ef   :  { %3460 = vperm.xlu1 %5543, %v3454_v25  }
0x13f0   :  { %3432 = vperm.xlu0 %5542, %v3426_v51  }
0x13f3   :  { %3442 = vperm.xlu1 %5543, %v3428_v21  }
0x13f4   :  { %3465 = vperm.xlu0 %5542, %v3455_v54  }
0x13f8   :  { %3447 = vperm.xlu0 %5542, %v3429_v19  }
0x1462   :  { %v3379_v26 = vpop.xlane.xlu0 %3378 }
0x1463   :  { %v3387_v37 = vmul.f32 0.03125, %v3379_v26  ;;  %v3376_v29 = vpop.xlane.xlu1 %3375 }
0x1464   :  { %v3386_v6 = vmul.f32 0.03125, %v3376_v29 }
0x1465   :  { %v3391_v46 = vsub.f32 %v3361_v63, %v3387_v37  ;;  %v3457_v63 = vld [vmem:[%s7142_s25 + $0x18] sm:$0xff] }
0x1466   :  { %v3390_v44 = vsub.f32 %v3356_v61, %v3386_v6 }
0x1467   :  { %v3382_v55 = vpop.xlane.xlu0 %3381  ;;  %v3385_v14 = vpop.xlane.xlu1 %3384  ;;  %v3395_v10 = vmul.f32 %v3391_v46, %v3391_v46 }
0x1468   :  { %v3388_v13 = vmul.f32 0.03125, %v3382_v55  ;;  %v3389_v30 = vmul.f32 0.03125, %v3385_v14  ;;  %v3394_v62 = vmul.f32 %v3390_v44, %v3390_v44 }
0x1469   :  { %v3401_v35 = vsel %vm7852_vm0, %v3395_v10, 0.0 }
0x146a   :  { %v3392_v17 = vsub.f32 %v3366_v11, %v3388_v13  ;;  %v3393_v45 = vsub.f32 %v3371_v8, %v3389_v30  ;;  %3402 = vadd.xlane.f32.xlu1 %v3401_v35  ;;  %v3398_v24 = vsel %vm7856_vm8, %v3394_v62, 0.0  ;;  %vm7859_vm8 = vcmask 7168  }
0x146b   :  { %3399 = vadd.xlane.f32.xlu0 %v3398_v24  ;;  %v3438_v15 = vpop.permute.xlu1 %3437 }
0x146c   :  { %v3396_v5 = vmul.f32 %v3392_v17, %v3392_v17  ;;  %v3397_v27 = vmul.f32 %v3393_v45, %v3393_v45 }
0x146e   :  { %v3404_v23 = vsel %vm7857_vm6, %v3396_v5, 0.0  ;;  %v3407_v48 = vsel %vm7858_vm2, %v3397_v27, 0.0  ;;  %vm7860_vm6 = vmmov %vm7859_vm8  ;;  %vm7861_vm2 = vcmask 269312  }
0x146f   :  { %3405 = vadd.xlane.f32.xlu0 %v3404_v23  ;;  %3408 = vadd.xlane.f32.xlu1 %v3407_v48  ;;  %v3433_v12 = vpop.permute.xlu0 %3432  ;;  %v3461_v61 = vpop.permute.xlu1 %3460  ;;  %vm7862_vm11 = vmmov %vm7861_vm2 }
0x1473   :  { %v3466_v18 = vpop.permute.xlu0 %3465  ;;  %v3443_v22 = vpop.permute.xlu1 %3442 }
0x1477   :  { %v3448_v7 = vpop.permute.xlu0 %3447 }
0x1480   :  { %3470 = vperm.xlu1 %5543, %v3456_v49  }
0x1485   :  { %3475 = vperm.xlu0 %5542, %v3457_v63  }
0x14f7   :  { %v3403_v4 = vpop.xlane.xlu1 %3402 }
0x14f8   :  { %v3411_v8 = vmul.f32 0.03125, %v3403_v4  ;;  %v3400_v59 = vpop.xlane.xlu0 %3399 }
0x14f9   :  { %v3410_v11 = vmul.f32 0.03125, %v3400_v59 }
0x14fa   :  { %v3415_v34 = vadd.f32 1e-05, %v3411_v8 }
0x14fb   :  { %v3414_v2 = vadd.f32 1e-05, %v3410_v11 }
0x14fc   :  { %5659 = vrsqrt.f32 %v3415_v34  ;;  %v3406_v3 = vpop.xlane.xlu0 %3405  ;;  %v3409_v25 = vpop.xlane.xlu1 %3408 }
0x14fd   :  { %5661 = vrsqrt.f32 %v3414_v2  ;;  %v3412_v51 = vmul.f32 0.03125, %v3406_v3  ;;  %v3413_v21 = vmul.f32 0.03125, %v3409_v25 }
0x14ff   :  { %v3416_v54 = vadd.f32 1e-05, %v3412_v51  ;;  %v3417_v19 = vadd.f32 1e-05, %v3413_v21 }
0x1500   :  { %v3471_v48 = vpop.permute.xlu1 %3470 }
0x1501   :  { %5663 = vrsqrt.f32 %v3416_v54 }
0x1502   :  { %5665 = vrsqrt.f32 %v3417_v19 }
0x1506   :  { %v5660_v26 = vpop.eup %5659 }
0x1507   :  { %v5662_v37 = vpop.eup %5661  ;;  %v3423_v29 = vmul.f32 %v5660_v26, %v3391_v46 }
0x1508   :  { %v3422_v6 = vmul.f32 %v5662_v37, %v3390_v44  ;;  %v3476_v44 = vpop.permute.xlu0 %3475 }
0x1509   :  { %v3451_v55 = vmul.f32 %v3438_v15, %v3423_v29 }
0x150a   :  { %v3450_v14 = vmul.f32 %v3433_v12, %v3422_v6 }
0x150b   :  { %v5664_v10 = vpop.eup %5663  ;;  %v3479_v13 = vadd.f32 %v3466_v18, %v3451_v55 }
0x150c   :  { %v5666_v30 = vpop.eup %5665  ;;  %v3424_v62 = vmul.f32 %v5664_v10, %v3392_v17  ;;  %v3478_v35 = vadd.f32 %v3461_v61, %v3450_v14  ;;  %v3486_v61 = vld [vmem:[%s4209_s3] sm:$0xff]  ;;  %s5751_s3 = smov 30  }
0x150d   :  { %v3425_v24 = vmul.f32 %v5666_v30, %v3393_v45  ;;  %v3483_v5 = vmax.f32 %v3479_v13, 0.0 }
0x150e   :  { %v3452_v27 = vmul.f32 %v3443_v22, %v3424_v62  ;;  %v3482_v23 = vmax.f32 %v3478_v35, 0.0 }
0x150f   :  { %v3453_v49 = vmul.f32 %v3448_v7, %v3425_v24 }
0x1510   :  { %v3480_v46 = vadd.f32 %v3471_v48, %v3452_v27  ;;  %v5604_v63 = vpack.i.bf16 %v3483_v5, %v3482_v23  ;;  %v5402_v15 = vpack.c.bf16 %v3483_v5, %v3482_v23 }
0x1511   :  { %v3481_v12 = vadd.f32 %v3476_v44, %v3453_v49 }
0x1512   :  { %v3484_v18 = vmax.f32 %v3480_v46, 0.0  ;;  %5605 = vrot.lane.b32.xlu0 %v5604_v63, %s7770_s1  ;;  %5403 = vmatpush3.bf16.msra.mxu1 %v5402_v15 }
0x1513   :  { %v3485_v17 = vmax.f32 %v3481_v12, 0.0  ;;  %5404 = vmatprep.subr.bf16.mxu1 %v5724_v41 }
0x1515   :  { %v5405_v45 = vpack.c.bf16 %v3485_v17, %v3484_v18 }
0x1516   :  { %3697 = vrot.lane.b32.xlu0 %v3485_v17, %s7770_s1 }
0x1517   :  { %5406 = vmatpush3.bf16.msra.mxu1 %v5405_v45 }
0x151a   :  { %5019 = vmatmul.mubr.msk.f32.vlgmr.msra.gmra.mrb[36].mxu1 %vm7852_vm0, %v3486_v61  ;;  %vm7863_vm0 = vcmask 154624  }
0x1584   :  { %v5606_v22 = vpop.permute.xlu0 %5605 }
0x1585   :  { %v5608_v7 = vunpack.i.h.bf16 %v5606_v22  ;;  %v5607_v4 = vunpack.i.l.bf16 %v5606_v22 }
0x1587   :  { %v3704_v8 = vsel %vm7859_vm8, -inf, %v5608_v7  ;;  %v3703_v59 = vsel %vm7860_vm6, -inf, %v5607_v4  ;;  %vm7864_vm8 = vcmask 416768  }
0x1588   :  { %v7162_v11 = vsel %vm7861_vm2, %v3704_v8, -inf  ;;  %v7165_v34 = vsel %vm7862_vm11, %v3703_v59, -inf  ;;  %vm7875_vm11 = vmmov %vm7860_vm6  ;;  %v3698_v29 = vpop.permute.xlu0 %3697 }
0x1589   :  { %v5609_v2 = vpack.i.bf16 %v7162_v11, %v7165_v34  ;;  %vm7878_vm6 = vmmov %vm7861_vm2 }
0x158a   :  { %vm7879_vm2 = vmmov %vm7875_vm11 }
0x158b   :  { %5610 = vrot.lane.b32.xlu0 %v5609_v2, %s7738_s28  ;;  %v3706_v55 = vsel %vm7879_vm2, -inf, %v3698_v29 }
0x15ed   :  { %v3556_v3 = vpop.f32.mrb[36].mxu1 }
0x15ee   :  { %3561 = vrot.lane.b32.xlu1 %v3556_v3, %s7776_s27  ;;  %v5020_v25 = vpop.f32.mrb[37].mxu1  ;;  %s7873_s27 = smov 98  }
0x15f2   :  { %3695 = vrot.lane.b32.xlu1 %v3484_v18, %s7770_s1 }
0x15f6   :  { %3719 = vrot.lane.b32.xlu1 %v7165_v34, %s7736_s29 }
0x15fd   :  { %v7240_v5 = vpop.permute.xlu0 %5610 }
0x15fe   :  { %v5612_v53 = vunpack.i.l.bf16 %v7240_v5 }
0x1660   :  { %v3562_v51 = vpop.permute.xlu1 %3561 }
0x1661   :  { %v3564_v21 = vsel %vm7863_vm0, 0.0, %v3562_v51  ;;  %vm7881_vm0 = vmmov %vm7878_vm6 }
0x1662   :  { %v3565_v54 = vsel %vm7864_vm8, %v3564_v21, 0.0  ;;  %v7224_v13 = vsel %vm7881_vm0, %v3706_v55, -inf  ;;  %vm7882_vm8 = vcmask 719872  }
0x1663   :  { %3619 = vrot.lane.b32.xlu0 %v3565_v54, %s7720_s19  ;;  %3615 = vrot.lane.b32.xlu1 %v3565_v54, %s7779_s5  ;;  %s7865_s19 = smov 104   ;;  %s7874_s5 = smov 115  }
0x1664   :  { %v3696_v19 = vpop.permute.xlu1 %3695 }
0x1665   :  { %v3705_v37 = vsel %vm7875_vm11, -inf, %v3696_v19  ;;  %vm7883_vm11 = vcmask 261120  }
0x1666   :  { %v7214_v6 = vsel %vm7878_vm6, %v3705_v37, -inf  ;;  %v4067_v30 = vsel %vm7883_vm11, %v6773_v43, 0.0  ;;  %vm7884_vm6 = vmmov %vm7883_vm11 }
0x1667   :  { %3755 = vrot.lane.b32.xlu0 %v3565_v54, %s7722_s24  ;;  %3623 = vrot.lane.b32.xlu1 %v3565_v54, %s7780_s18  ;;  %s7866_s24 = smov 101   ;;  %s7877_s18 = smov 97   ;;  %v5614_v14 = vpack.i.bf16 %v7214_v6, %v7162_v11  ;;  %v4073_v62 = vsel %vm7884_vm6, %v6784_v38, 0.0  ;;  %vm7885_vm2 = vmmov %vm7884_vm6 }
0x1668   :  { %v4064_v35 = vsel %vm7885_vm2, %v6771_v36, 0.0  ;;  %vm7886_vm0 = vmmov %vm7885_vm2  ;;  %v7242_v27 = vpop.permute.xlu1 %3719 }
0x1669   :  { %v4070_v24 = vsel %vm7886_vm0, %v6782_v33, 0.0  ;;  %vm7899_vm11 = vmmov %vm7886_vm0 }
0x166a   :  { %vm7900_vm6 = vmmov %vm7886_vm0 }
0x166b   :  { %3631 = vrot.lane.b32.xlu0 %v3565_v54, %s7724_s15  ;;  %3627 = vrot.lane.b32.xlu1 %v3565_v54, %s7781_s8  ;;  %s7872_s15 = smov 94   ;;  %s7880_s8 = smov 114   ;;  %vm7901_vm2 = vmmov %vm7886_vm0 }
0x166f   :  { %3571 = vrot.lane.b32.xlu0 %v3565_v54, %s7726_s17  ;;  %3567 = vrot.lane.b32.xlu1 %v3565_v54, %s7721_s20  ;;  %s7867_s20 = smov 95  }
0x1673   :  { %3639 = vrot.lane.b32.xlu0 %v3565_v54, %s7728_s12  ;;  %3635 = vrot.lane.b32.xlu1 %v3565_v54, %s7723_s7  ;;  %s7868_s12 = smov 117   ;;  %s7871_s7 = smov 116  }
0x1677   :  { %3579 = vrot.lane.b32.xlu0 %v3565_v54, %s7729_s14  ;;  %3575 = vrot.lane.b32.xlu1 %v3565_v54, %s7725_s16  ;;  %s7869_s14 = smov 118   ;;  %s5747_s16 = smov 23  }
0x167b   :  { %3647 = vrot.lane.b32.xlu0 %v3565_v54, %s7731_s10  ;;  %3643 = vrot.lane.b32.xlu1 %v3565_v54, %s7865_s19  ;;  %s7870_s10 = smov 100  }
0x167f   :  { %3587 = vrot.lane.b32.xlu0 %v3565_v54, %s7823_s11  ;;  %3583 = vrot.lane.b32.xlu1 %v3565_v54, %s7824_s22  ;;  %s5749_s22 = smov 25  }
0x1680   :  { %s7262_s6 = sld [smem:[%s7449_s0 + %s5749_s22]]  }
0x1683   :  { %3655 = vrot.lane.b32.xlu0 %v3565_v54, %s7866_s24  ;;  %3651 = vrot.lane.b32.xlu1 %v3565_v54, %s7676_s30  ;;  %s7205_s30 = sld [smem:[%s7449_s0 + %s5747_s16]]  }
0x1686   :  { %v4033_v2 = vld [vmem:[%s7262_s6 + $0x8] sm:$0xff] }
0x1687   :  { %3679 = vrot.lane.b32.xlu0 %v3565_v54, %s7867_s20  ;;  %3675 = vrot.lane.b32.xlu1 %v3565_v54, %s7784_s13  ;;  %s7374_s20 = sld [smem:[%s7449_s0 + %s5751_s3]]  }
0x1689   :  { %v3759_v26 = vld [vmem:[%s7205_s30 + $0x8] sm:$0xff]  ;;  %v3760_v10 = vld [vmem:[%s7205_s30 + $0x10] sm:$0xff] }
0x168a   :  { %3846 = vmatprep.mubr.f32.mxu0 %v3759_v26  ;;  %5043 = vmatprep.mubr.msk.f32.mxu1 %vm7882_vm8, %v3760_v10 }
0x168b   :  { %3595 = vrot.lane.b32.xlu0 %v3565_v54, %s7868_s12  ;;  %3591 = vrot.lane.b32.xlu1 %v3565_v54, %s7869_s14  ;;  %s5752_s12 = smov 31  }
0x168f   :  { %3663 = vrot.lane.b32.xlu0 %v3565_v54, %s7681_s4  ;;  %3659 = vrot.lane.b32.xlu1 %v3565_v54, %s7870_s10  ;;  %s7876_s4 = smov 113  }
0x1693   :  { %3599 = vrot.lane.b32.xlu0 %v3565_v54, %s7871_s7  ;;  %3683 = vrot.lane.b32.xlu1 %v3565_v54, %s7872_s15  ;;  %s7428_s7 = sld [smem:[%s7449_s0 + %s5752_s12]]  }
0x1697   :  { %3667 = vrot.lane.b32.xlu0 %v3565_v54, %s7873_s27  ;;  %3603 = vrot.lane.b32.xlu1 %v3565_v54, %s7874_s5 }
0x169b   :  { %3611 = vrot.lane.b32.xlu0 %v3565_v54, %s7876_s4  ;;  %3671 = vrot.lane.b32.xlu1 %v3565_v54, %s7877_s18 }
0x169f   :  { %3607 = vrot.lane.b32.xlu1 %v3565_v54, %s7880_s8  ;;  %3739 = vrot.lane.b32.xlu0 %v7214_v6, %s7738_s28 }
0x16a3   :  { %5615 = vrot.lane.b32.xlu1 %v5614_v14, %s7736_s29  ;;  %3741 = vrot.lane.b32.xlu0 %v7224_v13, %s7738_s28 }
0x16a7   :  { %3725 = vrot.lane.b32.xlu1 %v7224_v13, %s7736_s29  ;;  %s5748_s29 = smov 24  }
0x16a8   :  { %s7247_s11 = sld [smem:[%s7449_s0 + %s5748_s29]]  }
0x16ae   :  { %v4004_v18 = vld [vmem:[%s7247_s11] sm:$0xff]  ;;  %v4006_v61 = vld [vmem:[%s7247_s11 + $0x10] sm:$0xff]  ;;  %v4007_v4 = vld [vmem:[%s7247_s11 + $0x18] sm:$0xff] }
0x16c2   :  { %4068 = vadd.xlane.f32.xlu0 %v4067_v30 }
0x16c6   :  { %4074 = vadd.xlane.f32.xlu0 %v4073_v62 }
0x16cb   :  { %4065 = vadd.xlane.f32.xlu1 %v4064_v35 }
0x16cf   :  { %4071 = vadd.xlane.f32.xlu1 %v4070_v24 }
0x16d5   :  { %v3620_v23 = vpop.permute.xlu0 %3619  ;;  %v3616_v48 = vpop.permute.xlu1 %3615 }
0x16d6   :  { %v5407_v49 = vpack.c.bf16 %v3620_v23, %v3616_v48 }
0x16d8   :  { %5409 = vmatprep.subr.msk.bf16.mxu0 %vm5895_vm7, %v5407_v49  ;;  %vm7887_vm7 = vnez %v7648_v16 }
0x16d9   :  { %v3756_v46 = vpop.permute.xlu0 %3755  ;;  %v3624_v44 = vpop.permute.xlu1 %3623  ;;  %5410 = vmatpush3.bf16.msra.mxu0 %v5724_v41 }
0x16da   :  { %v5411_v63 = vpack.c.bf16 %v3756_v46, %v3624_v44 }
0x16dc   :  { %5413 = vmatprep.subr.msk.bf16.mxu0 %vm5922_vm14, %v5411_v63  ;;  %vm7888_vm14 = vnez %v7662_v57  ;;  %v3767_v57 = vld [vmem:[%s7205_s30 + $0x48] sm:$0xff] }
0x16dd   :  { %v3632_v15 = vpop.permute.xlu0 %3631  ;;  %v3628_v12 = vpop.permute.xlu1 %3627  ;;  %5414 = vmatpush3.bf16.msra.mxu0 %v5724_v41  ;;  %v3711_v35 = vsel %vm7888_vm14, %v7165_v34, -inf }
0x16de   :  { %v5415_v17 = vpack.c.bf16 %v3632_v15, %v3628_v12  ;;  %v3747_v1 = vmax.f32 %v3711_v35, %v5612_v53 }
0x16e0   :  { %4010 = vperm.xlu1 %5543, %v4004_v18   ;;  %5417 = vmatprep.subr.msk.bf16.mxu0 %vm7693_vm4, %v5415_v17  ;;  %vm7891_vm4 = vnez %v7650_v28  ;;  %v5613_v17 = vunpack.i.h.bf16 %v7240_v5 }
0x16e1   :  { %v3572_v31 = vpop.permute.xlu0 %3571  ;;  %v3568_v45 = vpop.permute.xlu1 %3567 }
0x16e2   :  { %v5418_v42 = vpack.c.bf16 %v3572_v31, %v3568_v45  ;;  %v3762_v31 = vld [vmem:[%s7205_s30 + $0x20] sm:$0xff] }
0x16e4   :  { %4020 = vperm.xlu1 %5543, %v4006_v61   ;;  %5420 = vmatpush3.bf16.msk.msra.mxu0 %vm7739_vm15, %v5418_v42  ;;  %vm7893_vm15 = vnez %v7660_v56 }
0x16e5   :  { %v3640_v22 = vpop.permute.xlu0 %3639  ;;  %v3636_v7 = vpop.permute.xlu1 %3635 }
0x16e6   :  { %v5421_v52 = vpack.c.bf16 %v3640_v22, %v3636_v7 }
0x16e8   :  { %4025 = vperm.xlu1 %5543, %v4007_v4   ;;  %5423 = vmatprep.subr.msk.bf16.mxu0 %vm7740_vm3, %v5421_v52  ;;  %vm7894_vm3 = vmmov %vm7882_vm8 }
0x16e9   :  { %v3580_v8 = vpop.permute.xlu0 %3579  ;;  %v3576_v59 = vpop.permute.xlu1 %3575  ;;  %vm7898_vm8 = vmmov %vm7886_vm0 }
0x16ea   :  { %v5424_v3 = vpack.c.bf16 %v3580_v8, %v3576_v59  ;;  %v3765_v8 = vld [vmem:[%s7205_s30 + $0x38] sm:$0xff]  ;;  %v3714_v59 = vsel %vm7888_vm14, %v7224_v13, -inf  ;;  %v3766_v13 = vld [vmem:[%s7205_s30 + $0x40] sm:$0xff] }
0x16ec   :  { %4043 = vperm.xlu1 %5543, %v4033_v2   ;;  %5426 = vmatpush3.bf16.msk.msra.mxu0 %vm7696_vm13, %v5424_v3  ;;  %vm7889_vm13 = vnez %v7664_v58  ;;  %v3769_v58 = vld [vmem:[%s7205_s30 + $0x58] sm:$0xff] }
0x16ed   :  { %v3648_v25 = vpop.permute.xlu0 %3647  ;;  %v3644_v51 = vpop.permute.xlu1 %3643  ;;  %v3731_v39 = vsel %vm7889_vm13, %v7242_v27, -inf }
0x16ee   :  { %v5427_v60 = vpack.c.bf16 %v3648_v25, %v3644_v51  ;;  %v3751_v49 = vmax.f32 %v3747_v1, %v3731_v39  ;;  %v3764_v51 = vld [vmem:[%s7205_s30 + $0x30] sm:$0xff] }
0x16f0   :  { %5429 = vmatprep.subr.msk.bf16.mxu0 %vm7697_vm9, %v5427_v60  ;;  %vm7890_vm9 = vnez %v7656_v47  ;;  %v5465_v34 = vpack.c.bf16 %v3751_v49, %v5684_v0 }
0x16f1   :  { %v3588_v21 = vpop.permute.xlu0 %3587  ;;  %v3584_v54 = vpop.permute.xlu1 %3583 }
0x16f2   :  { %v5430_v19 = vpack.c.bf16 %v3588_v21, %v3584_v54  ;;  %v3768_v21 = vld [vmem:[%s7205_s30 + $0x50] sm:$0xff]  ;;  %v3763_v54 = vld [vmem:[%s7205_s30 + $0x28] sm:$0xff] }
0x16f4   :  { %5432 = vmatpush3.bf16.msk.msra.mxu0 %vm7741_vm5, %v5430_v19  ;;  %vm7895_vm5 = vmmov %vm7894_vm3 }
0x16f5   :  { %v3656_v9 = vpop.permute.xlu0 %3655  ;;  %v3652_v26 = vpop.permute.xlu1 %3651 }
0x16f6   :  { %v5433_v37 = vpack.c.bf16 %v3656_v9, %v3652_v26 }
0x16f8   :  { %5435 = vmatprep.subr.msk.bf16.mxu0 %vm7699_vm10, %v5433_v37  ;;  %vm7892_vm10 = vnez %v7658_v50  ;;  %v3713_v50 = vsel %vm7888_vm14, %v7214_v6, -inf }
0x16f9   :  { %v3680_v20 = vpop.permute.xlu0 %3679  ;;  %v3676_v29 = vpop.permute.xlu1 %3675 }
0x16fa   :  { %v5451_v55 = vpack.c.bf16 %v3680_v20, %v3676_v29 }
0x16fc   :  { %5453 = vmatprep.subr.msk.bf16.mxu1 %vm7797_vm1, %v5451_v55 }
0x16fd   :  { %v3596_v32 = vpop.permute.xlu0 %3595  ;;  %5456 = vmatpush3.bf16.msk.msra.mxu1 %vm7797_vm1, %v5451_v55  ;;  %v3592_v14 = vpop.permute.xlu1 %3591  ;;  %vm7896_vm1 = vmmov %vm7894_vm3 }
0x16fe   :  { %v5436_v10 = vpack.c.bf16 %v3596_v32, %v3592_v14 }
0x1700   :  { %5438 = vmatpush3.bf16.msk.msra.mxu0 %vm7841_vm12, %v5436_v10  ;;  %vm7897_vm12 = vmmov %vm7886_vm0 }
0x1701   :  { %v3664_v40 = vpop.permute.xlu0 %3663  ;;  %v3660_v30 = vpop.permute.xlu1 %3659 }
0x1702   :  { %v5439_v62 = vpack.c.bf16 %v3664_v40, %v3660_v30 }
0x1704   :  { %5441 = vmatprep.subr.msk.bf16.mxu0 %vm7887_vm7, %v5439_v62  ;;  %vm7902_vm7 = vmmov %vm7886_vm0 }
0x1705   :  { %v3600_v24 = vpop.permute.xlu0 %3599  ;;  %v3684_v23 = vpop.permute.xlu1 %3683 }
0x1706   :  { %v5457_v48 = vpack.c.bf16 %v5684_v0, %v3684_v23  ;;  %v3758_v0 = vld [vmem:[%s7205_s30] sm:$0xff] }
0x1708   :  { %5459 = vmatprep.subr.msk.bf16.mxu1 %vm7890_vm9, %v5457_v48 }
0x1709   :  { %v3668_v46 = vpop.permute.xlu0 %3667  ;;  %5462 = vmatpush3.bf16.msk.msra.mxu1 %vm7890_vm9, %v5457_v48  ;;  %v3604_v16 = vpop.permute.xlu1 %3603  ;;  %vm7905_vm9 = vmmov %vm7886_vm0 }
0x170a   :  { %v5442_v44 = vpack.c.bf16 %v3604_v16, %v3600_v24  ;;  %5463 = vmatprep.subr.bf16.mxu1 %v5724_v41 }
0x170c   :  { %5444 = vmatpush3.bf16.msk.msra.mxu0 %vm7891_vm4, %v5442_v44  ;;  %vm7906_vm4 = vmmov %vm7886_vm0 }
0x170d   :  { %v3612_v27 = vpop.permute.xlu0 %3611  ;;  %5464 = vmatpush3.bf16.msra.mxu1 %v5724_v41  ;;  %v3672_v63 = vpop.permute.xlu1 %3671  ;;  %v3712_v41 = vsel %vm7888_vm14, %v7162_v11, -inf  ;;  %v3761_v11 = vld [vmem:[%s7205_s30 + $0x18] sm:$0xff]  ;;  %vm7903_vm14 = vmmov %vm7886_vm0 }
0x170e   :  { %v5445_v15 = vpack.c.bf16 %v3672_v63, %v3668_v46  ;;  %5466 = vmatprep.subr.bf16.mxu1 %v5465_v34  ;;  %v3748_v42 = vmax.f32 %v3712_v41, %v5613_v17 }
0x1710   :  { %5447 = vmatprep.subr.msk.bf16.mxu0 %vm7892_vm10, %v5445_v15  ;;  %vm7907_vm10 = vmmov %vm7886_vm0 }
0x1711   :  { %5468 = vmatpush3.bf16.msra.mxu1 %v5465_v34  ;;  %v3608_v47 = vpop.permute.xlu1 %3607  ;;  %v3740_v12 = vpop.permute.xlu0 %3739 }
0x1712   :  { %v5448_v18 = vpack.c.bf16 %v3612_v27, %v3608_v47  ;;  %v3749_v5 = vmax.f32 %v3713_v50, %v3740_v12 }
0x1714   :  { %5450 = vmatpush3.bf16.msk.msra.mxu0 %vm7893_vm15, %v5448_v18  ;;  %vm7908_vm15 = vmmov %vm7886_vm0 }
0x1715   :  { %v5616_v28 = vpop.permute.xlu1 %5615  ;;  %v3742_v56 = vpop.permute.xlu0 %3741 }
0x1716   :  { %v5618_v45 = vunpack.i.h.bf16 %v5616_v28  ;;  %v5617_v61 = vunpack.i.l.bf16 %v5616_v28  ;;  %v3750_v3 = vmax.f32 %v3714_v59, %v3742_v56  ;;  %v4144_v59 = vld [vmem:[%s7374_s20] sm:$0xff] }
0x1717   :  { %3847 = vmatmul.mubr.f32.vlgmr.msra.gmra.mrb[38].mxu0 %v3758_v0 }
0x1718   :  { %v3733_v22 = vsel %vm7889_vm13, %v5618_v45, -inf  ;;  %v3732_v7 = vsel %vm7889_vm13, %v5617_v61, -inf  ;;  %3851 = vmatprep.mubr.f32.mxu0 %v3762_v31 }
0x1719   :  { %v3753_v4 = vmax.f32 %v3749_v5, %v3733_v22  ;;  %v3752_v52 = vmax.f32 %v3748_v42, %v3732_v7  ;;  %v3726_v6 = vpop.permute.xlu1 %3725  ;;  %v4035_v5 = vld [vmem:[%s7262_s6 + $0x18] sm:$0xff]  ;;  %v4118_v22 = vld [vmem:[%s4216_s23 + $0x10] sm:$0xff] }
0x171a   :  { %v3734_v2 = vsel %vm7889_vm13, %v3726_v6, -inf  ;;  %v4119_v7 = vld [vmem:[%s4216_s23 + $0x18] sm:$0xff]  ;;  %v4034_v6 = vld [vmem:[%s7262_s6 + $0x10] sm:$0xff]  ;;  %vm7904_vm13 = vmmov %vm7886_vm0 }
0x171b   :  { %v5469_v25 = vpack.c.bf16 %v3753_v4, %v3752_v52  ;;  %3852 = vmatmul.mubr.f32.gmra.mrb[40].mxu0 %v3761_v11  ;;  %v3754_v60 = vmax.f32 %v3750_v3, %v3734_v2  ;;  %v4145_v11 = vld [vmem:[%s7374_s20 + $0x8] sm:$0xff]  ;;  %v4032_v52 = vld [vmem:[%s7262_s6] sm:$0xff] }
0x171c   :  { %3856 = vmatprep.mubr.f32.mxu0 %v3765_v8  ;;  %v4005_v4 = vld [vmem:[%s7247_s11 + $0x8] sm:$0xff] }
0x171d   :  { %5470 = vmatprep.subr.bf16.mxu1 %v5469_v25  ;;  %v4117_v8 = vld [vmem:[%s4216_s23 + $0x8] sm:$0xff] }
0x171e   :  { %5472 = vmatpush3.bf16.msra.mxu1 %v5469_v25 }
0x171f   :  { %5041 = vmatprep.subr.mxu1 %v3754_v60  ;;  %3857 = vmatmul.mubr.f32.gmra.mrb[42].mxu0 %v3764_v51 }
0x1720   :  { %3861 = vmatprep.mubr.f32.mxu0 %v3768_v21 }
0x1722   :  { %5042 = vmatpush3.msra.mxu1 %v3754_v60 }
0x1723   :  { %5044 = vmatmul.mubr.msk.f32.vlgmr.msra.gmra.mrb[38].mxu1 %vm7894_vm3, %v3763_v54  ;;  %3862 = vmatmul.mubr.f32.gmra.mrb[44].mxu0 %v3767_v57  ;;  %vm7909_vm3 = vmmov %vm7886_vm0 }
0x1724   :  { %5046 = vmatprep.mubr.msk.f32.mxu1 %vm7895_vm5, %v3766_v13  ;;  %vm7910_vm5 = vmmov %vm7886_vm0 }
0x1727   :  { %5047 = vmatmul.mubr.msk.f32.gmra.mrb[40].mxu1 %vm7896_vm1, %v3769_v58  ;;  %vm7911_vm1 = vmmov %vm7886_vm0 }
0x174f   :  { %v4069_v19 = vpop.xlane.xlu0 %4068 }
0x1750   :  { %v4077_v9 = vmul.f32 0.03125, %v4069_v19 }
0x1752   :  { %v7337_v26 = vsub.f32 %v6773_v43, %v4077_v9 }
0x1753   :  { %v4075_v17 = vpop.xlane.xlu0 %4074 }
0x1754   :  { %v4085_v37 = vmul.f32 %v7337_v26, %v7337_v26  ;;  %v4079_v31 = vmul.f32 0.03125, %v4075_v17 }
0x1756   :  { %v4091_v20 = vsel %vm7897_vm12, %v4085_v37, 0.0  ;;  %v7360_v45 = vsub.f32 %v6784_v38, %v4079_v31  ;;  %v4116_v38 = vld [vmem:[%s4216_s23] sm:$0xff] }
0x1757   :  { %4092 = vadd.xlane.f32.xlu1 %v4091_v20 }
0x1758   :  { %v4066_v29 = vpop.xlane.xlu1 %4065  ;;  %v4087_v42 = vmul.f32 %v7360_v45, %v7360_v45 }
0x1759   :  { %v4076_v55 = vmul.f32 0.03125, %v4066_v29 }
0x175a   :  { %v4097_v56 = vsel %vm7903_vm14, %v4087_v42, 0.0 }
0x175b   :  { %v7343_v32 = vsub.f32 %v6771_v36, %v4076_v55 }
0x175c   :  { %v4072_v62 = vpop.xlane.xlu1 %4071 }
0x175d   :  { %v4084_v14 = vmul.f32 %v7343_v32, %v7343_v32  ;;  %v4078_v24 = vmul.f32 0.03125, %v4072_v62 }
0x175f   :  { %v4088_v10 = vsel %vm7898_vm8, %v4084_v14, 0.0  ;;  %v7349_v36 = vsub.f32 %v6782_v33, %v4078_v24 }
0x1760   :  { %4089 = vadd.xlane.f32.xlu0 %v4088_v10  ;;  %v7381_v2 = vpop.permute.xlu1 %4010 }
0x1761   :  { %v4086_v18 = vmul.f32 %v7349_v36, %v7349_v36 }
0x1763   :  { %v4094_v41 = vsel %vm7901_vm2, %v4086_v18, 0.0 }
0x1764   :  { %v7383_v3 = vpop.permute.xlu1 %4020 }
0x1768   :  { %v7385_v25 = vpop.permute.xlu1 %4025 }
0x176c   :  { %v7387_v51 = vpop.permute.xlu1 %4043 }
0x17e4   :  { %v4093_v60 = vpop.xlane.xlu1 %4092 }
0x17ea   :  { %v4792_v40 = vpop.f32.mrb[38].mxu0 }
0x17eb   :  { %v4793_v43 = vpop.f32.mrb[39].mxu0 }
0x17ec   :  { %v4794_v30 = vadd.f32 %v4793_v43, %v4792_v40 }
0x17ed   :  { %v4090_v21 = vpop.xlane.xlu0 %4089 }
0x17ee   :  { %v4795_v53 = vpop.f32.mrb[40].mxu0  ;;  %v4100_v18 = vmul.f32 0.03125, %v4090_v21 }
0x17ef   :  { %v4796_v35 = vpop.f32.mrb[41].mxu0 }
0x17f0   :  { %v4797_v39 = vadd.f32 %v4796_v35, %v4795_v53 }
0x17f2   :  { %v4798_v23 = vpop.f32.mrb[42].mxu0 }
0x17f3   :  { %v4799_v1 = vpop.f32.mrb[43].mxu0 }
0x17f4   :  { %v4800_v48 = vadd.f32 %v4799_v1, %v4798_v23  ;;  %v4147_v1 = vld [vmem:[%s7374_s20 + $0x18] sm:$0xff] }
0x17f6   :  { %v5045_v49 = vpop.f32.mrb[38].mxu1  ;;  %v4801_v46 = vpop.f32.mrb[44].mxu0 }
0x17f7   :  { %v3939_v16 = vadd.f32 %v5045_v49, %v4797_v39  ;;  %v3933_v44 = vpop.f32.mrb[39].mxu1  ;;  %v4802_v34 = vpop.f32.mrb[45].mxu0 }
0x17f8   :  { %v3934_v27 = vadd.f32 %v4794_v30, %v3933_v44  ;;  %v4803_v63 = vadd.f32 %v4802_v34, %v4801_v46 }
0x17f9   :  { %v3955_v15 = vsel %vm7899_vm11, %v3939_v16, 0.0 }
0x17fa   :  { %3956 = vadd.xlane.f32.xlu1 %v3955_v15  ;;  %v3952_v47 = vsel %vm7900_vm6, %v3934_v27, 0.0  ;;  %v5048_v12 = vpop.f32.mrb[40].mxu1 }
0x17fb   :  { %3953 = vadd.xlane.f32.xlu0 %v3952_v47  ;;  %v7355_v33 = vadd.f32 %v5048_v12, %v4803_v63  ;;  %v3943_v0 = vpop.f32.mrb[41].mxu1  ;;  %v4101_v12 = vmul.f32 0.03125, %v4093_v60 }
0x17fc   :  { %v3944_v28 = vadd.f32 %v4800_v48, %v3943_v0  ;;  %v4146_v48 = vld [vmem:[%s7374_s20 + $0x10] sm:$0xff] }
0x17fd   :  { %v3961_v61 = vsel %vm7902_vm7, %v7355_v33, 0.0  ;;  %v4105_v0 = vadd.f32 1e-05, %v4101_v12 }
0x17fe   :  { %v3958_v50 = vsel %vm7886_vm0, %v3944_v28, 0.0 }
0x17ff   :  { %4095 = vadd.xlane.f32.xlu0 %v4094_v41  ;;  %5667 = vrsqrt.f32 %v4105_v0 }
0x1803   :  { %3959 = vadd.xlane.f32.xlu0 %v3958_v50 }
0x1807   :  { %3962 = vadd.xlane.f32.xlu0 %v3961_v61 }
0x180b   :  { %4053 = vperm.xlu1 %5543, %v4035_v5   ;;  %4098 = vadd.xlane.f32.xlu0 %v4097_v56 }
0x180f   :  { %4122 = vperm.xlu1 %5543, %v4116_v38  }
0x1813   :  { %4132 = vperm.xlu1 %5543, %v4118_v22  }
0x1817   :  { %4137 = vperm.xlu1 %5543, %v4119_v7  }
0x181b   :  { %4155 = vperm.xlu1 %5543, %v4145_v11  }
0x1821   :  { %4015 = vperm.xlu0 %5542, %v4005_v4  }
0x1825   :  { %4038 = vperm.xlu0 %5542, %v4032_v52  }
0x1829   :  { %4048 = vperm.xlu0 %5542, %v4034_v6   ;;  %v5668_v6 = vpop.eup %5667 }
0x182d   :  { %4127 = vperm.xlu0 %5542, %v4117_v8  }
0x1831   :  { %4150 = vperm.xlu0 %5542, %v4144_v59  }
0x1887   :  { %v3957_v54 = vpop.xlane.xlu1 %3956 }
0x1888   :  { %v3965_v57 = vmul.f32 0.03125, %v3957_v54  ;;  %v3954_v13 = vpop.xlane.xlu0 %3953 }
0x1889   :  { %v3964_v58 = vmul.f32 0.03125, %v3954_v13 }
0x188a   :  { %v7389_v19 = vsub.f32 %v3939_v16, %v3965_v57  ;;  %v4113_v57 = vmul.f32 %v5668_v6, %v7337_v26 }
0x188b   :  { %v7391_v9 = vsub.f32 %v3934_v27, %v3964_v58  ;;  %v7412_v16 = vpop.permute.xlu1 %4053 }
0x188c   :  { %v4096_v37 = vpop.xlane.xlu0 %4095  ;;  %v3973_v20 = vmul.f32 %v7389_v19, %v7389_v19 }
0x188d   :  { %v3972_v29 = vmul.f32 %v7391_v9, %v7391_v9  ;;  %v4102_v5 = vmul.f32 0.03125, %v4096_v37 }
0x188e   :  { %v3979_v55 = vsel %vm7904_vm13, %v3973_v20, 0.0 }
0x188f   :  { %3980 = vadd.xlane.f32.xlu0 %v3979_v55  ;;  %v3976_v14 = vsel %vm7905_vm9, %v3972_v29, 0.0  ;;  %v4123_v34 = vpop.permute.xlu1 %4122  ;;  %v4106_v38 = vadd.f32 1e-05, %v4102_v5 }
0x1890   :  { %3977 = vadd.xlane.f32.xlu1 %v3976_v14  ;;  %v3960_v10 = vpop.xlane.xlu0 %3959 }
0x1891   :  { %v3966_v40 = vmul.f32 0.03125, %v3960_v10 }
0x1893   :  { %v7399_v43 = vsub.f32 %v3944_v28, %v3966_v40  ;;  %v7416_v63 = vpop.permute.xlu1 %4132  ;;  %v4104_v28 = vadd.f32 1e-05, %v4100_v18 }
0x1894   :  { %v3963_v30 = vpop.xlane.xlu0 %3962 }
0x1895   :  { %v3967_v53 = vmul.f32 0.03125, %v3963_v30  ;;  %v3974_v62 = vmul.f32 %v7399_v43, %v7399_v43  ;;  %5669 = vrsqrt.f32 %v4104_v28 }
0x1897   :  { %v7404_v35 = vsub.f32 %v7355_v33, %v3967_v53  ;;  %v3982_v39 = vsel %vm7906_vm4, %v3974_v62, 0.0  ;;  %v7418_v47 = vpop.permute.xlu1 %4137 }
0x1898   :  { %3983 = vadd.xlane.f32.xlu1 %v3982_v39  ;;  %v4099_v49 = vpop.xlane.xlu0 %4098 }
0x1899   :  { %v3975_v24 = vmul.f32 %v7404_v35, %v7404_v35  ;;  %v4103_v22 = vmul.f32 0.03125, %v4099_v49 }
0x189b   :  { %v3985_v23 = vsel %vm7907_vm10, %v3975_v24, 0.0  ;;  %v4156_v33 = vpop.permute.xlu1 %4155  ;;  %v4107_v4 = vadd.f32 1e-05, %v4103_v22 }
0x189c   :  { %3986 = vadd.xlane.f32.xlu0 %v3985_v23 }
0x189f   :  { %v5670_v59 = vpop.eup %5669 }
0x18a0   :  { %v4016_v46 = vpop.permute.xlu0 %4015  ;;  %v4112_v55 = vmul.f32 %v5670_v59, %v7343_v32 }
0x18a2   :  { %v4140_v10 = vmul.f32 %v4123_v34, %v4112_v55 }
0x18a4   :  { %v4039_v44 = vpop.permute.xlu0 %4038 }
0x18a8   :  { %v7414_v27 = vpop.permute.xlu0 %4048 }
0x18a9   :  { %4165 = vperm.xlu1 %5543, %v4147_v1  }
0x18ac   :  { %v4128_v15 = vpop.permute.xlu0 %4127 }
0x18ad   :  { %v4141_v20 = vmul.f32 %v4128_v15, %v4113_v57 }
0x18b0   :  { %v4151_v17 = vpop.permute.xlu0 %4150 }
0x18b1   :  { %v4168_v53 = vadd.f32 %v4151_v17, %v4140_v10 }
0x18b2   :  { %4160 = vperm.xlu0 %5542, %v4146_v48  }
0x191c   :  { %v3981_v31 = vpop.xlane.xlu0 %3980 }
0x191d   :  { %v3989_v41 = vmul.f32 0.03125, %v3981_v31  ;;  %v3978_v50 = vpop.xlane.xlu1 %3977 }
0x191e   :  { %v3988_v61 = vmul.f32 0.03125, %v3978_v50 }
0x191f   :  { %v3993_v42 = vadd.f32 1e-05, %v3989_v41 }
0x1920   :  { %v3992_v56 = vadd.f32 1e-05, %v3988_v61 }
0x1921   :  { %5671 = vrsqrt.f32 %v3993_v42 }
0x1922   :  { %5673 = vrsqrt.f32 %v3992_v56 }
0x1923   :  { %5675 = vrsqrt.f32 %v4106_v38 }
0x1925   :  { %v3984_v7 = vpop.xlane.xlu1 %3983 }
0x1926   :  { %v3990_v11 = vmul.f32 0.03125, %v3984_v7 }
0x1928   :  { %v3994_v52 = vadd.f32 1e-05, %v3990_v11 }
0x1929   :  { %v3987_v8 = vpop.xlane.xlu0 %3986  ;;  %v4166_v17 = vpop.permute.xlu1 %4165 }
0x192a   :  { %5677 = vrsqrt.f32 %v3994_v52  ;;  %v3991_v60 = vmul.f32 0.03125, %v3987_v8 }
0x192b   :  { %v5672_v21 = vpop.eup %5671  ;;  %5679 = vrsqrt.f32 %v4107_v4 }
0x192c   :  { %v5674_v54 = vpop.eup %5673  ;;  %v4001_v13 = vmul.f32 %v5672_v21, %v7389_v19  ;;  %v3995_v58 = vadd.f32 1e-05, %v3991_v60 }
0x192d   :  { %v4000_v37 = vmul.f32 %v5674_v54, %v7391_v9  ;;  %v5676_v40 = vpop.eup %5675  ;;  %v4169_v9 = vadd.f32 %v4156_v33, %v4141_v20 }
0x192e   :  { %v4029_v29 = vmul.f32 %v4016_v46, %v4001_v13  ;;  %5681 = vrsqrt.f32 %v3995_v58 }
0x192f   :  { %v4028_v14 = vmul.f32 %v7381_v2, %v4000_v37  ;;  %v4114_v2 = vmul.f32 %v5676_v40, %v7349_v36 }
0x1930   :  { %v4057_v26 = vadd.f32 %v7387_v51, %v4029_v29 }
0x1931   :  { %v4056_v19 = vadd.f32 %v4039_v44, %v4028_v14  ;;  %v4161_v44 = vpop.permute.xlu0 %4160  ;;  %v4142_v34 = vmul.f32 %v7416_v63, %v4114_v2 }
0x1932   :  { %v4061_v30 = vmax.f32 %v4057_v26, 0.0 }
0x1933   :  { %v4060_v62 = vmax.f32 %v4056_v19, 0.0 }
0x1934   :  { %v5678_v32 = vpop.eup %5677  ;;  %v4173_v39 = vadd.f32 %v4169_v9, %v4061_v30 }
0x1935   :  { %v4172_v24 = vadd.f32 %v4168_v53, %v4060_v62  ;;  %v4002_v23 = vmul.f32 %v5678_v32, %v7399_v43  ;;  %v5680_v1 = vpop.eup %5679 }
0x1936   :  { %v4177_v48 = vmax.f32 %v4173_v39, 0.0  ;;  %v4115_v15 = vmul.f32 %v5680_v1, %v7360_v45 }
0x1937   :  { %v4176_v49 = vmax.f32 %v4172_v24, 0.0  ;;  %v4030_v51 = vmul.f32 %v7383_v3, %v4002_v23  ;;  %v4170_v3 = vadd.f32 %v4161_v44, %v4142_v34 }
0x1938   :  { %v5682_v46 = vpop.eup %5681  ;;  %4181 = vst.msk [vmem:[%s7428_s7 + $0x8] sm:$0xff] %vm7908_vm15, %v4177_v48  ;;  %v4143_v33 = vmul.f32 %v7418_v47, %v4115_v15 }
0x1939   :  { %4180 = vst.msk [vmem:[%s7428_s7] sm:$0xff] %vm7909_vm3, %v4176_v49  ;;  %v4003_v36 = vmul.f32 %v5682_v46, %v7404_v35  ;;  %v4058_v43 = vadd.f32 %v7414_v27, %v4030_v51 }
0x193a   :  { %v4171_v28 = vadd.f32 %v4166_v17, %v4143_v33 }
0x193b   :  { %v4031_v12 = vmul.f32 %v7385_v25, %v4003_v36  ;;  %v4062_v18 = vmax.f32 %v4058_v43, 0.0 }
0x193d   :  { %v4059_v0 = vadd.f32 %v7412_v16, %v4031_v12  ;;  %v4174_v63 = vadd.f32 %v4170_v3, %v4062_v18 }
0x193f   :  { %v4063_v31 = vmax.f32 %v4059_v0, 0.0  ;;  %v4178_v41 = vmax.f32 %v4174_v63, 0.0 }
0x1941   :  { %v4175_v50 = vadd.f32 %v4171_v28, %v4063_v31  ;;  %4182 = vst.msk [vmem:[%s7428_s7 + $0x10] sm:$0xff] %vm7910_vm5, %v4178_v41 }
0x1943   :  { %v4179_v45 = vmax.f32 %v4175_v50, 0.0 }
0x1945   :  { %4183 = vst.msk [vmem:[%s7428_s7 + $0x18] sm:$0xff] %vm7911_vm1, %v4179_v45 }

</bundles_post_ra>
